<compile_context>
chip_gen: v6e
topology: v6e:2x2x1
jax: 0.10.0
libtpu: 0.0.40
codegen_flags: <defaults>
</compile_context>

<pallas_src>
import numpy as np
import jax
import jax.numpy as jnp
from jax import lax
from jax.experimental import pallas as pl
from jax.experimental.pallas import tpu as pltpu

# ---------------------------------------------------------------- dimensions
L_IN = 300
PAD = 3
K = 4
L_PAD = L_IN + 2 * PAD                # 306
C1, C2, C3 = 32, 64, 128
L1 = L_IN + 2 * PAD - K + 1           # 303
P1 = L1 // 2                          # 151
L2 = P1 + 2 * PAD - K + 1             # 154
P2 = L2 // 2                          # 77
L3 = P2 + 2 * PAD - K + 1             # 80  -> 128 * 80 = 10240
FEAT = C3 * L3                        # 10240
OUT = 8

# TODO(synk): nn.Dropout(0.52) is identity at inference; training-mode RNG
# dropout is not implemented.


# ---------------------------------------------------------- conv-stack kernel
def make_conv_stack_kernel(bt):
    """Kernel processing one batch tile of `bt` samples per grid step."""

    def conv_stack_kernel(x_ref, w1_ref, b1_ref, w2_ref, b2_ref, w3_ref,
                          b3_ref, h3_ref, c1s, p1s, c2s, p2s):
        # Zero only the PAD halo rows of the padded pooling scratches: the
        # interiors are fully overwritten for every sample.  Done every grid
        # step (cheap: 4 tiny masked stores) so it stays correct when the
        # "parallel" batch axis is sharded across TensorCores.
        p1s[pl.ds(0, PAD), :] = jnp.zeros((PAD, C1), jnp.float32)
        p1s[pl.ds(PAD + P1, PAD), :] = jnp.zeros((PAD, C1), jnp.float32)
        p2s[pl.ds(0, PAD), :] = jnp.zeros((PAD, C2), jnp.float32)
        p2s[pl.ds(PAD + P2, PAD), :] = jnp.zeros((PAD, C2), jnp.float32)

        w1 = w1_ref[...]            # (4, 32)      w1[k, oc]
        b1 = b1_ref[...]            # (1, 32)
        w2 = w2_ref[...]            # (128, 64)    w2[k*32 + ic, oc]
        b2 = b2_ref[...]            # (1, 64)
        w3 = w3_ref[...]            # (256, 128)   w3[k*64 + ic, oc]
        b3 = b3_ref[...]            # (1, 128)

        for b in range(bt):
            # --- conv1 (in_channels == 1): shifted broadcast-multiplies (VPU)
            xb = x_ref[:, b:b + 1]                       # (306, 1)
            acc1 = xb[0:L1, :] * w1[0:1, :]              # (303, 32)
            for k in range(1, K):
                acc1 = acc1 + xb[k:k + L1, :] * w1[k:k + 1, :]
            c1s[...] = jnp.maximum(acc1 + b1, 0.0)       # bias + ReLU

            # --- maxpool(2): strided sublane reads; drops the odd last row
            p1s[pl.ds(PAD, P1), :] = jnp.maximum(
                c1s[pl.ds(0, P1, stride=2), :],
                c1s[pl.ds(1, P1, stride=2), :])          # (151, 32)

            # --- conv2: single MXU matmul over the im2col operand (K = 128)
            col1 = jnp.concatenate(
                [p1s[pl.ds(k, L2), :] for k in range(K)], axis=1)   # (154, 128)
            acc2 = jnp.dot(col1, w2, preferred_element_type=jnp.float32)
            c2s[...] = jnp.maximum(acc2 + b2, 0.0)       # (154, 64)

            # --- maxpool(2)
            p2s[pl.ds(PAD, P2), :] = jnp.maximum(
                c2s[pl.ds(0, P2, stride=2), :],
                c2s[pl.ds(1, P2, stride=2), :])          # (77, 64)

            # --- conv3: single MXU matmul over the im2col operand (K = 256)
            col2 = jnp.concatenate(
                [p2s[pl.ds(k, L3), :] for k in range(K)], axis=1)   # (80, 256)
            acc3 = jnp.dot(col2, w3, preferred_element_type=jnp.float32)
            h3_ref[b] = jnp.maximum(acc3 + b3, 0.0)      # (80, 128) = (L, C)

    return conv_stack_kernel


# ------------------------------------------------------------------ FC kernel
def fc_kernel(x_ref, w_ref, b_ref, o_ref):
    # x: (B, 10240) L-major flattened features; w: (8, 10240) lane-dense.
    # Transposed-RHS contraction keeps the weight block lane-dense in VMEM.
    o_ref[...] = lax.dot_general(
        x_ref[...], w_ref[...],
        dimension_numbers=(((1,), (1,)), ((), ())),
        preferred_element_type=jnp.float32) + b_ref[...]


# --------------------------------------------------------------- full forward
def cnn_forward(x, W1, B1, W2, B2, W3, B3, Wf, Bf, *, bt=4):
    """x: (B, 1, 300) float32 (NCL, like PyTorch). Returns (B, 8)."""
    B = x.shape[0]
    nb = pl.cdiv(B, bt)
    Bpad = nb * bt

    # glue: pack the NCL input into dense (nb, 306, bt) tiles:
    # length on sublanes, sample on lanes -> dense HBM->VMEM DMA per tile.
    x2 = jnp.pad(x.reshape(B, L_IN), ((0, Bpad - B), (PAD, PAD)))  # (Bpad, 306)
    xg = x2.reshape(nb, bt, L_PAD).transpose(0, 2, 1)              # (nb,306,bt)

    # glue: weights re-laid out for the im2col matmuls
    #   w1k[k, oc]        = W1[oc, 0, k]
    #   w2m[k*32+ic, oc]  = W2[oc, ic, k]
    #   w3m[k*64+ic, oc]  = W3[oc, ic, k]
    w1k = jnp.transpose(W1[:, 0, :], (1, 0))                       # (4, 32)
    w2m = jnp.transpose(W2, (2, 1, 0)).reshape(K * C1, C2)         # (128, 64)
    w3m = jnp.transpose(W3, (2, 1, 0)).reshape(K * C2, C3)         # (256, 128)

    h3 = pl.pallas_call(
        make_conv_stack_kernel(bt),
        out_shape=jax.ShapeDtypeStruct((Bpad, L3, C3), jnp.float32),
        grid=(nb,),
        in_specs=[
            pl.BlockSpec((None, L_PAD, bt), lambda i: (i, 0, 0)),
            pl.BlockSpec((K, C1), lambda i: (0, 0)),
            pl.BlockSpec((1, C1), lambda i: (0, 0)),
            pl.BlockSpec((K * C1, C2), lambda i: (0, 0)),
            pl.BlockSpec((1, C2), lambda i: (0, 0)),
            pl.BlockSpec((K * C2, C3), lambda i: (0, 0)),
            pl.BlockSpec((1, C3), lambda i: (0, 0)),
        ],
        out_specs=pl.BlockSpec((bt, L3, C3), lambda i: (i, 0, 0)),
        scratch_shapes=[
            pltpu.VMEM((L1, C1), jnp.float32),               # conv1+relu out
            pltpu.VMEM((P1 + 2 * PAD, C1), jnp.float32),     # padded pool1
            pltpu.VMEM((L2, C2), jnp.float32),               # conv2+relu out
            pltpu.VMEM((P2 + 2 * PAD, C2), jnp.float32),     # padded pool2
        ],
        compiler_params=pltpu.CompilerParams(
            dimension_semantics=("parallel",)),
    )(xg, w1k, B1.reshape(1, C1), w2m, B2.reshape(1, C2), w3m,
      B3.reshape(1, C3))

    # glue: permute Wf's columns once so that the contiguous L-major flatten of
    # h3 (B, L3, C3) matches PyTorch's channel-major x.view(B, -1):
    #   WfP[o, l*C3 + c] = Wf[o, c*L3 + l]
    WfP = Wf.reshape(OUT, C3, L3).transpose(0, 2, 1).reshape(OUT, FEAT)
    flat = h3.reshape(Bpad, FEAT)          # contiguous reshape, no transpose

    out = pl.pallas_call(
        fc_kernel,
        out_shape=jax.ShapeDtypeStruct((Bpad, OUT), jnp.float32),
        grid=(1,),
        in_specs=[pl.BlockSpec((Bpad, FEAT), lambda i: (0, 0)),
                  pl.BlockSpec((OUT, FEAT), lambda i: (0, 0)),
                  pl.BlockSpec((1, OUT), lambda i: (0, 0))],
        out_specs=pl.BlockSpec((Bpad, OUT), lambda i: (0, 0)),
    )(flat, WfP, Bf.reshape(1, OUT))
    return out[:B]


# ------------------------------------------------------ pure-JAX reference
def torch_like_reference(x, params):
    W1, B1, W2, B2, W3, B3, Wf, Bf = params

    def conv1d(h, w, b, pad):
        y = lax.conv_general_dilated(
            h, w, window_strides=(1,), padding=[(pad, pad)],
            dimension_numbers=("NCH", "OIH", "NCH"))
        return y + b[None, :, None]

    def maxpool2(h):
        return lax.reduce_window(h, -jnp.inf, lax.max,
                                 (1, 1, 2), (1, 1, 2), "VALID")

    h = maxpool2(jax.nn.relu(conv1d(x, W1, B1, PAD)))
    h = maxpool2(jax.nn.relu(conv1d(h, W2, B2, PAD)))
    h = jax.nn.relu(conv1d(h, W3, B3, PAD))
    h = h.reshape(h.shape[0], -1)
    return h @ Wf.T + Bf[None, :]


# ----------------------------------------------------------------------- main
if __name__ == "__main__":
    key = jax.random.PRNGKey(0)
    ks = jax.random.split(key, 9)
    Bsz = 6                                   # exercises batch padding (6 -> 8)

    def uinit(k, shape, fan_in):
        bound = 1.0 / np.sqrt(fan_in)
        return jax.random.uniform(k, shape, jnp.float32, -bound, bound)

    W1 = uinit(ks[0], (C1, 1, K), 1 * K);   B1 = uinit(ks[1], (C1,), 1 * K)
    W2 = uinit(ks[2], (C2, C1, K), C1 * K); B2 = uinit(ks[3], (C2,), C1 * K)
    W3 = uinit(ks[4], (C3, C2, K), C2 * K); B3 = uinit(ks[5], (C3,), C2 * K)
    Wf = uinit(ks[6], (OUT, FEAT), FEAT);   Bf = uinit(ks[7], (OUT,), FEAT)
    x = jax.random.normal(ks[8], (Bsz, 1, L_IN), jnp.float32)

    fwd = jax.jit(cnn_forward)
    out = jax.block_until_ready(fwd(x, W1, B1, W2, B2, W3, B3, Wf, Bf))
    assert out.shape == (Bsz, OUT), out.shape

    ref = jax.block_until_ready(
        torch_like_reference(x, (W1, B1, W2, B2, W3, B3, Wf, Bf)))
    err = float(np.max(np.abs(np.asarray(out) - np.asarray(ref))))
    if not np.allclose(np.asarray(out), np.asarray(ref), rtol=2e-2, atol=2e-2):
        raise RuntimeError(f"mismatch vs reference, max abs diff {err}")
    print("KERNEL_OK")
</pallas_src>

<mosaic_0001>
module attributes {stable_mosaic.version = 11 : i64} {
  func.func @conv_stack_kernel(%arg0: i32, %arg1: memref<1x306x4xf32, #tpu.memory_space<vmem>>, %arg2: memref<4x32xf32, #tpu.memory_space<vmem>>, %arg3: memref<1x32xf32, #tpu.memory_space<vmem>>, %arg4: memref<128x64xf32, #tpu.memory_space<vmem>>, %arg5: memref<1x64xf32, #tpu.memory_space<vmem>>, %arg6: memref<256x128xf32, #tpu.memory_space<vmem>>, %arg7: memref<1x128xf32, #tpu.memory_space<vmem>>, %arg8: memref<4x80x128xf32, #tpu.memory_space<vmem>>, %arg9: memref<303x32xf32, #tpu.memory_space<vmem>>, %arg10: memref<157x32xf32, #tpu.memory_space<vmem>>, %arg11: memref<154x64xf32, #tpu.memory_space<vmem>>, %arg12: memref<83x64xf32, #tpu.memory_space<vmem>>) attributes {dimension_semantics = [#tpu.dimension_semantics<parallel>], iteration_bounds = array<i64: 2>, scalar_prefetch = 0 : i64, scratch_operands = 4 : i64, tpu.core_type = #tpu.core_type<tc>, window_params = [{transform_indices = @transform_0, window_bounds = array<i64: 1, 306, 4>}, {pipeline_mode = #tpu.pipeline_mode<synchronous>, transform_indices = @transform_1, window_bounds = array<i64: 4, 32>}, {pipeline_mode = #tpu.pipeline_mode<synchronous>, transform_indices = @transform_2, window_bounds = array<i64: 1, 32>}, {pipeline_mode = #tpu.pipeline_mode<synchronous>, transform_indices = @transform_3, window_bounds = array<i64: 128, 64>}, {pipeline_mode = #tpu.pipeline_mode<synchronous>, transform_indices = @transform_4, window_bounds = array<i64: 1, 64>}, {pipeline_mode = #tpu.pipeline_mode<synchronous>, transform_indices = @transform_5, window_bounds = array<i64: 256, 128>}, {pipeline_mode = #tpu.pipeline_mode<synchronous>, transform_indices = @transform_6, window_bounds = array<i64: 1, 128>}, {transform_indices = @transform_7, window_bounds = array<i64: 4, 80, 128>}]} {
    %cst = arith.constant 0.000000e+00 : f32
    %0 = vector.broadcast %cst : f32 to vector<3x32xf32>
    %c0 = arith.constant 0 : index
    %c0_0 = arith.constant 0 : index
    %1 = vector.load %arg10[%c0, %c0_0] : memref<157x32xf32, #tpu.memory_space<vmem>>, vector<3x32xf32>
    tpu.vector_store %arg10[%c0, %c0_0], %0 {strides = array<i32>} : memref<157x32xf32, #tpu.memory_space<vmem>>, vector<3x32xf32>,
    %cst_1 = arith.constant 0.000000e+00 : f32
    %2 = vector.broadcast %cst_1 : f32 to vector<3x32xf32>
    %c154 = arith.constant 154 : index
    %c0_2 = arith.constant 0 : index
    %3 = vector.load %arg10[%c154, %c0_2] : memref<157x32xf32, #tpu.memory_space<vmem>>, vector<3x32xf32>
    tpu.vector_store %arg10[%c154, %c0_2], %2 {strides = array<i32>} : memref<157x32xf32, #tpu.memory_space<vmem>>, vector<3x32xf32>,
    %cst_3 = arith.constant 0.000000e+00 : f32
    %4 = vector.broadcast %cst_3 : f32 to vector<3x64xf32>
    %c0_4 = arith.constant 0 : index
    %c0_5 = arith.constant 0 : index
    %5 = vector.load %arg12[%c0_4, %c0_5] : memref<83x64xf32, #tpu.memory_space<vmem>>, vector<3x64xf32>
    tpu.vector_store %arg12[%c0_4, %c0_5], %4 {strides = array<i32>} : memref<83x64xf32, #tpu.memory_space<vmem>>, vector<3x64xf32>,
    %cst_6 = arith.constant 0.000000e+00 : f32
    %6 = vector.broadcast %cst_6 : f32 to vector<3x64xf32>
    %c80 = arith.constant 80 : index
    %c0_7 = arith.constant 0 : index
    %7 = vector.load %arg12[%c80, %c0_7] : memref<83x64xf32, #tpu.memory_space<vmem>>, vector<3x64xf32>
    tpu.vector_store %arg12[%c80, %c0_7], %6 {strides = array<i32>} : memref<83x64xf32, #tpu.memory_space<vmem>>, vector<3x64xf32>,
    %c0_8 = arith.constant 0 : index
    %c0_9 = arith.constant 0 : index
    %8 = vector.load %arg2[%c0_8, %c0_9] : memref<4x32xf32, #tpu.memory_space<vmem>>, vector<4x32xf32>
    %c0_10 = arith.constant 0 : index
    %c0_11 = arith.constant 0 : index
    %9 = vector.load %arg3[%c0_10, %c0_11] : memref<1x32xf32, #tpu.memory_space<vmem>>, vector<1x32xf32>
    %c0_12 = arith.constant 0 : index
    %c0_13 = arith.constant 0 : index
    %10 = vector.load %arg4[%c0_12, %c0_13] : memref<128x64xf32, #tpu.memory_space<vmem>>, vector<128x64xf32>
    %c0_14 = arith.constant 0 : index
    %c0_15 = arith.constant 0 : index
    %11 = vector.load %arg5[%c0_14, %c0_15] : memref<1x64xf32, #tpu.memory_space<vmem>>, vector<1x64xf32>
    %c0_16 = arith.constant 0 : index
    %c0_17 = arith.constant 0 : index
    %12 = vector.load %arg6[%c0_16, %c0_17] : memref<256x128xf32, #tpu.memory_space<vmem>>, vector<256x128xf32>
    %c0_18 = arith.constant 0 : index
    %c0_19 = arith.constant 0 : index
    %13 = vector.load %arg7[%c0_18, %c0_19] : memref<1x128xf32, #tpu.memory_space<vmem>>, vector<1x128xf32>
    %c0_20 = arith.constant 0 : index
    %c0_21 = arith.constant 0 : index
    %c0_22 = arith.constant 0 : index
    %14 = vector.load %arg1[%c0_20, %c0_21, %c0_22] : memref<1x306x4xf32, #tpu.memory_space<vmem>>, vector<1x306x1xf32>
    %15 = vector.shape_cast %14 : vector<1x306x1xf32> to vector<306x1xf32>
    %16 = vector.extract_strided_slice %15 {offsets = [0, 0], sizes = [303, 1], strides = [1, 1]} : vector<306x1xf32> to vector<303x1xf32>
    %17 = vector.extract_strided_slice %8 {offsets = [0, 0], sizes = [1, 32], strides = [1, 1]} : vector<4x32xf32> to vector<1x32xf32>
    %18 = vector.broadcast %16 : vector<303x1xf32> to vector<303x32xf32>
    %19 = vector.broadcast %17 : vector<1x32xf32> to vector<303x32xf32>
    %20 = arith.mulf %18, %19 : vector<303x32xf32>
    %21 = vector.extract_strided_slice %15 {offsets = [1, 0], sizes = [303, 1], strides = [1, 1]} : vector<306x1xf32> to vector<303x1xf32>
    %22 = vector.extract_strided_slice %8 {offsets = [1, 0], sizes = [1, 32], strides = [1, 1]} : vector<4x32xf32> to vector<1x32xf32>
    %23 = vector.broadcast %21 : vector<303x1xf32> to vector<303x32xf32>
    %24 = vector.broadcast %22 : vector<1x32xf32> to vector<303x32xf32>
    %25 = arith.mulf %23, %24 : vector<303x32xf32>
    %26 = arith.addf %20, %25 : vector<303x32xf32>
    %27 = vector.extract_strided_slice %15 {offsets = [2, 0], sizes = [303, 1], strides = [1, 1]} : vector<306x1xf32> to vector<303x1xf32>
    %28 = vector.extract_strided_slice %8 {offsets = [2, 0], sizes = [1, 32], strides = [1, 1]} : vector<4x32xf32> to vector<1x32xf32>
    %29 = vector.broadcast %27 : vector<303x1xf32> to vector<303x32xf32>
    %30 = vector.broadcast %28 : vector<1x32xf32> to vector<303x32xf32>
    %31 = arith.mulf %29, %30 : vector<303x32xf32>
    %32 = arith.addf %26, %31 : vector<303x32xf32>
    %33 = vector.extract_strided_slice %15 {offsets = [3, 0], sizes = [303, 1], strides = [1, 1]} : vector<306x1xf32> to vector<303x1xf32>
    %34 = vector.extract_strided_slice %8 {offsets = [3, 0], sizes = [1, 32], strides = [1, 1]} : vector<4x32xf32> to vector<1x32xf32>
    %35 = vector.broadcast %33 : vector<303x1xf32> to vector<303x32xf32>
    %36 = vector.broadcast %34 : vector<1x32xf32> to vector<303x32xf32>
    %37 = arith.mulf %35, %36 : vector<303x32xf32>
    %38 = arith.addf %32, %37 : vector<303x32xf32>
    %39 = vector.broadcast %9 : vector<1x32xf32> to vector<303x32xf32>
    %40 = arith.addf %38, %39 : vector<303x32xf32>
    %cst_23 = arith.constant 0.000000e+00 : f32
    %41 = vector.broadcast %cst_23 : f32 to vector<303x32xf32>
    %42 = arith.maximumf %40, %41 : vector<303x32xf32>
    %c0_24 = arith.constant 0 : index
    %c0_25 = arith.constant 0 : index
    %43 = vector.load %arg9[%c0_24, %c0_25] : memref<303x32xf32, #tpu.memory_space<vmem>>, vector<303x32xf32>
    tpu.vector_store %arg9[%c0_24, %c0_25], %42 {strides = array<i32>} : memref<303x32xf32, #tpu.memory_space<vmem>>, vector<303x32xf32>,
    %c0_26 = arith.constant 0 : index
    %c0_27 = arith.constant 0 : index
    %44 = tpu.strided_load %arg9[%c0_26, %c0_27] {strides = array<i32: 2, 1>} : memref<303x32xf32, #tpu.memory_space<vmem>>, vector<151x32xf32>
    %c1 = arith.constant 1 : index
    %c0_28 = arith.constant 0 : index
    %45 = tpu.strided_load %arg9[%c1, %c0_28] {strides = array<i32: 2, 1>} : memref<303x32xf32, #tpu.memory_space<vmem>>, vector<151x32xf32>
    %46 = arith.maximumf %44, %45 : vector<151x32xf32>
    %c3 = arith.constant 3 : index
    %c0_29 = arith.constant 0 : index
    %47 = vector.load %arg10[%c3, %c0_29] : memref<157x32xf32, #tpu.memory_space<vmem>>, vector<151x32xf32>
    tpu.vector_store %arg10[%c3, %c0_29], %46 {strides = array<i32>} : memref<157x32xf32, #tpu.memory_space<vmem>>, vector<151x32xf32>,
    %c0_30 = arith.constant 0 : index
    %c0_31 = arith.constant 0 : index
    %48 = vector.load %arg10[%c0_30, %c0_31] : memref<157x32xf32, #tpu.memory_space<vmem>>, vector<154x32xf32>
    %c1_32 = arith.constant 1 : index
    %c0_33 = arith.constant 0 : index
    %49 = vector.load %arg10[%c1_32, %c0_33] : memref<157x32xf32, #tpu.memory_space<vmem>>, vector<154x32xf32>
    %c2 = arith.constant 2 : index
    %c0_34 = arith.constant 0 : index
    %50 = vector.load %arg10[%c2, %c0_34] : memref<157x32xf32, #tpu.memory_space<vmem>>, vector<154x32xf32>
    %c3_35 = arith.constant 3 : index
    %c0_36 = arith.constant 0 : index
    %51 = vector.load %arg10[%c3_35, %c0_36] : memref<157x32xf32, #tpu.memory_space<vmem>>, vector<154x32xf32>
    %52 = tpu.concatenate %48, %49, %50, %51 in 1 : vector<154x32xf32>, vector<154x32xf32>, vector<154x32xf32>, vector<154x32xf32> -> vector<154x128xf32>
    %cst_37 = arith.constant dense<0.000000e+00> : vector<154x64xf32>
    %53 = tpu.matmul %52, %10, %cst_37 {dimension_numbers = #tpu.dot_dimension_numbers<[1], [0], [0], [1], [0, 0, 1, 1], [], []>} : vector<154x128xf32>, vector<128x64xf32>, vector<154x64xf32> -> vector<154x64xf32>
    %54 = vector.broadcast %11 : vector<1x64xf32> to vector<154x64xf32>
    %55 = arith.addf %53, %54 : vector<154x64xf32>
    %cst_38 = arith.constant 0.000000e+00 : f32
    %56 = vector.broadcast %cst_38 : f32 to vector<154x64xf32>
    %57 = arith.maximumf %55, %56 : vector<154x64xf32>
    %c0_39 = arith.constant 0 : index
    %c0_40 = arith.constant 0 : index
    %58 = vector.load %arg11[%c0_39, %c0_40] : memref<154x64xf32, #tpu.memory_space<vmem>>, vector<154x64xf32>
    tpu.vector_store %arg11[%c0_39, %c0_40], %57 {strides = array<i32>} : memref<154x64xf32, #tpu.memory_space<vmem>>, vector<154x64xf32>,
    %c0_41 = arith.constant 0 : index
    %c0_42 = arith.constant 0 : index
    %59 = tpu.strided_load %arg11[%c0_41, %c0_42] {strides = array<i32: 2, 1>} : memref<154x64xf32, #tpu.memory_space<vmem>>, vector<77x64xf32>
    %c1_43 = arith.constant 1 : index
    %c0_44 = arith.constant 0 : index
    %60 = tpu.strided_load %arg11[%c1_43, %c0_44] {strides = array<i32: 2, 1>} : memref<154x64xf32, #tpu.memory_space<vmem>>, vector<77x64xf32>
    %61 = arith.maximumf %59, %60 : vector<77x64xf32>
    %c3_45 = arith.constant 3 : index
    %c0_46 = arith.constant 0 : index
    %62 = vector.load %arg12[%c3_45, %c0_46] : memref<83x64xf32, #tpu.memory_space<vmem>>, vector<77x64xf32>
    tpu.vector_store %arg12[%c3_45, %c0_46], %61 {strides = array<i32>} : memref<83x64xf32, #tpu.memory_space<vmem>>, vector<77x64xf32>,
    %c0_47 = arith.constant 0 : index
    %c0_48 = arith.constant 0 : index
    %63 = vector.load %arg12[%c0_47, %c0_48] : memref<83x64xf32, #tpu.memory_space<vmem>>, vector<80x64xf32>
    %c1_49 = arith.constant 1 : index
    %c0_50 = arith.constant 0 : index
    %64 = vector.load %arg12[%c1_49, %c0_50] : memref<83x64xf32, #tpu.memory_space<vmem>>, vector<80x64xf32>
    %c2_51 = arith.constant 2 : index
    %c0_52 = arith.constant 0 : index
    %65 = vector.load %arg12[%c2_51, %c0_52] : memref<83x64xf32, #tpu.memory_space<vmem>>, vector<80x64xf32>
    %c3_53 = arith.constant 3 : index
    %c0_54 = arith.constant 0 : index
    %66 = vector.load %arg12[%c3_53, %c0_54] : memref<83x64xf32, #tpu.memory_space<vmem>>, vector<80x64xf32>
    %67 = tpu.concatenate %63, %64, %65, %66 in 1 : vector<80x64xf32>, vector<80x64xf32>, vector<80x64xf32>, vector<80x64xf32> -> vector<80x256xf32>
    %cst_55 = arith.constant dense<0.000000e+00> : vector<80x128xf32>
    %68 = tpu.matmul %67, %12, %cst_55 {dimension_numbers = #tpu.dot_dimension_numbers<[1], [0], [0], [1], [0, 0, 1, 1], [], []>} : vector<80x256xf32>, vector<256x128xf32>, vector<80x128xf32> -> vector<80x128xf32>
    %69 = vector.broadcast %13 : vector<1x128xf32> to vector<80x128xf32>
    %70 = arith.addf %68, %69 : vector<80x128xf32>
    %cst_56 = arith.constant 0.000000e+00 : f32
    %71 = vector.broadcast %cst_56 : f32 to vector<80x128xf32>
    %72 = arith.maximumf %70, %71 : vector<80x128xf32>
    %c0_57 = arith.constant 0 : index
    %c0_58 = arith.constant 0 : index
    %c0_59 = arith.constant 0 : index
    %73 = vector.load %arg8[%c0_57, %c0_58, %c0_59] : memref<4x80x128xf32, #tpu.memory_space<vmem>>, vector<1x80x128xf32>
    %74 = vector.shape_cast %73 : vector<1x80x128xf32> to vector<80x128xf32>
    %75 = vector.shape_cast %72 : vector<80x128xf32> to vector<1x80x128xf32>
    tpu.vector_store %arg8[%c0_57, %c0_58, %c0_59], %75 {strides = array<i32>} : memref<4x80x128xf32, #tpu.memory_space<vmem>>, vector<1x80x128xf32>,
    %c0_60 = arith.constant 0 : index
    %c0_61 = arith.constant 0 : index
    %c1_62 = arith.constant 1 : index
    %76 = vector.load %arg1[%c0_60, %c0_61, %c1_62] : memref<1x306x4xf32, #tpu.memory_space<vmem>>, vector<1x306x1xf32>
    %77 = vector.shape_cast %76 : vector<1x306x1xf32> to vector<306x1xf32>
    %78 = vector.extract_strided_slice %77 {offsets = [0, 0], sizes = [303, 1], strides = [1, 1]} : vector<306x1xf32> to vector<303x1xf32>
    %79 = vector.extract_strided_slice %8 {offsets = [0, 0], sizes = [1, 32], strides = [1, 1]} : vector<4x32xf32> to vector<1x32xf32>
    %80 = vector.broadcast %78 : vector<303x1xf32> to vector<303x32xf32>
    %81 = vector.broadcast %79 : vector<1x32xf32> to vector<303x32xf32>
    %82 = arith.mulf %80, %81 : vector<303x32xf32>
    %83 = vector.extract_strided_slice %77 {offsets = [1, 0], sizes = [303, 1], strides = [1, 1]} : vector<306x1xf32> to vector<303x1xf32>
    %84 = vector.extract_strided_slice %8 {offsets = [1, 0], sizes = [1, 32], strides = [1, 1]} : vector<4x32xf32> to vector<1x32xf32>
    %85 = vector.broadcast %83 : vector<303x1xf32> to vector<303x32xf32>
    %86 = vector.broadcast %84 : vector<1x32xf32> to vector<303x32xf32>
    %87 = arith.mulf %85, %86 : vector<303x32xf32>
    %88 = arith.addf %82, %87 : vector<303x32xf32>
    %89 = vector.extract_strided_slice %77 {offsets = [2, 0], sizes = [303, 1], strides = [1, 1]} : vector<306x1xf32> to vector<303x1xf32>
    %90 = vector.extract_strided_slice %8 {offsets = [2, 0], sizes = [1, 32], strides = [1, 1]} : vector<4x32xf32> to vector<1x32xf32>
    %91 = vector.broadcast %89 : vector<303x1xf32> to vector<303x32xf32>
    %92 = vector.broadcast %90 : vector<1x32xf32> to vector<303x32xf32>
    %93 = arith.mulf %91, %92 : vector<303x32xf32>
    %94 = arith.addf %88, %93 : vector<303x32xf32>
    %95 = vector.extract_strided_slice %77 {offsets = [3, 0], sizes = [303, 1], strides = [1, 1]} : vector<306x1xf32> to vector<303x1xf32>
    %96 = vector.extract_strided_slice %8 {offsets = [3, 0], sizes = [1, 32], strides = [1, 1]} : vector<4x32xf32> to vector<1x32xf32>
    %97 = vector.broadcast %95 : vector<303x1xf32> to vector<303x32xf32>
    %98 = vector.broadcast %96 : vector<1x32xf32> to vector<303x32xf32>
    %99 = arith.mulf %97, %98 : vector<303x32xf32>
    %100 = arith.addf %94, %99 : vector<303x32xf32>
    %101 = vector.broadcast %9 : vector<1x32xf32> to vector<303x32xf32>
    %102 = arith.addf %100, %101 : vector<303x32xf32>
    %cst_63 = arith.constant 0.000000e+00 : f32
    %103 = vector.broadcast %cst_63 : f32 to vector<303x32xf32>
    %104 = arith.maximumf %102, %103 : vector<303x32xf32>
    %c0_64 = arith.constant 0 : index
    %c0_65 = arith.constant 0 : index
    %105 = vector.load %arg9[%c0_64, %c0_65] : memref<303x32xf32, #tpu.memory_space<vmem>>, vector<303x32xf32>
    tpu.vector_store %arg9[%c0_64, %c0_65], %104 {strides = array<i32>} : memref<303x32xf32, #tpu.memory_space<vmem>>, vector<303x32xf32>,
    %c0_66 = arith.constant 0 : index
    %c0_67 = arith.constant 0 : index
    %106 = tpu.strided_load %arg9[%c0_66, %c0_67] {strides = array<i32: 2, 1>} : memref<303x32xf32, #tpu.memory_space<vmem>>, vector<151x32xf32>
    %c1_68 = arith.constant 1 : index
    %c0_69 = arith.constant 0 : index
    %107 = tpu.strided_load %arg9[%c1_68, %c0_69] {strides = array<i32: 2, 1>} : memref<303x32xf32, #tpu.memory_space<vmem>>, vector<151x32xf32>
    %108 = arith.maximumf %106, %107 : vector<151x32xf32>
    %c3_70 = arith.constant 3 : index
    %c0_71 = arith.constant 0 : index
    %109 = vector.load %arg10[%c3_70, %c0_71] : memref<157x32xf32, #tpu.memory_space<vmem>>, vector<151x32xf32>
    tpu.vector_store %arg10[%c3_70, %c0_71], %108 {strides = array<i32>} : memref<157x32xf32, #tpu.memory_space<vmem>>, vector<151x32xf32>,
    %c0_72 = arith.constant 0 : index
    %c0_73 = arith.constant 0 : index
    %110 = vector.load %arg10[%c0_72, %c0_73] : memref<157x32xf32, #tpu.memory_space<vmem>>, vector<154x32xf32>
    %c1_74 = arith.constant 1 : index
    %c0_75 = arith.constant 0 : index
    %111 = vector.load %arg10[%c1_74, %c0_75] : memref<157x32xf32, #tpu.memory_space<vmem>>, vector<154x32xf32>
    %c2_76 = arith.constant 2 : index
    %c0_77 = arith.constant 0 : index
    %112 = vector.load %arg10[%c2_76, %c0_77] : memref<157x32xf32, #tpu.memory_space<vmem>>, vector<154x32xf32>
    %c3_78 = arith.constant 3 : index
    %c0_79 = arith.constant 0 : index
    %113 = vector.load %arg10[%c3_78, %c0_79] : memref<157x32xf32, #tpu.memory_space<vmem>>, vector<154x32xf32>
    %114 = tpu.concatenate %110, %111, %112, %113 in 1 : vector<154x32xf32>, vector<154x32xf32>, vector<154x32xf32>, vector<154x32xf32> -> vector<154x128xf32>
    %cst_80 = arith.constant dense<0.000000e+00> : vector<154x64xf32>
    %115 = tpu.matmul %114, %10, %cst_80 {dimension_numbers = #tpu.dot_dimension_numbers<[1], [0], [0], [1], [0, 0, 1, 1], [], []>} : vector<154x128xf32>, vector<128x64xf32>, vector<154x64xf32> -> vector<154x64xf32>
    %116 = vector.broadcast %11 : vector<1x64xf32> to vector<154x64xf32>
    %117 = arith.addf %115, %116 : vector<154x64xf32>
    %cst_81 = arith.constant 0.000000e+00 : f32
    %118 = vector.broadcast %cst_81 : f32 to vector<154x64xf32>
    %119 = arith.maximumf %117, %118 : vector<154x64xf32>
    %c0_82 = arith.constant 0 : index
    %c0_83 = arith.constant 0 : index
    %120 = vector.load %arg11[%c0_82, %c0_83] : memref<154x64xf32, #tpu.memory_space<vmem>>, vector<154x64xf32>
    tpu.vector_store %arg11[%c0_82, %c0_83], %119 {strides = array<i32>} : memref<154x64xf32, #tpu.memory_space<vmem>>, vector<154x64xf32>,
    %c0_84 = arith.constant 0 : index
    %c0_85 = arith.constant 0 : index
    %121 = tpu.strided_load %arg11[%c0_84, %c0_85] {strides = array<i32: 2, 1>} : memref<154x64xf32, #tpu.memory_space<vmem>>, vector<77x64xf32>
    %c1_86 = arith.constant 1 : index
    %c0_87 = arith.constant 0 : index
    %122 = tpu.strided_load %arg11[%c1_86, %c0_87] {strides = array<i32: 2, 1>} : memref<154x64xf32, #tpu.memory_space<vmem>>, vector<77x64xf32>
    %123 = arith.maximumf %121, %122 : vector<77x64xf32>
    %c3_88 = arith.constant 3 : index
    %c0_89 = arith.constant 0 : index
    %124 = vector.load %arg12[%c3_88, %c0_89] : memref<83x64xf32, #tpu.memory_space<vmem>>, vector<77x64xf32>
    tpu.vector_store %arg12[%c3_88, %c0_89], %123 {strides = array<i32>} : memref<83x64xf32, #tpu.memory_space<vmem>>, vector<77x64xf32>,
    %c0_90 = arith.constant 0 : index
    %c0_91 = arith.constant 0 : index
    %125 = vector.load %arg12[%c0_90, %c0_91] : memref<83x64xf32, #tpu.memory_space<vmem>>, vector<80x64xf32>
    %c1_92 = arith.constant 1 : index
    %c0_93 = arith.constant 0 : index
    %126 = vector.load %arg12[%c1_92, %c0_93] : memref<83x64xf32, #tpu.memory_space<vmem>>, vector<80x64xf32>
    %c2_94 = arith.constant 2 : index
    %c0_95 = arith.constant 0 : index
    %127 = vector.load %arg12[%c2_94, %c0_95] : memref<83x64xf32, #tpu.memory_space<vmem>>, vector<80x64xf32>
    %c3_96 = arith.constant 3 : index
    %c0_97 = arith.constant 0 : index
    %128 = vector.load %arg12[%c3_96, %c0_97] : memref<83x64xf32, #tpu.memory_space<vmem>>, vector<80x64xf32>
    %129 = tpu.concatenate %125, %126, %127, %128 in 1 : vector<80x64xf32>, vector<80x64xf32>, vector<80x64xf32>, vector<80x64xf32> -> vector<80x256xf32>
    %cst_98 = arith.constant dense<0.000000e+00> : vector<80x128xf32>
    %130 = tpu.matmul %129, %12, %cst_98 {dimension_numbers = #tpu.dot_dimension_numbers<[1], [0], [0], [1], [0, 0, 1, 1], [], []>} : vector<80x256xf32>, vector<256x128xf32>, vector<80x128xf32> -> vector<80x128xf32>
    %131 = vector.broadcast %13 : vector<1x128xf32> to vector<80x128xf32>
    %132 = arith.addf %130, %131 : vector<80x128xf32>
    %cst_99 = arith.constant 0.000000e+00 : f32
    %133 = vector.broadcast %cst_99 : f32 to vector<80x128xf32>
    %134 = arith.maximumf %132, %133 : vector<80x128xf32>
    %c1_100 = arith.constant 1 : index
    %c0_101 = arith.constant 0 : index
    %c0_102 = arith.constant 0 : index
    %135 = vector.load %arg8[%c1_100, %c0_101, %c0_102] : memref<4x80x128xf32, #tpu.memory_space<vmem>>, vector<1x80x128xf32>
    %136 = vector.shape_cast %135 : vector<1x80x128xf32> to vector<80x128xf32>
    %137 = vector.shape_cast %134 : vector<80x128xf32> to vector<1x80x128xf32>
    tpu.vector_store %arg8[%c1_100, %c0_101, %c0_102], %137 {strides = array<i32>} : memref<4x80x128xf32, #tpu.memory_space<vmem>>, vector<1x80x128xf32>,
    %c0_103 = arith.constant 0 : index
    %c0_104 = arith.constant 0 : index
    %c2_105 = arith.constant 2 : index
    %138 = vector.load %arg1[%c0_103, %c0_104, %c2_105] : memref<1x306x4xf32, #tpu.memory_space<vmem>>, vector<1x306x1xf32>
    %139 = vector.shape_cast %138 : vector<1x306x1xf32> to vector<306x1xf32>
    %140 = vector.extract_strided_slice %139 {offsets = [0, 0], sizes = [303, 1], strides = [1, 1]} : vector<306x1xf32> to vector<303x1xf32>
    %141 = vector.extract_strided_slice %8 {offsets = [0, 0], sizes = [1, 32], strides = [1, 1]} : vector<4x32xf32> to vector<1x32xf32>
    %142 = vector.broadcast %140 : vector<303x1xf32> to vector<303x32xf32>
    %143 = vector.broadcast %141 : vector<1x32xf32> to vector<303x32xf32>
    %144 = arith.mulf %142, %143 : vector<303x32xf32>
    %145 = vector.extract_strided_slice %139 {offsets = [1, 0], sizes = [303, 1], strides = [1, 1]} : vector<306x1xf32> to vector<303x1xf32>
    %146 = vector.extract_strided_slice %8 {offsets = [1, 0], sizes = [1, 32], strides = [1, 1]} : vector<4x32xf32> to vector<1x32xf32>
    %147 = vector.broadcast %145 : vector<303x1xf32> to vector<303x32xf32>
    %148 = vector.broadcast %146 : vector<1x32xf32> to vector<303x32xf32>
    %149 = arith.mulf %147, %148 : vector<303x32xf32>
    %150 = arith.addf %144, %149 : vector<303x32xf32>
    %151 = vector.extract_strided_slice %139 {offsets = [2, 0], sizes = [303, 1], strides = [1, 1]} : vector<306x1xf32> to vector<303x1xf32>
    %152 = vector.extract_strided_slice %8 {offsets = [2, 0], sizes = [1, 32], strides = [1, 1]} : vector<4x32xf32> to vector<1x32xf32>
    %153 = vector.broadcast %151 : vector<303x1xf32> to vector<303x32xf32>
    %154 = vector.broadcast %152 : vector<1x32xf32> to vector<303x32xf32>
    %155 = arith.mulf %153, %154 : vector<303x32xf32>
    %156 = arith.addf %150, %155 : vector<303x32xf32>
    %157 = vector.extract_strided_slice %139 {offsets = [3, 0], sizes = [303, 1], strides = [1, 1]} : vector<306x1xf32> to vector<303x1xf32>
    %158 = vector.extract_strided_slice %8 {offsets = [3, 0], sizes = [1, 32], strides = [1, 1]} : vector<4x32xf32> to vector<1x32xf32>
    %159 = vector.broadcast %157 : vector<303x1xf32> to vector<303x32xf32>
    %160 = vector.broadcast %158 : vector<1x32xf32> to vector<303x32xf32>
    %161 = arith.mulf %159, %160 : vector<303x32xf32>
    %162 = arith.addf %156, %161 : vector<303x32xf32>
    %163 = vector.broadcast %9 : vector<1x32xf32> to vector<303x32xf32>
    %164 = arith.addf %162, %163 : vector<303x32xf32>
    %cst_106 = arith.constant 0.000000e+00 : f32
    %165 = vector.broadcast %cst_106 : f32 to vector<303x32xf32>
    %166 = arith.maximumf %164, %165 : vector<303x32xf32>
    %c0_107 = arith.constant 0 : index
    %c0_108 = arith.constant 0 : index
    %167 = vector.load %arg9[%c0_107, %c0_108] : memref<303x32xf32, #tpu.memory_space<vmem>>, vector<303x32xf32>
    tpu.vector_store %arg9[%c0_107, %c0_108], %166 {strides = array<i32>} : memref<303x32xf32, #tpu.memory_space<vmem>>, vector<303x32xf32>,
    %c0_109 = arith.constant 0 : index
    %c0_110 = arith.constant 0 : index
    %168 = tpu.strided_load %arg9[%c0_109, %c0_110] {strides = array<i32: 2, 1>} : memref<303x32xf32, #tpu.memory_space<vmem>>, vector<151x32xf32>
    %c1_111 = arith.constant 1 : index
    %c0_112 = arith.constant 0 : index
    %169 = tpu.strided_load %arg9[%c1_111, %c0_112] {strides = array<i32: 2, 1>} : memref<303x32xf32, #tpu.memory_space<vmem>>, vector<151x32xf32>
    %170 = arith.maximumf %168, %169 : vector<151x32xf32>
    %c3_113 = arith.constant 3 : index
    %c0_114 = arith.constant 0 : index
    %171 = vector.load %arg10[%c3_113, %c0_114] : memref<157x32xf32, #tpu.memory_space<vmem>>, vector<151x32xf32>
    tpu.vector_store %arg10[%c3_113, %c0_114], %170 {strides = array<i32>} : memref<157x32xf32, #tpu.memory_space<vmem>>, vector<151x32xf32>,
    %c0_115 = arith.constant 0 : index
    %c0_116 = arith.constant 0 : index
    %172 = vector.load %arg10[%c0_115, %c0_116] : memref<157x32xf32, #tpu.memory_space<vmem>>, vector<154x32xf32>
    %c1_117 = arith.constant 1 : index
    %c0_118 = arith.constant 0 : index
    %173 = vector.load %arg10[%c1_117, %c0_118] : memref<157x32xf32, #tpu.memory_space<vmem>>, vector<154x32xf32>
    %c2_119 = arith.constant 2 : index
    %c0_120 = arith.constant 0 : index
    %174 = vector.load %arg10[%c2_119, %c0_120] : memref<157x32xf32, #tpu.memory_space<vmem>>, vector<154x32xf32>
    %c3_121 = arith.constant 3 : index
    %c0_122 = arith.constant 0 : index
    %175 = vector.load %arg10[%c3_121, %c0_122] : memref<157x32xf32, #tpu.memory_space<vmem>>, vector<154x32xf32>
    %176 = tpu.concatenate %172, %173, %174, %175 in 1 : vector<154x32xf32>, vector<154x32xf32>, vector<154x32xf32>, vector<154x32xf32> -> vector<154x128xf32>
    %cst_123 = arith.constant dense<0.000000e+00> : vector<154x64xf32>
    %177 = tpu.matmul %176, %10, %cst_123 {dimension_numbers = #tpu.dot_dimension_numbers<[1], [0], [0], [1], [0, 0, 1, 1], [], []>} : vector<154x128xf32>, vector<128x64xf32>, vector<154x64xf32> -> vector<154x64xf32>
    %178 = vector.broadcast %11 : vector<1x64xf32> to vector<154x64xf32>
    %179 = arith.addf %177, %178 : vector<154x64xf32>
    %cst_124 = arith.constant 0.000000e+00 : f32
    %180 = vector.broadcast %cst_124 : f32 to vector<154x64xf32>
    %181 = arith.maximumf %179, %180 : vector<154x64xf32>
    %c0_125 = arith.constant 0 : index
    %c0_126 = arith.constant 0 : index
    %182 = vector.load %arg11[%c0_125, %c0_126] : memref<154x64xf32, #tpu.memory_space<vmem>>, vector<154x64xf32>
    tpu.vector_store %arg11[%c0_125, %c0_126], %181 {strides = array<i32>} : memref<154x64xf32, #tpu.memory_space<vmem>>, vector<154x64xf32>,
    %c0_127 = arith.constant 0 : index
    %c0_128 = arith.constant 0 : index
    %183 = tpu.strided_load %arg11[%c0_127, %c0_128] {strides = array<i32: 2, 1>} : memref<154x64xf32, #tpu.memory_space<vmem>>, vector<77x64xf32>
    %c1_129 = arith.constant 1 : index
    %c0_130 = arith.constant 0 : index
    %184 = tpu.strided_load %arg11[%c1_129, %c0_130] {strides = array<i32: 2, 1>} : memref<154x64xf32, #tpu.memory_space<vmem>>, vector<77x64xf32>
    %185 = arith.maximumf %183, %184 : vector<77x64xf32>
    %c3_131 = arith.constant 3 : index
    %c0_132 = arith.constant 0 : index
    %186 = vector.load %arg12[%c3_131, %c0_132] : memref<83x64xf32, #tpu.memory_space<vmem>>, vector<77x64xf32>
    tpu.vector_store %arg12[%c3_131, %c0_132], %185 {strides = array<i32>} : memref<83x64xf32, #tpu.memory_space<vmem>>, vector<77x64xf32>,
    %c0_133 = arith.constant 0 : index
    %c0_134 = arith.constant 0 : index
    %187 = vector.load %arg12[%c0_133, %c0_134] : memref<83x64xf32, #tpu.memory_space<vmem>>, vector<80x64xf32>
    %c1_135 = arith.constant 1 : index
    %c0_136 = arith.constant 0 : index
    %188 = vector.load %arg12[%c1_135, %c0_136] : memref<83x64xf32, #tpu.memory_space<vmem>>, vector<80x64xf32>
    %c2_137 = arith.constant 2 : index
    %c0_138 = arith.constant 0 : index
    %189 = vector.load %arg12[%c2_137, %c0_138] : memref<83x64xf32, #tpu.memory_space<vmem>>, vector<80x64xf32>
    %c3_139 = arith.constant 3 : index
    %c0_140 = arith.constant 0 : index
    %190 = vector.load %arg12[%c3_139, %c0_140] : memref<83x64xf32, #tpu.memory_space<vmem>>, vector<80x64xf32>
    %191 = tpu.concatenate %187, %188, %189, %190 in 1 : vector<80x64xf32>, vector<80x64xf32>, vector<80x64xf32>, vector<80x64xf32> -> vector<80x256xf32>
    %cst_141 = arith.constant dense<0.000000e+00> : vector<80x128xf32>
    %192 = tpu.matmul %191, %12, %cst_141 {dimension_numbers = #tpu.dot_dimension_numbers<[1], [0], [0], [1], [0, 0, 1, 1], [], []>} : vector<80x256xf32>, vector<256x128xf32>, vector<80x128xf32> -> vector<80x128xf32>
    %193 = vector.broadcast %13 : vector<1x128xf32> to vector<80x128xf32>
    %194 = arith.addf %192, %193 : vector<80x128xf32>
    %cst_142 = arith.constant 0.000000e+00 : f32
    %195 = vector.broadcast %cst_142 : f32 to vector<80x128xf32>
    %196 = arith.maximumf %194, %195 : vector<80x128xf32>
    %c2_143 = arith.constant 2 : index
    %c0_144 = arith.constant 0 : index
    %c0_145 = arith.constant 0 : index
    %197 = vector.load %arg8[%c2_143, %c0_144, %c0_145] : memref<4x80x128xf32, #tpu.memory_space<vmem>>, vector<1x80x128xf32>
    %198 = vector.shape_cast %197 : vector<1x80x128xf32> to vector<80x128xf32>
    %199 = vector.shape_cast %196 : vector<80x128xf32> to vector<1x80x128xf32>
    tpu.vector_store %arg8[%c2_143, %c0_144, %c0_145], %199 {strides = array<i32>} : memref<4x80x128xf32, #tpu.memory_space<vmem>>, vector<1x80x128xf32>,
    %c0_146 = arith.constant 0 : index
    %c0_147 = arith.constant 0 : index
    %c3_148 = arith.constant 3 : index
    %200 = vector.load %arg1[%c0_146, %c0_147, %c3_148] : memref<1x306x4xf32, #tpu.memory_space<vmem>>, vector<1x306x1xf32>
    %201 = vector.shape_cast %200 : vector<1x306x1xf32> to vector<306x1xf32>
    %202 = vector.extract_strided_slice %201 {offsets = [0, 0], sizes = [303, 1], strides = [1, 1]} : vector<306x1xf32> to vector<303x1xf32>
    %203 = vector.extract_strided_slice %8 {offsets = [0, 0], sizes = [1, 32], strides = [1, 1]} : vector<4x32xf32> to vector<1x32xf32>
    %204 = vector.broadcast %202 : vector<303x1xf32> to vector<303x32xf32>
    %205 = vector.broadcast %203 : vector<1x32xf32> to vector<303x32xf32>
    %206 = arith.mulf %204, %205 : vector<303x32xf32>
    %207 = vector.extract_strided_slice %201 {offsets = [1, 0], sizes = [303, 1], strides = [1, 1]} : vector<306x1xf32> to vector<303x1xf32>
    %208 = vector.extract_strided_slice %8 {offsets = [1, 0], sizes = [1, 32], strides = [1, 1]} : vector<4x32xf32> to vector<1x32xf32>
    %209 = vector.broadcast %207 : vector<303x1xf32> to vector<303x32xf32>
    %210 = vector.broadcast %208 : vector<1x32xf32> to vector<303x32xf32>
    %211 = arith.mulf %209, %210 : vector<303x32xf32>
    %212 = arith.addf %206, %211 : vector<303x32xf32>
    %213 = vector.extract_strided_slice %201 {offsets = [2, 0], sizes = [303, 1], strides = [1, 1]} : vector<306x1xf32> to vector<303x1xf32>
    %214 = vector.extract_strided_slice %8 {offsets = [2, 0], sizes = [1, 32], strides = [1, 1]} : vector<4x32xf32> to vector<1x32xf32>
    %215 = vector.broadcast %213 : vector<303x1xf32> to vector<303x32xf32>
    %216 = vector.broadcast %214 : vector<1x32xf32> to vector<303x32xf32>
    %217 = arith.mulf %215, %216 : vector<303x32xf32>
    %218 = arith.addf %212, %217 : vector<303x32xf32>
    %219 = vector.extract_strided_slice %201 {offsets = [3, 0], sizes = [303, 1], strides = [1, 1]} : vector<306x1xf32> to vector<303x1xf32>
    %220 = vector.extract_strided_slice %8 {offsets = [3, 0], sizes = [1, 32], strides = [1, 1]} : vector<4x32xf32> to vector<1x32xf32>
    %221 = vector.broadcast %219 : vector<303x1xf32> to vector<303x32xf32>
    %222 = vector.broadcast %220 : vector<1x32xf32> to vector<303x32xf32>
    %223 = arith.mulf %221, %222 : vector<303x32xf32>
    %224 = arith.addf %218, %223 : vector<303x32xf32>
    %225 = vector.broadcast %9 : vector<1x32xf32> to vector<303x32xf32>
    %226 = arith.addf %224, %225 : vector<303x32xf32>
    %cst_149 = arith.constant 0.000000e+00 : f32
    %227 = vector.broadcast %cst_149 : f32 to vector<303x32xf32>
    %228 = arith.maximumf %226, %227 : vector<303x32xf32>
    %c0_150 = arith.constant 0 : index
    %c0_151 = arith.constant 0 : index
    %229 = vector.load %arg9[%c0_150, %c0_151] : memref<303x32xf32, #tpu.memory_space<vmem>>, vector<303x32xf32>
    tpu.vector_store %arg9[%c0_150, %c0_151], %228 {strides = array<i32>} : memref<303x32xf32, #tpu.memory_space<vmem>>, vector<303x32xf32>,
    %c0_152 = arith.constant 0 : index
    %c0_153 = arith.constant 0 : index
    %230 = tpu.strided_load %arg9[%c0_152, %c0_153] {strides = array<i32: 2, 1>} : memref<303x32xf32, #tpu.memory_space<vmem>>, vector<151x32xf32>
    %c1_154 = arith.constant 1 : index
    %c0_155 = arith.constant 0 : index
    %231 = tpu.strided_load %arg9[%c1_154, %c0_155] {strides = array<i32: 2, 1>} : memref<303x32xf32, #tpu.memory_space<vmem>>, vector<151x32xf32>
    %232 = arith.maximumf %230, %231 : vector<151x32xf32>
    %c3_156 = arith.constant 3 : index
    %c0_157 = arith.constant 0 : index
    %233 = vector.load %arg10[%c3_156, %c0_157] : memref<157x32xf32, #tpu.memory_space<vmem>>, vector<151x32xf32>
    tpu.vector_store %arg10[%c3_156, %c0_157], %232 {strides = array<i32>} : memref<157x32xf32, #tpu.memory_space<vmem>>, vector<151x32xf32>,
    %c0_158 = arith.constant 0 : index
    %c0_159 = arith.constant 0 : index
    %234 = vector.load %arg10[%c0_158, %c0_159] : memref<157x32xf32, #tpu.memory_space<vmem>>, vector<154x32xf32>
    %c1_160 = arith.constant 1 : index
    %c0_161 = arith.constant 0 : index
    %235 = vector.load %arg10[%c1_160, %c0_161] : memref<157x32xf32, #tpu.memory_space<vmem>>, vector<154x32xf32>
    %c2_162 = arith.constant 2 : index
    %c0_163 = arith.constant 0 : index
    %236 = vector.load %arg10[%c2_162, %c0_163] : memref<157x32xf32, #tpu.memory_space<vmem>>, vector<154x32xf32>
    %c3_164 = arith.constant 3 : index
    %c0_165 = arith.constant 0 : index
    %237 = vector.load %arg10[%c3_164, %c0_165] : memref<157x32xf32, #tpu.memory_space<vmem>>, vector<154x32xf32>
    %238 = tpu.concatenate %234, %235, %236, %237 in 1 : vector<154x32xf32>, vector<154x32xf32>, vector<154x32xf32>, vector<154x32xf32> -> vector<154x128xf32>
    %cst_166 = arith.constant dense<0.000000e+00> : vector<154x64xf32>
    %239 = tpu.matmul %238, %10, %cst_166 {dimension_numbers = #tpu.dot_dimension_numbers<[1], [0], [0], [1], [0, 0, 1, 1], [], []>} : vector<154x128xf32>, vector<128x64xf32>, vector<154x64xf32> -> vector<154x64xf32>
    %240 = vector.broadcast %11 : vector<1x64xf32> to vector<154x64xf32>
    %241 = arith.addf %239, %240 : vector<154x64xf32>
    %cst_167 = arith.constant 0.000000e+00 : f32
    %242 = vector.broadcast %cst_167 : f32 to vector<154x64xf32>
    %243 = arith.maximumf %241, %242 : vector<154x64xf32>
    %c0_168 = arith.constant 0 : index
    %c0_169 = arith.constant 0 : index
    %244 = vector.load %arg11[%c0_168, %c0_169] : memref<154x64xf32, #tpu.memory_space<vmem>>, vector<154x64xf32>
    tpu.vector_store %arg11[%c0_168, %c0_169], %243 {strides = array<i32>} : memref<154x64xf32, #tpu.memory_space<vmem>>, vector<154x64xf32>,
    %c0_170 = arith.constant 0 : index
    %c0_171 = arith.constant 0 : index
    %245 = tpu.strided_load %arg11[%c0_170, %c0_171] {strides = array<i32: 2, 1>} : memref<154x64xf32, #tpu.memory_space<vmem>>, vector<77x64xf32>
    %c1_172 = arith.constant 1 : index
    %c0_173 = arith.constant 0 : index
    %246 = tpu.strided_load %arg11[%c1_172, %c0_173] {strides = array<i32: 2, 1>} : memref<154x64xf32, #tpu.memory_space<vmem>>, vector<77x64xf32>
    %247 = arith.maximumf %245, %246 : vector<77x64xf32>
    %c3_174 = arith.constant 3 : index
    %c0_175 = arith.constant 0 : index
    %248 = vector.load %arg12[%c3_174, %c0_175] : memref<83x64xf32, #tpu.memory_space<vmem>>, vector<77x64xf32>
    tpu.vector_store %arg12[%c3_174, %c0_175], %247 {strides = array<i32>} : memref<83x64xf32, #tpu.memory_space<vmem>>, vector<77x64xf32>,
    %c0_176 = arith.constant 0 : index
    %c0_177 = arith.constant 0 : index
    %249 = vector.load %arg12[%c0_176, %c0_177] : memref<83x64xf32, #tpu.memory_space<vmem>>, vector<80x64xf32>
    %c1_178 = arith.constant 1 : index
    %c0_179 = arith.constant 0 : index
    %250 = vector.load %arg12[%c1_178, %c0_179] : memref<83x64xf32, #tpu.memory_space<vmem>>, vector<80x64xf32>
    %c2_180 = arith.constant 2 : index
    %c0_181 = arith.constant 0 : index
    %251 = vector.load %arg12[%c2_180, %c0_181] : memref<83x64xf32, #tpu.memory_space<vmem>>, vector<80x64xf32>
    %c3_182 = arith.constant 3 : index
    %c0_183 = arith.constant 0 : index
    %252 = vector.load %arg12[%c3_182, %c0_183] : memref<83x64xf32, #tpu.memory_space<vmem>>, vector<80x64xf32>
    %253 = tpu.concatenate %249, %250, %251, %252 in 1 : vector<80x64xf32>, vector<80x64xf32>, vector<80x64xf32>, vector<80x64xf32> -> vector<80x256xf32>
    %cst_184 = arith.constant dense<0.000000e+00> : vector<80x128xf32>
    %254 = tpu.matmul %253, %12, %cst_184 {dimension_numbers = #tpu.dot_dimension_numbers<[1], [0], [0], [1], [0, 0, 1, 1], [], []>} : vector<80x256xf32>, vector<256x128xf32>, vector<80x128xf32> -> vector<80x128xf32>
    %255 = vector.broadcast %13 : vector<1x128xf32> to vector<80x128xf32>
    %256 = arith.addf %254, %255 : vector<80x128xf32>
    %cst_185 = arith.constant 0.000000e+00 : f32
    %257 = vector.broadcast %cst_185 : f32 to vector<80x128xf32>
    %258 = arith.maximumf %256, %257 : vector<80x128xf32>
    %c3_186 = arith.constant 3 : index
    %c0_187 = arith.constant 0 : index
    %c0_188 = arith.constant 0 : index
    %259 = vector.load %arg8[%c3_186, %c0_187, %c0_188] : memref<4x80x128xf32, #tpu.memory_space<vmem>>, vector<1x80x128xf32>
    %260 = vector.shape_cast %259 : vector<1x80x128xf32> to vector<80x128xf32>
    %261 = vector.shape_cast %258 : vector<80x128xf32> to vector<1x80x128xf32>
    tpu.vector_store %arg8[%c3_186, %c0_187, %c0_188], %261 {strides = array<i32>} : memref<4x80x128xf32, #tpu.memory_space<vmem>>, vector<1x80x128xf32>,
    return
  }
  func.func @transform_0(%arg0: i32) -> (i32, i32, i32) {
    %c0_i32 = arith.constant 0 : i32
    %c0_i32_0 = arith.constant 0 : i32
    %c0_i32_1 = arith.constant 0 : i32
    return %arg0, %c0_i32, %c0_i32_0 : i32, i32, i32
  }
  func.func @transform_1(%arg0: i32) -> (i32, i32) {
    %c0_i32 = arith.constant 0 : i32
    %c0_i32_0 = arith.constant 0 : i32
    %c0_i32_1 = arith.constant 0 : i32
    return %c0_i32, %c0_i32_0 : i32, i32
  }
  func.func @transform_2(%arg0: i32) -> (i32, i32) {
    %c0_i32 = arith.constant 0 : i32
    %c0_i32_0 = arith.constant 0 : i32
    %c0_i32_1 = arith.constant 0 : i32
    return %c0_i32, %c0_i32_0 : i32, i32
  }
  func.func @transform_3(%arg0: i32) -> (i32, i32) {
    %c0_i32 = arith.constant 0 : i32
    %c0_i32_0 = arith.constant 0 : i32
    %c0_i32_1 = arith.constant 0 : i32
    return %c0_i32, %c0_i32_0 : i32, i32
  }
  func.func @transform_4(%arg0: i32) -> (i32, i32) {
    %c0_i32 = arith.constant 0 : i32
    %c0_i32_0 = arith.constant 0 : i32
    %c0_i32_1 = arith.constant 0 : i32
    return %c0_i32, %c0_i32_0 : i32, i32
  }
  func.func @transform_5(%arg0: i32) -> (i32, i32) {
    %c0_i32 = arith.constant 0 : i32
    %c0_i32_0 = arith.constant 0 : i32
    %c0_i32_1 = arith.constant 0 : i32
    return %c0_i32, %c0_i32_0 : i32, i32
  }
  func.func @transform_6(%arg0: i32) -> (i32, i32) {
    %c0_i32 = arith.constant 0 : i32
    %c0_i32_0 = arith.constant 0 : i32
    %c0_i32_1 = arith.constant 0 : i32
    return %c0_i32, %c0_i32_0 : i32, i32
  }
  func.func @transform_7(%arg0: i32) -> (i32, i32, i32) {
    %c0_i32 = arith.constant 0 : i32
    %c0_i32_0 = arith.constant 0 : i32
    %c0_i32_1 = arith.constant 0 : i32
    return %arg0, %c0_i32, %c0_i32_0 : i32, i32, i32
  }
}

module attributes {stable_mosaic.version = 11 : i64} {
  func.func @fc_kernel(%arg0: i32, %arg1: memref<8x10240xf32, #tpu.memory_space<vmem>>, %arg2: memref<8x10240xf32, #tpu.memory_space<vmem>>, %arg3: memref<1x8xf32, #tpu.memory_space<vmem>>, %arg4: memref<8x8xf32, #tpu.memory_space<vmem>>) attributes {dimension_semantics = [#tpu.dimension_semantics<arbitrary>], iteration_bounds = array<i64: 1>, scalar_prefetch = 0 : i64, scratch_operands = 0 : i64, tpu.core_type = #tpu.core_type<tc>, window_params = [{pipeline_mode = #tpu.pipeline_mode<synchronous>, transform_indices = @transform_0, window_bounds = array<i64: 8, 10240>}, {pipeline_mode = #tpu.pipeline_mode<synchronous>, transform_indices = @transform_1, window_bounds = array<i64: 8, 10240>}, {pipeline_mode = #tpu.pipeline_mode<synchronous>, transform_indices = @transform_2, window_bounds = array<i64: 1, 8>}, {pipeline_mode = #tpu.pipeline_mode<synchronous>, transform_indices = @transform_3, window_bounds = array<i64: 8, 8>}]} {
    %c0 = arith.constant 0 : index
    %c0_0 = arith.constant 0 : index
    %0 = vector.load %arg1[%c0, %c0_0] : memref<8x10240xf32, #tpu.memory_space<vmem>>, vector<8x10240xf32>
    %c0_1 = arith.constant 0 : index
    %c0_2 = arith.constant 0 : index
    %1 = vector.load %arg2[%c0_1, %c0_2] : memref<8x10240xf32, #tpu.memory_space<vmem>>, vector<8x10240xf32>
    %cst = arith.constant dense<0.000000e+00> : vector<8x8xf32>
    %2 = tpu.matmul %0, %1, %cst {dimension_numbers = #tpu.dot_dimension_numbers<[1], [1], [0], [0], [0, 0, 1, 0], [], []>} : vector<8x10240xf32>, vector<8x10240xf32>, vector<8x8xf32> -> vector<8x8xf32>
    %c0_3 = arith.constant 0 : index
    %c0_4 = arith.constant 0 : index
    %3 = vector.load %arg3[%c0_3, %c0_4] : memref<1x8xf32, #tpu.memory_space<vmem>>, vector<1x8xf32>
    %4 = vector.broadcast %3 : vector<1x8xf32> to vector<8x8xf32>
    %5 = arith.addf %2, %4 : vector<8x8xf32>
    %c0_5 = arith.constant 0 : index
    %c0_6 = arith.constant 0 : index
    %6 = vector.load %arg4[%c0_5, %c0_6] : memref<8x8xf32, #tpu.memory_space<vmem>>, vector<8x8xf32>
    tpu.vector_store %arg4[%c0_5, %c0_6], %5 {strides = array<i32>} : memref<8x8xf32, #tpu.memory_space<vmem>>, vector<8x8xf32>,
    return
  }
  func.func @transform_0(%arg0: i32) -> (i32, i32) {
    %c0_i32 = arith.constant 0 : i32
    %c0_i32_0 = arith.constant 0 : i32
    %c0_i32_1 = arith.constant 0 : i32
    return %c0_i32, %c0_i32_0 : i32, i32
  }
  func.func @transform_1(%arg0: i32) -> (i32, i32) {
    %c0_i32 = arith.constant 0 : i32
    %c0_i32_0 = arith.constant 0 : i32
    %c0_i32_1 = arith.constant 0 : i32
    return %c0_i32, %c0_i32_0 : i32, i32
  }
  func.func @transform_2(%arg0: i32) -> (i32, i32) {
    %c0_i32 = arith.constant 0 : i32
    %c0_i32_0 = arith.constant 0 : i32
    %c0_i32_1 = arith.constant 0 : i32
    return %c0_i32, %c0_i32_0 : i32, i32
  }
  func.func @transform_3(%arg0: i32) -> (i32, i32) {
    %c0_i32 = arith.constant 0 : i32
    %c0_i32_0 = arith.constant 0 : i32
    %c0_i32_1 = arith.constant 0 : i32
    return %c0_i32, %c0_i32_0 : i32, i32
  }
}

</mosaic_0001>

<bundles_post_ra>
// kernel: cnn_forward.3
= control target key start
LH: loop header
LB: loop body
LE: loop exit
PB: predicated region body
PF: predicated region fallthrough
CT: control target
= control target key end

     0   :  { %s3529_s0 = inlined_call_operand.vmem [shape: f32[8,10240], index: 0, kind: input, shape index: {}]   ;;  %s3530_s1 = inlined_call_operand.vmem [shape: f32[8,10240], index: 1, kind: input, shape index: {}]   ;;  %s3531_s2 = inlined_call_operand.vmem [shape: f32[1,8], index: 2, kind: input, shape index: {}]   ;;  %s3532_s3 = inlined_call_operand.hbm [shape: f32[8,8], index: 3, kind: output, shape index: {}]  }
   0x1   :  { %v96_v0 = vld [vmem:[%s3530_s1 + $0x8] sm:$0xff]  ;;  %v95_v1 = vld [vmem:[%s3530_s1] sm:$0xff]  ;;  %v98_v2 = vld [vmem:[%s3530_s1 + $0x18] sm:$0xff] }
   0x2   :  { %212 = vmatprep.subr.mxu0 %v96_v0  ;;  %282 = vmatprep.subr.mxu1 %v98_v2  ;;  %v97_v3 = vld [vmem:[%s3530_s1 + $0x10] sm:$0xff]  ;;  %v16_v4 = vld [vmem:[%s3529_s0 + $0x8] sm:$0xff]  ;;  %v15_v5 = vld [vmem:[%s3529_s0] sm:$0xff] }
   0x3   :  { %213 = vmatpush1.xpose.msra.mxu0 %v95_v1  ;;  %283 = vmatpush1.xpose.msra.mxu1 %v97_v3  ;;  %v18_v6 = vld [vmem:[%s3529_s0 + $0x18] sm:$0xff]  ;;  %v100_v7 = vld [vmem:[%s3530_s1 + $0x28] sm:$0xff]  ;;  %v17_v8 = vld [vmem:[%s3529_s0 + $0x10] sm:$0xff] }
   0x4   :  { %246 = vmatprep.mubr.f32.mxu0 %v16_v4  ;;  %316 = vmatprep.mubr.f32.mxu1 %v18_v6  ;;  %v99_v9 = vld [vmem:[%s3530_s1 + $0x20] sm:$0xff]  ;;  %v102_v10 = vld [vmem:[%s3530_s1 + $0x38] sm:$0xff]  ;;  %v101_v11 = vld [vmem:[%s3530_s1 + $0x30] sm:$0xff] }
   0x5   :  { %352 = vmatprep.subr.mxu0 %v100_v7  ;;  %422 = vmatprep.subr.mxu1 %v102_v10  ;;  %v20_v12 = vld [vmem:[%s3529_s0 + $0x28] sm:$0xff]  ;;  %v22_v13 = vld [vmem:[%s3529_s0 + $0x38] sm:$0xff]  ;;  %v19_v15 = vld [vmem:[%s3529_s0 + $0x20] sm:$0xff] }
   0x6   :  { %247 = vmatmul.mubr.f32.vlgmr.msra.gmra.mxu0 %v15_v5  ;;  %317 = vmatmul.mubr.f32.vlgmr.msra.gmra.mxu1 %v17_v8  ;;  %v104_v14 = vld [vmem:[%s3530_s1 + $0x48] sm:$0xff]  ;;  %v21_v16 = vld [vmem:[%s3529_s0 + $0x30] sm:$0xff]  ;;  %v106_v17 = vld [vmem:[%s3530_s1 + $0x58] sm:$0xff] }
   0x7   :  { %353 = vmatpush1.xpose.msra.mxu0 %v99_v9  ;;  %423 = vmatpush1.xpose.msra.mxu1 %v101_v11  ;;  %v103_v18 = vld [vmem:[%s3530_s1 + $0x40] sm:$0xff]  ;;  %v105_v19 = vld [vmem:[%s3530_s1 + $0x50] sm:$0xff]  ;;  %v24_v20 = vld [vmem:[%s3529_s0 + $0x48] sm:$0xff] }
   0x8   :  { %386 = vmatprep.mubr.f32.mxu0 %v20_v12  ;;  %456 = vmatprep.mubr.f32.mxu1 %v22_v13  ;;  %v26_v21 = vld [vmem:[%s3529_s0 + $0x58] sm:$0xff]  ;;  %v108_v22 = vld [vmem:[%s3530_s1 + $0x68] sm:$0xff]  ;;  %v23_v24 = vld [vmem:[%s3529_s0 + $0x40] sm:$0xff] }
   0x9   :  { %492 = vmatprep.subr.mxu0 %v104_v14  ;;  %562 = vmatprep.subr.mxu1 %v106_v17  ;;  %v110_v23 = vld [vmem:[%s3530_s1 + $0x78] sm:$0xff]  ;;  %v25_v25 = vld [vmem:[%s3529_s0 + $0x50] sm:$0xff]  ;;  %v107_v26 = vld [vmem:[%s3530_s1 + $0x60] sm:$0xff] }
   0xa   :  { %387 = vmatmul.mubr.f32.vlgmr.msra.gmra.mxu0 %v19_v15  ;;  %457 = vmatmul.mubr.f32.vlgmr.msra.gmra.mxu1 %v21_v16  ;;  %v109_v27 = vld [vmem:[%s3530_s1 + $0x70] sm:$0xff]  ;;  %v28_v28 = vld [vmem:[%s3529_s0 + $0x68] sm:$0xff]  ;;  %v30_v29 = vld [vmem:[%s3529_s0 + $0x78] sm:$0xff] }
   0xb   :  { %493 = vmatpush1.xpose.msra.mxu0 %v103_v18  ;;  %563 = vmatpush1.xpose.msra.mxu1 %v105_v19  ;;  %v112_v30 = vld [vmem:[%s3530_s1 + $0x88] sm:$0xff]  ;;  %v114_v31 = vld [vmem:[%s3530_s1 + $0x98] sm:$0xff]  ;;  %v27_v32 = vld [vmem:[%s3529_s0 + $0x60] sm:$0xff] }
   0xc   :  { %526 = vmatprep.mubr.f32.mxu0 %v24_v20  ;;  %596 = vmatprep.mubr.f32.mxu1 %v26_v21  ;;  %v29_v33 = vld [vmem:[%s3529_s0 + $0x70] sm:$0xff]  ;;  %v111_v34 = vld [vmem:[%s3530_s1 + $0x80] sm:$0xff]  ;;  %v32_v36 = vld [vmem:[%s3529_s0 + $0x88] sm:$0xff] }
   0xd   :  { %632 = vmatprep.subr.mxu0 %v108_v22  ;;  %702 = vmatprep.subr.mxu1 %v110_v23  ;;  %v113_v35 = vld [vmem:[%s3530_s1 + $0x90] sm:$0xff]  ;;  %v34_v37 = vld [vmem:[%s3529_s0 + $0x98] sm:$0xff]  ;;  %v116_v38 = vld [vmem:[%s3530_s1 + $0xa8] sm:$0xff] }
   0xe   :  { %527 = vmatmul.mubr.f32.vlgmr.msra.gmra.mxu0 %v23_v24  ;;  %597 = vmatmul.mubr.f32.vlgmr.msra.gmra.mxu1 %v25_v25  ;;  %v118_v39 = vld [vmem:[%s3530_s1 + $0xb8] sm:$0xff]  ;;  %v31_v40 = vld [vmem:[%s3529_s0 + $0x80] sm:$0xff]  ;;  %v33_v41 = vld [vmem:[%s3529_s0 + $0x90] sm:$0xff] }
   0xf   :  { %633 = vmatpush1.xpose.msra.mxu0 %v107_v26  ;;  %703 = vmatpush1.xpose.msra.mxu1 %v109_v27  ;;  %v115_v42 = vld [vmem:[%s3530_s1 + $0xa0] sm:$0xff]  ;;  %v117_v43 = vld [vmem:[%s3530_s1 + $0xb0] sm:$0xff]  ;;  %v36_v44 = vld [vmem:[%s3529_s0 + $0xa8] sm:$0xff] }
  0x10   :  { %666 = vmatprep.mubr.f32.mxu0 %v28_v28  ;;  %736 = vmatprep.mubr.f32.mxu1 %v30_v29  ;;  %v38_v45 = vld [vmem:[%s3529_s0 + $0xb8] sm:$0xff]  ;;  %v120_v46 = vld [vmem:[%s3530_s1 + $0xc8] sm:$0xff]  ;;  %v35_v48 = vld [vmem:[%s3529_s0 + $0xa0] sm:$0xff] }
  0x11   :  { %772 = vmatprep.subr.mxu0 %v112_v30  ;;  %842 = vmatprep.subr.mxu1 %v114_v31  ;;  %v122_v47 = vld [vmem:[%s3530_s1 + $0xd8] sm:$0xff]  ;;  %v37_v49 = vld [vmem:[%s3529_s0 + $0xb0] sm:$0xff]  ;;  %v119_v50 = vld [vmem:[%s3530_s1 + $0xc0] sm:$0xff] }
  0x12   :  { %667 = vmatmul.mubr.f32.vlgmr.msra.gmra.mxu0 %v27_v32  ;;  %737 = vmatmul.mubr.f32.vlgmr.msra.gmra.mxu1 %v29_v33  ;;  %v121_v51 = vld [vmem:[%s3530_s1 + $0xd0] sm:$0xff]  ;;  %v40_v52 = vld [vmem:[%s3529_s0 + $0xc8] sm:$0xff]  ;;  %v42_v53 = vld [vmem:[%s3529_s0 + $0xd8] sm:$0xff] }
  0x13   :  { %773 = vmatpush1.xpose.msra.mxu0 %v111_v34  ;;  %843 = vmatpush1.xpose.msra.mxu1 %v113_v35  ;;  %v124_v54 = vld [vmem:[%s3530_s1 + $0xe8] sm:$0xff]  ;;  %v126_v55 = vld [vmem:[%s3530_s1 + $0xf8] sm:$0xff]  ;;  %v39_v56 = vld [vmem:[%s3529_s0 + $0xc0] sm:$0xff] }
  0x14   :  { %806 = vmatprep.mubr.f32.mxu0 %v32_v36  ;;  %876 = vmatprep.mubr.f32.mxu1 %v34_v37  ;;  %v41_v57 = vld [vmem:[%s3529_s0 + $0xd0] sm:$0xff]  ;;  %v123_v58 = vld [vmem:[%s3530_s1 + $0xe0] sm:$0xff]  ;;  %v44_v60 = vld [vmem:[%s3529_s0 + $0xe8] sm:$0xff] }
  0x15   :  { %912 = vmatprep.subr.mxu0 %v116_v38  ;;  %982 = vmatprep.subr.mxu1 %v118_v39  ;;  %v125_v59 = vld [vmem:[%s3530_s1 + $0xf0] sm:$0xff]  ;;  %v46_v61 = vld [vmem:[%s3529_s0 + $0xf8] sm:$0xff]  ;;  %v128_v62 = vld [vmem:[%s3530_s1 + $0x108] sm:$0xff] }
  0x16   :  { %807 = vmatmul.mubr.f32.vlgmr.msra.gmra.mxu0 %v31_v40  ;;  %877 = vmatmul.mubr.f32.vlgmr.msra.gmra.mxu1 %v33_v41  ;;  %v130_v63 = vld [vmem:[%s3530_s1 + $0x118] sm:$0xff]  ;;  %v43_v0 = vld [vmem:[%s3529_s0 + $0xe0] sm:$0xff]  ;;  %v45_v1 = vld [vmem:[%s3529_s0 + $0xf0] sm:$0xff] }
  0x17   :  { %913 = vmatpush1.xpose.msra.mxu0 %v115_v42  ;;  %983 = vmatpush1.xpose.msra.mxu1 %v117_v43  ;;  %v127_v2 = vld [vmem:[%s3530_s1 + $0x100] sm:$0xff]  ;;  %v129_v3 = vld [vmem:[%s3530_s1 + $0x110] sm:$0xff]  ;;  %v48_v4 = vld [vmem:[%s3529_s0 + $0x108] sm:$0xff] }
  0x18   :  { %946 = vmatprep.mubr.f32.mxu0 %v36_v44  ;;  %1016 = vmatprep.mubr.f32.mxu1 %v38_v45  ;;  %v50_v5 = vld [vmem:[%s3529_s0 + $0x118] sm:$0xff]  ;;  %v132_v6 = vld [vmem:[%s3530_s1 + $0x128] sm:$0xff]  ;;  %v47_v8 = vld [vmem:[%s3529_s0 + $0x100] sm:$0xff] }
  0x19   :  { %1052 = vmatprep.subr.mxu0 %v120_v46  ;;  %1122 = vmatprep.subr.mxu1 %v122_v47  ;;  %v134_v7 = vld [vmem:[%s3530_s1 + $0x138] sm:$0xff]  ;;  %v49_v9 = vld [vmem:[%s3529_s0 + $0x110] sm:$0xff]  ;;  %v131_v10 = vld [vmem:[%s3530_s1 + $0x120] sm:$0xff] }
  0x1a   :  { %947 = vmatmul.mubr.f32.vlgmr.msra.gmra.mxu0 %v35_v48  ;;  %1017 = vmatmul.mubr.f32.vlgmr.msra.gmra.mxu1 %v37_v49  ;;  %v133_v11 = vld [vmem:[%s3530_s1 + $0x130] sm:$0xff]  ;;  %v52_v12 = vld [vmem:[%s3529_s0 + $0x128] sm:$0xff]  ;;  %v54_v13 = vld [vmem:[%s3529_s0 + $0x138] sm:$0xff] }
  0x1b   :  { %1053 = vmatpush1.xpose.msra.mxu0 %v119_v50  ;;  %1123 = vmatpush1.xpose.msra.mxu1 %v121_v51  ;;  %v136_v14 = vld [vmem:[%s3530_s1 + $0x148] sm:$0xff]  ;;  %v138_v15 = vld [vmem:[%s3530_s1 + $0x158] sm:$0xff]  ;;  %v51_v16 = vld [vmem:[%s3529_s0 + $0x120] sm:$0xff] }
  0x1c   :  { %1086 = vmatprep.mubr.f32.mxu0 %v40_v52  ;;  %1156 = vmatprep.mubr.f32.mxu1 %v42_v53  ;;  %v53_v17 = vld [vmem:[%s3529_s0 + $0x130] sm:$0xff]  ;;  %v135_v18 = vld [vmem:[%s3530_s1 + $0x140] sm:$0xff]  ;;  %v56_v20 = vld [vmem:[%s3529_s0 + $0x148] sm:$0xff] }
  0x1d   :  { %1192 = vmatprep.subr.mxu0 %v124_v54  ;;  %1262 = vmatprep.subr.mxu1 %v126_v55  ;;  %v137_v19 = vld [vmem:[%s3530_s1 + $0x150] sm:$0xff]  ;;  %v58_v21 = vld [vmem:[%s3529_s0 + $0x158] sm:$0xff]  ;;  %v140_v22 = vld [vmem:[%s3530_s1 + $0x168] sm:$0xff] }
  0x1e   :  { %1087 = vmatmul.mubr.f32.vlgmr.msra.gmra.mxu0 %v39_v56  ;;  %1157 = vmatmul.mubr.f32.vlgmr.msra.gmra.mxu1 %v41_v57  ;;  %v142_v23 = vld [vmem:[%s3530_s1 + $0x178] sm:$0xff]  ;;  %v55_v24 = vld [vmem:[%s3529_s0 + $0x140] sm:$0xff]  ;;  %v57_v25 = vld [vmem:[%s3529_s0 + $0x150] sm:$0xff] }
  0x1f   :  { %1193 = vmatpush1.xpose.msra.mxu0 %v123_v58  ;;  %1263 = vmatpush1.xpose.msra.mxu1 %v125_v59  ;;  %v139_v26 = vld [vmem:[%s3530_s1 + $0x160] sm:$0xff]  ;;  %v141_v27 = vld [vmem:[%s3530_s1 + $0x170] sm:$0xff]  ;;  %v60_v28 = vld [vmem:[%s3529_s0 + $0x168] sm:$0xff] }
  0x20   :  { %1226 = vmatprep.mubr.f32.mxu0 %v44_v60  ;;  %1296 = vmatprep.mubr.f32.mxu1 %v46_v61  ;;  %v62_v29 = vld [vmem:[%s3529_s0 + $0x178] sm:$0xff]  ;;  %v144_v30 = vld [vmem:[%s3530_s1 + $0x188] sm:$0xff]  ;;  %v59_v32 = vld [vmem:[%s3529_s0 + $0x160] sm:$0xff] }
  0x21   :  { %1332 = vmatprep.subr.mxu0 %v128_v62  ;;  %1402 = vmatprep.subr.mxu1 %v130_v63  ;;  %v146_v31 = vld [vmem:[%s3530_s1 + $0x198] sm:$0xff]  ;;  %v61_v33 = vld [vmem:[%s3529_s0 + $0x170] sm:$0xff]  ;;  %v143_v34 = vld [vmem:[%s3530_s1 + $0x180] sm:$0xff] }
  0x22   :  { %1227 = vmatmul.mubr.f32.vlgmr.msra.gmra.mxu0 %v43_v0  ;;  %1297 = vmatmul.mubr.f32.vlgmr.msra.gmra.mxu1 %v45_v1  ;;  %v145_v35 = vld [vmem:[%s3530_s1 + $0x190] sm:$0xff]  ;;  %v64_v36 = vld [vmem:[%s3529_s0 + $0x188] sm:$0xff]  ;;  %v66_v37 = vld [vmem:[%s3529_s0 + $0x198] sm:$0xff] }
  0x23   :  { %1333 = vmatpush1.xpose.msra.mxu0 %v127_v2  ;;  %1403 = vmatpush1.xpose.msra.mxu1 %v129_v3  ;;  %v148_v38 = vld [vmem:[%s3530_s1 + $0x1a8] sm:$0xff]  ;;  %v150_v39 = vld [vmem:[%s3530_s1 + $0x1b8] sm:$0xff]  ;;  %v63_v40 = vld [vmem:[%s3529_s0 + $0x180] sm:$0xff] }
  0x24   :  { %1366 = vmatprep.mubr.f32.mxu0 %v48_v4  ;;  %1436 = vmatprep.mubr.f32.mxu1 %v50_v5  ;;  %v65_v41 = vld [vmem:[%s3529_s0 + $0x190] sm:$0xff]  ;;  %v147_v42 = vld [vmem:[%s3530_s1 + $0x1a0] sm:$0xff]  ;;  %v68_v44 = vld [vmem:[%s3529_s0 + $0x1a8] sm:$0xff] }
  0x25   :  { %1472 = vmatprep.subr.mxu0 %v132_v6  ;;  %1542 = vmatprep.subr.mxu1 %v134_v7  ;;  %v149_v43 = vld [vmem:[%s3530_s1 + $0x1b0] sm:$0xff]  ;;  %v70_v45 = vld [vmem:[%s3529_s0 + $0x1b8] sm:$0xff]  ;;  %v152_v46 = vld [vmem:[%s3530_s1 + $0x1c8] sm:$0xff] }
  0x26   :  { %1367 = vmatmul.mubr.f32.vlgmr.msra.gmra.mxu0 %v47_v8  ;;  %1437 = vmatmul.mubr.f32.vlgmr.msra.gmra.mxu1 %v49_v9  ;;  %v154_v47 = vld [vmem:[%s3530_s1 + $0x1d8] sm:$0xff] }
  0x27   :  { %1473 = vmatpush1.xpose.msra.mxu0 %v131_v10  ;;  %1543 = vmatpush1.xpose.msra.mxu1 %v133_v11 }
  0x28   :  { %1506 = vmatprep.mubr.f32.mxu0 %v52_v12  ;;  %1576 = vmatprep.mubr.f32.mxu1 %v54_v13 }
  0x29   :  { %1612 = vmatprep.subr.mxu0 %v136_v14  ;;  %1682 = vmatprep.subr.mxu1 %v138_v15 }
  0x2a   :  { %1507 = vmatmul.mubr.f32.vlgmr.msra.gmra.mxu0 %v51_v16  ;;  %1577 = vmatmul.mubr.f32.vlgmr.msra.gmra.mxu1 %v53_v17 }
  0x2b   :  { %1613 = vmatpush1.xpose.msra.mxu0 %v135_v18  ;;  %1683 = vmatpush1.xpose.msra.mxu1 %v137_v19 }
  0x2c   :  { %1646 = vmatprep.mubr.f32.mxu0 %v56_v20  ;;  %1716 = vmatprep.mubr.f32.mxu1 %v58_v21 }
  0x2d   :  { %1752 = vmatprep.subr.mxu0 %v140_v22  ;;  %1822 = vmatprep.subr.mxu1 %v142_v23 }
  0x2e   :  { %1647 = vmatmul.mubr.f32.vlgmr.msra.gmra.mxu0 %v55_v24  ;;  %1717 = vmatmul.mubr.f32.vlgmr.msra.gmra.mxu1 %v57_v25 }
  0x2f   :  { %1753 = vmatpush1.xpose.msra.mxu0 %v139_v26  ;;  %1823 = vmatpush1.xpose.msra.mxu1 %v141_v27 }
  0x30   :  { %1786 = vmatprep.mubr.f32.mxu0 %v60_v28  ;;  %1856 = vmatprep.mubr.f32.mxu1 %v62_v29 }
  0x31   :  { %1892 = vmatprep.subr.mxu0 %v144_v30  ;;  %1962 = vmatprep.subr.mxu1 %v146_v31 }
  0x32   :  { %1787 = vmatmul.mubr.f32.vlgmr.msra.gmra.mxu0 %v59_v32  ;;  %1857 = vmatmul.mubr.f32.vlgmr.msra.gmra.mxu1 %v61_v33 }
  0x33   :  { %1893 = vmatpush1.xpose.msra.mxu0 %v143_v34  ;;  %1963 = vmatpush1.xpose.msra.mxu1 %v145_v35 }
  0x34   :  { %1926 = vmatprep.mubr.f32.mxu0 %v64_v36  ;;  %1996 = vmatprep.mubr.f32.mxu1 %v66_v37 }
  0x35   :  { %2032 = vmatprep.subr.mxu0 %v148_v38  ;;  %2102 = vmatprep.subr.mxu1 %v150_v39 }
  0x36   :  { %1927 = vmatmul.mubr.f32.vlgmr.msra.gmra.mxu0 %v63_v40  ;;  %1997 = vmatmul.mubr.f32.vlgmr.msra.gmra.mxu1 %v65_v41 }
  0x37   :  { %8 = vsyncpa [#allocation3], 0  ;;  %2033 = vmatpush1.xpose.msra.mxu0 %v147_v42  ;;  %2103 = vmatpush1.xpose.msra.mxu1 %v149_v43  ;;  %v67_v48 = vld [vmem:[%s3529_s0 + $0x1a0] sm:$0xff]  ;;  %v69_v49 = vld [vmem:[%s3529_s0 + $0x1b0] sm:$0xff]  ;;  %vm2982_vm0 = vcmask 64512  }
  0x38   :  { %2066 = vmatprep.mubr.f32.mxu0 %v68_v44  ;;  %2136 = vmatprep.mubr.f32.mxu1 %v70_v45  ;;  %v151_v50 = vld [vmem:[%s3530_s1 + $0x1c0] sm:$0xff]  ;;  %v153_v51 = vld [vmem:[%s3530_s1 + $0x1d0] sm:$0xff]  ;;  %v72_v52 = vld [vmem:[%s3529_s0 + $0x1c8] sm:$0xff] }
  0x39   :  { %2172 = vmatprep.subr.mxu0 %v152_v46  ;;  %2242 = vmatprep.subr.mxu1 %v154_v47  ;;  %v74_v53 = vld [vmem:[%s3529_s0 + $0x1d8] sm:$0xff]  ;;  %v156_v54 = vld [vmem:[%s3530_s1 + $0x1e8] sm:$0xff]  ;;  %v71_v56 = vld [vmem:[%s3529_s0 + $0x1c0] sm:$0xff] }
  0x3a   :  { %2067 = vmatmul.mubr.f32.vlgmr.msra.gmra.mxu0 %v67_v48  ;;  %2137 = vmatmul.mubr.f32.vlgmr.msra.gmra.mxu1 %v69_v49  ;;  %v158_v55 = vld [vmem:[%s3530_s1 + $0x1f8] sm:$0xff]  ;;  %v73_v57 = vld [vmem:[%s3529_s0 + $0x1d0] sm:$0xff]  ;;  %v155_v58 = vld [vmem:[%s3530_s1 + $0x1e0] sm:$0xff] }
  0x3b   :  { %2173 = vmatpush1.xpose.msra.mxu0 %v151_v50  ;;  %2243 = vmatpush1.xpose.msra.mxu1 %v153_v51  ;;  %v157_v59 = vld [vmem:[%s3530_s1 + $0x1f0] sm:$0xff]  ;;  %v76_v60 = vld [vmem:[%s3529_s0 + $0x1e8] sm:$0xff]  ;;  %v78_v61 = vld [vmem:[%s3529_s0 + $0x1f8] sm:$0xff] }
  0x3c   :  { %2206 = vmatprep.mubr.f32.mxu0 %v72_v52  ;;  %2276 = vmatprep.mubr.f32.mxu1 %v74_v53  ;;  %v160_v62 = vld [vmem:[%s3530_s1 + $0x208] sm:$0xff]  ;;  %v162_v63 = vld [vmem:[%s3530_s1 + $0x218] sm:$0xff]  ;;  %v75_v0 = vld [vmem:[%s3529_s0 + $0x1e0] sm:$0xff] }
  0x3d   :  { %2312 = vmatprep.subr.mxu0 %v156_v54  ;;  %2382 = vmatprep.subr.mxu1 %v158_v55  ;;  %v77_v1 = vld [vmem:[%s3529_s0 + $0x1f0] sm:$0xff]  ;;  %v159_v2 = vld [vmem:[%s3530_s1 + $0x200] sm:$0xff]  ;;  %v80_v4 = vld [vmem:[%s3529_s0 + $0x208] sm:$0xff] }
  0x3e   :  { %2207 = vmatmul.mubr.f32.vlgmr.msra.gmra.mxu0 %v71_v56  ;;  %2277 = vmatmul.mubr.f32.vlgmr.msra.gmra.mxu1 %v73_v57  ;;  %v161_v3 = vld [vmem:[%s3530_s1 + $0x210] sm:$0xff]  ;;  %v82_v5 = vld [vmem:[%s3529_s0 + $0x218] sm:$0xff]  ;;  %v164_v6 = vld [vmem:[%s3530_s1 + $0x228] sm:$0xff] }
  0x3f   :  { %2313 = vmatpush1.xpose.msra.mxu0 %v155_v58  ;;  %2383 = vmatpush1.xpose.msra.mxu1 %v157_v59  ;;  %v166_v7 = vld [vmem:[%s3530_s1 + $0x238] sm:$0xff]  ;;  %v79_v8 = vld [vmem:[%s3529_s0 + $0x200] sm:$0xff]  ;;  %v81_v9 = vld [vmem:[%s3529_s0 + $0x210] sm:$0xff] }
  0x40   :  { %2346 = vmatprep.mubr.f32.mxu0 %v76_v60  ;;  %2416 = vmatprep.mubr.f32.mxu1 %v78_v61  ;;  %v163_v10 = vld [vmem:[%s3530_s1 + $0x220] sm:$0xff]  ;;  %v165_v11 = vld [vmem:[%s3530_s1 + $0x230] sm:$0xff]  ;;  %v84_v12 = vld [vmem:[%s3529_s0 + $0x228] sm:$0xff] }
  0x41   :  { %2452 = vmatprep.subr.mxu0 %v160_v62  ;;  %2522 = vmatprep.subr.mxu1 %v162_v63  ;;  %v86_v13 = vld [vmem:[%s3529_s0 + $0x238] sm:$0xff]  ;;  %v168_v14 = vld [vmem:[%s3530_s1 + $0x248] sm:$0xff]  ;;  %v83_v16 = vld [vmem:[%s3529_s0 + $0x220] sm:$0xff] }
  0x42   :  { %2347 = vmatmul.mubr.f32.vlgmr.msra.gmra.mxu0 %v75_v0  ;;  %2417 = vmatmul.mubr.f32.vlgmr.msra.gmra.mxu1 %v77_v1  ;;  %v170_v15 = vld [vmem:[%s3530_s1 + $0x258] sm:$0xff]  ;;  %v85_v17 = vld [vmem:[%s3529_s0 + $0x230] sm:$0xff]  ;;  %v167_v18 = vld [vmem:[%s3530_s1 + $0x240] sm:$0xff] }
  0x43   :  { %2453 = vmatpush1.xpose.msra.mxu0 %v159_v2  ;;  %2523 = vmatpush1.xpose.msra.mxu1 %v161_v3  ;;  %v169_v19 = vld [vmem:[%s3530_s1 + $0x250] sm:$0xff]  ;;  %v88_v20 = vld [vmem:[%s3529_s0 + $0x248] sm:$0xff]  ;;  %v90_v21 = vld [vmem:[%s3529_s0 + $0x258] sm:$0xff] }
  0x44   :  { %2486 = vmatprep.mubr.f32.mxu0 %v80_v4  ;;  %2556 = vmatprep.mubr.f32.mxu1 %v82_v5  ;;  %v172_v22 = vld [vmem:[%s3530_s1 + $0x268] sm:$0xff]  ;;  %v174_v23 = vld [vmem:[%s3530_s1 + $0x278] sm:$0xff]  ;;  %v87_v24 = vld [vmem:[%s3529_s0 + $0x240] sm:$0xff] }
  0x45   :  { %2592 = vmatprep.subr.mxu0 %v164_v6  ;;  %2662 = vmatprep.subr.mxu1 %v166_v7  ;;  %v89_v25 = vld [vmem:[%s3529_s0 + $0x250] sm:$0xff]  ;;  %v171_v26 = vld [vmem:[%s3530_s1 + $0x260] sm:$0xff]  ;;  %v92_v28 = vld [vmem:[%s3529_s0 + $0x268] sm:$0xff] }
  0x46   :  { %2487 = vmatmul.mubr.f32.vlgmr.msra.gmra.mxu0 %v79_v8  ;;  %2557 = vmatmul.mubr.f32.vlgmr.msra.gmra.mxu1 %v81_v9  ;;  %v173_v27 = vld [vmem:[%s3530_s1 + $0x270] sm:$0xff]  ;;  %v94_v29 = vld [vmem:[%s3529_s0 + $0x278] sm:$0xff]  ;;  %v91_v30 = vld [vmem:[%s3529_s0 + $0x260] sm:$0xff] }
  0x47   :  { %2593 = vmatpush1.xpose.msra.mxu0 %v163_v10  ;;  %2663 = vmatpush1.xpose.msra.mxu1 %v165_v11  ;;  %v93_v31 = vld [vmem:[%s3529_s0 + $0x270] sm:$0xff]  ;;  %v2998_v32 = vld [vmem:[%s3531_s2] ss:$0 sm:$0xff]  ;;  %s3022_s0 = smov [#allocation2]  }
  0x48   :  { %2626 = vmatprep.mubr.f32.mxu0 %v84_v12  ;;  %2696 = vmatprep.mubr.f32.mxu1 %v86_v13  ;;  %s2990_s2 = sshll.u32 %s3022_s0, 4  ;;  %s2991_s2 = int_to_ptr.vmem [resolvable:$true] %s2990_s2 }
  0x49   :  { %2732 = vmatprep.subr.mxu0 %v168_v14  ;;  %2802 = vmatprep.subr.mxu1 %v170_v15  ;;  %s3000_s9 = scalar_lea.vmem %s2991_s2, 128  ;;  %p3005_p1 = scmp.lt.s32.totalorder %s2991_s2, %s2991_s2 }
  0x4a   :  { %2627 = vmatmul.mubr.f32.vlgmr.msra.gmra.mxu0 %v83_v16  ;;  %2697 = vmatmul.mubr.f32.vlgmr.msra.gmra.mxu1 %v85_v17  ;;  %p3001_p0 = scmp.ne.s32.totalorder %s2991_s2, %s3000_s9  ;;  %p3006_p2 = scmp.lt.s32.totalorder %s3000_s9, %s3000_s9 }
  0x4b   :  { %2733 = vmatpush1.xpose.msra.mxu0 %v167_v18  ;;  %2803 = vmatpush1.xpose.msra.mxu1 %v169_v19 }
  0x4c   :  { %2766 = vmatprep.mubr.f32.mxu0 %v88_v20  ;;  %2836 = vmatprep.mubr.f32.mxu1 %v90_v21  ;;  %p3007_p3 = por %p3006_p2, %p3005_p1 }
  0x4d   :  { %2872 = vmatprep.subr.mxu0 %v172_v22  ;;  %2942 = vmatprep.subr.mxu1 %v174_v23 }
  0x4e   :  { %2767 = vmatmul.mubr.f32.vlgmr.msra.gmra.mxu0 %v87_v24  ;;  %2837 = vmatmul.mubr.f32.vlgmr.msra.gmra.mxu1 %v89_v25  ;;  %p3008_p4 = pnand %p3007_p3, %p3001_p0 }
  0x4f   :  { %2873 = vmatpush1.xpose.msra.mxu0 %v171_v26  ;;  %2943 = vmatpush1.xpose.msra.mxu1 %v173_v27 }
  0x50   :  { %2906 = vmatprep.mubr.f32.mxu0 %v92_v28  ;;  %2976 = vmatprep.mubr.f32.mxu1 %v94_v29 }
  0x52   :  { %2907 = vmatmul.mubr.f32.vlgmr.msra.gmra.mxu0 %v91_v30  ;;  %2977 = vmatmul.mubr.f32.vlgmr.msra.gmra.mxu1 %v93_v31 }
  0xc6   :  { %v248_v33 = vpop.f32.mrf.mxu0  ;;  %v318_v34 = vpop.f32.mrf.mxu1 }
  0xc7   :  { %v249_v35 = vadd.f32 %v2998_v32, %v248_v33 }
  0xc8   :  { %v250_v36 = vpop.f32.mrf.mxu0  ;;  %v320_v37 = vpop.f32.mrf.mxu1 }
  0xc9   :  { %v319_v38 = vadd.f32 %v318_v34, %v249_v35 }
  0xca   :  { %v388_v39 = vpop.f32.mrf.mxu0  ;;  %v458_v40 = vpop.f32.mrf.mxu1 }
  0xcb   :  { %v389_v41 = vadd.f32 %v388_v39, %v319_v38 }
  0xcc   :  { %v390_v42 = vpop.f32.mrf.mxu0  ;;  %v460_v43 = vpop.f32.mrf.mxu1 }
  0xcd   :  { %v459_v44 = vadd.f32 %v458_v40, %v389_v41 }
  0xce   :  { %v528_v45 = vpop.f32.mrf.mxu0  ;;  %v598_v46 = vpop.f32.mrf.mxu1 }
  0xcf   :  { %v529_v47 = vadd.f32 %v528_v45, %v459_v44 }
  0xd0   :  { %v530_v48 = vpop.f32.mrf.mxu0  ;;  %v600_v49 = vpop.f32.mrf.mxu1 }
  0xd1   :  { %v599_v50 = vadd.f32 %v598_v46, %v529_v47 }
  0xd2   :  { %v668_v51 = vpop.f32.mrf.mxu0  ;;  %v738_v52 = vpop.f32.mrf.mxu1 }
  0xd3   :  { %v669_v53 = vadd.f32 %v668_v51, %v599_v50 }
  0xd4   :  { %v670_v54 = vpop.f32.mrf.mxu0  ;;  %v740_v55 = vpop.f32.mrf.mxu1 }
  0xd5   :  { %v739_v56 = vadd.f32 %v738_v52, %v669_v53 }
  0xd6   :  { %v808_v57 = vpop.f32.mrf.mxu0  ;;  %v878_v58 = vpop.f32.mrf.mxu1 }
  0xd7   :  { %v809_v59 = vadd.f32 %v808_v57, %v739_v56 }
  0xd8   :  { %v810_v60 = vpop.f32.mrf.mxu0  ;;  %v880_v61 = vpop.f32.mrf.mxu1 }
  0xd9   :  { %v879_v62 = vadd.f32 %v878_v58, %v809_v59 }
  0xda   :  { %v948_v63 = vpop.f32.mrf.mxu0  ;;  %v1018_v0 = vpop.f32.mrf.mxu1 }
  0xdb   :  { %v949_v1 = vadd.f32 %v948_v63, %v879_v62 }
  0xdc   :  { %v950_v2 = vpop.f32.mrf.mxu0  ;;  %v1020_v3 = vpop.f32.mrf.mxu1 }
  0xdd   :  { %v1019_v4 = vadd.f32 %v1018_v0, %v949_v1 }
  0xde   :  { %v1088_v5 = vpop.f32.mrf.mxu0  ;;  %v1158_v6 = vpop.f32.mrf.mxu1 }
  0xdf   :  { %v1089_v7 = vadd.f32 %v1088_v5, %v1019_v4 }
  0xe0   :  { %v1090_v8 = vpop.f32.mrf.mxu0  ;;  %v1160_v9 = vpop.f32.mrf.mxu1 }
  0xe1   :  { %v1159_v10 = vadd.f32 %v1158_v6, %v1089_v7 }
  0xe2   :  { %v1228_v11 = vpop.f32.mrf.mxu0  ;;  %v1298_v12 = vpop.f32.mrf.mxu1 }
  0xe3   :  { %v1229_v13 = vadd.f32 %v1228_v11, %v1159_v10 }
  0xe4   :  { %v1230_v14 = vpop.f32.mrf.mxu0  ;;  %v1300_v15 = vpop.f32.mrf.mxu1 }
  0xe5   :  { %v1299_v16 = vadd.f32 %v1298_v12, %v1229_v13 }
  0xe6   :  { %v1368_v17 = vpop.f32.mrf.mxu0  ;;  %v1438_v18 = vpop.f32.mrf.mxu1 }
  0xe7   :  { %v1369_v19 = vadd.f32 %v1368_v17, %v1299_v16 }
  0xe8   :  { %v1370_v20 = vpop.f32.mrf.mxu0  ;;  %v1440_v21 = vpop.f32.mrf.mxu1 }
  0xe9   :  { %v1439_v22 = vadd.f32 %v1438_v18, %v1369_v19 }
  0xea   :  { %v1508_v23 = vpop.f32.mrf.mxu0  ;;  %v1578_v24 = vpop.f32.mrf.mxu1 }
  0xeb   :  { %v1509_v25 = vadd.f32 %v1508_v23, %v1439_v22 }
  0xec   :  { %v1510_v26 = vpop.f32.mrf.mxu0  ;;  %v1580_v27 = vpop.f32.mrf.mxu1 }
  0xed   :  { %v1579_v28 = vadd.f32 %v1578_v24, %v1509_v25 }
  0xee   :  { %v1648_v29 = vpop.f32.mrf.mxu0  ;;  %v1718_v30 = vpop.f32.mrf.mxu1 }
  0xef   :  { %v1649_v31 = vadd.f32 %v1648_v29, %v1579_v28 }
  0xf0   :  { %v1650_v32 = vpop.f32.mrf.mxu0  ;;  %v1720_v33 = vpop.f32.mrf.mxu1 }
  0xf1   :  { %v1719_v34 = vadd.f32 %v1718_v30, %v1649_v31 }
  0xf2   :  { %v1788_v35 = vpop.f32.mrf.mxu0  ;;  %v1858_v36 = vpop.f32.mrf.mxu1 }
  0xf3   :  { %v1789_v37 = vadd.f32 %v1788_v35, %v1719_v34 }
  0xf4   :  { %v1790_v38 = vpop.f32.mrf.mxu0  ;;  %v1860_v39 = vpop.f32.mrf.mxu1 }
  0xf5   :  { %v1859_v40 = vadd.f32 %v1858_v36, %v1789_v37 }
  0xf6   :  { %v1928_v41 = vpop.f32.mrf.mxu0  ;;  %v1998_v42 = vpop.f32.mrf.mxu1 }
  0xf7   :  { %v1929_v43 = vadd.f32 %v1928_v41, %v1859_v40 }
  0xf8   :  { %v1930_v44 = vpop.f32.mrf.mxu0  ;;  %v2000_v45 = vpop.f32.mrf.mxu1 }
  0xf9   :  { %v1999_v46 = vadd.f32 %v1998_v42, %v1929_v43 }
  0xfa   :  { %v2068_v47 = vpop.f32.mrf.mxu0  ;;  %v2138_v48 = vpop.f32.mrf.mxu1 }
  0xfb   :  { %v2069_v49 = vadd.f32 %v2068_v47, %v1999_v46 }
  0xfc   :  { %v2070_v50 = vpop.f32.mrf.mxu0  ;;  %v2140_v51 = vpop.f32.mrf.mxu1 }
  0xfd   :  { %v2139_v52 = vadd.f32 %v2138_v48, %v2069_v49 }
  0xfe   :  { %v2208_v53 = vpop.f32.mrf.mxu0  ;;  %v2278_v54 = vpop.f32.mrf.mxu1 }
  0xff   :  { %v2209_v55 = vadd.f32 %v2208_v53, %v2139_v52 }
 0x100   :  { %v2210_v56 = vpop.f32.mrf.mxu0  ;;  %v2280_v57 = vpop.f32.mrf.mxu1 }
 0x101   :  { %v2279_v58 = vadd.f32 %v2278_v54, %v2209_v55 }
 0x102   :  { %v2348_v59 = vpop.f32.mrf.mxu0  ;;  %v2418_v60 = vpop.f32.mrf.mxu1 }
 0x103   :  { %v2349_v61 = vadd.f32 %v2348_v59, %v2279_v58 }
 0x104   :  { %v2350_v62 = vpop.f32.mrf.mxu0  ;;  %v2420_v63 = vpop.f32.mrf.mxu1 }
 0x105   :  { %v2419_v0 = vadd.f32 %v2418_v60, %v2349_v61 }
 0x106   :  { %v2488_v1 = vpop.f32.mrf.mxu0  ;;  %v2558_v2 = vpop.f32.mrf.mxu1 }
 0x107   :  { %v2489_v3 = vadd.f32 %v2488_v1, %v2419_v0 }
 0x108   :  { %v2490_v4 = vpop.f32.mrf.mxu0  ;;  %v2560_v5 = vpop.f32.mrf.mxu1 }
 0x109   :  { %v2559_v6 = vadd.f32 %v2558_v2, %v2489_v3 }
 0x10a   :  { %v2628_v7 = vpop.f32.mrf.mxu0  ;;  %v2698_v8 = vpop.f32.mrf.mxu1 }
 0x10b   :  { %v2629_v9 = vadd.f32 %v2628_v7, %v2559_v6 }
 0x10c   :  { %v2630_v10 = vpop.f32.mrf.mxu0  ;;  %v2700_v11 = vpop.f32.mrf.mxu1 }
 0x10d   :  { %v2699_v12 = vadd.f32 %v2698_v8, %v2629_v9 }
 0x10e   :  { %v2768_v13 = vpop.f32.mrf.mxu0  ;;  %v2838_v14 = vpop.f32.mrf.mxu1 }
 0x10f   :  { %v2769_v15 = vadd.f32 %v2768_v13, %v2699_v12 }
 0x110   :  { %v2770_v16 = vpop.f32.mrf.mxu0  ;;  %v2840_v17 = vpop.f32.mrf.mxu1 }
 0x111   :  { %v2839_v18 = vadd.f32 %v2838_v14, %v2769_v15 }
 0x112   :  { %v2908_v19 = vpop.f32.mrf.mxu0  ;;  %v2978_v20 = vpop.f32.mrf.mxu1 }
 0x113   :  { %v2909_v21 = vadd.f32 %v2908_v19, %v2839_v18 }
 0x114   :  { %v2910_v22 = vpop.f32.mrf.mxu0  ;;  %v2980_v23 = vpop.f32.mrf.mxu1 }
 0x115   :  { %v2979_v24 = vadd.f32 %v2978_v20, %v2909_v21 }
 0x117   :  { %2983 = vst.msk [vmem:[#allocation2] sm:$0xff] %vm2982_vm0, %v2979_v24 }
 0x118   :  { %3011 = shalt.err (!%p3008_p4)
}
 0x119   :  { %2993 = dma.vmem_to_hbm [thread:$0]  %s2991_s2, 128, %s3532_s3, [#allocation3]  }
 0x11a   :  { %3020 = dma.done.wait [#allocation3], 128  }
 0x11b   :  { %3021 = vsyncadd [#allocation3], 4294967168 }
 0x11c   :  { %2997 = vsyncpa [#allocation3], 1 }

// kernel: cnn_forward.2
= control target key start
LH: loop header
LB: loop body
LE: loop exit
PB: predicated region body
PF: predicated region fallthrough
CT: control target
= control target key end

     0   :  { %s10377_s24 = smov 0   ;;  %s16534_s0 = inlined_call_operand.vmem [shape: f32[2,306,4], index: 0, kind: input, shape index: {}]   ;;  %s16535_s1 = inlined_call_operand.vmem [shape: f32[4,32], index: 1, kind: input, shape index: {}]   ;;  %s16536_s2 = inlined_call_operand.vmem [shape: f32[1,32], index: 2, kind: input, shape index: {}]   ;;  %s16537_s3 = inlined_call_operand.vmem [shape: f32[128,64], index: 3, kind: input, shape index: {}]   ;;  %s16538_s4 = inlined_call_operand.vmem [shape: f32[1,64], index: 4, kind: input, shape index: {}]   ;;  %s16539_s5 = inlined_call_operand.vmem [shape: f32[256,128], index: 5, kind: input, shape index: {}]   ;;  %s16540_s6 = inlined_call_operand.vmem [shape: f32[1,128], index: 6, kind: input, shape index: {}]   ;;  %s16541_s7 = inlined_call_operand.vmem [shape: f32[8,80,128], index: 7, kind: output, shape index: {}]  }
   0x1 LB: > { %s10383_s25 = sadd.s32 4294967295, %s10327_s24   ;;  %p8708_p0 = scmp.ge.s32.totalorder %s10327_s24, 1  ;;  %s10327_s24 = sphi %s10377_s24, %s17_s24  }
   0x2   : > { %p237_p1 = scmp.lt.s32.totalorder %s10327_s24, 3 }
   0x4   : > { %p238_p2 = pnand %p8708_p0, %p237_p1 }
   0x6   : > { %241 = sbr.rel (%p238_p2) target bundleno = 1806 (0x70e), region = 48 }
   0xb   : > { %p270_p3 = scmp.lt.s32.totalorder %s10383_s25, 1  ;;  %v10329_v0 = vmov 0   ;;  %vm282_vm0 = vcmask 256000   ;;  %v16542_v35 = vmov 0.0   ;;  %v10331_v41 = vmov 1   ;;  %s10332_s12 = smov 32  }
   0xc   : > { %9406 = vset.pattern.permute.xlu1 %v10329_v0  ;;  %9405 = vset.pattern.permute.xlu0 %v10329_v0  ;;  %283 = vst.msk [vmem:[#allocation3] sm:$0x7] %vm282_vm0, %v16542_v35  ;;  %284 = vst.msk [vmem:[#allocation3 + $0x9a] sm:$0x7] %vm282_vm0, %v16542_v35  ;;  %v569_v42 = vlaneseq  ;;  %v288_v46 = vld [vmem:[%s16535_s1] sm:$0xf] }
   0xd   : > { %s271_s26 = scalar_select %p270_p3, %s10383_s25, 1  ;;  %vm691_vm1 = vcmask 1046528   ;;  %vm930_vm2 = vcmask 1045504   ;;  %vm1166_vm3 = vcmask 1044480   ;;  %vm1402_vm4 = vcmask 261120  }
   0xe   : > { %v570_v43 = vshrl.u32 %v569_v42, 7  ;;  %vm1440_vm5 = vcmask 260096   ;;  %s10333_s16 = smov 64   ;;  %s10334_s9 = smov 96   ;;  %vm1895_vm6 = vcmask 523264   ;;  %vm1916_vm7 = vcmask 785408  }
   0xf   : > { %s9387_s27 = smul.u32 312, %s271_s26  ;;  %vm2147_vm8 = vcmask 517120   ;;  %vm285_vm9 = vcmask 518144   ;;  %vm2207_vm10 = vcmask 520192   ;;  %s8710_s15 = sshll.u32 %s10383_s25, 2 }
  0x10   : > { %v613_v44 = vsub.s32 1, %v570_v43  ;;  %v850_v45 = vsub.s32 2, %v570_v43  ;;  %v1086_v47 = vsub.s32 3, %v570_v43  ;;  %v571_v48 = vsub.s32 0, %v570_v43  ;;  %p15933_p4 = scmp.lt.s32.totalorder %s8710_s15, 7 }
  0x11   : > { %s10392_s30 = scalar_lea.vmem %s16534_s0, %s9387_s27 }
  0x12   : > { %v10395_v1 = vld [vmem:[%s10392_s30 + $0x10] sm:$0xff]  ;;  %v10398_v2 = vld [vmem:[%s10392_s30] sm:$0xff]  ;;  %v10403_v3 = vld [vmem:[%s10392_s30 + $0x18] sm:$0xff]  ;;  %v10494_v49 = vrot.slane %v288_v46, %v613_v44  ;;  %v10496_v50 = vrot.slane %v288_v46, %v850_v45  ;;  %v10498_v51 = vrot.slane %v288_v46, %v1086_v47  ;;  %v10500_v52 = vrot.slane %v288_v46, %v571_v48  ;;  %s16951_s15 = smov (!%p15933_p4, %s8710_s15), 7 }
  0x13   : > { %391 = vperm.xlu1 %9406, %v10395_v1   ;;  %381 = vperm.xlu0 %9405, %v10398_v2   ;;  %v10406_v4 = vld [vmem:[%s10392_s30 + $0x8] sm:$0xff]  ;;  %v10414_v6 = vld [vmem:[%s10392_s30 + $0x20] sm:$0xff]  ;;  %v10419_v7 = vld [vmem:[%s10392_s30 + $0x38] sm:$0xff]  ;;  %s9388_s25 = smul.u32 80, %s16951_s15 }
  0x14   : > { %v10411_v5 = vld [vmem:[%s10392_s30 + $0x28] sm:$0xff]  ;;  %v10422_v8 = vld [vmem:[%s10392_s30 + $0x30] sm:$0xff]  ;;  %v10430_v10 = vld [vmem:[%s10392_s30 + $0x40] sm:$0xff] }
  0x15   : > { %v10427_v9 = vld [vmem:[%s10392_s30 + $0x48] sm:$0xff]  ;;  %v10435_v11 = vld [vmem:[%s10392_s30 + $0x58] sm:$0xff]  ;;  %v10438_v12 = vld [vmem:[%s10392_s30 + $0x50] sm:$0xff]  ;;  %s15983_s22 = scalar_lea.vmem %s16541_s7, %s9388_s25 }
  0x16   : > { %v10443_v13 = vld [vmem:[%s10392_s30 + $0x68] sm:$0xff]  ;;  %v10446_v14 = vld [vmem:[%s10392_s30 + $0x60] sm:$0xff]  ;;  %v355_v15 = vld [vmem:[%s10392_s30 + $0x78] sm:$0xff] }
  0x17   : > { %396 = vperm.xlu1 %9406, %v10403_v3   ;;  %386 = vperm.xlu0 %9405, %v10406_v4   ;;  %v354_v16 = vld [vmem:[%s10392_s30 + $0x70] sm:$0xff]  ;;  %v357_v17 = vld [vmem:[%s10392_s30 + $0x88] sm:$0xff]  ;;  %v356_v18 = vld [vmem:[%s10392_s30 + $0x80] sm:$0xff] }
  0x18   : > { %v359_v19 = vld [vmem:[%s10392_s30 + $0x98] sm:$0xff]  ;;  %v358_v20 = vld [vmem:[%s10392_s30 + $0x90] sm:$0xff]  ;;  %v361_v21 = vld [vmem:[%s10392_s30 + $0xa8] sm:$0xff] }
  0x19   : > { %v360_v22 = vld [vmem:[%s10392_s30 + $0xa0] sm:$0xff]  ;;  %v363_v23 = vld [vmem:[%s10392_s30 + $0xb8] sm:$0xff]  ;;  %v362_v24 = vld [vmem:[%s10392_s30 + $0xb0] sm:$0xff] }
  0x1a   : > { %v365_v25 = vld [vmem:[%s10392_s30 + $0xc8] sm:$0xff]  ;;  %v364_v26 = vld [vmem:[%s10392_s30 + $0xc0] sm:$0xff]  ;;  %v367_v27 = vld [vmem:[%s10392_s30 + $0xd8] sm:$0xff] }
  0x1b   : > { %406 = vperm.xlu1 %9406, %v10411_v5   ;;  %401 = vperm.xlu0 %9405, %v10414_v6   ;;  %v366_v28 = vld [vmem:[%s10392_s30 + $0xd0] sm:$0xff]  ;;  %v369_v29 = vld [vmem:[%s10392_s30 + $0xe8] sm:$0xff]  ;;  %v368_v30 = vld [vmem:[%s10392_s30 + $0xe0] sm:$0xff] }
  0x1c   : > { %v371_v31 = vld [vmem:[%s10392_s30 + $0xf8] sm:$0xff]  ;;  %v370_v32 = vld [vmem:[%s10392_s30 + $0xf0] sm:$0xff]  ;;  %v373_v33 = vld [vmem:[%s10392_s30 + $0x108] sm:$0xff] }
  0x1d   : > { %v372_v34 = vld [vmem:[%s10392_s30 + $0x100] sm:$0xff]  ;;  %v375_v36 = vld [vmem:[%s10392_s30 + $0x118] sm:$0xff]  ;;  %v374_v37 = vld [vmem:[%s10392_s30 + $0x110] sm:$0xff] }
  0x1e   : > { %v377_v38 = vld [vmem:[%s10392_s30 + $0x128] sm:$0xff]  ;;  %v376_v39 = vld [vmem:[%s10392_s30 + $0x120] sm:$0xff]  ;;  %v378_v40 = vld [vmem:[%s10392_s30 + $0x130] sm:$0x3] }
  0x1f   : > { %416 = vperm.xlu1 %9406, %v10419_v7   ;;  %411 = vperm.xlu0 %9405, %v10422_v8  }
  0x23   : > { %426 = vperm.xlu1 %9406, %v10427_v9   ;;  %421 = vperm.xlu0 %9405, %v10430_v10  }
  0x27   : > { %436 = vperm.xlu1 %9406, %v10435_v11   ;;  %431 = vperm.xlu0 %9405, %v10438_v12  }
  0x2b   : > { %446 = vperm.xlu1 %9406, %v10443_v13   ;;  %441 = vperm.xlu0 %9405, %v10446_v14  }
  0x2f   : > { %456 = vperm.xlu1 %9406, %v355_v15   ;;  %451 = vperm.xlu0 %9405, %v354_v16  }
  0x33   : > { %466 = vperm.xlu1 %9406, %v357_v17   ;;  %461 = vperm.xlu0 %9405, %v356_v18  }
  0x37   : > { %476 = vperm.xlu1 %9406, %v359_v19   ;;  %471 = vperm.xlu0 %9405, %v358_v20  }
  0x3b   : > { %486 = vperm.xlu1 %9406, %v361_v21   ;;  %481 = vperm.xlu0 %9405, %v360_v22  }
  0x3f   : > { %496 = vperm.xlu1 %9406, %v363_v23   ;;  %491 = vperm.xlu0 %9405, %v362_v24  }
  0x43   : > { %506 = vperm.xlu1 %9406, %v365_v25   ;;  %501 = vperm.xlu0 %9405, %v364_v26  }
  0x47   : > { %516 = vperm.xlu1 %9406, %v367_v27   ;;  %511 = vperm.xlu0 %9405, %v366_v28  }
  0x4b   : > { %526 = vperm.xlu1 %9406, %v369_v29   ;;  %521 = vperm.xlu0 %9405, %v368_v30  }
  0x4f   : > { %536 = vperm.xlu1 %9406, %v371_v31   ;;  %531 = vperm.xlu0 %9405, %v370_v32  }
  0x53   : > { %546 = vperm.xlu1 %9406, %v373_v33   ;;  %541 = vperm.xlu0 %9405, %v372_v34  }
  0x57   : > { %556 = vperm.xlu1 %9406, %v375_v36   ;;  %551 = vperm.xlu0 %9405, %v374_v37  }
  0x5b   : > { %566 = vperm.xlu1 %9406, %v377_v38   ;;  %561 = vperm.xlu0 %9405, %v376_v39   ;;  %v10544_v39 = vld [vmem:[%s16536_s2] ss:$0 sm:$0xff] }
  0x5f   : > { %845 = vperm.xlu0 %9405, %v378_v40   ;;  %9407 = vset.pattern.permute.xlu1 %v10331_v41 }
  0x60   : > { %2531 = vperm.xlu1 %9407, %v10398_v2  }
  0x63   : > { %9408 = vset.pattern.permute.xlu0 %v10331_v41 }
  0x64   : > { %2541 = vperm.xlu1 %9407, %v10395_v1   ;;  %2536 = vperm.xlu0 %9408, %v10406_v4  }
  0x68   : > { %2546 = vperm.xlu1 %9407, %v10403_v3   ;;  %2551 = vperm.xlu0 %9408, %v10414_v6  }
  0x6c   : > { %2556 = vperm.xlu1 %9407, %v10411_v5   ;;  %2561 = vperm.xlu0 %9408, %v10422_v8  }
  0x70   : > { %2566 = vperm.xlu1 %9407, %v10419_v7   ;;  %2571 = vperm.xlu0 %9408, %v10430_v10  }
  0x74   : > { %2576 = vperm.xlu1 %9407, %v10427_v9   ;;  %2581 = vperm.xlu0 %9408, %v10438_v12  }
  0x78   : > { %2586 = vperm.xlu1 %9407, %v10435_v11   ;;  %2591 = vperm.xlu0 %9408, %v10446_v14  }
  0x7c   : > { %2596 = vperm.xlu1 %9407, %v10443_v13  }
  0x8e   : > { %v392_v53 = vpop.permute.xlu1 %391  ;;  %v382_v54 = vpop.permute.xlu0 %381 }
  0x8f   : > { %v617_v55 = vmul.f32 %v10494_v49, %v392_v53  ;;  %v854_v56 = vmul.f32 %v10496_v50, %v392_v53  ;;  %v1090_v57 = vmul.f32 %v10498_v51, %v392_v53  ;;  %v615_v58 = vmul.f32 %v10494_v49, %v382_v54 }
  0x90   : > { %v852_v59 = vmul.f32 %v10496_v50, %v382_v54  ;;  %v575_v60 = vmul.f32 %v10500_v52, %v392_v53  ;;  %v1088_v61 = vmul.f32 %v10498_v51, %v382_v54  ;;  %v573_v1 = vmul.f32 %v10500_v52, %v382_v54 }
  0x91   : > { %v695_v62 = vrot.slane %v617_v55, 1  ;;  %v934_v63 = vrot.slane %v854_v56, 2  ;;  %v1170_v0 = vrot.slane %v1090_v57, 3  ;;  %v692_v4 = vrot.slane %v615_v58, 1 }
  0x92   : > { %v397_v2 = vpop.permute.xlu1 %396  ;;  %v387_v3 = vpop.permute.xlu0 %386  ;;  %v931_v8 = vrot.slane %v852_v59, 2  ;;  %v1167_v12 = vrot.slane %v1088_v61, 3 }
  0x93   : > { %v618_v5 = vmul.f32 %v10494_v49, %v397_v2  ;;  %v10512_v6 = vmul.f32 %v10496_v50, %v397_v2  ;;  %v10515_v7 = vmul.f32 %v10498_v51, %v397_v2  ;;  %v616_v9 = vmul.f32 %v10494_v49, %v387_v3 }
  0x94   : > { %v853_v10 = vmul.f32 %v10496_v50, %v387_v3  ;;  %v1089_v11 = vmul.f32 %v10498_v51, %v387_v3  ;;  %v576_v16 = vmul.f32 %v10500_v52, %v397_v2  ;;  %v574_v24 = vmul.f32 %v10500_v52, %v387_v3 }
  0x95   : > { %v697_v13 = vrot.slane %v618_v5, 1  ;;  %v936_v14 = vrot.slane %v10512_v6, 2  ;;  %v1172_v15 = vrot.slane %v10515_v7, 3  ;;  %v693_v17 = vrot.slane %v616_v9, 1 }
  0x96   : > { %v932_v18 = vrot.slane %v853_v10, 2  ;;  %v1168_v19 = vrot.slane %v1089_v11, 3  ;;  %v407_v20 = vpop.permute.xlu1 %406  ;;  %v402_v33 = vpop.permute.xlu0 %401 }
  0x97   : > { %v698_v21 = vsel %vm691_vm1, %v695_v62, %v697_v13  ;;  %v937_v22 = vsel %vm930_vm2, %v934_v63, %v936_v14  ;;  %v1173_v23 = vsel %vm1166_vm3, %v1170_v0, %v1172_v15  ;;  %v694_v26 = vsel %vm691_vm1, %v692_v4, %v693_v17 }
  0x98   : > { %v807_v25 = vadd.f32 %v698_v21, %v575_v60  ;;  %v696_v27 = vsel %vm691_vm1, %v693_v17, %v695_v62  ;;  %v10530_v28 = vmul.f32 %v10500_v52, %v407_v20  ;;  %v805_v29 = vadd.f32 %v694_v26, %v573_v1 }
  0x99   : > { %v806_v30 = vadd.f32 %v696_v27, %v574_v24  ;;  %v933_v31 = vsel %vm930_vm2, %v931_v8, %v932_v18  ;;  %v935_v32 = vsel %vm930_vm2, %v932_v18, %v934_v63  ;;  %v1169_v36 = vsel %vm1166_vm3, %v1167_v12, %v1168_v19 }
  0x9a   : > { %v1048_v34 = vadd.f32 %v937_v22, %v807_v25  ;;  %v10536_v37 = vmul.f32 %v10494_v49, %v407_v20  ;;  %v10539_v38 = vmul.f32 %v10496_v50, %v407_v20  ;;  %v1046_v40 = vadd.f32 %v933_v31, %v805_v29  ;;  %v417_v48 = vpop.permute.xlu1 %416  ;;  %v412_v9 = vpop.permute.xlu0 %411 }
  0x9b   : > { %v1047_v41 = vadd.f32 %v935_v32, %v806_v30  ;;  %v1171_v42 = vsel %vm1166_vm3, %v1168_v19, %v1170_v0  ;;  %v10548_v43 = vmul.f32 %v10498_v51, %v407_v20  ;;  %v577_v46 = vmul.f32 %v10500_v52, %v402_v33 }
  0x9c   : > { %v1284_v44 = vadd.f32 %v1173_v23, %v1048_v34  ;;  %v701_v45 = vrot.slane %v10536_v37, 1  ;;  %v619_v47 = vmul.f32 %v10494_v49, %v402_v33  ;;  %v1282_v53 = vadd.f32 %v1169_v36, %v1046_v40 }
  0x9d   : > { %v1283_v54 = vadd.f32 %v1171_v42, %v1047_v41  ;;  %v940_v55 = vrot.slane %v10539_v38, 2  ;;  %v856_v56 = vmul.f32 %v10496_v50, %v402_v33  ;;  %v1176_v58 = vrot.slane %v10548_v43, 3 }
  0x9e   : > { %v1328_v57 = vadd.f32 %v10544_v39, %v1284_v44  ;;  %v699_v59 = vrot.slane %v619_v47, 1  ;;  %v1092_v60 = vmul.f32 %v10498_v51, %v402_v33  ;;  %v1326_v61 = vadd.f32 %v10544_v39, %v1282_v53  ;;  %v427_v22 = vpop.permute.xlu1 %426  ;;  %v422_v47 = vpop.permute.xlu0 %421 }
  0x9f   : > { %v1327_v62 = vadd.f32 %v10544_v39, %v1283_v54  ;;  %v938_v63 = vrot.slane %v856_v56, 2  ;;  %v10561_v0 = vmul.f32 %v10494_v49, %v417_v48  ;;  %v10570_v17 = vmul.f32 %v10500_v52, %v417_v48 }
  0xa0   : > { %v1366_v1 = vmax.f32 %v1328_v57, 0.0  ;;  %v700_v2 = vsel %vm691_vm1, %v697_v13, %v699_v59  ;;  %v702_v3 = vsel %vm691_vm1, %v699_v59, %v701_v45  ;;  %v1174_v4 = vrot.slane %v1092_v60, 3 }
  0xa1   : > { %v1364_v5 = vmax.f32 %v1326_v61, 0.0  ;;  %v1365_v6 = vmax.f32 %v1327_v62, 0.0  ;;  %v808_v7 = vadd.f32 %v700_v2, %v576_v16  ;;  %v809_v8 = vadd.f32 %v702_v3, %v577_v46 }
  0xa2   : > { %1405 = vst.msk [vmem:[#allocation2 + $0x10] sm:$0xff] %vm1402_vm4, %v1366_v1  ;;  %v939_v10 = vsel %vm930_vm2, %v936_v14, %v938_v63  ;;  %v941_v11 = vsel %vm930_vm2, %v938_v63, %v940_v55  ;;  %v1175_v12 = vsel %vm1166_vm3, %v1172_v15, %v1174_v4  ;;  %v1177_v16 = vsel %vm1166_vm3, %v1174_v4, %v1176_v58  ;;  %v437_v59 = vpop.permute.xlu1 %436 }
  0xa3   : > { %1403 = vst.msk [vmem:[#allocation2] sm:$0xff] %vm1402_vm4, %v1364_v5  ;;  %1404 = vst.msk [vmem:[#allocation2 + $0x8] sm:$0xff] %vm1402_vm4, %v1365_v6  ;;  %v1049_v13 = vadd.f32 %v939_v10, %v808_v7  ;;  %v1050_v18 = vadd.f32 %v941_v11, %v809_v8  ;;  %v859_v19 = vmul.f32 %v10496_v50, %v417_v48  ;;  %v705_v20 = vrot.slane %v10561_v0, 1 }
  0xa4   : > { %v10578_v14 = vmul.f32 %v10498_v51, %v417_v48  ;;  %v621_v15 = vmul.f32 %v10494_v49, %v412_v9  ;;  %v858_v21 = vmul.f32 %v10496_v50, %v412_v9  ;;  %v579_v25 = vmul.f32 %v10500_v52, %v412_v9 }
  0xa5   : > { %v1285_v23 = vadd.f32 %v1175_v12, %v1049_v13  ;;  %v1286_v24 = vadd.f32 %v1177_v16, %v1050_v18  ;;  %v1094_v26 = vmul.f32 %v10498_v51, %v412_v9  ;;  %v944_v27 = vrot.slane %v859_v19, 2 }
  0xa6   : > { %v1180_v29 = vrot.slane %v10578_v14, 3  ;;  %v703_v30 = vrot.slane %v621_v15, 1  ;;  %v942_v31 = vrot.slane %v858_v21, 2  ;;  %v10588_v36 = vmul.f32 %v10494_v49, %v427_v22  ;;  %v432_v21 = vpop.permute.xlu0 %431 }
  0xa7   : > { %v1329_v32 = vadd.f32 %v10544_v39, %v1285_v23  ;;  %v1330_v33 = vadd.f32 %v10544_v39, %v1286_v24  ;;  %v1178_v34 = vrot.slane %v1094_v26, 3  ;;  %v10594_v41 = vmul.f32 %v10500_v52, %v427_v22 }
  0xa8   : > { %v704_v37 = vsel %vm691_vm1, %v701_v45, %v703_v30  ;;  %v706_v38 = vsel %vm691_vm1, %v703_v30, %v705_v20  ;;  %v943_v40 = vsel %vm930_vm2, %v940_v55, %v942_v31  ;;  %v945_v48 = vsel %vm930_vm2, %v942_v31, %v944_v27 }
  0xa9   : > { %v1367_v42 = vmax.f32 %v1329_v32, 0.0  ;;  %v1368_v43 = vmax.f32 %v1330_v33, 0.0  ;;  %v810_v44 = vadd.f32 %v704_v37, %v10530_v28  ;;  %v811_v46 = vadd.f32 %v706_v38, %v579_v25  ;;  %v447_v25 = vpop.permute.xlu1 %446 }
  0xaa   : > { %v1179_v53 = vsel %vm1166_vm3, %v1176_v58, %v1178_v34  ;;  %v1181_v54 = vsel %vm1166_vm3, %v1178_v34, %v1180_v29  ;;  %v10601_v45 = vmul.f32 %v10496_v50, %v427_v22  ;;  %v709_v57 = vrot.slane %v10588_v36, 1 }
  0xab   : > { %1406 = vst.msk [vmem:[#allocation2 + $0x18] sm:$0xff] %vm1402_vm4, %v1367_v42  ;;  %1407 = vst.msk [vmem:[#allocation2 + $0x20] sm:$0xff] %vm1402_vm4, %v1368_v43  ;;  %v1051_v55 = vadd.f32 %v943_v40, %v810_v44  ;;  %v1052_v56 = vadd.f32 %v945_v48, %v811_v46  ;;  %v10607_v28 = vmul.f32 %v10498_v51, %v427_v22 }
  0xac   : > { %v581_v60 = vmul.f32 %v10500_v52, %v422_v47  ;;  %v623_v58 = vmul.f32 %v10494_v49, %v422_v47  ;;  %v860_v61 = vmul.f32 %v10496_v50, %v422_v47  ;;  %v1096_v62 = vmul.f32 %v10498_v51, %v422_v47 }
  0xad   : > { %v1287_v63 = vadd.f32 %v1179_v53, %v1051_v55  ;;  %v1288_v0 = vadd.f32 %v1181_v54, %v1052_v56  ;;  %v948_v1 = vrot.slane %v10601_v45, 2  ;;  %v1184_v2 = vrot.slane %v10607_v28, 3  ;;  %v442_v28 = vpop.permute.xlu0 %441 }
  0xae   : > { %v707_v3 = vrot.slane %v623_v58, 1  ;;  %v946_v4 = vrot.slane %v860_v61, 2  ;;  %v1182_v5 = vrot.slane %v1096_v62, 3  ;;  %v10616_v6 = vmul.f32 %v10494_v49, %v437_v59  ;;  %v457_v62 = vpop.permute.xlu1 %456 }
  0xaf   : > { %v1331_v7 = vadd.f32 %v10544_v39, %v1287_v63  ;;  %v1332_v8 = vadd.f32 %v10544_v39, %v1288_v0  ;;  %v10621_v9 = vmul.f32 %v10496_v50, %v437_v59  ;;  %v10624_v10 = vmul.f32 %v10498_v51, %v437_v59 }
  0xb0   : > { %v708_v11 = vsel %vm691_vm1, %v705_v20, %v707_v3  ;;  %v710_v12 = vsel %vm691_vm1, %v707_v3, %v709_v57  ;;  %v947_v13 = vsel %vm930_vm2, %v944_v27, %v946_v4  ;;  %v10630_v18 = vmul.f32 %v10500_v52, %v437_v59 }
  0xb1   : > { %v1369_v16 = vmax.f32 %v1331_v7, 0.0  ;;  %v1370_v19 = vmax.f32 %v1332_v8, 0.0  ;;  %v812_v14 = vadd.f32 %v708_v11, %v10570_v17  ;;  %v813_v15 = vadd.f32 %v710_v12, %v581_v60 }
  0xb2   : > { %v949_v22 = vsel %vm930_vm2, %v946_v4, %v948_v1  ;;  %v1183_v23 = vsel %vm1166_vm3, %v1180_v29, %v1182_v5  ;;  %v1185_v24 = vsel %vm1166_vm3, %v1182_v5, %v1184_v2  ;;  %v713_v20 = vrot.slane %v10616_v6, 1 }
  0xb3   : > { %1408 = vst.msk [vmem:[#allocation2 + $0x28] sm:$0xff] %vm1402_vm4, %v1369_v16  ;;  %1409 = vst.msk [vmem:[#allocation2 + $0x30] sm:$0xff] %vm1402_vm4, %v1370_v19  ;;  %v1053_v26 = vadd.f32 %v947_v13, %v812_v14  ;;  %v1054_v27 = vadd.f32 %v949_v22, %v813_v15  ;;  %v952_v30 = vrot.slane %v10621_v9, 2  ;;  %v1188_v17 = vrot.slane %v10624_v10, 3 }
  0xb4   : > { %v583_v31 = vmul.f32 %v10500_v52, %v432_v21  ;;  %v625_v32 = vmul.f32 %v10494_v49, %v432_v21  ;;  %v862_v29 = vmul.f32 %v10496_v50, %v432_v21  ;;  %v1098_v33 = vmul.f32 %v10498_v51, %v432_v21 }
  0xb5   : > { %v1289_v34 = vadd.f32 %v1183_v23, %v1053_v26  ;;  %v1290_v36 = vadd.f32 %v1185_v24, %v1054_v27  ;;  %v10646_v37 = vmul.f32 %v10494_v49, %v447_v25  ;;  %v10649_v38 = vmul.f32 %v10496_v50, %v447_v25 }
  0xb6   : > { %v711_v40 = vrot.slane %v625_v32, 1  ;;  %v950_v42 = vrot.slane %v862_v29, 2  ;;  %v1186_v43 = vrot.slane %v1098_v33, 3  ;;  %v10652_v44 = vmul.f32 %v10498_v51, %v447_v25 }
  0xb7   : > { %v1333_v46 = vadd.f32 %v10544_v39, %v1289_v34  ;;  %v1334_v47 = vadd.f32 %v10544_v39, %v1290_v36  ;;  %v10657_v48 = vmul.f32 %v10500_v52, %v447_v25  ;;  %v717_v53 = vrot.slane %v10646_v37, 1  ;;  %v467_v34 = vpop.permute.xlu1 %466 }
  0xb8   : > { %v712_v54 = vsel %vm691_vm1, %v709_v57, %v711_v40  ;;  %v714_v45 = vsel %vm691_vm1, %v711_v40, %v713_v20  ;;  %v951_v55 = vsel %vm930_vm2, %v948_v1, %v950_v42  ;;  %v956_v56 = vrot.slane %v10649_v38, 2 }
  0xb9   : > { %v1371_v59 = vmax.f32 %v1333_v46, 0.0  ;;  %v1372_v60 = vmax.f32 %v1334_v47, 0.0  ;;  %v814_v58 = vadd.f32 %v712_v54, %v10594_v41  ;;  %v815_v61 = vadd.f32 %v714_v45, %v583_v31  ;;  %v452_v31 = vpop.permute.xlu0 %451 }
  0xba   : > { %v953_v63 = vsel %vm930_vm2, %v950_v42, %v952_v30  ;;  %v1187_v0 = vsel %vm1166_vm3, %v1184_v2, %v1186_v43  ;;  %v1189_v3 = vsel %vm1166_vm3, %v1186_v43, %v1188_v17  ;;  %v1192_v57 = vrot.slane %v10652_v44, 3 }
  0xbb   : > { %1410 = vst.msk [vmem:[#allocation2 + $0x38] sm:$0xff] %vm1402_vm4, %v1371_v59  ;;  %1411 = vst.msk [vmem:[#allocation2 + $0x40] sm:$0xff] %vm1402_vm4, %v1372_v60  ;;  %v1055_v1 = vadd.f32 %v951_v55, %v814_v58  ;;  %v1056_v4 = vadd.f32 %v953_v63, %v815_v61  ;;  %v627_v5 = vmul.f32 %v10494_v49, %v442_v28 }
  0xbc   : > { %v864_v41 = vmul.f32 %v10496_v50, %v442_v28  ;;  %v585_v6 = vmul.f32 %v10500_v52, %v442_v28  ;;  %v1100_v7 = vmul.f32 %v10498_v51, %v442_v28  ;;  %v10676_v2 = vmul.f32 %v10494_v49, %v457_v62 }
  0xbd   : > { %v10679_v8 = vmul.f32 %v10496_v50, %v457_v62  ;;  %v1291_v9 = vadd.f32 %v1187_v0, %v1055_v1  ;;  %v1292_v10 = vadd.f32 %v1189_v3, %v1056_v4  ;;  %v715_v11 = vrot.slane %v627_v5, 1 }
  0xbe   : > { %v954_v12 = vrot.slane %v864_v41, 2  ;;  %v1190_v13 = vrot.slane %v1100_v7, 3  ;;  %v10682_v16 = vmul.f32 %v10500_v52, %v457_v62  ;;  %v721_v19 = vrot.slane %v10676_v2, 1  ;;  %v462_v41 = vpop.permute.xlu0 %461 }
  0xbf   : > { %v10686_v14 = vmul.f32 %v10498_v51, %v457_v62  ;;  %v1335_v15 = vadd.f32 %v10544_v39, %v1291_v9  ;;  %v1336_v21 = vadd.f32 %v10544_v39, %v1292_v10  ;;  %v716_v22 = vsel %vm691_vm1, %v713_v20, %v715_v11 }
  0xc0   : > { %v718_v23 = vsel %vm691_vm1, %v715_v11, %v717_v53  ;;  %v816_v24 = vadd.f32 %v716_v22, %v10630_v18  ;;  %v955_v26 = vsel %vm930_vm2, %v952_v30, %v954_v12  ;;  %v960_v27 = vrot.slane %v10679_v8, 2  ;;  %v477_v11 = vpop.permute.xlu1 %476 }
  0xc1   : > { %v817_v25 = vadd.f32 %v718_v23, %v585_v6  ;;  %v1373_v32 = vmax.f32 %v1335_v15, 0.0  ;;  %v1374_v29 = vmax.f32 %v1336_v21, 0.0  ;;  %v957_v33 = vsel %vm930_vm2, %v954_v12, %v956_v56 }
  0xc2   : > { %v1191_v20 = vsel %vm1166_vm3, %v1188_v17, %v1190_v13  ;;  %v1057_v36 = vadd.f32 %v955_v26, %v816_v24  ;;  %v1193_v18 = vsel %vm1166_vm3, %v1190_v13, %v1192_v57  ;;  %v1196_v30 = vrot.slane %v10686_v14, 3 }
  0xc3   : > { %v1058_v40 = vadd.f32 %v957_v33, %v817_v25  ;;  %1412 = vst.msk [vmem:[#allocation2 + $0x48] sm:$0xff] %vm1402_vm4, %v1373_v32  ;;  %1413 = vst.msk [vmem:[#allocation2 + $0x50] sm:$0xff] %vm1402_vm4, %v1374_v29  ;;  %v587_v42 = vmul.f32 %v10500_v52, %v452_v31  ;;  %v629_v43 = vmul.f32 %v10494_v49, %v452_v31 }
  0xc4   : > { %v866_v46 = vmul.f32 %v10496_v50, %v452_v31  ;;  %v1102_v17 = vmul.f32 %v10498_v51, %v452_v31  ;;  %v1293_v47 = vadd.f32 %v1191_v20, %v1057_v36  ;;  %v10712_v45 = vmul.f32 %v10494_v49, %v467_v34 }
  0xc5   : > { %v1294_v54 = vadd.f32 %v1193_v18, %v1058_v40  ;;  %v10715_v55 = vmul.f32 %v10496_v50, %v467_v34  ;;  %v719_v28 = vrot.slane %v629_v43, 1  ;;  %v10718_v58 = vmul.f32 %v10498_v51, %v467_v34 }
  0xc6   : > { %v958_v59 = vrot.slane %v866_v46, 2  ;;  %v1194_v60 = vrot.slane %v1102_v17, 3  ;;  %v1337_v61 = vadd.f32 %v10544_v39, %v1293_v47  ;;  %v10723_v63 = vmul.f32 %v10500_v52, %v467_v34  ;;  %v472_v17 = vpop.permute.xlu0 %471 }
  0xc7   : > { %v1338_v62 = vadd.f32 %v10544_v39, %v1294_v54  ;;  %v725_v0 = vrot.slane %v10712_v45, 1  ;;  %v720_v3 = vsel %vm691_vm1, %v717_v53, %v719_v28  ;;  %v722_v1 = vsel %vm691_vm1, %v719_v28, %v721_v19  ;;  %v487_v28 = vpop.permute.xlu1 %486 }
  0xc8   : > { %v959_v4 = vsel %vm930_vm2, %v956_v56, %v958_v59  ;;  %v964_v5 = vrot.slane %v10715_v55, 2  ;;  %v1375_v6 = vmax.f32 %v1337_v61, 0.0  ;;  %v818_v9 = vadd.f32 %v720_v3, %v10657_v48 }
  0xc9   : > { %v1376_v7 = vmax.f32 %v1338_v62, 0.0  ;;  %v819_v10 = vadd.f32 %v722_v1, %v587_v42  ;;  %v961_v37 = vsel %vm930_vm2, %v958_v59, %v960_v27  ;;  %v1195_v53 = vsel %vm1166_vm3, %v1192_v57, %v1194_v60 }
  0xca   : > { %v1197_v38 = vsel %vm1166_vm3, %v1194_v60, %v1196_v30  ;;  %v1200_v56 = vrot.slane %v10718_v58, 3  ;;  %1414 = vst.msk [vmem:[#allocation2 + $0x58] sm:$0xff] %vm1402_vm4, %v1375_v6  ;;  %v1059_v48 = vadd.f32 %v959_v4, %v818_v9  ;;  %v631_v13 = vmul.f32 %v10494_v49, %v462_v41 }
  0xcb   : > { %1415 = vst.msk [vmem:[#allocation2 + $0x60] sm:$0xff] %vm1402_vm4, %v1376_v7  ;;  %v1060_v12 = vadd.f32 %v961_v37, %v819_v10  ;;  %v868_v15 = vmul.f32 %v10496_v50, %v462_v41  ;;  %v589_v44 = vmul.f32 %v10500_v52, %v462_v41  ;;  %v1104_v57 = vmul.f32 %v10498_v51, %v462_v41 }
  0xcc   : > { %v10754_v21 = vmul.f32 %v10494_v49, %v477_v11  ;;  %v10757_v22 = vmul.f32 %v10496_v50, %v477_v11  ;;  %v1295_v23 = vadd.f32 %v1195_v53, %v1059_v48  ;;  %v723_v25 = vrot.slane %v631_v13, 1 }
  0xcd   : > { %v1296_v24 = vadd.f32 %v1197_v38, %v1060_v12  ;;  %v962_v26 = vrot.slane %v868_v15, 2  ;;  %v1198_v31 = vrot.slane %v1104_v57, 3  ;;  %v10760_v32 = vmul.f32 %v10500_v52, %v477_v11  ;;  %v482_v15 = vpop.permute.xlu0 %481 }
  0xce   : > { %v729_v29 = vrot.slane %v10754_v21, 1  ;;  %v10764_v33 = vmul.f32 %v10498_v51, %v477_v11  ;;  %v1339_v20 = vadd.f32 %v10544_v39, %v1295_v23  ;;  %v724_v36 = vsel %vm691_vm1, %v721_v19, %v723_v25 }
  0xcf   : > { %v1340_v34 = vadd.f32 %v10544_v39, %v1296_v24  ;;  %v726_v40 = vsel %vm691_vm1, %v723_v25, %v725_v0  ;;  %v820_v18 = vadd.f32 %v724_v36, %v10682_v16  ;;  %v963_v43 = vsel %vm930_vm2, %v960_v27, %v962_v26  ;;  %v497_v25 = vpop.permute.xlu1 %496 }
  0xd0   : > { %v821_v42 = vadd.f32 %v726_v40, %v589_v44  ;;  %v968_v46 = vrot.slane %v10757_v22, 2  ;;  %v1377_v47 = vmax.f32 %v1339_v20, 0.0  ;;  %v965_v2 = vsel %vm930_vm2, %v962_v26, %v964_v5 }
  0xd1   : > { %v1378_v54 = vmax.f32 %v1340_v34, 0.0  ;;  %v1199_v19 = vsel %vm1166_vm3, %v1196_v30, %v1198_v31  ;;  %v1061_v16 = vadd.f32 %v963_v43, %v820_v18  ;;  %v1201_v8 = vsel %vm1166_vm3, %v1198_v31, %v1200_v56 }
  0xd2   : > { %v1062_v59 = vadd.f32 %v965_v2, %v821_v42  ;;  %v1204_v27 = vrot.slane %v10764_v33, 3  ;;  %1416 = vst.msk [vmem:[#allocation2 + $0x68] sm:$0xff] %vm1402_vm4, %v1377_v47  ;;  %v591_v60 = vmul.f32 %v10500_v52, %v472_v17  ;;  %v633_v61 = vmul.f32 %v10494_v49, %v472_v17 }
  0xd3   : > { %1417 = vst.msk [vmem:[#allocation2 + $0x70] sm:$0xff] %vm1402_vm4, %v1378_v54  ;;  %v870_v14 = vmul.f32 %v10496_v50, %v472_v17  ;;  %v1106_v30 = vmul.f32 %v10498_v51, %v472_v17  ;;  %v1297_v62 = vadd.f32 %v1199_v19, %v1061_v16  ;;  %v10796_v1 = vmul.f32 %v10494_v49, %v487_v28  ;;  %v1442_v19 = vld [vmem:[#allocation2] ss:$2 sm:$0xff] }
  0xd4   : > { %v1298_v3 = vadd.f32 %v1201_v8, %v1062_v59  ;;  %v10799_v4 = vmul.f32 %v10496_v50, %v487_v28  ;;  %v727_v41 = vrot.slane %v633_v61, 1  ;;  %v10802_v9 = vmul.f32 %v10498_v51, %v487_v28  ;;  %v1444_v61 = vld [vmem:[#allocation2 + $0x10] ss:$2 sm:$0xff] }
  0xd5   : > { %v966_v6 = vrot.slane %v870_v14, 2  ;;  %v1202_v7 = vrot.slane %v1106_v30, 3  ;;  %v1341_v10 = vadd.f32 %v10544_v39, %v1297_v62  ;;  %v10807_v37 = vmul.f32 %v10500_v52, %v487_v28  ;;  %v1480_v28 = vld [vmem:[#allocation2 + $0x1] ss:$2 sm:$0xff]  ;;  %v1482_v14 = vld [vmem:[#allocation2 + $0x11] ss:$2 sm:$0xff] }
  0xd6   : > { %v1342_v11 = vadd.f32 %v10544_v39, %v1298_v3  ;;  %v733_v53 = vrot.slane %v10796_v1, 1  ;;  %v728_v38 = vsel %vm691_vm1, %v725_v0, %v727_v41  ;;  %v730_v48 = vsel %vm691_vm1, %v727_v41, %v729_v29 }
  0xd7   : > { %v967_v12 = vsel %vm930_vm2, %v964_v5, %v966_v6  ;;  %v972_v13 = vrot.slane %v10799_v4, 2  ;;  %v1379_v44 = vmax.f32 %v1341_v10, 0.0  ;;  %v822_v23 = vadd.f32 %v728_v38, %v10723_v63  ;;  %v507_v38 = vpop.permute.xlu1 %506 }
  0xd8   : > { %v1380_v57 = vmax.f32 %v1342_v11, 0.0  ;;  %v823_v24 = vadd.f32 %v730_v48, %v591_v60  ;;  %v969_v45 = vsel %vm930_vm2, %v966_v6, %v968_v46  ;;  %v1203_v0 = vsel %vm1166_vm3, %v1200_v56, %v1202_v7  ;;  %v492_v6 = vpop.permute.xlu0 %491 }
  0xd9   : > { %v1205_v55 = vsel %vm1166_vm3, %v1202_v7, %v1204_v27  ;;  %v1208_v5 = vrot.slane %v10802_v9, 3  ;;  %1418 = vst.msk [vmem:[#allocation2 + $0x78] sm:$0xff] %vm1402_vm4, %v1379_v44  ;;  %v1063_v63 = vadd.f32 %v967_v12, %v822_v23  ;;  %v635_v31 = vmul.f32 %v10494_v49, %v482_v15 }
  0xda   : > { %1419 = vst.msk [vmem:[#allocation2 + $0x80] sm:$0xff] %vm1402_vm4, %v1380_v57  ;;  %v1064_v26 = vadd.f32 %v969_v45, %v823_v24  ;;  %v872_v20 = vmul.f32 %v10496_v50, %v482_v15  ;;  %v593_v58 = vmul.f32 %v10500_v52, %v482_v15  ;;  %v1108_v56 = vmul.f32 %v10498_v51, %v482_v15 }
  0xdb   : > { %v10838_v34 = vmul.f32 %v10494_v49, %v497_v25  ;;  %v10841_v36 = vmul.f32 %v10496_v50, %v497_v25  ;;  %v1299_v40 = vadd.f32 %v1203_v0, %v1063_v63  ;;  %v731_v42 = vrot.slane %v635_v31, 1 }
  0xdc   : > { %v1300_v18 = vadd.f32 %v1205_v55, %v1064_v26  ;;  %v970_v43 = vrot.slane %v872_v20, 2  ;;  %v1206_v17 = vrot.slane %v1108_v56, 3  ;;  %v10844_v47 = vmul.f32 %v10500_v52, %v497_v25 }
  0xdd   : > { %v737_v54 = vrot.slane %v10838_v34, 1  ;;  %v10848_v2 = vmul.f32 %v10498_v51, %v497_v25  ;;  %v1343_v16 = vadd.f32 %v10544_v39, %v1299_v40  ;;  %v732_v8 = vsel %vm691_vm1, %v729_v29, %v731_v42 }
  0xde   : > { %v1344_v59 = vadd.f32 %v10544_v39, %v1300_v18  ;;  %v734_v60 = vsel %vm691_vm1, %v731_v42, %v733_v53  ;;  %v824_v30 = vadd.f32 %v732_v8, %v10760_v32  ;;  %v971_v3 = vsel %vm930_vm2, %v968_v46, %v970_v43 }
  0xdf   : > { %v825_v62 = vadd.f32 %v734_v60, %v593_v58  ;;  %v976_v41 = vrot.slane %v10841_v36, 2  ;;  %v1381_v7 = vmax.f32 %v1343_v16, 0.0  ;;  %v973_v29 = vsel %vm930_vm2, %v970_v43, %v972_v13 }
  0xe0   : > { %v1382_v21 = vmax.f32 %v1344_v59, 0.0  ;;  %v1207_v10 = vsel %vm1166_vm3, %v1204_v27, %v1206_v17  ;;  %v1065_v11 = vadd.f32 %v971_v3, %v824_v30  ;;  %v1209_v22 = vsel %vm1166_vm3, %v1206_v17, %v1208_v5 }
  0xe1   : > { %v1066_v32 = vadd.f32 %v973_v29, %v825_v62  ;;  %v1517_v46 = vmax.f32 %v1442_v19, %v1480_v28  ;;  %1420 = vst.msk [vmem:[#allocation2 + $0x88] sm:$0xff] %vm1402_vm4, %v1381_v7  ;;  %v1212_v48 = vrot.slane %v10848_v2, 3  ;;  %v1518_v12 = vmax.f32 %v1444_v61, %v1482_v14  ;;  %v502_v19 = vpop.permute.xlu0 %501  ;;  %v517_v28 = vpop.permute.xlu1 %516 }
  0xe2   : > { %1421 = vst.msk [vmem:[#allocation2 + $0x90] sm:$0xff] %vm1402_vm4, %v1382_v21  ;;  %v637_v15 = vmul.f32 %v10494_v49, %v492_v6  ;;  %v874_v33 = vmul.f32 %v10496_v50, %v492_v6  ;;  %v1301_v27 = vadd.f32 %v1207_v10, %v1065_v11  ;;  %v595_v57 = vmul.f32 %v10500_v52, %v492_v6 }
  0xe3   : > { %v1302_v44 = vadd.f32 %v1209_v22, %v1066_v32  ;;  %1536 = vst.msk [vmem:[#allocation3 + $0x3] sm:$0xff] %vm1402_vm4, %v1517_v46  ;;  %v1110_v23 = vmul.f32 %v10498_v51, %v492_v6  ;;  %1537 = vst.msk [vmem:[#allocation3 + $0xb] sm:$0xff] %vm1402_vm4, %v1518_v12  ;;  %v10882_v45 = vmul.f32 %v10494_v49, %v507_v38  ;;  %v1446_v32 = vld [vmem:[#allocation2 + $0x20] ss:$2 sm:$0xff]  ;;  %v1484_v22 = vld [vmem:[#allocation2 + $0x21] ss:$2 sm:$0xff] }
  0xe4   : > { %v735_v24 = vrot.slane %v637_v15, 1  ;;  %v974_v25 = vrot.slane %v874_v33, 2  ;;  %v10885_v0 = vmul.f32 %v10496_v50, %v507_v38  ;;  %v1345_v55 = vadd.f32 %v10544_v39, %v1301_v27  ;;  %v1448_v33 = vld [vmem:[#allocation2 + $0x30] ss:$2 sm:$0xff]  ;;  %v1486_v27 = vld [vmem:[#allocation2 + $0x31] ss:$2 sm:$0xff] }
  0xe5   : > { %v1346_v63 = vadd.f32 %v10544_v39, %v1302_v44  ;;  %v1210_v26 = vrot.slane %v1110_v23, 3  ;;  %v10890_v31 = vmul.f32 %v10498_v51, %v507_v38  ;;  %v10902_v40 = vmul.f32 %v10500_v52, %v507_v38 }
  0xe6   : > { %v736_v20 = vsel %vm691_vm1, %v733_v53, %v735_v24  ;;  %v738_v58 = vsel %vm691_vm1, %v735_v24, %v737_v54  ;;  %v975_v56 = vsel %vm930_vm2, %v972_v13, %v974_v25  ;;  %v1383_v18 = vmax.f32 %v1345_v55, 0.0 }
  0xe7   : > { %v1384_v42 = vmax.f32 %v1346_v63, 0.0  ;;  %v826_v43 = vadd.f32 %v736_v20, %v10807_v37  ;;  %v827_v17 = vadd.f32 %v738_v58, %v595_v57  ;;  %v977_v1 = vsel %vm930_vm2, %v974_v25, %v976_v41  ;;  %v512_v20 = vpop.permute.xlu0 %511  ;;  %v527_v58 = vpop.permute.xlu1 %526 }
  0xe8   : > { %v1211_v53 = vsel %vm1166_vm3, %v1208_v5, %v1210_v26  ;;  %v1213_v4 = vsel %vm1166_vm3, %v1210_v26, %v1212_v48  ;;  %v741_v13 = vrot.slane %v10882_v45, 1  ;;  %1422 = vst.msk [vmem:[#allocation2 + $0x98] sm:$0xff] %vm1402_vm4, %v1383_v18  ;;  %v980_v59 = vrot.slane %v10885_v0, 2 }
  0xe9   : > { %1423 = vst.msk [vmem:[#allocation2 + $0xa0] sm:$0xff] %vm1402_vm4, %v1384_v42  ;;  %v1067_v37 = vadd.f32 %v975_v56, %v826_v43  ;;  %v1068_v16 = vadd.f32 %v977_v1, %v827_v17  ;;  %v1216_v8 = vrot.slane %v10890_v31, 3  ;;  %v597_v9 = vmul.f32 %v10500_v52, %v502_v19 }
  0xea   : > { %v639_v5 = vmul.f32 %v10494_v49, %v502_v19  ;;  %v876_v60 = vmul.f32 %v10496_v50, %v502_v19  ;;  %v1112_v61 = vmul.f32 %v10498_v51, %v502_v19  ;;  %v1575_v14 = vld [vmem:[#allocation3 + $0x1] sm:$0xff]  ;;  %v1576_v30 = vld [vmem:[#allocation3 + $0x9] sm:$0xff]  ;;  %v10924_v6 = vmul.f32 %v10494_v49, %v517_v28 }
  0xeb   : > { %v1303_v62 = vadd.f32 %v1211_v53, %v1067_v37  ;;  %v1304_v3 = vadd.f32 %v1213_v4, %v1068_v16  ;;  %v10927_v7 = vmul.f32 %v10496_v50, %v517_v28  ;;  %v9409_v21 = vpack.i.bf16 %v1576_v30, %v1575_v14 }
  0xec   : > { %v739_v29 = vrot.slane %v639_v5, 1  ;;  %v978_v10 = vrot.slane %v876_v60, 2  ;;  %v1214_v11 = vrot.slane %v1112_v61, 3  ;;  %v10932_v12 = vmul.f32 %v10500_v52, %v517_v28 }
  0xed   : > { %v1347_v46 = vadd.f32 %v10544_v39, %v1303_v62  ;;  %v1348_v38 = vadd.f32 %v10544_v39, %v1304_v3  ;;  %v745_v15 = vrot.slane %v10924_v6, 1  ;;  %9410 = vrot.lane.b32.xlu1 %v9409_v21, %s10332_s12  ;;  %v984_v24 = vrot.slane %v10927_v7, 2 }
  0xee   : > { %v740_v44 = vsel %vm691_vm1, %v737_v54, %v739_v29  ;;  %v742_v57 = vsel %vm691_vm1, %v739_v29, %v741_v13  ;;  %v979_v23 = vsel %vm930_vm2, %v976_v41, %v978_v10  ;;  %v981_v34 = vsel %vm930_vm2, %v978_v10, %v980_v59  ;;  %v522_v29 = vpop.permute.xlu0 %521 }
  0xef   : > { %v1385_v25 = vmax.f32 %v1347_v46, 0.0  ;;  %v1386_v55 = vmax.f32 %v1348_v38, 0.0  ;;  %v828_v63 = vadd.f32 %v740_v44, %v10844_v47  ;;  %v829_v26 = vadd.f32 %v742_v57, %v597_v9  ;;  %v537_v46 = vpop.permute.xlu1 %536 }
  0xf0   : > { %v1215_v54 = vsel %vm1166_vm3, %v1212_v48, %v1214_v11  ;;  %v10954_v36 = vmul.f32 %v10498_v51, %v517_v28  ;;  %v1519_v41 = vmax.f32 %v1446_v32, %v1484_v22  ;;  %v1217_v18 = vsel %vm1166_vm3, %v1214_v11, %v1216_v8 }
  0xf1   : > { %1424 = vst.msk [vmem:[#allocation2 + $0xa8] sm:$0xff] %vm1402_vm4, %v1385_v25  ;;  %1425 = vst.msk [vmem:[#allocation2 + $0xb0] sm:$0xff] %vm1402_vm4, %v1386_v55  ;;  %v1069_v47 = vadd.f32 %v979_v23, %v828_v63  ;;  %v1070_v56 = vadd.f32 %v981_v34, %v829_v26  ;;  %v1520_v42 = vmax.f32 %v1448_v33, %v1486_v27 }
  0xf2   : > { %1538 = vst.msk [vmem:[#allocation3 + $0x13] sm:$0xff] %vm1402_vm4, %v1519_v41  ;;  %v599_v2 = vmul.f32 %v10500_v52, %v512_v20  ;;  %v641_v48 = vmul.f32 %v10494_v49, %v512_v20  ;;  %v878_v43 = vmul.f32 %v10496_v50, %v512_v20  ;;  %v1114_v17 = vmul.f32 %v10498_v51, %v512_v20 }
  0xf3   : > { %v1305_v19 = vadd.f32 %v1215_v54, %v1069_v47  ;;  %v1306_v1 = vadd.f32 %v1217_v18, %v1070_v56  ;;  %v1220_v53 = vrot.slane %v10954_v36, 3  ;;  %1539 = vst.msk [vmem:[#allocation3 + $0x1b] sm:$0xff] %vm1402_vm4, %v1520_v42  ;;  %v10969_v4 = vmul.f32 %v10494_v49, %v527_v58  ;;  %v1450_v47 = vld [vmem:[#allocation2 + $0x40] ss:$2 sm:$0xff]  ;;  %v1488_v56 = vld [vmem:[#allocation2 + $0x41] ss:$2 sm:$0xff] }
  0xf4   : > { %v743_v28 = vrot.slane %v641_v48, 1  ;;  %v982_v37 = vrot.slane %v878_v43, 2  ;;  %v1218_v16 = vrot.slane %v1114_v17, 3  ;;  %v10972_v9 = vmul.f32 %v10496_v50, %v527_v58  ;;  %v1452_v43 = vld [vmem:[#allocation2 + $0x50] ss:$2 sm:$0xff] }
  0xf5   : > { %v1349_v5 = vadd.f32 %v10544_v39, %v1305_v19  ;;  %v1350_v60 = vadd.f32 %v10544_v39, %v1306_v1  ;;  %v10977_v61 = vmul.f32 %v10500_v52, %v527_v58  ;;  %v10980_v14 = vmul.f32 %v10498_v51, %v527_v58  ;;  %v1490_v17 = vld [vmem:[#allocation2 + $0x51] ss:$2 sm:$0xff] }
  0xf6   : > { %v744_v30 = vsel %vm691_vm1, %v741_v13, %v743_v28  ;;  %v746_v62 = vsel %vm691_vm1, %v743_v28, %v745_v15  ;;  %v983_v3 = vsel %vm930_vm2, %v980_v59, %v982_v37  ;;  %v749_v21 = vrot.slane %v10969_v4, 1 }
  0xf7   : > { %v1387_v10 = vmax.f32 %v1349_v5, 0.0  ;;  %v1388_v11 = vmax.f32 %v1350_v60, 0.0  ;;  %v830_v32 = vadd.f32 %v744_v30, %v10902_v40  ;;  %v831_v22 = vadd.f32 %v746_v62, %v599_v2  ;;  %v547_v62 = vpop.permute.xlu1 %546 }
  0xf8   : > { %v985_v45 = vsel %vm930_vm2, %v982_v37, %v984_v24  ;;  %v1219_v13 = vsel %vm1166_vm3, %v1216_v8, %v1218_v16  ;;  %v1221_v0 = vsel %vm1166_vm3, %v1218_v16, %v1220_v53  ;;  %v988_v59 = vrot.slane %v10972_v9, 2  ;;  %v532_v16 = vpop.permute.xlu0 %531 }
  0xf9   : > { %1426 = vst.msk [vmem:[#allocation2 + $0xb8] sm:$0xff] %vm1402_vm4, %v1387_v10  ;;  %1427 = vst.msk [vmem:[#allocation2 + $0xc0] sm:$0xff] %vm1402_vm4, %v1388_v11  ;;  %v1071_v40 = vadd.f32 %v983_v3, %v830_v32  ;;  %v1072_v38 = vadd.f32 %v985_v45, %v831_v22  ;;  %v1224_v33 = vrot.slane %v10980_v14, 3  ;;  %v643_v27 = vmul.f32 %v10494_v49, %v522_v29  ;;  %v1577_v44 = vld [vmem:[#allocation3 + $0x11] sm:$0xff] }
  0xfa   : > { %v1578_v31 = vld [vmem:[#allocation3 + $0x19] sm:$0xff]  ;;  %v601_v8 = vmul.f32 %v10500_v52, %v522_v29  ;;  %v880_v57 = vmul.f32 %v10496_v50, %v522_v29  ;;  %v1116_v23 = vmul.f32 %v10498_v51, %v522_v29  ;;  %v11011_v25 = vmul.f32 %v10494_v49, %v537_v46 }
  0xfb   : > { %v9414_v55 = vpack.i.bf16 %v1578_v31, %v1577_v44  ;;  %v1307_v63 = vadd.f32 %v1219_v13, %v1071_v40  ;;  %v1308_v26 = vadd.f32 %v1221_v0, %v1072_v38  ;;  %v747_v20 = vrot.slane %v643_v27, 1 }
  0xfc   : > { %v986_v34 = vrot.slane %v880_v57, 2  ;;  %v1222_v54 = vrot.slane %v1116_v23, 3  ;;  %v11014_v41 = vmul.f32 %v10500_v52, %v537_v46  ;;  %v11017_v58 = vmul.f32 %v10496_v50, %v537_v46 }
  0xfd   : > { %9415 = vrot.lane.b32.xlu0 %v9414_v55, %s10332_s12  ;;  %v1351_v18 = vadd.f32 %v10544_v39, %v1307_v63  ;;  %v1352_v42 = vadd.f32 %v10544_v39, %v1308_v26  ;;  %v748_v2 = vsel %vm691_vm1, %v745_v15, %v747_v20  ;;  %v750_v48 = vsel %vm691_vm1, %v747_v20, %v749_v21  ;;  %v542_v20 = vpop.permute.xlu0 %541 }
  0xfe   : > { %v832_v19 = vadd.f32 %v748_v2, %v10932_v12  ;;  %v833_v1 = vadd.f32 %v750_v48, %v601_v8  ;;  %v987_v28 = vsel %vm930_vm2, %v984_v24, %v986_v34  ;;  %v753_v37 = vrot.slane %v11011_v25, 1 }
  0xff   : > { %v1389_v5 = vmax.f32 %v1351_v18, 0.0  ;;  %v1390_v6 = vmax.f32 %v1352_v42, 0.0  ;;  %v989_v15 = vsel %vm930_vm2, %v986_v34, %v988_v59  ;;  %v1223_v60 = vsel %vm1166_vm3, %v1220_v53, %v1222_v54  ;;  %v557_v42 = vpop.permute.xlu1 %556 }
 0x100   : > { %v1073_v30 = vadd.f32 %v987_v28, %v832_v19  ;;  %v1074_v12 = vadd.f32 %v989_v15, %v833_v1  ;;  %v1225_v7 = vsel %vm1166_vm3, %v1222_v54, %v1224_v33  ;;  %v11043_v24 = vmul.f32 %v10498_v51, %v537_v46  ;;  %v11100_v15 = vld [vmem:[%s16536_s2] ss:$0 sm:$0xff] }
 0x101   : > { %1428 = vst.msk [vmem:[#allocation2 + $0xc8] sm:$0xff] %vm1402_vm4, %v1389_v5  ;;  %1429 = vst.msk [vmem:[#allocation2 + $0xd0] sm:$0xff] %vm1402_vm4, %v1390_v6  ;;  %v992_v3 = vrot.slane %v11017_v58, 2  ;;  %v1521_v29 = vmax.f32 %v1450_v47, %v1488_v56  ;;  %v1522_v36 = vmax.f32 %v1452_v43, %v1490_v17  ;;  %v645_v53 = vmul.f32 %v10494_v49, %v532_v16 }
 0x102   : > { %v1309_v10 = vadd.f32 %v1223_v60, %v1073_v30  ;;  %v1310_v11 = vadd.f32 %v1225_v7, %v1074_v12  ;;  %v603_v32 = vmul.f32 %v10500_v52, %v532_v16  ;;  %v882_v22 = vmul.f32 %v10496_v50, %v532_v16 }
 0x103   : > { %v1228_v46 = vrot.slane %v11043_v24, 3  ;;  %1540 = vst.msk [vmem:[#allocation3 + $0x23] sm:$0xff] %vm1402_vm4, %v1521_v29  ;;  %1541 = vst.msk [vmem:[#allocation3 + $0x2b] sm:$0xff] %vm1402_vm4, %v1522_v36  ;;  %v751_v45 = vrot.slane %v645_v53, 1  ;;  %v1118_v13 = vmul.f32 %v10498_v51, %v532_v16  ;;  %v11056_v0 = vmul.f32 %v10494_v49, %v547_v62  ;;  %v1492_v29 = vld [vmem:[#allocation2 + $0x61] ss:$2 sm:$0xff] }
 0x104   : > { %v1353_v40 = vadd.f32 %v10544_v39, %v1309_v10  ;;  %v1354_v38 = vadd.f32 %v10544_v39, %v1310_v11  ;;  %v990_v27 = vrot.slane %v882_v22, 2  ;;  %v11061_v44 = vmul.f32 %v10500_v52, %v547_v62  ;;  %v1494_v22 = vld [vmem:[#allocation2 + $0x71] ss:$2 sm:$0xff] }
 0x105   : > { %v752_v31 = vsel %vm691_vm1, %v749_v21, %v751_v45  ;;  %v754_v8 = vsel %vm691_vm1, %v751_v45, %v753_v37  ;;  %v1226_v57 = vrot.slane %v1118_v13, 3  ;;  %v11070_v23 = vmul.f32 %v10496_v50, %v547_v62 }
 0x106   : > { %v1391_v55 = vmax.f32 %v1353_v40, 0.0  ;;  %v1392_v63 = vmax.f32 %v1354_v38, 0.0  ;;  %v834_v39 = vadd.f32 %v752_v31, %v10977_v61  ;;  %v835_v26 = vadd.f32 %v754_v8, %v603_v32  ;;  %v1456_v32 = vld [vmem:[#allocation2 + $0x70] ss:$2 sm:$0xff]  ;;  %v552_v38 = vpop.permute.xlu0 %551 }
 0x107   : > { %v991_v4 = vsel %vm930_vm2, %v988_v59, %v990_v27  ;;  %v993_v21 = vsel %vm930_vm2, %v990_v27, %v992_v3  ;;  %v1227_v34 = vsel %vm1166_vm3, %v1224_v33, %v1226_v57  ;;  %v757_v54 = vrot.slane %v11056_v0, 1  ;;  %v1496_v0 = vld [vmem:[#allocation2 + $0x81] ss:$2 sm:$0xff] }
 0x108   : > { %1430 = vst.msk [vmem:[#allocation2 + $0xd8] sm:$0xff] %vm1402_vm4, %v1391_v55  ;;  %1431 = vst.msk [vmem:[#allocation2 + $0xe0] sm:$0xff] %vm1402_vm4, %v1392_v63  ;;  %v1075_v61 = vadd.f32 %v991_v4, %v834_v39  ;;  %v1076_v47 = vadd.f32 %v993_v21, %v835_v26  ;;  %v1229_v9 = vsel %vm1166_vm3, %v1226_v57, %v1228_v46  ;;  %v996_v56 = vrot.slane %v11070_v23, 2  ;;  %v567_v55 = vpop.permute.xlu1 %566 }
 0x109   : > { %v11089_v59 = vmul.f32 %v10498_v51, %v547_v62  ;;  %v647_v14 = vmul.f32 %v10494_v49, %v542_v20  ;;  %v884_v33 = vmul.f32 %v10496_v50, %v542_v20  ;;  %v1120_v18 = vmul.f32 %v10498_v51, %v542_v20  ;;  %v1454_v62 = vld [vmem:[#allocation2 + $0x60] ss:$2 sm:$0xff] }
 0x10a   : > { %v1579_v2 = vld [vmem:[#allocation3 + $0x21] sm:$0xff]  ;;  %v1580_v48 = vld [vmem:[#allocation3 + $0x29] sm:$0xff]  ;;  %v1311_v43 = vadd.f32 %v1227_v34, %v1075_v61  ;;  %v1312_v17 = vadd.f32 %v1229_v9, %v1076_v47  ;;  %v605_v1 = vmul.f32 %v10500_v52, %v542_v20  ;;  %v11105_v12 = vmul.f32 %v10500_v52, %v557_v42 }
 0x10b   : > { %v1232_v19 = vrot.slane %v11089_v59, 3  ;;  %v9419_v28 = vpack.i.bf16 %v1580_v48, %v1579_v2  ;;  %v755_v16 = vrot.slane %v647_v14, 1  ;;  %v994_v5 = vrot.slane %v884_v33, 2  ;;  %v1498_v59 = vld [vmem:[#allocation2 + $0x91] ss:$2 sm:$0xff] }
 0x10c   : > { %v1230_v6 = vrot.slane %v1120_v18, 3  ;;  %v1355_v60 = vadd.f32 %v11100_v15, %v1311_v43  ;;  %v1356_v30 = vadd.f32 %v11100_v15, %v1312_v17  ;;  %v11108_v7 = vmul.f32 %v10494_v49, %v557_v42 }
 0x10d   : > { %9420 = vrot.lane.b32.xlu1 %v9419_v28, %s10332_s12  ;;  %v756_v36 = vsel %vm691_vm1, %v753_v37, %v755_v16  ;;  %v758_v53 = vsel %vm691_vm1, %v755_v16, %v757_v54  ;;  %v995_v10 = vsel %vm930_vm2, %v992_v3, %v994_v5  ;;  %v11121_v11 = vmul.f32 %v10496_v50, %v557_v42 }
 0x10e   : > { %v1393_v45 = vmax.f32 %v1355_v60, 0.0  ;;  %v1394_v13 = vmax.f32 %v1356_v30, 0.0  ;;  %v836_v40 = vadd.f32 %v756_v36, %v11014_v41  ;;  %v837_v25 = vadd.f32 %v758_v53, %v605_v1  ;;  %v1458_v60 = vld [vmem:[#allocation2 + $0x80] ss:$2 sm:$0xff]  ;;  %v1460_v53 = vld [vmem:[#allocation2 + $0x90] ss:$2 sm:$0xff] }
 0x10f   : > { %v997_v37 = vsel %vm930_vm2, %v994_v5, %v996_v56  ;;  %v1231_v58 = vsel %vm1166_vm3, %v1228_v46, %v1230_v6  ;;  %v1233_v3 = vsel %vm1166_vm3, %v1230_v6, %v1232_v19  ;;  %v761_v27 = vrot.slane %v11108_v7, 1  ;;  %v562_v6 = vpop.permute.xlu0 %561 }
 0x110   : > { %1432 = vst.msk [vmem:[#allocation2 + $0xe8] sm:$0xff] %vm1402_vm4, %v1393_v45  ;;  %1433 = vst.msk [vmem:[#allocation2 + $0xf0] sm:$0xff] %vm1402_vm4, %v1394_v13  ;;  %v1077_v41 = vadd.f32 %v995_v10, %v836_v40  ;;  %v1078_v31 = vadd.f32 %v997_v37, %v837_v25  ;;  %v11137_v8 = vmul.f32 %v10498_v51, %v557_v42  ;;  %v1000_v24 = vrot.slane %v11121_v11, 2 }
 0x111   : > { %v1523_v57 = vmax.f32 %v1454_v62, %v1492_v29  ;;  %v1524_v46 = vmax.f32 %v1456_v32, %v1494_v22  ;;  %v649_v63 = vmul.f32 %v10494_v49, %v552_v38  ;;  %v886_v39 = vmul.f32 %v10496_v50, %v552_v38 }
 0x112   : > { %v1313_v26 = vadd.f32 %v1231_v58, %v1077_v41  ;;  %v1314_v20 = vadd.f32 %v1233_v3, %v1078_v31  ;;  %v607_v4 = vmul.f32 %v10500_v52, %v552_v38  ;;  %v1122_v21 = vmul.f32 %v10498_v51, %v552_v38  ;;  %v1462_v58 = vld [vmem:[#allocation2 + $0xa0] ss:$2 sm:$0xff] }
 0x113   : > { %1542 = vst.msk [vmem:[#allocation3 + $0x33] sm:$0xff] %vm1402_vm4, %v1523_v57  ;;  %v1236_v34 = vrot.slane %v11137_v8, 3  ;;  %1543 = vst.msk [vmem:[#allocation3 + $0x3b] sm:$0xff] %vm1402_vm4, %v1524_v46  ;;  %v759_v61 = vrot.slane %v649_v63, 1  ;;  %v998_v47 = vrot.slane %v886_v39, 2  ;;  %v652_v9 = vmul.f32 %v10494_v49, %v567_v55 }
 0x114   : > { %v1357_v14 = vadd.f32 %v11100_v15, %v1313_v26  ;;  %v1358_v33 = vadd.f32 %v11100_v15, %v1314_v20  ;;  %v1234_v18 = vrot.slane %v1122_v21, 3  ;;  %v11151_v42 = vmul.f32 %v10496_v50, %v567_v55  ;;  %v1500_v46 = vld [vmem:[#allocation2 + $0xa1] ss:$2 sm:$0xff]  ;;  %v1464_v63 = vld [vmem:[#allocation2 + $0xb0] ss:$2 sm:$0xff] }
 0x115   : > { %v760_v2 = vsel %vm691_vm1, %v757_v54, %v759_v61  ;;  %v762_v48 = vsel %vm691_vm1, %v759_v61, %v761_v27  ;;  %v999_v43 = vsel %vm930_vm2, %v996_v56, %v998_v47  ;;  %v610_v17 = vmul.f32 %v10500_v52, %v567_v55  ;;  %v1502_v39 = vld [vmem:[#allocation2 + $0xb1] ss:$2 sm:$0xff]  ;;  %v846_v61 = vpop.permute.xlu0 %845 }
 0x116   : > { %v1395_v1 = vmax.f32 %v1357_v14, 0.0  ;;  %v1396_v28 = vmax.f32 %v1358_v33, 0.0  ;;  %v838_v16 = vadd.f32 %v760_v2, %v11061_v44  ;;  %v839_v5 = vadd.f32 %v762_v48, %v607_v4  ;;  %v1468_v14 = vld [vmem:[#allocation2 + $0xd0] ss:$2 sm:$0xff] }
 0x117   : > { %v1001_v54 = vsel %vm930_vm2, %v998_v47, %v1000_v24  ;;  %v1235_v23 = vsel %vm1166_vm3, %v1232_v19, %v1234_v18  ;;  %v1237_v56 = vsel %vm1166_vm3, %v1234_v18, %v1236_v34  ;;  %v765_v30 = vrot.slane %v652_v9, 1  ;;  %v1466_v47 = vld [vmem:[#allocation2 + $0xc0] ss:$2 sm:$0xff]  ;;  %v1504_v9 = vld [vmem:[#allocation2 + $0xc1] ss:$2 sm:$0xff] }
 0x118   : > { %1434 = vst.msk [vmem:[#allocation2 + $0xf8] sm:$0xff] %vm1402_vm4, %v1395_v1  ;;  %1435 = vst.msk [vmem:[#allocation2 + $0x100] sm:$0xff] %vm1402_vm4, %v1396_v28  ;;  %v1079_v44 = vadd.f32 %v999_v43, %v838_v16  ;;  %v1080_v62 = vadd.f32 %v1001_v54, %v839_v5  ;;  %v1004_v29 = vrot.slane %v11151_v42, 2  ;;  %v11177_v36 = vmul.f32 %v10498_v51, %v567_v55  ;;  %v11184_v55 = vpop.permute.xlu1 %2531  ;;  %v1506_v43 = vld [vmem:[#allocation2 + $0xd1] ss:$2 sm:$0xff] }
 0x119   : > { %v609_v19 = vmul.f32 %v10500_v52, %v562_v6  ;;  %v651_v10 = vmul.f32 %v10494_v49, %v562_v6  ;;  %v888_v32 = vmul.f32 %v10496_v50, %v562_v6  ;;  %v1124_v22 = vmul.f32 %v10498_v51, %v562_v6  ;;  %v1508_v7 = vld [vmem:[#allocation2 + $0xe1] ss:$2 sm:$0xff] }
 0x11a   : > { %v1581_v45 = vld [vmem:[#allocation3 + $0x31] sm:$0xff]  ;;  %v1582_v13 = vld [vmem:[#allocation3 + $0x39] sm:$0xff]  ;;  %v1315_v40 = vadd.f32 %v1235_v23, %v1079_v44  ;;  %v1316_v25 = vadd.f32 %v1237_v56, %v1080_v62  ;;  %v1240_v38 = vrot.slane %v11177_v36, 3  ;;  %v1525_v37 = vmax.f32 %v1458_v60, %v1496_v0 }
 0x11b   : > { %v9424_v3 = vpack.i.bf16 %v1582_v13, %v1581_v45  ;;  %v763_v41 = vrot.slane %v651_v10, 1  ;;  %v1002_v31 = vrot.slane %v888_v32, 2  ;;  %v1238_v57 = vrot.slane %v1124_v22, 3  ;;  %v11221_v22 = vld [vmem:[#allocation3 + $0xa] sm:$0xff]  ;;  %v11223_v45 = vld [vmem:[#allocation3 + $0x1a] sm:$0xff] }
 0x11c   : > { %v1359_v26 = vadd.f32 %v11100_v15, %v1315_v40  ;;  %v1360_v20 = vadd.f32 %v11100_v15, %v1316_v25  ;;  %v842_v4 = vadd.f32 %v765_v30, %v610_v17  ;;  %v1526_v21 = vmax.f32 %v1460_v53, %v1498_v59  ;;  %1544 = vst.msk [vmem:[#allocation3 + $0x43] sm:$0xff] %vm1402_vm4, %v1525_v37  ;;  %v1470_v17 = vld [vmem:[#allocation2 + $0xe0] ss:$2 sm:$0xff]  ;;  %v11212_v62 = vpop.permute.xlu1 %2541  ;;  %v304_v37 = vld [vmem:[%s16537_s3 + $0x70] sm:$0xff] }
 0x11d   : > { %9425 = vrot.lane.b32.xlu0 %v9424_v3, %s10332_s12  ;;  %v764_v33 = vsel %vm691_vm1, %v761_v27, %v763_v41  ;;  %v766_v18 = vsel %vm691_vm1, %v763_v41, %v765_v30  ;;  %v1003_v2 = vsel %vm930_vm2, %v1000_v24, %v1002_v31  ;;  %v1005_v48 = vsel %vm930_vm2, %v1002_v31, %v1004_v29  ;;  %v11229_v42 = vld [vmem:[#allocation3 + $0x2a] sm:$0xff]  ;;  %v11242_v31 = vld [vmem:[#allocation3 + $0x3a] sm:$0xff] }
 0x11e   : > { %v1397_v1 = vmax.f32 %v1359_v26, 0.0  ;;  %v1398_v28 = vmax.f32 %v1360_v20, 0.0  ;;  %v840_v16 = vadd.f32 %v764_v33, %v11105_v12  ;;  %v841_v5 = vadd.f32 %v766_v18, %v609_v19  ;;  %1545 = vst.msk [vmem:[#allocation3 + $0x4b] sm:$0xff] %vm1402_vm4, %v1526_v21  ;;  %v11245_v26 = vld [vmem:[#allocation3 + $0x2] sm:$0xff]  ;;  %v11247_v20 = vld [vmem:[#allocation3 + $0x12] sm:$0xff] }
 0x11f   : > { %v1472_v27 = vld [vmem:[#allocation2 + $0xf0] ss:$2 sm:$0xff]  ;;  %v1510_v6 = vld [vmem:[#allocation2 + $0xf1] ss:$2 sm:$0xff]  ;;  %v1239_v11 = vsel %vm1166_vm3, %v1236_v34, %v1238_v57  ;;  %v1241_v24 = vsel %vm1166_vm3, %v1238_v57, %v1240_v38  ;;  %v890_v60 = vmul.f32 %v10496_v50, %v846_v61  ;;  %v1126_v0 = vmul.f32 %v10498_v51, %v846_v61 }
 0x120   : > { %1436 = vst.msk [vmem:[#allocation2 + $0x108] sm:$0xff] %vm1402_vm4, %v1397_v1  ;;  %1437 = vst.msk [vmem:[#allocation2 + $0x110] sm:$0xff] %vm1402_vm4, %v1398_v28  ;;  %v1081_v12 = vadd.f32 %v1003_v2, %v840_v16  ;;  %v1082_v54 = vadd.f32 %v1005_v48, %v841_v5  ;;  %v1527_v23 = vmax.f32 %v1462_v58, %v1500_v46  ;;  %v11382_v2 = vld [vmem:[#allocation3 + $0x13] sm:$0xff] }
 0x121   : > { %v1528_v56 = vmax.f32 %v1464_v63, %v1502_v39  ;;  %v1006_v30 = vrot.slane %v890_v60, 2  ;;  %v1242_v8 = vrot.slane %v1126_v0, 3  ;;  %v1529_v44 = vmax.f32 %v1466_v47, %v1504_v9  ;;  %v11258_v9 = vld [vmem:[#allocation3 + $0x32] sm:$0xff]  ;;  %16627 = vst [vmem:[#allocation9_spill] sm:$0xff] %v11382_v2 }
 0x122   : > { %v1530_v34 = vmax.f32 %v1468_v14, %v1506_v43  ;;  %v1317_v53 = vadd.f32 %v1239_v11, %v1081_v12  ;;  %v1318_v59 = vadd.f32 %v1241_v24, %v1082_v54  ;;  %1546 = vst.msk [vmem:[#allocation3 + $0x53] sm:$0xff] %vm1402_vm4, %v1527_v23  ;;  %v1531_v19 = vmax.f32 %v1470_v17, %v1508_v7  ;;  %v2547_v14 = vpop.permute.xlu1 %2546 }
 0x123   : > { %1547 = vst.msk [vmem:[#allocation3 + $0x5b] sm:$0xff] %vm1402_vm4, %v1528_v56  ;;  %v1532_v10 = vmax.f32 %v1472_v27, %v1510_v6  ;;  %v1007_v32 = vsel %vm930_vm2, %v1004_v29, %v1006_v30  ;;  %1548 = vst.msk [vmem:[#allocation3 + $0x63] sm:$0xff] %vm1402_vm4, %v1529_v44  ;;  %v11234_v29 = vld [vmem:[%s16537_s3 + $0x78] sm:$0xff]  ;;  %v1243_v41 = vsel %vm1166_vm3, %v1240_v38, %v1242_v8 }
 0x124   : > { %1549 = vst.msk [vmem:[#allocation3 + $0x6b] sm:$0xff] %vm1402_vm4, %v1530_v34  ;;  %v1361_v13 = vadd.f32 %v11100_v15, %v1317_v53  ;;  %v1362_v40 = vadd.f32 %v11100_v15, %v1318_v59  ;;  %v1083_v25 = vadd.f32 %v1007_v32, %v842_v4  ;;  %1550 = vst.msk [vmem:[#allocation3 + $0x73] sm:$0xff] %vm1402_vm4, %v1531_v19  ;;  %v1583_v58 = vld [vmem:[#allocation3 + $0x41] sm:$0xff]  ;;  %9139 = vmatprep.subr.mxu0 %v11234_v29  ;;  %v11305_v34 = vld [vmem:[#allocation3 + $0xb] sm:$0xff] }
 0x125   : > { %1551 = vst.msk [vmem:[#allocation3 + $0x7b] sm:$0xff] %vm1402_vm4, %v1532_v10  ;;  %v1584_v3 = vld [vmem:[#allocation3 + $0x49] sm:$0xff]  ;;  %9140 = vmatpush3.msra.mxu0 %v11234_v29  ;;  %v11270_v43 = vmul.f32 %v11212_v62, %v10494_v49  ;;  %v11274_v28 = vmul.f32 %v11184_v55, %v10494_v49  ;;  %v11278_v16 = vmul.f32 %v11184_v55, %v10496_v50 }
 0x126   : > { %v1399_v57 = vmax.f32 %v1361_v13, 0.0  ;;  %v1400_v46 = vmax.f32 %v1362_v40, 0.0  ;;  %v9429_v63 = vpack.i.bf16 %v1584_v3, %v1583_v58  ;;  %v1319_v39 = vadd.f32 %v1243_v41, %v1083_v25  ;;  %v11249_v4 = vld [vmem:[#allocation3 + $0x22] sm:$0xff]  ;;  %9141 = vmatprep.subr.mxu0 %v304_v37  ;;  %v11266_v48 = vld [vmem:[#allocation3 + $0x4a] sm:$0xff]  ;;  %v2557_v3 = vpop.permute.xlu1 %2556 }
 0x127   : > { %v1474_v21 = vld [vmem:[#allocation2 + $0x100] ss:$2 sm:$0xff]  ;;  %v1512_v36 = vld [vmem:[#allocation2 + $0x101] ss:$2 sm:$0xff]  ;;  %v11282_v5 = vmul.f32 %v11184_v55, %v10498_v51  ;;  %v11286_v7 = vmul.f32 %v11212_v62, %v10496_v50  ;;  %9142 = vmatpush3.msra.mxu0 %v304_v37  ;;  %v11289_v60 = vld [vmem:[#allocation3 + $0x42] sm:$0xff]  ;;  %v11293_v0 = vmul.f32 %v11184_v55, %v10500_v52  ;;  %v11297_v12 = vmul.f32 %v11212_v62, %v10498_v51 }
 0x128   : > { %1438 = vst.msk [vmem:[#allocation2 + $0x118] sm:$0xff] %vm1402_vm4, %v1399_v57  ;;  %1439 = vst.msk [vmem:[#allocation2 + $0x120] sm:$0xff] %vm1402_vm4, %v1400_v46  ;;  %9430 = vrot.lane.b32.xlu1 %v9429_v63, %s10332_s12  ;;  %v1363_v33 = vadd.f32 %v11100_v15, %v1319_v39  ;;  %v1533_v18 = vmax.f32 %v1474_v21, %v1512_v36  ;;  %v16549_v8 = vrot.slane %v11270_v43, 1  ;;  %v11324_v37 = vld [vmem:[#allocation3 + $0x3] sm:$0xff]  ;;  %v11326_v58 = vld [vmem:[#allocation3 + $0x1b] sm:$0xff] }
 0x129   : > { %v1585_v17 = vld [vmem:[#allocation3 + $0x51] sm:$0xff]  ;;  %v16548_v44 = vrot.slane %v11286_v7, 2  ;;  %v11308_v53 = vmul.f32 %v2547_v14, %v10494_v49  ;;  %v11311_v59 = vmul.f32 %v2547_v14, %v10496_v50  ;;  %v11314_v19 = vmul.f32 %v2547_v14, %v10498_v51 }
 0x12a   : > { %v1586_v1 = vld [vmem:[#allocation3 + $0x59] sm:$0xff]  ;;  %v1401_v27 = vmax.f32 %v1363_v33, 0.0  ;;  %v1587_v11 = vld [vmem:[#allocation3 + $0x61] sm:$0xff]  ;;  %1552 = vst.msk [vmem:[#allocation3 + $0x83] sm:$0xff] %vm1402_vm4, %v1533_v18  ;;  %v2721_v25 = vmul.f32 %v11212_v62, %v10500_v52  ;;  %v16547_v46 = vrot.slane %v11297_v12, 3  ;;  %v11336_v36 = vld [vmem:[#allocation3 + $0x2b] sm:$0xff]  ;;  %v2567_v38 = vpop.permute.xlu1 %2566 }
 0x12b   : > { %v9434_v6 = vpack.i.bf16 %v1586_v1, %v1585_v17  ;;  %v1588_v24 = vld [vmem:[#allocation3 + $0x69] sm:$0xff]  ;;  %v1589_v23 = vld [vmem:[#allocation3 + $0x71] sm:$0xff]  ;;  %v11317_v10 = vld [vmem:[#allocation3 + $0x5a] sm:$0xff]  ;;  %v16545_v63 = vrot.slane %v11308_v53, 1  ;;  %v16544_v39 = vrot.slane %v11311_v59, 2  ;;  %v16546_v21 = vrot.slane %v11314_v19, 3 }
 0x12c   : > { %v9439_v54 = vpack.i.bf16 %v1588_v24, %v1587_v11  ;;  %v1590_v56 = vld [vmem:[#allocation3 + $0x79] sm:$0xff]  ;;  %1441 = vst.msk [vmem:[#allocation2 + $0x128] sm:$0x7f] %vm1440_vm5, %v1401_v27  ;;  %v11328_v41 = vld [vmem:[#allocation3 + $0x6a] sm:$0xff]  ;;  %16624 = vst [vmem:[#allocation6_spill] sm:$0xff] %v11336_v36  ;;  %v11343_v1 = vmul.f32 %v2547_v14, %v10500_v52  ;;  %v11346_v27 = vmul.f32 %v2557_v3, %v10494_v49  ;;  %v16641_v36 = vrot.slane %v11282_v5, 3 }
 0x12d   : > { %9435 = vrot.lane.b32.xlu0 %v9434_v6, %s10332_s12  ;;  %v9444_v55 = vpack.i.bf16 %v1590_v56, %v1589_v23  ;;  %v11330_v57 = vld [vmem:[#allocation3 + $0x7a] sm:$0xff]  ;;  %v11349_v6 = vmul.f32 %v2557_v3, %v10496_v50  ;;  %v11359_v23 = vld [vmem:[#allocation3 + $0x62] sm:$0xff]  ;;  %v11361_v14 = vld [vmem:[#allocation3 + $0x72] sm:$0xff]  ;;  %v2839_v56 = vsel %vm691_vm1, %v16549_v8, %v16545_v63  ;;  %v3073_v35 = vsel %vm930_vm2, %v16548_v44, %v16544_v39 }
 0x12e   : > { %9440 = vrot.lane.b32.xlu1 %v9439_v54, %s10332_s12  ;;  %v11338_v62 = vld [vmem:[#allocation3 + $0x3b] sm:$0xff]  ;;  %v11357_v54 = vld [vmem:[#allocation3 + $0x52] sm:$0xff]  ;;  %v2948_v30 = vadd.f32 %v2839_v56, %v2721_v25  ;;  %v3304_v47 = vsel %vm1166_vm3, %v16547_v46, %v16546_v21  ;;  %v2537_v25 = vpop.permute.xlu0 %2536  ;;  %v11411_v44 = vmul.f32 %v2567_v38, %v10494_v49  ;;  %v11424_v17 = vld [vmem:[#allocation3 + $0x43] sm:$0xff]  ;;  %v11436_v32 = vmul.f32 %v2567_v38, %v10500_v52 }
 0x12f   : > { %16625 = vst [vmem:[#allocation7_spill] sm:$0xff] %v11338_v62  ;;  %v1476_v33 = vld [vmem:[#allocation2 + $0x110] ss:$2 sm:$0xff]  ;;  %v1514_v18 = vld [vmem:[#allocation2 + $0x111] ss:$2 sm:$0xff]  ;;  %v11354_v11 = vld [vmem:[%s16537_s3 + $0x68] sm:$0xff]  ;;  %v2758_v13 = vmul.f32 %v2537_v25, %v10494_v49  ;;  %v2990_v21 = vmul.f32 %v2537_v25, %v10496_v50  ;;  %v3221_v40 = vmul.f32 %v2537_v25, %v10498_v51 }
 0x130   : > { %16626 = vst [vmem:[#allocation8_spill] sm:$0xff] %v11354_v11  ;;  %v1534_v24 = vmax.f32 %v1476_v33, %v1514_v18  ;;  %9143 = vmatprep.subr.mxu0 %v11354_v11  ;;  %v11393_v18 = vld [vmem:[#allocation3 + $0x23] sm:$0xff]  ;;  %v11397_v56 = vld [vmem:[#allocation3 + $0x33] sm:$0xff]  ;;  %v11399_v61 = vld [vmem:[#allocation3 + $0x4b] sm:$0xff]  ;;  %v3184_v63 = vadd.f32 %v3073_v35, %v2948_v30  ;;  %v11405_v33 = vmul.f32 %v2557_v3, %v10500_v52 }
 0x131   : > { %9445 = vrot.lane.b32.xlu0 %v9444_v55, %s10332_s12  ;;  %v11374_v55 = vmul.f32 %v2557_v3, %v10498_v51  ;;  %16628 = vst [vmem:[#allocation10_spill] sm:$0xff] %v11393_v18  ;;  %16629 = vst [vmem:[#allocation11_spill] sm:$0xff] %v11397_v56  ;;  %9144 = vmatpush3.msra.mxu0 %v11354_v11  ;;  %v11417_v35 = vld [vmem:[%s16537_s3 + $0x60] sm:$0xff]  ;;  %v11422_v30 = vld [vmem:[%s16537_s3 + $0x58] sm:$0xff]  ;;  %v3299_v62 = vrot.slane %v3221_v40, 3 }
 0x132   : > { %1553 = vst.msk [vmem:[#allocation3 + $0x8b] sm:$0xff] %vm1402_vm4, %v1534_v24  ;;  %16630 = vst [vmem:[#allocation12_spill] sm:$0xff] %v11399_v61  ;;  %v3415_v3 = vadd.f32 %v3304_v47, %v3184_v63  ;;  %9145 = vmatprep.subr.mxu0 %v11417_v35  ;;  %v11439_v47 = vmul.f32 %v2567_v38, %v10496_v50  ;;  %v2834_v63 = vrot.slane %v2758_v13, 1  ;;  %v11446_v56 = vld [vmem:[#allocation3 + $0x53] sm:$0xff]  ;;  %v11452_v8 = vld [vmem:[%s16537_s3 + $0x50] sm:$0xff] }
 0x133   : > { %v1478_v24 = vld [vmem:[#allocation2 + $0x120] ss:$2 sm:$0x7f]  ;;  %v1516_v39 = vld [vmem:[#allocation2 + $0x121] ss:$2 sm:$0x7f]  ;;  %9146 = vmatpush3.msra.mxu0 %v11417_v35 }
 0x134   : > { %v1535_v46 = vmax.f32 %v1478_v24, %v1516_v39  ;;  %16631 = vst [vmem:[#allocation13_spill] sm:$0xff] %v11417_v35  ;;  %16632 = vst [vmem:[#allocation14_spill] sm:$0xff] %v11422_v30  ;;  %v11426_v39 = vld [vmem:[#allocation3 + $0x5b] sm:$0xff]  ;;  %v2720_v24 = vmul.f32 %v2537_v25, %v10500_v52  ;;  %v3453_v11 = vadd.f32 %v11100_v15, %v3415_v3  ;;  %9147 = vmatprep.subr.mxu0 %v11422_v30  ;;  %v11483_v2 = vld [vmem:[#allocation3 + $0x63] sm:$0xff] }
 0x135   : > { %16633 = vst [vmem:[#allocation15_spill] sm:$0xff] %v11424_v17  ;;  %16634 = vst [vmem:[#allocation16_spill] sm:$0xff] %v11426_v39  ;;  %v11444_v25 = vmul.f32 %v2567_v38, %v10498_v51  ;;  %v16636_v3 = vrot.slane %v11274_v28, 1  ;;  %v16637_v17 = vrot.slane %v11270_v43, 1  ;;  %9148 = vmatpush3.msra.mxu0 %v11422_v30  ;;  %v11469_v61 = vld [vmem:[%s16537_s3 + $0x48] sm:$0xff]  ;;  %v1591_v13 = vld [vmem:[#allocation3 + $0x81] sm:$0xff] }
 0x136   : > { %1554 = vst.msk [vmem:[#allocation3 + $0x93] sm:$0x7f] %vm1440_vm5, %v1535_v46  ;;  %16635 = vst [vmem:[#allocation17_spill] sm:$0xff] %v11446_v56  ;;  %v3068_v46 = vrot.slane %v2990_v21, 2  ;;  %v11463_v21 = vld [vmem:[#allocation3 + $0x6b] sm:$0xff]  ;;  %v3491_v35 = vmax.f32 %v3453_v11, 0.0  ;;  %9149 = vmatprep.subr.mxu0 %v11452_v8  ;;  %v3300_v11 = vsel %vm1166_vm3, %v16641_v36, %v3299_v62 }
 0x137   : > { %v2835_v38 = vsel %vm691_vm1, %v16636_v3, %v2834_v63  ;;  %v2837_v40 = vsel %vm691_vm1, %v2834_v63, %v16637_v17  ;;  %16638 = vst [vmem:[#allocation18_spill] sm:$0xff] %v11469_v61  ;;  %v16639_v3 = vrot.slane %v11278_v16, 2  ;;  %v16640_v30 = vrot.slane %v11286_v7, 2  ;;  %9150 = vmatpush3.msra.mxu0 %v11452_v8  ;;  %v11496_v5 = vld [vmem:[%s16537_s3 + $0x40] sm:$0xff]  ;;  %v11548_v63 = vld [vmem:[#allocation3 + $0x9a] sm:$0x3] }
 0x138   : > { %v2946_v28 = vadd.f32 %v2835_v38, %v11293_v0  ;;  %v2947_v56 = vadd.f32 %v2837_v40, %v2720_v24  ;;  %3529 = vst.msk [vmem:[#allocation2 + $0x10] sm:$0xff] %vm1402_vm4, %v3491_v35  ;;  %9151 = vmatprep.subr.mxu0 %v11469_v61  ;;  %16643 = vst [vmem:[#allocation19_spill] sm:$0xff] %v11496_v5  ;;  %v11509_v35 = vld [vmem:[%s16537_s3 + $0x38] sm:$0xff] }
 0x139   : > { %v1592_v18 = vld [vmem:[#allocation3 + $0x89] sm:$0xff]  ;;  %v3069_v43 = vsel %vm930_vm2, %v16639_v3, %v3068_v46  ;;  %v3071_v39 = vsel %vm930_vm2, %v3068_v46, %v16640_v30  ;;  %v2577_v30 = vpop.permute.xlu1 %2576  ;;  %v2552_v46 = vpop.permute.xlu0 %2551  ;;  %9152 = vmatpush3.msra.mxu0 %v11469_v61  ;;  %v16649_v61 = vrot.slane %v11314_v19, 3 }
 0x13a   : > { %v9449_v17 = vpack.i.bf16 %v1592_v18, %v1591_v13  ;;  %v3182_v16 = vadd.f32 %v3069_v43, %v2946_v28  ;;  %v3183_v0 = vadd.f32 %v3071_v39, %v2947_v56  ;;  %v16642_v18 = vrot.slane %v11297_v12, 3  ;;  %9153 = vmatprep.subr.mxu0 %v11496_v5 }
 0x13b   : > { %v11501_v12 = vmul.f32 %v2577_v30, %v10494_v49  ;;  %v2761_v56 = vmul.f32 %v2552_v46, %v10494_v49  ;;  %v2993_v28 = vmul.f32 %v2552_v46, %v10496_v50  ;;  %v3224_v3 = vmul.f32 %v2552_v46, %v10498_v51  ;;  %9154 = vmatpush3.msra.mxu0 %v11496_v5 }
 0x13c   : > { %v3302_v24 = vsel %vm1166_vm3, %v3299_v62, %v16642_v18  ;;  %9450 = vrot.lane.b32.xlu1 %v9449_v17, %s10332_s12  ;;  %v2723_v62 = vmul.f32 %v2552_v46, %v10500_v52  ;;  %v3413_v38 = vadd.f32 %v3300_v11, %v3182_v16  ;;  %v11515_v17 = vmul.f32 %v2577_v30, %v10500_v52 }
 0x13d   : > { %v1593_v39 = vld [vmem:[#allocation3 + $0x91] sm:$0xff]  ;;  %v1594_v13 = vld [vmem:[#allocation3 + $0x99] sm:$0x3]  ;;  %v3414_v40 = vadd.f32 %v3302_v24, %v3183_v0  ;;  %v11518_v18 = vmul.f32 %v2577_v30, %v10496_v50  ;;  %v2840_v7 = vrot.slane %v2761_v56, 1  ;;  %v3074_v16 = vrot.slane %v2993_v28, 2  ;;  %9155 = vmatprep.subr.mxu0 %v11509_v35  ;;  %v11527_v24 = vld [vmem:[%s16537_s3 + $0x30] sm:$0xff]  ;;  %v2587_v56 = vpop.permute.xlu1 %2586  ;;  %v2562_v5 = vpop.permute.xlu0 %2561 }
 0x13e   : > { %v9454_v43 = vpack.i.bf16 %v1594_v13, %v1593_v39  ;;  %v3451_v36 = vadd.f32 %v11100_v15, %v3413_v38  ;;  %v3305_v0 = vrot.slane %v3224_v3, 3  ;;  %v16644_v46 = vpack.i.bf16 %v11221_v22, %v11245_v26  ;;  %v11544_v3 = vld [vmem:[#allocation3 + $0x8a] sm:$0xff]  ;;  %9156 = vmatpush3.msra.mxu0 %v11509_v35 }
 0x13f   : > { %v3452_v11 = vadd.f32 %v11100_v15, %v3414_v40  ;;  %v11536_v39 = vmul.f32 %v2577_v30, %v10498_v51  ;;  %v16645_v13 = vrot.slane %v11308_v53, 1  ;;  %v16646_v40 = vrot.slane %v11346_v27, 1  ;;  %9157 = vmatprep.subr.mxu0 %v11527_v24 }
 0x140   : > { %9455 = vrot.lane.b32.xlu0 %v9454_v43, %s10332_s12  ;;  %9460 = vrot.lane.b32.xlu1 %v16644_v46, %s10333_s16  ;;  %v11546_v43 = vld [vmem:[#allocation3 + $0x92] sm:$0xff]  ;;  %v3489_v22 = vmax.f32 %v3451_v36, 0.0  ;;  %v16647_v53 = vrot.slane %v11311_v59, 2  ;;  %v3306_v36 = vsel %vm1166_vm3, %v16649_v61, %v3305_v0  ;;  %v11575_v61 = vmul.f32 %v2587_v56, %v10494_v49 }
 0x141   : > { %v2841_v38 = vsel %vm691_vm1, %v16645_v13, %v2840_v7  ;;  %v2843_v28 = vsel %vm691_vm1, %v2840_v7, %v16646_v40  ;;  %v3490_v26 = vmax.f32 %v3452_v11, 0.0  ;;  %v16648_v7 = vrot.slane %v11349_v6, 2  ;;  %v11568_v59 = vld [vmem:[%s16537_s3 + $0x28] sm:$0xff]  ;;  %9158 = vmatpush3.msra.mxu0 %v11527_v24 }
 0x142   : > { %v2949_v46 = vadd.f32 %v2841_v38, %v11343_v1  ;;  %v2950_v30 = vadd.f32 %v2843_v28, %v2723_v62  ;;  %v3075_v13 = vsel %vm930_vm2, %v16647_v53, %v3074_v16  ;;  %v16650_v11 = vrot.slane %v11374_v55, 3  ;;  %v11570_v62 = vld [vmem:[#allocation3 + $0x82] sm:$0xff]  ;;  %3527 = vst.msk [vmem:[#allocation2] sm:$0xff] %vm1402_vm4, %v3489_v22  ;;  %9159 = vmatprep.subr.mxu0 %v11568_v59 }
 0x143   : > { %v3077_v40 = vsel %vm930_vm2, %v3074_v16, %v16648_v7  ;;  %3528 = vst.msk [vmem:[#allocation2 + $0x8] sm:$0xff] %vm1402_vm4, %v3490_v26  ;;  %v16651_v38 = vpack.i.bf16 %v11223_v45, %v11247_v20  ;;  %v16652_v28 = vpack.i.bf16 %v11229_v42, %v11249_v4  ;;  %v11598_v45 = vld [vmem:[%s16537_s3 + $0x20] sm:$0xff]  ;;  %v11601_v42 = vmul.f32 %v2587_v56, %v10500_v52 }
 0x144   : > { %v3308_v1 = vsel %vm1166_vm3, %v3305_v0, %v16650_v11  ;;  %v3185_v19 = vadd.f32 %v3075_v13, %v2949_v46  ;;  %v3186_v16 = vadd.f32 %v3077_v40, %v2950_v30  ;;  %v11578_v0 = vmul.f32 %v2587_v56, %v10496_v50  ;;  %9160 = vmatpush3.msra.mxu0 %v11568_v59 }
 0x145   : > { %9465 = vrot.lane.b32.xlu0 %v16651_v38, %s10333_s16  ;;  %9470 = vrot.lane.b32.xlu1 %v16652_v28, %s10333_s16  ;;  %v11604_v4 = vmul.f32 %v2587_v56, %v10498_v51  ;;  %v2725_v13 = vmul.f32 %v2562_v5, %v10500_v52  ;;  %v2763_v7 = vmul.f32 %v2562_v5, %v10494_v49  ;;  %v2572_v38 = vpop.permute.xlu0 %2571  ;;  %v11622_v28 = vld [vmem:[%s16537_s3 + $0x18] sm:$0xff] }
 0x146   : > { %v3416_v20 = vadd.f32 %v3306_v36, %v3185_v19  ;;  %v3417_v53 = vadd.f32 %v3308_v1, %v3186_v16  ;;  %v2995_v40 = vmul.f32 %v2562_v5, %v10496_v50  ;;  %v3226_v11 = vmul.f32 %v2562_v5, %v10498_v51  ;;  %v11616_v16 = vpop.permute.xlu1 %2596  ;;  %9161 = vmatprep.subr.mxu0 %v11598_v45 }
 0x147   : > { %v16653_v5 = vpack.i.bf16 %v11242_v31, %v11258_v9  ;;  %v11634_v30 = vmul.f32 %v11616_v16, %v10494_v49  ;;  %v11639_v31 = vmul.f32 %v11616_v16, %v10496_v50  ;;  %9162 = vmatpush3.msra.mxu0 %v11598_v45 }
 0x148   : > { %v3454_v36 = vadd.f32 %v11100_v15, %v3416_v20  ;;  %v3455_v1 = vadd.f32 %v11100_v15, %v3417_v53  ;;  %v16654_v20 = vpack.i.bf16 %v11266_v48, %v11289_v60  ;;  %v2844_v53 = vrot.slane %v2763_v7, 1  ;;  %9163 = vmatprep.subr.mxu0 %v11622_v28 }
 0x149   : > { %9475 = vrot.lane.b32.xlu0 %v16653_v5, %s10333_s16  ;;  %v3078_v56 = vrot.slane %v2995_v40, 2  ;;  %v3309_v19 = vrot.slane %v3226_v11, 3  ;;  %v16655_v60 = vrot.slane %v11346_v27, 1  ;;  %v16656_v40 = vrot.slane %v11411_v44, 1  ;;  %v11658_v27 = vld [vmem:[%s16537_s3 + $0x10] sm:$0xff]  ;;  %9164 = vmatpush3.msra.mxu0 %v11622_v28 }
 0x14a   : > { %9480 = vrot.lane.b32.xlu1 %v16654_v20, %s10333_s16  ;;  %v3492_v26 = vmax.f32 %v3454_v36, 0.0  ;;  %v3493_v46 = vmax.f32 %v3455_v1, 0.0  ;;  %v3565_v9 = vld [vmem:[#allocation2] ss:$2 sm:$0xff]  ;;  %v3584_v48 = vld [vmem:[#allocation2 + $0x1] ss:$2 sm:$0xff]  ;;  %9165 = vmatprep.subr.mxu0 %v11658_v27 }
 0x14b   : > { %v2845_v7 = vsel %vm691_vm1, %v16655_v60, %v2844_v53  ;;  %v2847_v11 = vsel %vm691_vm1, %v2844_v53, %v16656_v40  ;;  %v16657_v36 = vrot.slane %v11349_v6, 2  ;;  %v16658_v5 = vrot.slane %v11439_v47, 2  ;;  %9166 = vmatpush3.msra.mxu0 %v11658_v27 }
 0x14c   : > { %v3603_v60 = vmax.f32 %v3565_v9, %v3584_v48  ;;  %3530 = vst.msk [vmem:[#allocation2 + $0x18] sm:$0xff] %vm1402_vm4, %v3492_v26  ;;  %3531 = vst.msk [vmem:[#allocation2 + $0x20] sm:$0xff] %vm1402_vm4, %v3493_v46  ;;  %v2951_v6 = vadd.f32 %v2845_v7, %v11405_v33  ;;  %v2952_v53 = vadd.f32 %v2847_v11, %v2725_v13  ;;  %v16661_v46 = vrot.slane %v11374_v55, 3  ;;  %v11684_v11 = vld [vmem:[#allocation3] sm:$0xff] }
 0x14d   : > { %v3079_v1 = vsel %vm930_vm2, %v16657_v36, %v3078_v56  ;;  %v3081_v20 = vsel %vm930_vm2, %v3078_v56, %v16658_v5  ;;  %v11665_v40 = vmul.f32 %v11616_v16, %v10498_v51  ;;  %v16659_v56 = vpack.i.bf16 %v11317_v10, %v11357_v54  ;;  %v11686_v10 = vld [vmem:[#allocation3 + $0x8] sm:$0xff] }
 0x14e   : > { %v16660_v26 = vpack.i.bf16 %v11328_v41, %v11359_v23  ;;  %v3310_v33 = vsel %vm1166_vm3, %v16661_v46, %v3309_v19  ;;  %v16662_v13 = vrot.slane %v11444_v25, 3  ;;  %v2727_v7 = vmul.f32 %v2572_v38, %v10500_v52  ;;  %v11691_v41 = vld [vmem:[%s16537_s3 + $0x8] sm:$0xff]  ;;  %3622 = vst.msk [vmem:[#allocation3 + $0x3] sm:$0xff] %vm1402_vm4, %v3603_v60  ;;  %v11706_v60 = vld [vmem:[%s16537_s3] sm:$0xff] }
 0x14f   : > { %9485 = vrot.lane.b32.xlu0 %v16659_v56, %s10333_s16  ;;  %v3187_v54 = vadd.f32 %v3079_v1, %v2951_v6  ;;  %v3188_v23 = vadd.f32 %v3081_v20, %v2952_v53  ;;  %v2765_v55 = vmul.f32 %v2572_v38, %v10494_v49  ;;  %v2997_v36 = vmul.f32 %v2572_v38, %v10496_v50 }
 0x150   : > { %9490 = vrot.lane.b32.xlu1 %v16660_v26, %s10333_s16  ;;  %v3312_v9 = vsel %vm1166_vm3, %v3309_v19, %v16662_v13  ;;  %v2582_v19 = vpop.permute.xlu0 %2581  ;;  %v3228_v5 = vmul.f32 %v2572_v38, %v10498_v51  ;;  %9167 = vmatprep.subr.mxu0 %v11691_v41  ;;  %v16663_v38 = vpack.i.bf16 %v11330_v57, %v11361_v14  ;;  %v16665_v48 = vrot.slane %v11411_v44, 1 }
 0x151   : > { %v2729_v56 = vmul.f32 %v2582_v19, %v10500_v52  ;;  %v2767_v26 = vmul.f32 %v2582_v19, %v10494_v49  ;;  %v2999_v46 = vmul.f32 %v2582_v19, %v10496_v50  ;;  %v3418_v1 = vadd.f32 %v3310_v33, %v3187_v54  ;;  %9168 = vmatpush3.msra.mxu0 %v11691_v41 }
 0x152   : > { %v3419_v20 = vadd.f32 %v3312_v9, %v3188_v23  ;;  %v2848_v6 = vrot.slane %v2765_v55, 1  ;;  %v3082_v53 = vrot.slane %v2997_v36, 2  ;;  %v16664_v13 = vpack.i.bf16 %v11544_v3, %v11570_v62  ;;  %9169 = vmatprep.subr.mxu0 %v11706_v60 }
 0x153   : > { %9495 = vrot.lane.b32.xlu0 %v16663_v38, %s10333_s16  ;;  %v3313_v33 = vrot.slane %v3228_v5, 3  ;;  %v2852_v9 = vrot.slane %v2767_v26, 1  ;;  %v3086_v54 = vrot.slane %v2999_v46, 2  ;;  %v3230_v23 = vmul.f32 %v2582_v19, %v10498_v51  ;;  %v3566_v3 = vld [vmem:[#allocation2 + $0x10] ss:$2 sm:$0xff]  ;;  %9170 = vmatpush3.msra.mxu0 %v11706_v60 }
 0x154   : > { %9500 = vrot.lane.b32.xlu1 %v16664_v13, %s10333_s16  ;;  %v3456_v55 = vadd.f32 %v11100_v15, %v3418_v1  ;;  %v3457_v36 = vadd.f32 %v11100_v15, %v3419_v20  ;;  %v2849_v22 = vsel %vm691_vm1, %v16665_v48, %v2848_v6  ;;  %v16666_v57 = vrot.slane %v11501_v12, 1  ;;  %v3585_v62 = vld [vmem:[#allocation2 + $0x11] ss:$2 sm:$0xff]  ;;  %9201 = vmatprep.subr.mxu0 %v11234_v29  ;;  %v16679_v29 = vld [vmem:[#allocation9_spill] sm:$0xff] }
 0x155   : > { %v2953_v5 = vadd.f32 %v2849_v22, %v11436_v32  ;;  %v16667_v19 = vrot.slane %v11439_v47, 2  ;;  %v16668_v1 = vrot.slane %v11518_v18, 2  ;;  %v3604_v48 = vmax.f32 %v3566_v3, %v3585_v62 }
 0x156   : > { %v2851_v14 = vsel %vm691_vm1, %v2848_v6, %v16666_v57  ;;  %v3494_v20 = vmax.f32 %v3456_v55, 0.0  ;;  %v3495_v6 = vmax.f32 %v3457_v36, 0.0  ;;  %v16669_v38 = vrot.slane %v11444_v25, 3  ;;  %v11749_v36 = vld [vmem:[#allocation3 + $0x10] sm:$0xff] }
 0x157   : > { %v2954_v26 = vadd.f32 %v2851_v14, %v2727_v7  ;;  %v3083_v46 = vsel %vm930_vm2, %v16667_v19, %v3082_v53  ;;  %v3085_v44 = vsel %vm930_vm2, %v3082_v53, %v16668_v1  ;;  %v16670_v32 = vpack.i.bf16 %v11548_v63, %v11546_v43  ;;  %3623 = vst.msk [vmem:[#allocation3 + $0xb] sm:$0xff] %vm1402_vm4, %v3604_v48 }
 0x158   : > { %v3314_v13 = vsel %vm1166_vm3, %v16669_v38, %v3313_v33  ;;  %v16671_v47 = vpack.i.bf16 %v11305_v34, %v11324_v37  ;;  %v3189_v22 = vadd.f32 %v3083_v46, %v2953_v5  ;;  %v16672_v53 = vrot.slane %v11536_v39, 3  ;;  %3532 = vst.msk [vmem:[#allocation2 + $0x28] sm:$0xff] %vm1402_vm4, %v3494_v20  ;;  %3533 = vst.msk [vmem:[#allocation2 + $0x30] sm:$0xff] %vm1402_vm4, %v3495_v6 }
 0x159   : > { %9505 = vrot.lane.b32.xlu0 %v16670_v32, %s10333_s16  ;;  %v3190_v7 = vadd.f32 %v3085_v44, %v2954_v26  ;;  %v3317_v55 = vrot.slane %v3230_v23, 3  ;;  %v16673_v63 = vmov %v16666_v57  ;;  %v16674_v34 = vrot.slane %v11575_v61, 1  ;;  %v2592_v26 = vpop.permute.xlu0 %2591  ;;  %v11809_v61 = vld [vmem:[%s16536_s2] ss:$0 sm:$0xff] }
 0x15a   : > { %9510 = vrot.lane.b32.xlu1 %v16671_v47, %s10334_s9  ;;  %v3316_v25 = vsel %vm1166_vm3, %v3313_v33, %v16672_v53  ;;  %v2853_v43 = vsel %vm691_vm1, %v16673_v63, %v2852_v9  ;;  %v16675_v57 = vmov %v16668_v1  ;;  %v16676_v33 = vrot.slane %v11578_v0, 2 }
 0x15b   : > { %v2855_v37 = vsel %vm691_vm1, %v2852_v9, %v16674_v34  ;;  %v3087_v14 = vsel %vm930_vm2, %v16675_v57, %v3086_v54  ;;  %v3420_v3 = vadd.f32 %v3314_v13, %v3189_v22  ;;  %v3421_v12 = vadd.f32 %v3316_v25, %v3190_v7  ;;  %v16686_v57 = vld [vmem:[#allocation7_spill] sm:$0xff] }
 0x15c   : > { %v3089_v23 = vsel %vm930_vm2, %v3086_v54, %v16676_v33  ;;  %v2955_v62 = vadd.f32 %v2853_v43, %v11515_v17  ;;  %v2956_v5 = vadd.f32 %v2855_v37, %v2729_v56  ;;  %v16677_v9 = vmov %v16672_v53  ;;  %v16681_v17 = vld [vmem:[#allocation6_spill] sm:$0xff] }
 0x15d   : > { %v3318_v18 = vsel %vm1166_vm3, %v16677_v9, %v3317_v55  ;;  %v16678_v19 = vrot.slane %v11604_v4, 3  ;;  %v2731_v54 = vmul.f32 %v2592_v26, %v10500_v52  ;;  %v2769_v1 = vmul.f32 %v2592_v26, %v10494_v49  ;;  %v16682_v56 = vld [vmem:[#allocation10_spill] sm:$0xff] }
 0x15e   : > { %v16680_v44 = vpack.i.bf16 %v11326_v58, %v16679_v29  ;;  %v16683_v48 = vpack.i.bf16 %v16681_v17, %v16682_v56  ;;  %v3092_v39 = vrot.slane %v11639_v31, 2  ;;  %v3458_v20 = vadd.f32 %v11100_v15, %v3420_v3  ;;  %v16690_v3 = vld [vmem:[#allocation15_spill] sm:$0xff] }
 0x15f   : > { %v3320_v46 = vsel %vm1166_vm3, %v3317_v55, %v16678_v19  ;;  %v3459_v6 = vadd.f32 %v11100_v15, %v3421_v12  ;;  %v3191_v38 = vadd.f32 %v3087_v14, %v2955_v62  ;;  %v3192_v13 = vadd.f32 %v3089_v23, %v2956_v5  ;;  %v16687_v14 = vld [vmem:[#allocation11_spill] sm:$0xff]  ;;  %v16689_v23 = vld [vmem:[#allocation12_spill] sm:$0xff]  ;;  %v3567_v62 = vld [vmem:[#allocation2 + $0x20] ss:$2 sm:$0xff] }
 0x160   : > { %9515 = vrot.lane.b32.xlu0 %v16680_v44, %s10334_s9  ;;  %9520 = vrot.lane.b32.xlu1 %v16683_v48, %s10334_s9  ;;  %v2856_v32 = vrot.slane %v2769_v1, 1  ;;  %v3001_v47 = vmul.f32 %v2592_v26, %v10496_v50  ;;  %v3232_v22 = vmul.f32 %v2592_v26, %v10498_v51  ;;  %v3323_v58 = vrot.slane %v11665_v40, 3  ;;  %v3586_v5 = vld [vmem:[#allocation2 + $0x21] ss:$2 sm:$0xff] }
 0x161   : > { %v3496_v7 = vmax.f32 %v3458_v20, 0.0  ;;  %v3497_v53 = vmax.f32 %v3459_v6, 0.0  ;;  %v3422_v25 = vadd.f32 %v3318_v18, %v3191_v38  ;;  %v3423_v55 = vadd.f32 %v3320_v46, %v3192_v13  ;;  %v1630_v38 = vld [vmem:[#allocation3 + $0x7b] sm:$0xff]  ;;  %v1632_v13 = vld [vmem:[#allocation3 + $0x8b] sm:$0xff] }
 0x162   : > { %v16684_v63 = vmov %v16674_v34  ;;  %v16685_v34 = vrot.slane %v11634_v30, 1  ;;  %v3090_v37 = vrot.slane %v3001_v47, 2  ;;  %v16688_v33 = vpack.i.bf16 %v16686_v57, %v16687_v14  ;;  %v16694_v47 = vld [vmem:[#allocation16_spill] sm:$0xff]  ;;  %v1633_v14 = vld [vmem:[#allocation3 + $0x93] sm:$0xff] }
 0x163   : > { %v2857_v43 = vsel %vm691_vm1, %v16684_v63, %v2856_v32  ;;  %v16691_v12 = vpack.i.bf16 %v16689_v23, %v16690_v3  ;;  %3534 = vst.msk [vmem:[#allocation2 + $0x38] sm:$0xff] %vm1402_vm4, %v3496_v7  ;;  %3535 = vst.msk [vmem:[#allocation2 + $0x40] sm:$0xff] %vm1402_vm4, %v3497_v53  ;;  %v3460_v26 = vadd.f32 %v11809_v61, %v3422_v25  ;;  %v3321_v19 = vrot.slane %v3232_v22, 3  ;;  %v16695_v22 = vld [vmem:[#allocation17_spill] sm:$0xff]  ;;  %v1631_v63 = vld [vmem:[#allocation3 + $0x83] sm:$0xff] }
 0x164   : > { %v2859_v15 = vsel %vm691_vm1, %v2856_v32, %v16685_v34  ;;  %9525 = vrot.lane.b32.xlu0 %v16688_v33, %s10334_s9  ;;  %v2957_v9 = vadd.f32 %v2857_v43, %v11601_v42  ;;  %v3605_v46 = vmax.f32 %v3567_v62, %v3586_v5  ;;  %v3461_v1 = vadd.f32 %v11809_v61, %v3423_v55  ;;  %v1629_v55 = vld [vmem:[#allocation3 + $0x73] sm:$0xff]  ;;  %v11844_v62 = vld [vmem:[#allocation3 + $0x20] sm:$0xff] }
 0x165   : > { %9530 = vrot.lane.b32.xlu1 %v16691_v12, %s10334_s9  ;;  %v2958_v18 = vadd.f32 %v2859_v15, %v2731_v54  ;;  %v16692_v29 = vrot.slane %v11578_v0, 2  ;;  %v3093_v17 = vsel %vm930_vm2, %v3090_v37, %v3092_v39  ;;  %v3498_v56 = vmax.f32 %v3460_v26, 0.0  ;;  %v11823_v54 = vld [vmem:[#allocation3 + $0x18] sm:$0xff]  ;;  %v2505_v12 = vld [vmem:[%s10392_s30 + $0x78] sm:$0xff] }
 0x166   : > { %v16693_v6 = vrot.slane %v11604_v4, 3  ;;  %v3499_v32 = vmax.f32 %v3461_v1, 0.0  ;;  %v3324_v0 = vsel %vm1166_vm3, %v3321_v19, %v3323_v58  ;;  %3624 = vst.msk [vmem:[#allocation3 + $0x13] sm:$0xff] %vm1402_vm4, %v3605_v46  ;;  %v16696_v7 = vpack.i.bf16 %v16694_v47, %v16695_v22  ;;  %v1634_v15 = vld [vmem:[#allocation3 + $0x9b] sm:$0x3]  ;;  %v11852_v1 = vld [vmem:[#allocation3 + $0x28] sm:$0xff] }
 0x167   : > { %v3091_v44 = vsel %vm930_vm2, %v16692_v29, %v3090_v37  ;;  %v3194_v20 = vadd.f32 %v3093_v17, %v2958_v18  ;;  %v16697_v4 = vpack.i.bf16 %v11463_v21, %v11483_v2  ;;  %3536 = vst.msk [vmem:[#allocation2 + $0x48] sm:$0xff] %vm1402_vm4, %v3498_v56  ;;  %v9544_v43 = vpack.i.bf16 %v1630_v38, %v1629_v55  ;;  %v2507_v46 = vld [vmem:[%s10392_s30 + $0x88] sm:$0xff]  ;;  %v2506_v29 = vld [vmem:[%s10392_s30 + $0x80] sm:$0xff]  ;;  %v2517_v22 = vld [vmem:[%s10392_s30 + $0xd8] sm:$0xff] }
 0x168   : > { %v3193_v48 = vadd.f32 %v3091_v44, %v2957_v9  ;;  %v3322_v42 = vsel %vm1166_vm3, %v16693_v6, %v3321_v19  ;;  %9535 = vrot.lane.b32.xlu0 %v16696_v7, %s10334_s9  ;;  %3537 = vst.msk [vmem:[#allocation2 + $0x50] sm:$0xff] %vm1402_vm4, %v3499_v32  ;;  %v9549_v34 = vpack.i.bf16 %v1632_v13, %v1631_v63  ;;  %v2504_v19 = vld [vmem:[%s10392_s30 + $0x70] sm:$0xff]  ;;  %v2509_v44 = vld [vmem:[%s10392_s30 + $0x98] sm:$0xff]  ;;  %v2510_v38 = vld [vmem:[%s10392_s30 + $0xa0] sm:$0xff] }
 0x169   : > { %9540 = vrot.lane.b32.xlu1 %v16697_v4, %s10334_s9  ;;  %v3425_v25 = vadd.f32 %v3324_v0, %v3194_v20  ;;  %v9554_v5 = vpack.i.bf16 %v1634_v15, %v1633_v14  ;;  %v11857_v20 = vld [vmem:[#allocation3 + $0x30] sm:$0xff]  ;;  %v2508_v6 = vld [vmem:[%s10392_s30 + $0x90] sm:$0xff]  ;;  %v2513_v13 = vld [vmem:[%s10392_s30 + $0xb8] sm:$0xff] }
 0x16a   : > { %v3424_v53 = vadd.f32 %v3322_v42, %v3193_v48  ;;  %v3568_v33 = vld [vmem:[#allocation2 + $0x30] ss:$2 sm:$0xff]  ;;  %v3587_v2 = vld [vmem:[#allocation2 + $0x31] ss:$2 sm:$0xff]  ;;  %v2511_v42 = vld [vmem:[%s10392_s30 + $0xa8] sm:$0xff] }
 0x16b   : > { %v3463_v57 = vadd.f32 %v11809_v61, %v3425_v25  ;;  %v3606_v21 = vmax.f32 %v3568_v33, %v3587_v2  ;;  %v2512_v32 = vld [vmem:[%s10392_s30 + $0xb0] sm:$0xff]  ;;  %v2515_v0 = vld [vmem:[%s10392_s30 + $0xc8] sm:$0xff]  ;;  %v2514_v47 = vld [vmem:[%s10392_s30 + $0xc0] sm:$0xff] }
 0x16c   : > { %v3462_v37 = vadd.f32 %v11809_v61, %v3424_v53  ;;  %9545 = vrot.lane.b32.xlu0 %v9544_v43, %s10334_s9  ;;  %v2516_v7 = vld [vmem:[%s10392_s30 + $0xd0] sm:$0xff]  ;;  %v2519_v4 = vld [vmem:[%s10392_s30 + $0xe8] sm:$0xff]  ;;  %v2518_v53 = vld [vmem:[%s10392_s30 + $0xe0] sm:$0xff] }
 0x16d   : > { %9550 = vrot.lane.b32.xlu1 %v9549_v34, %s10334_s9  ;;  %v3501_v3 = vmax.f32 %v3463_v57, 0.0  ;;  %3625 = vst.msk [vmem:[#allocation3 + $0x1b] sm:$0xff] %vm1402_vm4, %v3606_v21  ;;  %v2521_v25 = vld [vmem:[%s10392_s30 + $0xf8] sm:$0xff]  ;;  %v2520_v55 = vld [vmem:[%s10392_s30 + $0xf0] sm:$0xff]  ;;  %v2523_v63 = vld [vmem:[%s10392_s30 + $0x108] sm:$0xff] }
 0x16e   : > { %v3500_v23 = vmax.f32 %v3462_v37, 0.0  ;;  %v3569_v26 = vld [vmem:[#allocation2 + $0x40] ss:$2 sm:$0xff]  ;;  %v3588_v9 = vld [vmem:[#allocation2 + $0x41] ss:$2 sm:$0xff]  ;;  %v2525_v34 = vld [vmem:[%s10392_s30 + $0x118] sm:$0xff] }
 0x16f   : > { %3539 = vst.msk [vmem:[#allocation2 + $0x60] sm:$0xff] %vm1402_vm4, %v3501_v3  ;;  %v3607_v18 = vmax.f32 %v3569_v26, %v3588_v9  ;;  %v2522_v43 = vld [vmem:[%s10392_s30 + $0x100] sm:$0xff]  ;;  %v2524_v15 = vld [vmem:[%s10392_s30 + $0x110] sm:$0xff]  ;;  %v2527_v37 = vld [vmem:[%s10392_s30 + $0x128] sm:$0xff] }
 0x170   : > { %3538 = vst.msk [vmem:[#allocation2 + $0x58] sm:$0xff] %vm1402_vm4, %v3500_v23  ;;  %9555 = vrot.lane.b32.xlu0 %v9554_v5, %s10334_s9  ;;  %v3661_v57 = vld [vmem:[#allocation3 + $0x1] sm:$0xff]  ;;  %v3662_v14 = vld [vmem:[#allocation3 + $0x9] sm:$0xff]  ;;  %v3663_v5 = vld [vmem:[#allocation3 + $0x11] sm:$0xff] }
 0x171   : > { %2606 = vperm.xlu1 %9407, %v2505_v12   ;;  %3626 = vst.msk [vmem:[#allocation3 + $0x23] sm:$0xff] %vm1402_vm4, %v3607_v18  ;;  %v9559_v33 = vpack.i.bf16 %v3662_v14, %v3661_v57  ;;  %v2526_v2 = vld [vmem:[%s10392_s30 + $0x120] sm:$0xff]  ;;  %v2528_v12 = vld [vmem:[%s10392_s30 + $0x130] sm:$0x3]  ;;  %v9411_v18 = vpop.permute.xlu1 %9410 }
 0x174   : > { %2601 = vperm.xlu0 %9408, %v2504_v19   ;;  %v3664_v26 = vld [vmem:[#allocation3 + $0x19] sm:$0xff]  ;;  %v9416_v19 = vpop.permute.xlu0 %9415 }
 0x175   : > { %2616 = vperm.xlu1 %9407, %v2507_v46   ;;  %v9564_v9 = vpack.i.bf16 %v3664_v26, %v3663_v5  ;;  %v9418_v14 = vunpack.i.h.bf16 %v9416_v19 }
 0x177   : > { %v3570_v17 = vld [vmem:[#allocation2 + $0x50] ss:$2 sm:$0xff]  ;;  %v3589_v56 = vld [vmem:[#allocation2 + $0x51] ss:$2 sm:$0xff] }
 0x178   : > { %v3608_v48 = vmax.f32 %v3570_v17, %v3589_v56  ;;  %2611 = vperm.xlu0 %9408, %v2506_v29   ;;  %v3665_v21 = vld [vmem:[#allocation3 + $0x21] sm:$0xff] }
 0x179   : > { %2626 = vperm.xlu1 %9407, %v2509_v44  }
 0x17a   : > { %3627 = vst.msk [vmem:[#allocation3 + $0x2b] sm:$0xff] %vm1402_vm4, %v3608_v48 }
 0x17c   : > { %2621 = vperm.xlu0 %9408, %v2508_v6  }
 0x17d   : > { %2636 = vperm.xlu1 %9407, %v2511_v42  }
 0x17f   : > { %v11883_v46 = vpop.permute.xlu1 %9420 }
 0x180   : > { %2631 = vperm.xlu0 %9408, %v2510_v38  }
 0x181   : > { %2646 = vperm.xlu1 %9407, %v2513_v13   ;;  %v3666_v23 = vld [vmem:[#allocation3 + $0x29] sm:$0xff] }
 0x182   : > { %v9569_v3 = vpack.i.bf16 %v3666_v23, %v3665_v21  ;;  %v9422_v23 = vunpack.i.l.bf16 %v11883_v46 }
 0x184   : > { %2641 = vperm.xlu0 %9408, %v2512_v32  }
 0x185   : > { %2656 = vperm.xlu1 %9407, %v2515_v0  }
 0x188   : > { %2651 = vperm.xlu0 %9408, %v2514_v47  }
 0x189   : > { %2666 = vperm.xlu1 %9407, %v2517_v22  }
 0x18c   : > { %2661 = vperm.xlu0 %9408, %v2516_v7  }
 0x18d   : > { %2676 = vperm.xlu1 %9407, %v2519_v4   ;;  %v9413_v4 = vunpack.i.h.bf16 %v9411_v18 }
 0x18f   : > { %v11885_v29 = vpop.permute.xlu0 %9425  ;;  %v1876_v57 = vsel %vm1402_vm4, %v11686_v10, %v9413_v4 }
 0x190   : > { %2671 = vperm.xlu0 %9408, %v2518_v53   ;;  %v9412_v53 = vunpack.i.l.bf16 %v9411_v18 }
 0x191   : > { %2686 = vperm.xlu1 %9407, %v2521_v25  }
 0x194   : > { %2681 = vperm.xlu0 %9408, %v2520_v55  }
 0x195   : > { %2696 = vperm.xlu1 %9407, %v2523_v63  }
 0x198   : > { %2691 = vperm.xlu0 %9408, %v2522_v43  }
 0x199   : > { %2706 = vperm.xlu1 %9407, %v2525_v34  }
 0x19a   : > { %v11887_v44 = vpop.permute.xlu1 %9430 }
 0x19c   : > { %2701 = vperm.xlu0 %9408, %v2524_v15  }
 0x19d   : > { %2716 = vperm.xlu1 %9407, %v2527_v37   ;;  %v1875_v37 = vsel %vm1402_vm4, %v11684_v11, %v9412_v53 }
 0x19f   : > { %v11889_v17 = vpop.permute.xlu0 %9435 }
 0x1a0   : > { %2711 = vperm.xlu0 %9408, %v2526_v2   ;;  %v11891_v56 = vpop.permute.xlu1 %9440 }
 0x1a1   : > { %9560 = vrot.lane.b32.xlu1 %v9559_v33, %s10332_s12  ;;  %v9417_v33 = vunpack.i.l.bf16 %v9416_v19 }
 0x1a3   : > { %v11893_v48 = vpop.permute.xlu0 %9445 }
 0x1a4   : > { %2986 = vperm.xlu0 %9408, %v2528_v12  }
 0x1a5   : > { %9570 = vrot.lane.b32.xlu1 %v9569_v3, %s10332_s12 }
 0x1a8   : > { %9565 = vrot.lane.b32.xlu0 %v9564_v9, %s10332_s12 }
 0x1ae   : > { %v11895_v6 = vpop.permute.xlu1 %9450 }
 0x1b2   : > { %v11897_v42 = vpop.permute.xlu0 %9455  ;;  %v9461_v38 = vpop.permute.xlu1 %9460 }
 0x1b3   : > { %v9463_v63 = vunpack.i.h.bf16 %v9461_v38  ;;  %v9462_v43 = vunpack.i.l.bf16 %v9461_v38 }
 0x1b5   : > { %v1896_v12 = vsel %vm1895_vm6, %v1875_v37, %v9462_v43  ;;  %v1897_v5 = vsel %vm1895_vm6, %v1876_v57, %v9463_v63  ;;  %v9423_v43 = vunpack.i.h.bf16 %v11883_v46  ;;  %v1878_v63 = vsel %vm1402_vm4, %v11823_v54, %v9418_v14  ;;  %v11936_v57 = vld [vmem:[%s16537_s3 + $0x78] sm:$0xff]  ;;  %v10216_v54 = vld [vmem:[%s16537_s3 + $0x70] sm:$0xff] }
 0x1b6   : > { %v1879_v37 = vsel %vm1402_vm4, %v11844_v62, %v9422_v23 }
 0x1b7   : > { %v9466_v13 = vpop.permute.xlu0 %9465  ;;  %v11899_v32 = vpop.permute.xlu1 %9470 }
 0x1b8   : > { %v9467_v3 = vunpack.i.l.bf16 %v9466_v13  ;;  %v9468_v26 = vunpack.i.h.bf16 %v9466_v13  ;;  %v9472_v18 = vunpack.i.l.bf16 %v11899_v32 }
 0x1bb   : > { %v11901_v0 = vpop.permute.xlu0 %9475 }
 0x1bc   : > { %v11903_v47 = vpop.permute.xlu1 %9480  ;;  %v9477_v62 = vunpack.i.l.bf16 %v11901_v0 }
 0x1c1   : > { %v11905_v22 = vpop.permute.xlu0 %9485 }
 0x1c2   : > { %v11907_v7 = vpop.permute.xlu1 %9490 }
 0x1c5   : > { %v11909_v25 = vpop.permute.xlu0 %9495 }
 0x1c6   : > { %v11911_v55 = vpop.permute.xlu1 %9500 }
 0x1cb   : > { %v11913_v34 = vpop.permute.xlu0 %9505 }
 0x1cc   : > { %v9511_v15 = vpop.permute.xlu1 %9510 }
 0x1cd   : > { %v9513_v2 = vunpack.i.h.bf16 %v9511_v15  ;;  %v9512_v21 = vunpack.i.l.bf16 %v9511_v15  ;;  %v1877_v15 = vsel %vm1402_vm4, %v11749_v36, %v9417_v33  ;;  %v9473_v36 = vunpack.i.h.bf16 %v11899_v32 }
 0x1ce   : > { %v1898_v13 = vsel %vm1895_vm6, %v1877_v15, %v9467_v3  ;;  %v1899_v33 = vsel %vm1895_vm6, %v1878_v63, %v9468_v26  ;;  %v1900_v3 = vsel %vm1895_vm6, %v1879_v37, %v9472_v18  ;;  %v9428_v26 = vunpack.i.h.bf16 %v11885_v29  ;;  %v16700_v63 = vld [vmem:[#allocation14_spill] sm:$0xff] }
 0x1cf   : > { %v1917_v9 = vsel %vm1916_vm7, %v1896_v12, %v9512_v21  ;;  %v1918_v11 = vsel %vm1916_vm7, %v1897_v5, %v9513_v2  ;;  %v9427_v2 = vunpack.i.l.bf16 %v11885_v29  ;;  %v16698_v5 = vld [vmem:[#allocation8_spill] sm:$0xff]  ;;  %v9478_v18 = vunpack.i.h.bf16 %v11901_v0 }
 0x1d0   : > { %9171 = vmatprep.mubr.f32.mxu0 %v1917_v9  ;;  %v9482_v29 = vunpack.i.l.bf16 %v11903_v47 }
 0x1d1   : > { %9172 = vmatmul.mubr.f32.vlgmr.msra.gmra.mxu0 %v1918_v11  ;;  %v1880_v11 = vsel %vm1402_vm4, %v11852_v1, %v9423_v43 }
 0x1d2   : > { %v9516_v38 = vpop.permute.xlu0 %9515  ;;  %v9521_v10 = vpop.permute.xlu1 %9520  ;;  %9202 = vmatpush3.msra.mxu0 %v11936_v57 }
 0x1d3   : > { %v9518_v19 = vunpack.i.h.bf16 %v9516_v38  ;;  %v9517_v4 = vunpack.i.l.bf16 %v9516_v38  ;;  %v9522_v53 = vunpack.i.l.bf16 %v9521_v10  ;;  %9203 = vmatprep.subr.mxu0 %v10216_v54  ;;  %v9523_v14 = vunpack.i.h.bf16 %v9521_v10 }
 0x1d4   : > { %9204 = vmatpush3.msra.mxu0 %v10216_v54  ;;  %v9432_v38 = vunpack.i.l.bf16 %v11887_v44  ;;  %v1901_v10 = vsel %vm1895_vm6, %v1880_v11, %v9473_v36  ;;  %v1563_v36 = vld [vmem:[#allocation3 + $0x40] sm:$0xff]  ;;  %v1565_v11 = vld [vmem:[#allocation3 + $0x50] sm:$0xff] }
 0x1d5   : > { %v1919_v46 = vsel %vm1916_vm7, %v1898_v13, %v9517_v4  ;;  %v1920_v23 = vsel %vm1916_vm7, %v1899_v33, %v9518_v19  ;;  %v1921_v12 = vsel %vm1916_vm7, %v1900_v3, %v9522_v53  ;;  %9205 = vmatprep.subr.mxu0 %v16698_v5  ;;  %v1881_v19 = vsel %vm1402_vm4, %v11857_v20, %v9427_v2  ;;  %v16699_v4 = vld [vmem:[#allocation13_spill] sm:$0xff]  ;;  %v1562_v13 = vld [vmem:[#allocation3 + $0x38] sm:$0xff] }
 0x1d6   : > { %v9526_v21 = vpop.permute.xlu0 %9525  ;;  %9174 = vmatprep.mubr.f32.mxu0 %v1919_v46  ;;  %9206 = vmatpush3.msra.mxu0 %v16698_v5  ;;  %v1922_v15 = vsel %vm1916_vm7, %v1901_v10, %v9523_v14  ;;  %v1902_v1 = vsel %vm1895_vm6, %v1881_v19, %v9477_v62  ;;  %v9433_v20 = vunpack.i.h.bf16 %v11887_v44  ;;  %v1882_v2 = vsel %vm1402_vm4, %v1562_v13, %v9428_v26  ;;  %v16702_v19 = vld [vmem:[#allocation19_spill] sm:$0xff] }
 0x1d7   : > { %v9527_v32 = vunpack.i.l.bf16 %v9526_v21  ;;  %9175 = vmatmul.mubr.f32.gmra.mxu0 %v1920_v23  ;;  %v9531_v9 = vpop.permute.xlu1 %9530  ;;  %9207 = vmatprep.subr.mxu0 %v16699_v4  ;;  %v9528_v53 = vunpack.i.h.bf16 %v9526_v21  ;;  %v9437_v46 = vunpack.i.l.bf16 %v11889_v17  ;;  %v9483_v33 = vunpack.i.h.bf16 %v11903_v47  ;;  %v1564_v47 = vld [vmem:[#allocation3 + $0x48] sm:$0xff] }
 0x1d8   : > { %9177 = vmatprep.mubr.f32.mxu0 %v1921_v12  ;;  %9208 = vmatpush3.msra.mxu0 %v16699_v4  ;;  %v9532_v43 = vunpack.i.l.bf16 %v9531_v9  ;;  %v1903_v54 = vsel %vm1895_vm6, %v1882_v2, %v9478_v18  ;;  %v1883_v62 = vsel %vm1402_vm4, %v1563_v36, %v9432_v38  ;;  %v9487_v14 = vunpack.i.l.bf16 %v11905_v22  ;;  %v16701_v12 = vld [vmem:[#allocation18_spill] sm:$0xff] }
 0x1d9   : > { %v1923_v0 = vsel %vm1916_vm7, %v1902_v1, %v9527_v32  ;;  %9209 = vmatprep.subr.mxu0 %v16700_v63  ;;  %v9533_v44 = vunpack.i.h.bf16 %v9531_v9  ;;  %v1924_v21 = vsel %vm1916_vm7, %v1903_v54, %v9528_v53  ;;  %v1904_v23 = vsel %vm1895_vm6, %v1883_v62, %v9482_v29 }
 0x1da   : > { %v9536_v37 = vpop.permute.xlu0 %9535  ;;  %9210 = vmatpush3.msra.mxu0 %v16700_v63  ;;  %v1925_v32 = vsel %vm1916_vm7, %v1904_v23, %v9532_v43  ;;  %v9438_v5 = vunpack.i.h.bf16 %v11889_v17  ;;  %v1884_v9 = vsel %vm1402_vm4, %v1564_v47, %v9433_v20  ;;  %v9442_v38 = vunpack.i.l.bf16 %v11891_v56 }
 0x1db   : > { %9178 = vmatmul.mubr.f32.gmra.mxu0 %v1922_v15  ;;  %9211 = vmatprep.subr.mxu0 %v11452_v8  ;;  %v9537_v3 = vunpack.i.l.bf16 %v9536_v37  ;;  %v11982_v26 = vpop.permute.xlu1 %9540  ;;  %v1905_v18 = vsel %vm1895_vm6, %v1884_v9, %v9483_v33  ;;  %v1885_v10 = vsel %vm1402_vm4, %v1565_v11, %v9437_v46  ;;  %v9492_v17 = vunpack.i.l.bf16 %v11907_v7 }
 0x1dc   : > { %9180 = vmatprep.mubr.f32.mxu0 %v1923_v0  ;;  %9212 = vmatpush3.msra.mxu0 %v11452_v8  ;;  %v9488_v8 = vunpack.i.h.bf16 %v11905_v22  ;;  %v9538_v4 = vunpack.i.h.bf16 %v9536_v37  ;;  %v1926_v29 = vsel %vm1916_vm7, %v1905_v18, %v9533_v44  ;;  %v1906_v53 = vsel %vm1895_vm6, %v1885_v10, %v9487_v14  ;;  %v1566_v0 = vld [vmem:[#allocation3 + $0x58] sm:$0xff]  ;;  %v1567_v37 = vld [vmem:[#allocation3 + $0x60] sm:$0xff]  ;;  %v1568_v14 = vld [vmem:[#allocation3 + $0x68] sm:$0xff] }
 0x1dd   : > { %9213 = vmatprep.subr.mxu0 %v16701_v12  ;;  %v9443_v15 = vunpack.i.h.bf16 %v11891_v56  ;;  %v9447_v1 = vunpack.i.l.bf16 %v11893_v48  ;;  %v9542_v22 = vunpack.i.l.bf16 %v11982_v26  ;;  %v1927_v43 = vsel %vm1916_vm7, %v1906_v53, %v9537_v3  ;;  %v1573_v53 = vld [vmem:[#allocation3 + $0x90] sm:$0xff] }
 0x1de   : > { %9214 = vmatpush3.msra.mxu0 %v16701_v12  ;;  %v12002_v13 = vmul.f32 %v11616_v16, %v10500_v52  ;;  %v9448_v63 = vunpack.i.h.bf16 %v11893_v48  ;;  %v12005_v20 = vpop.permute.xlu0 %9545  ;;  %v1886_v56 = vsel %vm1402_vm4, %v1566_v0, %v9438_v5  ;;  %v9452_v2 = vunpack.i.l.bf16 %v11895_v6 }
 0x1df   : > { %9181 = vmatmul.mubr.f32.gmra.mxu0 %v1924_v21  ;;  %9215 = vmatprep.subr.mxu0 %v16702_v19  ;;  %v9493_v36 = vunpack.i.h.bf16 %v11907_v7  ;;  %v1907_v46 = vsel %vm1895_vm6, %v1886_v56, %v9488_v8  ;;  %v1887_v33 = vsel %vm1402_vm4, %v1567_v37, %v9442_v38  ;;  %v9497_v16 = vunpack.i.l.bf16 %v11909_v25  ;;  %v12020_v44 = vpop.permute.xlu1 %9550 }
 0x1e0   : > { %9183 = vmatprep.mubr.f32.mxu0 %v1925_v32  ;;  %9216 = vmatpush3.msra.mxu0 %v16702_v19  ;;  %v9543_v48 = vunpack.i.h.bf16 %v11982_v26  ;;  %v1928_v54 = vsel %vm1916_vm7, %v1907_v46, %v9538_v4  ;;  %v1908_v62 = vsel %vm1895_vm6, %v1887_v33, %v9492_v17  ;;  %v9547_v7 = vunpack.i.l.bf16 %v12005_v20  ;;  %v1570_v32 = vld [vmem:[#allocation3 + $0x78] sm:$0xff]  ;;  %v1571_v26 = vld [vmem:[#allocation3 + $0x80] sm:$0xff] }
 0x1e1   : > { %9217 = vmatprep.subr.mxu0 %v11509_v35  ;;  %v1929_v21 = vsel %vm1916_vm7, %v1908_v62, %v9542_v22  ;;  %v1888_v23 = vsel %vm1402_vm4, %v1568_v14, %v9443_v15  ;;  %v9453_v47 = vunpack.i.h.bf16 %v11895_v6  ;;  %v9458_v12 = vunpack.i.h.bf16 %v11897_v42  ;;  %v1574_v15 = vld [vmem:[#allocation3 + $0x98] sm:$0x3] }
 0x1e2   : > { %9218 = vmatpush3.msra.mxu0 %v11509_v35  ;;  %v1569_v35 = vld [vmem:[#allocation3 + $0x70] sm:$0xff]  ;;  %v1890_v5 = vsel %vm1402_vm4, %v1570_v32, %v9448_v63  ;;  %v9498_v9 = vunpack.i.h.bf16 %v11909_v25  ;;  %v9502_v11 = vunpack.i.l.bf16 %v11911_v55  ;;  %v1909_v38 = vsel %vm1895_vm6, %v1888_v23, %v9493_v36  ;;  %v9556_v18 = vpop.permute.xlu0 %9555 }
 0x1e3   : > { %9184 = vmatmul.mubr.f32.gmra.mxu0 %v1926_v29  ;;  %9219 = vmatprep.subr.mxu0 %v11527_v24  ;;  %v1889_v3 = vsel %vm1402_vm4, %v1569_v35, %v9447_v1  ;;  %v1891_v8 = vsel %vm1402_vm4, %v1571_v26, %v9452_v2  ;;  %v9503_v6 = vunpack.i.h.bf16 %v11911_v55  ;;  %v1930_v10 = vsel %vm1916_vm7, %v1909_v38, %v9543_v48  ;;  %v1572_v55 = vld [vmem:[#allocation3 + $0x88] sm:$0xff] }
 0x1e4   : > { %9186 = vmatprep.mubr.f32.mxu0 %v1927_v43  ;;  %9220 = vmatpush3.msra.mxu0 %v11527_v24  ;;  %v9457_v24 = vunpack.i.l.bf16 %v11897_v42  ;;  %v9548_v42 = vunpack.i.h.bf16 %v12005_v20  ;;  %v1910_v19 = vsel %vm1895_vm6, %v1889_v3, %v9497_v16  ;;  %v9507_v25 = vunpack.i.l.bf16 %v11913_v34 }
 0x1e5   : > { %9221 = vmatprep.subr.mxu0 %v11568_v59  ;;  %v9552_v17 = vunpack.i.l.bf16 %v12020_v44  ;;  %v1931_v29 = vsel %vm1916_vm7, %v1910_v19, %v9547_v7  ;;  %v9553_v1 = vunpack.i.h.bf16 %v12020_v44  ;;  %v9558_v43 = vunpack.i.h.bf16 %v9556_v18 }
 0x1e6   : > { %9222 = vmatpush3.msra.mxu0 %v11568_v59  ;;  %v9508_v59 = vunpack.i.h.bf16 %v11913_v34  ;;  %v1893_v22 = vsel %vm1402_vm4, %v1573_v53, %v9457_v24  ;;  %v1894_v34 = vsel %vm1402_vm4, %v1574_v15, %v9458_v12  ;;  %v9557_v0 = vunpack.i.l.bf16 %v9556_v18 }
 0x1e7   : > { %9187 = vmatmul.mubr.f32.gmra.mxu0 %v1928_v54  ;;  %9223 = vmatprep.subr.mxu0 %v11598_v45  ;;  %v1911_v63 = vsel %vm1895_vm6, %v1890_v5, %v9498_v9  ;;  %v1912_v20 = vsel %vm1895_vm6, %v1891_v8, %v9502_v11  ;;  %v1914_v48 = vsel %vm1895_vm6, %v1893_v22, %v9507_v25 }
 0x1e8   : > { %9189 = vmatprep.mubr.f32.mxu0 %v1929_v21  ;;  %9224 = vmatpush3.msra.mxu0 %v11598_v45  ;;  %v1892_v45 = vsel %vm1402_vm4, %v1572_v55, %v9453_v47  ;;  %v1932_v2 = vsel %vm1916_vm7, %v1911_v63, %v9548_v42  ;;  %v1915_v54 = vsel %vm1895_vm6, %v1894_v34, %v9508_v59 }
 0x1e9   : > { %9225 = vmatprep.subr.mxu0 %v11622_v28  ;;  %v1913_v36 = vsel %vm1895_vm6, %v1892_v45, %v9503_v6  ;;  %v1935_v23 = vsel %vm1916_vm7, %v1914_v48, %v9557_v0  ;;  %v1936_v3 = vsel %vm1916_vm7, %v1915_v54, %v9558_v43 }
 0x1ea   : > { %9226 = vmatpush3.msra.mxu0 %v11622_v28  ;;  %v1933_v28 = vsel %vm1916_vm7, %v1912_v20, %v9552_v17  ;;  %v1934_v7 = vsel %vm1916_vm7, %v1913_v36, %v9553_v1 }
 0x1eb   : > { %9190 = vmatmul.mubr.f32.gmra.mxu0 %v1930_v10  ;;  %9227 = vmatprep.subr.mxu0 %v11658_v27 }
 0x1ec   : > { %v2607_v4 = vpop.permute.xlu1 %2606  ;;  %9192 = vmatprep.mubr.f32.mxu0 %v1931_v29  ;;  %9228 = vmatpush3.msra.mxu0 %v11658_v27  ;;  %v16703_v27 = vrot.slane %v11634_v30, 1 }
 0x1ed   : > { %v12054_v56 = vmul.f32 %v2607_v4, %v10494_v49  ;;  %v12057_v37 = vmul.f32 %v2607_v4, %v10496_v50  ;;  %v12063_v46 = vmul.f32 %v2607_v4, %v10498_v51  ;;  %v2734_v44 = vmul.f32 %v2607_v4, %v10500_v52  ;;  %9229 = vmatprep.subr.mxu0 %v11691_v41 }
 0x1ee   : > { %9230 = vmatpush3.msra.mxu0 %v11691_v41 }
 0x1ef   : > { %v2602_v33 = vpop.permute.xlu0 %2601  ;;  %9193 = vmatmul.mubr.f32.gmra.mxu0 %v1932_v2  ;;  %v2862_v32 = vrot.slane %v12054_v56, 1  ;;  %v3096_v47 = vrot.slane %v12057_v37, 2  ;;  %v3327_v5 = vrot.slane %v12063_v46, 3  ;;  %9231 = vmatprep.subr.mxu0 %v11706_v60 }
 0x1f0   : > { %v2617_v16 = vpop.permute.xlu1 %2616  ;;  %v2771_v62 = vmul.f32 %v2602_v33, %v10494_v49  ;;  %v3003_v14 = vmul.f32 %v2602_v33, %v10496_v50  ;;  %v3234_v35 = vmul.f32 %v2602_v33, %v10498_v51  ;;  %9195 = vmatprep.mubr.f32.mxu0 %v1933_v28  ;;  %v2733_v26 = vmul.f32 %v2602_v33, %v10500_v52 }
 0x1f1   : > { %v12074_v21 = vmul.f32 %v2617_v16, %v10494_v49  ;;  %v12085_v11 = vmul.f32 %v2617_v16, %v10496_v50  ;;  %v12092_v42 = vmul.f32 %v2617_v16, %v10500_v52  ;;  %v12095_v18 = vmul.f32 %v2617_v16, %v10498_v51  ;;  %9232 = vmatpush3.msra.mxu0 %v11706_v60 }
 0x1f2   : > { %v2860_v12 = vrot.slane %v2771_v62, 1  ;;  %v3094_v24 = vrot.slane %v3003_v14, 2  ;;  %v3325_v9 = vrot.slane %v3234_v35, 3  ;;  %9263 = vmatprep.subr.mxu0 %v11936_v57 }
 0x1f3   : > { %v2612_v38 = vpop.permute.xlu0 %2611  ;;  %9196 = vmatmul.mubr.f32.gmra.mxu0 %v1934_v7  ;;  %v2866_v30 = vrot.slane %v12074_v21, 1  ;;  %v3331_v43 = vrot.slane %v12095_v18, 3 }
 0x1f4   : > { %v2861_v8 = vsel %vm691_vm1, %v16703_v27, %v2860_v12  ;;  %v2863_v6 = vsel %vm691_vm1, %v2860_v12, %v2862_v32  ;;  %9198 = vmatprep.mubr.f32.mxu0 %v1935_v23  ;;  %v3095_v59 = vsel %vm930_vm2, %v3092_v39, %v3094_v24  ;;  %v3097_v25 = vsel %vm930_vm2, %v3094_v24, %v3096_v47  ;;  %v2627_v53 = vpop.permute.xlu1 %2626 }
 0x1f5   : > { %v2959_v10 = vadd.f32 %v2861_v8, %v12002_v13  ;;  %v2960_v19 = vadd.f32 %v2863_v6, %v2733_v26  ;;  %v2773_v17 = vmul.f32 %v2612_v38, %v10494_v49  ;;  %v3005_v4 = vmul.f32 %v2612_v38, %v10496_v50 }
 0x1f6   : > { %v3236_v29 = vmul.f32 %v2612_v38, %v10498_v51  ;;  %v3326_v31 = vsel %vm1166_vm3, %v3323_v58, %v3325_v9  ;;  %v3100_v39 = vrot.slane %v12085_v11, 2  ;;  %v3328_v41 = vsel %vm1166_vm3, %v3325_v9, %v3327_v5 }
 0x1f7   : > { %v3195_v13 = vadd.f32 %v3095_v59, %v2959_v10  ;;  %v3196_v55 = vadd.f32 %v3097_v25, %v2960_v19  ;;  %9199 = vmatmul.mubr.f32.gmra.mxu0 %v1936_v3  ;;  %v2864_v15 = vrot.slane %v2773_v17, 1  ;;  %v3098_v1 = vrot.slane %v3005_v4, 2  ;;  %v2622_v36 = vpop.permute.xlu0 %2621 }
 0x1f8   : > { %v3329_v45 = vrot.slane %v3236_v29, 3  ;;  %v2735_v0 = vmul.f32 %v2612_v38, %v10500_v52  ;;  %v12120_v63 = vmul.f32 %v2627_v53, %v10494_v49  ;;  %v12123_v20 = vmul.f32 %v2627_v53, %v10496_v50  ;;  %v12133_v14 = vpop.permute.xlu1 %2636 }
 0x1f9   : > { %v3426_v22 = vadd.f32 %v3326_v31, %v3195_v13  ;;  %v3427_v34 = vadd.f32 %v3328_v41, %v3196_v55  ;;  %v2865_v40 = vsel %vm691_vm1, %v2862_v32, %v2864_v15  ;;  %v2867_v58 = vsel %vm691_vm1, %v2864_v15, %v2866_v30 }
 0x1fa   : > { %v2961_v37 = vadd.f32 %v2865_v40, %v2734_v44  ;;  %v2962_v2 = vadd.f32 %v2867_v58, %v2735_v0  ;;  %v3099_v46 = vsel %vm930_vm2, %v3096_v47, %v3098_v1  ;;  %v3101_v57 = vsel %vm930_vm2, %v3098_v1, %v3100_v39 }
 0x1fb   : > { %v3464_v60 = vadd.f32 %v11809_v61, %v3426_v22  ;;  %v3465_v56 = vadd.f32 %v11809_v61, %v3427_v34  ;;  %v3330_v33 = vsel %vm1166_vm3, %v3327_v5, %v3329_v45  ;;  %v12131_v16 = vmul.f32 %v2627_v53, %v10498_v51  ;;  %v2632_v19 = vpop.permute.xlu0 %2631 }
 0x1fc   : > { %v3197_v54 = vadd.f32 %v3099_v46, %v2961_v37  ;;  %v3198_v62 = vadd.f32 %v3101_v57, %v2962_v2  ;;  %v3332_v35 = vsel %vm1166_vm3, %v3329_v45, %v3331_v43  ;;  %v2775_v7 = vmul.f32 %v2622_v36, %v10494_v49 }
 0x1fd   : > { %v3502_v28 = vmax.f32 %v3464_v60, 0.0  ;;  %v3503_v48 = vmax.f32 %v3465_v56, 0.0  ;;  %v3007_v44 = vmul.f32 %v2622_v36, %v10496_v50  ;;  %v3238_v21 = vmul.f32 %v2622_v36, %v10498_v51 }
 0x1fe   : > { %v3428_v23 = vadd.f32 %v3330_v33, %v3197_v54  ;;  %v3429_v3 = vadd.f32 %v3332_v35, %v3198_v62  ;;  %v2738_v32 = vmul.f32 %v2627_v53, %v10500_v52  ;;  %v2870_v47 = vrot.slane %v12120_v63, 1 }
 0x1ff   : > { %3540 = vst.msk [vmem:[#allocation2 + $0x68] sm:$0xff] %vm1402_vm4, %v3502_v28  ;;  %3541 = vst.msk [vmem:[#allocation2 + $0x70] sm:$0xff] %vm1402_vm4, %v3503_v48  ;;  %v3104_v12 = vrot.slane %v12123_v20, 2  ;;  %v2868_v24 = vrot.slane %v2775_v7, 1  ;;  %v3102_v5 = vrot.slane %v3007_v44, 2  ;;  %v12146_v26 = vmul.f32 %v12133_v14, %v10494_v49  ;;  %v12174_v20 = vpop.permute.xlu1 %2646  ;;  %v2642_v54 = vpop.permute.xlu0 %2641 }
 0x200   : > { %v3466_v9 = vadd.f32 %v11809_v61, %v3428_v23  ;;  %v3467_v11 = vadd.f32 %v11809_v61, %v3429_v3  ;;  %v2737_v38 = vmul.f32 %v2622_v36, %v10500_v52  ;;  %v3333_v27 = vrot.slane %v3238_v21, 3 }
 0x201   : > { %v3335_v8 = vrot.slane %v12131_v16, 3  ;;  %v2869_v6 = vsel %vm691_vm1, %v2866_v30, %v2868_v24  ;;  %v2871_v18 = vsel %vm691_vm1, %v2868_v24, %v2870_v47  ;;  %v12156_v10 = vmul.f32 %v12133_v14, %v10496_v50 }
 0x202   : > { %v3504_v59 = vmax.f32 %v3466_v9, 0.0  ;;  %v3505_v25 = vmax.f32 %v3467_v11, 0.0  ;;  %v2963_v17 = vadd.f32 %v2869_v6, %v12092_v42  ;;  %v2964_v4 = vadd.f32 %v2871_v18, %v2737_v38 }
 0x203   : > { %v3103_v29 = vsel %vm930_vm2, %v3100_v39, %v3102_v5  ;;  %v3105_v13 = vsel %vm930_vm2, %v3102_v5, %v3104_v12  ;;  %v2874_v55 = vrot.slane %v12146_v26, 1  ;;  %v12164_v30 = vmul.f32 %v12133_v14, %v10498_v51  ;;  %v12208_v18 = vpop.permute.xlu1 %2656 }
 0x204   : > { %3542 = vst.msk [vmem:[#allocation2 + $0x78] sm:$0xff] %vm1402_vm4, %v3504_v59  ;;  %3543 = vst.msk [vmem:[#allocation2 + $0x80] sm:$0xff] %vm1402_vm4, %v3505_v25  ;;  %v3199_v31 = vadd.f32 %v3103_v29, %v2963_v17  ;;  %v3200_v53 = vadd.f32 %v3105_v13, %v2964_v4  ;;  %v3334_v41 = vsel %vm1166_vm3, %v3331_v43, %v3333_v27  ;;  %v3108_v45 = vrot.slane %v12156_v10, 2 }
 0x205   : > { %v2777_v42 = vmul.f32 %v2632_v19, %v10494_v49  ;;  %v3336_v1 = vsel %vm1166_vm3, %v3333_v27, %v3335_v8  ;;  %v3009_v22 = vmul.f32 %v2632_v19, %v10496_v50  ;;  %v3240_v34 = vmul.f32 %v2632_v19, %v10498_v51 }
 0x206   : > { %v3571_v15 = vld [vmem:[#allocation2 + $0x60] ss:$2 sm:$0xff]  ;;  %v3590_v39 = vld [vmem:[#allocation2 + $0x61] ss:$2 sm:$0xff]  ;;  %v3430_v40 = vadd.f32 %v3334_v41, %v3199_v31  ;;  %v3431_v58 = vadd.f32 %v3336_v1, %v3200_v53  ;;  %v3339_v43 = vrot.slane %v12164_v30, 3  ;;  %v2739_v60 = vmul.f32 %v2632_v19, %v10500_v52 }
 0x207   : > { %v3609_v0 = vmax.f32 %v3571_v15, %v3590_v39  ;;  %v2872_v63 = vrot.slane %v2777_v42, 1  ;;  %v3106_v56 = vrot.slane %v3009_v22, 2  ;;  %v3337_v37 = vrot.slane %v3240_v34, 3 }
 0x208   : > { %v3468_v2 = vadd.f32 %v11809_v61, %v3430_v40  ;;  %v3469_v36 = vadd.f32 %v11809_v61, %v3431_v58  ;;  %v12187_v28 = vmul.f32 %v12174_v20, %v10494_v49  ;;  %v12191_v48 = vmul.f32 %v12174_v20, %v10496_v50 }
 0x209   : > { %3628 = vst.msk [vmem:[#allocation3 + $0x33] sm:$0xff] %vm1402_vm4, %v3609_v0  ;;  %v2873_v46 = vsel %vm691_vm1, %v2870_v47, %v2872_v63  ;;  %v2875_v57 = vsel %vm691_vm1, %v2872_v63, %v2874_v55  ;;  %v3107_v7 = vsel %vm930_vm2, %v3104_v12, %v3106_v56  ;;  %v3109_v44 = vsel %vm930_vm2, %v3106_v56, %v3108_v45 }
 0x20a   : > { %v2965_v33 = vadd.f32 %v2873_v46, %v2738_v32  ;;  %v2966_v16 = vadd.f32 %v2875_v57, %v2739_v60  ;;  %v3506_v62 = vmax.f32 %v3468_v2, 0.0  ;;  %v3507_v35 = vmax.f32 %v3469_v36, 0.0  ;;  %v2667_v57 = vpop.permute.xlu1 %2666 }
 0x20b   : > { %v3572_v21 = vld [vmem:[#allocation2 + $0x70] ss:$2 sm:$0xff]  ;;  %v3591_v23 = vld [vmem:[#allocation2 + $0x71] ss:$2 sm:$0xff]  ;;  %v3338_v47 = vsel %vm1166_vm3, %v3335_v8, %v3337_v37  ;;  %v3340_v24 = vsel %vm1166_vm3, %v3337_v37, %v3339_v43  ;;  %v12201_v9 = vmul.f32 %v12174_v20, %v10498_v51  ;;  %v2779_v12 = vmul.f32 %v2642_v54, %v10494_v49 }
 0x20c   : > { %v3201_v3 = vadd.f32 %v3107_v7, %v2965_v33  ;;  %v3202_v32 = vadd.f32 %v3109_v44, %v2966_v16  ;;  %v3610_v5 = vmax.f32 %v3572_v21, %v3591_v23  ;;  %3544 = vst.msk [vmem:[#allocation2 + $0x88] sm:$0xff] %vm1402_vm4, %v3506_v62  ;;  %3545 = vst.msk [vmem:[#allocation2 + $0x90] sm:$0xff] %vm1402_vm4, %v3507_v35  ;;  %v2878_v10 = vrot.slane %v12187_v28, 1 }
 0x20d   : > { %v3011_v11 = vmul.f32 %v2642_v54, %v10496_v50  ;;  %v2740_v38 = vmul.f32 %v12133_v14, %v10500_v52  ;;  %v3242_v6 = vmul.f32 %v2642_v54, %v10498_v51  ;;  %v3112_v19 = vrot.slane %v12191_v48, 2 }
 0x20e   : > { %v3432_v27 = vadd.f32 %v3338_v47, %v3201_v3  ;;  %v3433_v8 = vadd.f32 %v3340_v24, %v3202_v32  ;;  %3629 = vst.msk [vmem:[#allocation3 + $0x3b] sm:$0xff] %vm1402_vm4, %v3610_v5  ;;  %v2876_v59 = vrot.slane %v2779_v12, 1  ;;  %v2741_v14 = vmul.f32 %v2642_v54, %v10500_v52  ;;  %v12250_v54 = vld [vmem:[%s16536_s2] ss:$0 sm:$0xff] }
 0x20f   : > { %v3110_v25 = vrot.slane %v3011_v11, 2  ;;  %v3341_v29 = vrot.slane %v3242_v6, 3  ;;  %v3343_v13 = vrot.slane %v12201_v9, 3  ;;  %v12223_v53 = vmul.f32 %v12208_v18, %v10494_v49 }
 0x210   : > { %v3470_v17 = vadd.f32 %v11809_v61, %v3432_v27  ;;  %v3471_v4 = vadd.f32 %v11809_v61, %v3433_v8  ;;  %v2877_v30 = vsel %vm691_vm1, %v2874_v55, %v2876_v59  ;;  %v2879_v31 = vsel %vm691_vm1, %v2876_v59, %v2878_v10  ;;  %v2652_v61 = vpop.permute.xlu0 %2651 }
 0x211   : > { %v2967_v15 = vadd.f32 %v2877_v30, %v2740_v38  ;;  %v2968_v39 = vadd.f32 %v2879_v31, %v2741_v14  ;;  %v3111_v1 = vsel %vm930_vm2, %v3108_v45, %v3110_v25  ;;  %v3113_v22 = vsel %vm930_vm2, %v3110_v25, %v3112_v19 }
 0x212   : > { %v3508_v41 = vmax.f32 %v3470_v17, 0.0  ;;  %v3509_v42 = vmax.f32 %v3471_v4, 0.0  ;;  %v3342_v34 = vsel %vm1166_vm3, %v3339_v43, %v3341_v29  ;;  %v12230_v26 = vmul.f32 %v12208_v18, %v10496_v50 }
 0x213   : > { %v3573_v55 = vld [vmem:[#allocation2 + $0x80] ss:$2 sm:$0xff]  ;;  %v3592_v0 = vld [vmem:[#allocation2 + $0x81] ss:$2 sm:$0xff]  ;;  %v3203_v40 = vadd.f32 %v3111_v1, %v2967_v15  ;;  %v3204_v58 = vadd.f32 %v3113_v22, %v2968_v39  ;;  %v3344_v63 = vsel %vm1166_vm3, %v3341_v29, %v3343_v13  ;;  %v12237_v45 = vmul.f32 %v12208_v18, %v10498_v51 }
 0x214   : > { %3546 = vst.msk [vmem:[#allocation2 + $0x98] sm:$0xff] %vm1402_vm4, %v3508_v41  ;;  %3547 = vst.msk [vmem:[#allocation2 + $0xa0] sm:$0xff] %vm1402_vm4, %v3509_v42  ;;  %v3611_v60 = vmax.f32 %v3573_v55, %v3592_v0  ;;  %v2781_v43 = vmul.f32 %v2652_v61, %v10494_v49  ;;  %v3013_v56 = vmul.f32 %v2652_v61, %v10496_v50  ;;  %v2882_v33 = vrot.slane %v12223_v53, 1  ;;  %v2662_v9 = vpop.permute.xlu0 %2661  ;;  %v2677_v42 = vpop.permute.xlu1 %2676 }
 0x215   : > { %v3244_v37 = vmul.f32 %v2652_v61, %v10498_v51  ;;  %v2742_v2 = vmul.f32 %v12174_v20, %v10500_v52  ;;  %v3434_v36 = vadd.f32 %v3342_v34, %v3203_v40  ;;  %v3435_v46 = vadd.f32 %v3344_v63, %v3204_v58 }
 0x216   : > { %3630 = vst.msk [vmem:[#allocation3 + $0x43] sm:$0xff] %vm1402_vm4, %v3611_v60  ;;  %v3116_v16 = vrot.slane %v12230_v26, 2  ;;  %v2880_v28 = vrot.slane %v2781_v43, 1  ;;  %v3114_v48 = vrot.slane %v3013_v56, 2  ;;  %v2743_v35 = vmul.f32 %v2652_v61, %v10500_v52 }
 0x217   : > { %v3472_v62 = vadd.f32 %v12250_v54, %v3434_v36  ;;  %v3473_v20 = vadd.f32 %v12250_v54, %v3435_v46  ;;  %v3345_v7 = vrot.slane %v3244_v37, 3  ;;  %v3347_v44 = vrot.slane %v12237_v45, 3 }
 0x218   : > { %v2881_v21 = vsel %vm691_vm1, %v2878_v10, %v2880_v28  ;;  %v2883_v23 = vsel %vm691_vm1, %v2880_v28, %v2882_v33  ;;  %v12259_v3 = vmul.f32 %v2667_v57, %v10494_v49  ;;  %v3115_v38 = vsel %vm930_vm2, %v3112_v19, %v3114_v48  ;;  %v2672_v43 = vpop.permute.xlu0 %2671 }
 0x219   : > { %v3510_v32 = vmax.f32 %v3472_v62, 0.0  ;;  %v3511_v47 = vmax.f32 %v3473_v20, 0.0  ;;  %v2969_v24 = vadd.f32 %v2881_v21, %v2742_v2  ;;  %v2970_v5 = vadd.f32 %v2883_v23, %v2743_v35  ;;  %v12302_v20 = vpop.permute.xlu1 %2686 }
 0x21a   : > { %v3117_v27 = vsel %vm930_vm2, %v3114_v48, %v3116_v16  ;;  %v12264_v8 = vmul.f32 %v2667_v57, %v10496_v50  ;;  %v12267_v6 = vmul.f32 %v2667_v57, %v10498_v51  ;;  %v3346_v17 = vsel %vm1166_vm3, %v3343_v13, %v3345_v7 }
 0x21b   : > { %v3574_v12 = vld [vmem:[#allocation2 + $0x90] ss:$2 sm:$0xff]  ;;  %v3593_v11 = vld [vmem:[#allocation2 + $0x91] ss:$2 sm:$0xff]  ;;  %3548 = vst.msk [vmem:[#allocation2 + $0xa8] sm:$0xff] %vm1402_vm4, %v3510_v32  ;;  %3549 = vst.msk [vmem:[#allocation2 + $0xb0] sm:$0xff] %vm1402_vm4, %v3511_v47  ;;  %v3205_v59 = vadd.f32 %v3115_v38, %v2969_v24  ;;  %v3206_v25 = vadd.f32 %v3117_v27, %v2970_v5  ;;  %v3348_v4 = vsel %vm1166_vm3, %v3345_v7, %v3347_v44 }
 0x21c   : > { %v3612_v10 = vmax.f32 %v3574_v12, %v3593_v11  ;;  %v2783_v19 = vmul.f32 %v2662_v9, %v10494_v49  ;;  %v3015_v14 = vmul.f32 %v2662_v9, %v10496_v50  ;;  %v3246_v29 = vmul.f32 %v2662_v9, %v10498_v51 }
 0x21d   : > { %v2744_v30 = vmul.f32 %v12208_v18, %v10500_v52  ;;  %v3436_v31 = vadd.f32 %v3346_v17, %v3205_v59  ;;  %v3437_v53 = vadd.f32 %v3348_v4, %v3206_v25  ;;  %v2746_v41 = vmul.f32 %v2667_v57, %v10500_v52  ;;  %v2682_v25 = vpop.permute.xlu0 %2681 }
 0x21e   : > { %3631 = vst.msk [vmem:[#allocation3 + $0x4b] sm:$0xff] %vm1402_vm4, %v3612_v10  ;;  %v2886_v13 = vrot.slane %v12259_v3, 1  ;;  %v3120_v15 = vrot.slane %v12264_v8, 2  ;;  %v2884_v39 = vrot.slane %v2783_v19, 1  ;;  %v3118_v61 = vrot.slane %v3015_v14, 2 }
 0x21f   : > { %v3474_v1 = vadd.f32 %v12250_v54, %v3436_v31  ;;  %v3475_v22 = vadd.f32 %v12250_v54, %v3437_v53  ;;  %v2745_v34 = vmul.f32 %v2662_v9, %v10500_v52  ;;  %v3349_v26 = vrot.slane %v3246_v29, 3 }
 0x220   : > { %v3351_v18 = vrot.slane %v12267_v6, 3  ;;  %v2885_v55 = vsel %vm691_vm1, %v2882_v33, %v2884_v39  ;;  %v2887_v0 = vsel %vm691_vm1, %v2884_v39, %v2886_v13  ;;  %v12289_v40 = vmul.f32 %v2677_v42, %v10494_v49 }
 0x221   : > { %v3512_v58 = vmax.f32 %v3474_v1, 0.0  ;;  %v3513_v63 = vmax.f32 %v3475_v22, 0.0  ;;  %v2971_v45 = vadd.f32 %v2885_v55, %v2744_v30  ;;  %v2972_v60 = vadd.f32 %v2887_v0, %v2745_v34 }
 0x222   : > { %v3575_v56 = vld [vmem:[#allocation2 + $0xa0] ss:$2 sm:$0xff]  ;;  %v3594_v37 = vld [vmem:[#allocation2 + $0xa1] ss:$2 sm:$0xff]  ;;  %v3119_v2 = vsel %vm930_vm2, %v3116_v16, %v3118_v61  ;;  %v3121_v36 = vsel %vm930_vm2, %v3118_v61, %v3120_v15  ;;  %v12294_v46 = vmul.f32 %v2677_v42, %v10496_v50  ;;  %v12297_v57 = vmul.f32 %v2677_v42, %v10498_v51 }
 0x223   : > { %v3613_v33 = vmax.f32 %v3575_v56, %v3594_v37  ;;  %3550 = vst.msk [vmem:[#allocation2 + $0xb8] sm:$0xff] %vm1402_vm4, %v3512_v58  ;;  %3551 = vst.msk [vmem:[#allocation2 + $0xc0] sm:$0xff] %vm1402_vm4, %v3513_v63  ;;  %v3207_v28 = vadd.f32 %v3119_v2, %v2971_v45  ;;  %v3208_v48 = vadd.f32 %v3121_v36, %v2972_v60  ;;  %v2890_v47 = vrot.slane %v12289_v40, 1  ;;  %v12342_v63 = vpop.permute.xlu1 %2696 }
 0x224   : > { %v3350_v62 = vsel %vm1166_vm3, %v3347_v44, %v3349_v26  ;;  %v3352_v16 = vsel %vm1166_vm3, %v3349_v26, %v3351_v18  ;;  %v2785_v35 = vmul.f32 %v2672_v43, %v10494_v49  ;;  %v3017_v7 = vmul.f32 %v2672_v43, %v10496_v50 }
 0x225   : > { %v3248_v21 = vmul.f32 %v2672_v43, %v10498_v51  ;;  %3632 = vst.msk [vmem:[#allocation3 + $0x53] sm:$0xff] %vm1402_vm4, %v3613_v33  ;;  %v3438_v23 = vadd.f32 %v3350_v62, %v3207_v28  ;;  %v3439_v3 = vadd.f32 %v3352_v16, %v3208_v48  ;;  %v2748_v32 = vmul.f32 %v2677_v42, %v10500_v52  ;;  %v2692_v48 = vpop.permute.xlu0 %2691 }
 0x226   : > { %v3124_v44 = vrot.slane %v12294_v46, 2  ;;  %v2888_v24 = vrot.slane %v2785_v35, 1  ;;  %v3122_v5 = vrot.slane %v3017_v7, 2  ;;  %v12314_v9 = vmul.f32 %v12302_v20, %v10494_v49 }
 0x227   : > { %v3476_v12 = vadd.f32 %v12250_v54, %v3438_v23  ;;  %v3477_v11 = vadd.f32 %v12250_v54, %v3439_v3  ;;  %v3355_v38 = vrot.slane %v12297_v57, 3  ;;  %v2747_v27 = vmul.f32 %v2672_v43, %v10500_v52 }
 0x228   : > { %v2889_v8 = vsel %vm691_vm1, %v2886_v13, %v2888_v24  ;;  %v2891_v6 = vsel %vm691_vm1, %v2888_v24, %v2890_v47  ;;  %v3353_v10 = vrot.slane %v3248_v21, 3  ;;  %v12324_v59 = vmul.f32 %v12302_v20, %v10496_v50 }
 0x229   : > { %v3514_v17 = vmax.f32 %v3476_v12, 0.0  ;;  %v3515_v4 = vmax.f32 %v3477_v11, 0.0  ;;  %v2973_v19 = vadd.f32 %v2889_v8, %v2746_v41  ;;  %v2974_v14 = vadd.f32 %v2891_v6, %v2747_v27 }
 0x22a   : > { %v3576_v29 = vld [vmem:[#allocation2 + $0xb0] ss:$2 sm:$0xff]  ;;  %v3595_v30 = vld [vmem:[#allocation2 + $0xb1] ss:$2 sm:$0xff]  ;;  %v3123_v31 = vsel %vm930_vm2, %v3120_v15, %v3122_v5  ;;  %v3125_v53 = vsel %vm930_vm2, %v3122_v5, %v3124_v44  ;;  %v2894_v42 = vrot.slane %v12314_v9, 1  ;;  %v12331_v13 = vmul.f32 %v12302_v20, %v10498_v51 }
 0x22b   : > { %v3614_v39 = vmax.f32 %v3576_v29, %v3595_v30  ;;  %3552 = vst.msk [vmem:[#allocation2 + $0xc8] sm:$0xff] %vm1402_vm4, %v3514_v17  ;;  %3553 = vst.msk [vmem:[#allocation2 + $0xd0] sm:$0xff] %vm1402_vm4, %v3515_v4  ;;  %v3209_v61 = vadd.f32 %v3123_v31, %v2973_v19  ;;  %v3210_v41 = vadd.f32 %v3125_v53, %v2974_v14  ;;  %v3128_v40 = vrot.slane %v12324_v59, 2 }
 0x22c   : > { %v2787_v1 = vmul.f32 %v2682_v25, %v10494_v49  ;;  %v3354_v22 = vsel %vm1166_vm3, %v3351_v18, %v3353_v10  ;;  %v3356_v15 = vsel %vm1166_vm3, %v3353_v10, %v3355_v38  ;;  %v3019_v34 = vmul.f32 %v2682_v25, %v10496_v50  ;;  %v12377_v10 = vpop.permute.xlu1 %2706 }
 0x22d   : > { %v3250_v26 = vmul.f32 %v2682_v25, %v10498_v51  ;;  %3633 = vst.msk [vmem:[#allocation3 + $0x5b] sm:$0xff] %vm1402_vm4, %v3614_v39  ;;  %v3440_v55 = vadd.f32 %v3354_v22, %v3209_v61  ;;  %v3441_v0 = vadd.f32 %v3356_v15, %v3210_v41  ;;  %v3359_v45 = vrot.slane %v12331_v13, 3  ;;  %v3668_v61 = vld [vmem:[#allocation3 + $0x39] sm:$0xff] }
 0x22e   : > { %v2892_v58 = vrot.slane %v2787_v1, 1  ;;  %v2749_v60 = vmul.f32 %v2682_v25, %v10500_v52  ;;  %v3126_v18 = vrot.slane %v3019_v34, 2  ;;  %v12354_v33 = vmul.f32 %v12342_v63, %v10494_v49  ;;  %v2702_v34 = vpop.permute.xlu0 %2701 }
 0x22f   : > { %v3357_v43 = vrot.slane %v3250_v26, 3  ;;  %v3478_v56 = vadd.f32 %v12250_v54, %v3440_v55  ;;  %v3479_v37 = vadd.f32 %v12250_v54, %v3441_v0  ;;  %v12358_v28 = vmul.f32 %v12342_v63, %v10496_v50  ;;  %v3667_v0 = vld [vmem:[#allocation3 + $0x31] sm:$0xff] }
 0x230   : > { %v2893_v2 = vsel %vm691_vm1, %v2890_v47, %v2892_v58  ;;  %v2895_v36 = vsel %vm691_vm1, %v2892_v58, %v2894_v42  ;;  %v3127_v35 = vsel %vm930_vm2, %v3124_v44, %v3126_v18  ;;  %v3129_v7 = vsel %vm930_vm2, %v3126_v18, %v3128_v40 }
 0x231   : > { %v2975_v46 = vadd.f32 %v2893_v2, %v2748_v32  ;;  %v2976_v57 = vadd.f32 %v2895_v36, %v2749_v60  ;;  %v3516_v62 = vmax.f32 %v3478_v56, 0.0  ;;  %v3517_v16 = vmax.f32 %v3479_v37, 0.0 }
 0x232   : > { %v3577_v21 = vld [vmem:[#allocation2 + $0xc0] ss:$2 sm:$0xff]  ;;  %v3596_v23 = vld [vmem:[#allocation2 + $0xc1] ss:$2 sm:$0xff]  ;;  %v3358_v47 = vsel %vm1166_vm3, %v3355_v38, %v3357_v43  ;;  %v12365_v24 = vmul.f32 %v12342_v63, %v10498_v51  ;;  %v3360_v44 = vsel %vm1166_vm3, %v3357_v43, %v3359_v45  ;;  %v2789_v12 = vmul.f32 %v2692_v48, %v10494_v49 }
 0x233   : > { %v3211_v3 = vadd.f32 %v3127_v35, %v2975_v46  ;;  %v3212_v32 = vadd.f32 %v3129_v7, %v2976_v57  ;;  %v3615_v5 = vmax.f32 %v3577_v21, %v3596_v23  ;;  %3554 = vst.msk [vmem:[#allocation2 + $0xd8] sm:$0xff] %vm1402_vm4, %v3516_v62  ;;  %3555 = vst.msk [vmem:[#allocation2 + $0xe0] sm:$0xff] %vm1402_vm4, %v3517_v16  ;;  %v2898_v59 = vrot.slane %v12354_v33, 1  ;;  %v2717_v23 = vpop.permute.xlu1 %2716 }
 0x234   : > { %v3021_v11 = vmul.f32 %v2692_v48, %v10496_v50  ;;  %v2750_v38 = vmul.f32 %v12302_v20, %v10500_v52  ;;  %v3252_v6 = vmul.f32 %v2692_v48, %v10498_v51  ;;  %v3132_v25 = vrot.slane %v12358_v28, 2 }
 0x235   : > { %v3442_v27 = vadd.f32 %v3358_v47, %v3211_v3  ;;  %v3443_v8 = vadd.f32 %v3360_v44, %v3212_v32  ;;  %3634 = vst.msk [vmem:[#allocation3 + $0x63] sm:$0xff] %vm1402_vm4, %v3615_v5  ;;  %v2896_v17 = vrot.slane %v2789_v12, 1  ;;  %v2751_v20 = vmul.f32 %v2692_v48, %v10500_v52 }
 0x236   : > { %v3130_v4 = vrot.slane %v3021_v11, 2  ;;  %v3361_v29 = vrot.slane %v3252_v6, 3  ;;  %v3363_v30 = vrot.slane %v12365_v24, 3  ;;  %v12392_v39 = vmul.f32 %v12377_v10, %v10494_v49  ;;  %v3669_v24 = vld [vmem:[#allocation3 + $0x41] sm:$0xff] }
 0x237   : > { %v3480_v19 = vadd.f32 %v12250_v54, %v3442_v27  ;;  %v3481_v14 = vadd.f32 %v12250_v54, %v3443_v8  ;;  %v2897_v31 = vsel %vm691_vm1, %v2894_v42, %v2896_v17  ;;  %v2899_v53 = vsel %vm691_vm1, %v2896_v17, %v2898_v59 }
 0x238   : > { %v2977_v22 = vadd.f32 %v2897_v31, %v2750_v38  ;;  %v2978_v15 = vadd.f32 %v2899_v53, %v2751_v20  ;;  %v3131_v26 = vsel %vm930_vm2, %v3128_v40, %v3130_v4  ;;  %v3133_v55 = vsel %vm930_vm2, %v3130_v4, %v3132_v25  ;;  %v2712_v38 = vpop.permute.xlu0 %2711  ;;  %v3670_v31 = vld [vmem:[#allocation3 + $0x49] sm:$0xff] }
 0x239   : > { %v3518_v41 = vmax.f32 %v3480_v19, 0.0  ;;  %v3519_v1 = vmax.f32 %v3481_v14, 0.0  ;;  %v12398_v9 = vmul.f32 %v12377_v10, %v10496_v50  ;;  %v12402_v42 = vmul.f32 %v12377_v10, %v10498_v51 }
 0x23a   : > { %v3578_v58 = vld [vmem:[#allocation2 + $0xd0] ss:$2 sm:$0xff]  ;;  %v3597_v60 = vld [vmem:[#allocation2 + $0xd1] ss:$2 sm:$0xff]  ;;  %v3213_v18 = vadd.f32 %v3131_v26, %v2977_v22  ;;  %v3214_v43 = vadd.f32 %v3133_v55, %v2978_v15  ;;  %v3362_v40 = vsel %vm1166_vm3, %v3359_v45, %v3361_v29  ;;  %v9574_v56 = vpack.i.bf16 %v3668_v61, %v3667_v0 }
 0x23b   : > { %3556 = vst.msk [vmem:[#allocation2 + $0xe8] sm:$0xff] %vm1402_vm4, %v3518_v41  ;;  %3557 = vst.msk [vmem:[#allocation2 + $0xf0] sm:$0xff] %vm1402_vm4, %v3519_v1  ;;  %v3616_v37 = vmax.f32 %v3578_v58, %v3597_v60  ;;  %v3364_v2 = vsel %vm1166_vm3, %v3361_v29, %v3363_v30  ;;  %v2791_v36 = vmul.f32 %v2702_v34, %v10494_v49  ;;  %v2902_v45 = vrot.slane %v12392_v39, 1 }
 0x23c   : > { %v3023_v46 = vmul.f32 %v2702_v34, %v10496_v50  ;;  %v3444_v57 = vadd.f32 %v3362_v40, %v3213_v18  ;;  %v3445_v33 = vadd.f32 %v3364_v2, %v3214_v43  ;;  %9575 = vrot.lane.b32.xlu0 %v9574_v56, %s10332_s12  ;;  %v3254_v28 = vmul.f32 %v2702_v34, %v10498_v51  ;;  %v2987_v18 = vpop.permute.xlu0 %2986 }
 0x23d   : > { %3635 = vst.msk [vmem:[#allocation3 + $0x6b] sm:$0xff] %vm1402_vm4, %v3616_v37  ;;  %v2752_v13 = vmul.f32 %v12342_v63, %v10500_v52  ;;  %v2900_v48 = vrot.slane %v2791_v36, 1  ;;  %v3136_v7 = vrot.slane %v12398_v9, 2  ;;  %v2753_v21 = vmul.f32 %v2702_v34, %v10500_v52 }
 0x23e   : > { %v3134_v62 = vrot.slane %v3023_v46, 2  ;;  %v3482_v16 = vadd.f32 %v12250_v54, %v3444_v57  ;;  %v3483_v35 = vadd.f32 %v12250_v54, %v3445_v33  ;;  %v3367_v3 = vrot.slane %v12402_v42, 3 }
 0x23f   : > { %v2901_v32 = vsel %vm691_vm1, %v2898_v59, %v2900_v48  ;;  %v2903_v47 = vsel %vm691_vm1, %v2900_v48, %v2902_v45  ;;  %v3365_v63 = vrot.slane %v3254_v28, 3  ;;  %v2794_v4 = vmul.f32 %v2717_v23, %v10494_v49 }
 0x240   : > { %v3520_v5 = vmax.f32 %v3482_v16, 0.0  ;;  %v3521_v44 = vmax.f32 %v3483_v35, 0.0  ;;  %v2979_v12 = vadd.f32 %v2901_v32, %v2752_v13  ;;  %v2980_v11 = vadd.f32 %v2903_v47, %v2753_v21 }
 0x241   : > { %v3135_v6 = vsel %vm930_vm2, %v3132_v25, %v3134_v62  ;;  %v3137_v17 = vsel %vm930_vm2, %v3134_v62, %v3136_v7  ;;  %v12431_v19 = vmul.f32 %v2717_v23, %v10496_v50  ;;  %v12436_v29 = vmul.f32 %v2717_v23, %v10498_v51 }
 0x242   : > { %v3579_v27 = vld [vmem:[#allocation2 + $0xe0] ss:$2 sm:$0xff]  ;;  %v3598_v8 = vld [vmem:[#allocation2 + $0xe1] ss:$2 sm:$0xff]  ;;  %3558 = vst.msk [vmem:[#allocation2 + $0xf8] sm:$0xff] %vm1402_vm4, %v3520_v5  ;;  %3559 = vst.msk [vmem:[#allocation2 + $0x100] sm:$0xff] %vm1402_vm4, %v3521_v44  ;;  %v3215_v14 = vadd.f32 %v3135_v6, %v2979_v12  ;;  %v3216_v20 = vadd.f32 %v3137_v17, %v2980_v11  ;;  %v3366_v25 = vsel %vm1166_vm3, %v3363_v30, %v3365_v63 }
 0x243   : > { %v3617_v59 = vmax.f32 %v3579_v27, %v3598_v8  ;;  %v3368_v53 = vsel %vm1166_vm3, %v3365_v63, %v3367_v3  ;;  %v2793_v39 = vmul.f32 %v2712_v38, %v10494_v49  ;;  %v3025_v61 = vmul.f32 %v2712_v38, %v10496_v50  ;;  %v3671_v12 = vld [vmem:[#allocation3 + $0x51] sm:$0xff]  ;;  %v3673_v6 = vld [vmem:[#allocation3 + $0x61] sm:$0xff] }
 0x244   : > { %v2754_v41 = vmul.f32 %v12377_v10, %v10500_v52  ;;  %v3446_v1 = vadd.f32 %v3366_v25, %v3215_v14  ;;  %v3447_v22 = vadd.f32 %v3368_v53, %v3216_v20  ;;  %v3256_v15 = vmul.f32 %v2712_v38, %v10498_v51  ;;  %v3674_v47 = vld [vmem:[#allocation3 + $0x69] sm:$0xff] }
 0x245   : > { %3636 = vst.msk [vmem:[#allocation3 + $0x73] sm:$0xff] %vm1402_vm4, %v3617_v59  ;;  %v2906_v34 = vrot.slane %v2794_v4, 1  ;;  %v2904_v30 = vrot.slane %v2793_v39, 1  ;;  %v3138_v26 = vrot.slane %v3025_v61, 2  ;;  %v9579_v55 = vpack.i.bf16 %v3670_v31, %v3669_v24 }
 0x246   : > { %v3484_v9 = vadd.f32 %v12250_v54, %v3446_v1  ;;  %v3485_v0 = vadd.f32 %v12250_v54, %v3447_v22  ;;  %v3140_v58 = vrot.slane %v12431_v19, 2  ;;  %v2755_v60 = vmul.f32 %v2712_v38, %v10500_v52 }
 0x247   : > { %v3371_v10 = vrot.slane %v12436_v29, 3  ;;  %v2905_v43 = vsel %vm691_vm1, %v2902_v45, %v2904_v30  ;;  %v2907_v40 = vsel %vm691_vm1, %v2904_v30, %v2906_v34  ;;  %v3369_v56 = vrot.slane %v3256_v15, 3  ;;  %9580 = vrot.lane.b32.xlu1 %v9579_v55, %s10332_s12  ;;  %v3672_v45 = vld [vmem:[#allocation3 + $0x59] sm:$0xff] }
 0x248   : > { %v3522_v37 = vmax.f32 %v3484_v9, 0.0  ;;  %v3523_v2 = vmax.f32 %v3485_v0, 0.0  ;;  %v2981_v36 = vadd.f32 %v2905_v43, %v2754_v41  ;;  %v2982_v46 = vadd.f32 %v2907_v40, %v2755_v60  ;;  %v3682_v60 = vld [vmem:[#allocation3 + $0xa] sm:$0xff] }
 0x249   : > { %v3580_v57 = vld [vmem:[#allocation2 + $0xf0] ss:$2 sm:$0xff]  ;;  %v3599_v33 = vld [vmem:[#allocation2 + $0xf1] ss:$2 sm:$0xff]  ;;  %v3139_v28 = vsel %vm930_vm2, %v3136_v7, %v3138_v26  ;;  %v3141_v13 = vsel %vm930_vm2, %v3138_v26, %v3140_v58  ;;  %v3027_v48 = vmul.f32 %v2987_v18, %v10496_v50  ;;  %v3258_v62 = vmul.f32 %v2987_v18, %v10498_v51 }
 0x24a   : > { %v3618_v16 = vmax.f32 %v3580_v57, %v3599_v33  ;;  %3560 = vst.msk [vmem:[#allocation2 + $0x108] sm:$0xff] %vm1402_vm4, %v3522_v37  ;;  %3561 = vst.msk [vmem:[#allocation2 + $0x110] sm:$0xff] %vm1402_vm4, %v3523_v2  ;;  %v2756_v35 = vmul.f32 %v2717_v23, %v10500_v52  ;;  %v3217_v21 = vadd.f32 %v3139_v28, %v2981_v36  ;;  %v10335_v29 = vmov 2   ;;  %v3684_v37 = vld [vmem:[#allocation3 + $0x1a] sm:$0xff]  ;;  %v3685_v2 = vld [vmem:[#allocation3 + $0x22] sm:$0xff] }
 0x24b   : > { %v3218_v32 = vadd.f32 %v3141_v13, %v2982_v46  ;;  %v3370_v7 = vsel %vm1166_vm3, %v3367_v3, %v3369_v56  ;;  %v3372_v63 = vsel %vm1166_vm3, %v3369_v56, %v3371_v10  ;;  %v3142_v5 = vrot.slane %v3027_v48, 2  ;;  %9659 = vset.pattern.permute.xlu1 %v10335_v29  ;;  %9660 = vset.pattern.permute.xlu0 %v10335_v29  ;;  %v3683_v56 = vld [vmem:[#allocation3 + $0x12] sm:$0xff]  ;;  %v3686_v36 = vld [vmem:[#allocation3 + $0x2a] sm:$0xff]  ;;  %v3688_v33 = vld [vmem:[#allocation3 + $0x3a] sm:$0xff] }
 0x24c   : > { %v3373_v44 = vrot.slane %v3258_v62, 3  ;;  %3637 = vst.msk [vmem:[#allocation3 + $0x7b] sm:$0xff] %vm1402_vm4, %v3618_v16  ;;  %v2983_v11 = vadd.f32 %v2906_v34, %v2756_v35  ;;  %v3448_v38 = vadd.f32 %v3370_v7, %v3217_v21  ;;  %v9584_v8 = vpack.i.bf16 %v3672_v45, %v3671_v12  ;;  %v3675_v61 = vld [vmem:[#allocation3 + $0x71] sm:$0xff]  ;;  %v3689_v48 = vld [vmem:[#allocation3 + $0x42] sm:$0xff]  ;;  %v3692_v16 = vld [vmem:[#allocation3 + $0x5a] sm:$0xff] }
 0x24d   : > { %v3449_v27 = vadd.f32 %v3372_v63, %v3218_v32  ;;  %v3143_v23 = vsel %vm930_vm2, %v3140_v58, %v3142_v5  ;;  %v9589_v17 = vpack.i.bf16 %v3674_v47, %v3673_v6  ;;  %v3681_v58 = vld [vmem:[#allocation3 + $0x2] sm:$0xff]  ;;  %v9614_v46 = vpack.i.bf16 %v3684_v37, %v3683_v56  ;;  %v3690_v28 = vld [vmem:[#allocation3 + $0x4a] sm:$0xff]  ;;  %v3687_v13 = vld [vmem:[#allocation3 + $0x32] sm:$0xff] }
 0x24e   : > { %v3486_v4 = vadd.f32 %v12250_v54, %v3448_v38  ;;  %v3219_v3 = vadd.f32 %v3143_v23, %v2983_v11  ;;  %9585 = vrot.lane.b32.xlu0 %v9584_v8, %s10332_s12  ;;  %v3374_v19 = vsel %vm1166_vm3, %v3371_v10, %v3373_v44  ;;  %v9609_v40 = vpack.i.bf16 %v3682_v60, %v3681_v58  ;;  %v3694_v35 = vld [vmem:[#allocation3 + $0x6a] sm:$0xff]  ;;  %v3691_v21 = vld [vmem:[#allocation3 + $0x52] sm:$0xff]  ;;  %v3693_v32 = vld [vmem:[#allocation3 + $0x62] sm:$0xff] }
 0x24f   : > { %v3487_v42 = vadd.f32 %v12250_v54, %v3449_v27  ;;  %9590 = vrot.lane.b32.xlu1 %v9589_v17, %s10332_s12  ;;  %v9619_v57 = vpack.i.bf16 %v3686_v36, %v3685_v2  ;;  %v9624_v62 = vpack.i.bf16 %v3688_v33, %v3687_v13  ;;  %v9629_v45 = vpack.i.bf16 %v3690_v28, %v3689_v48  ;;  %v3695_v44 = vld [vmem:[#allocation3 + $0x72] sm:$0xff]  ;;  %v3700_v8 = vld [vmem:[#allocation3 + $0x9a] sm:$0x3]  ;;  %v12533_v29 = vld [vmem:[%s10392_s30 + $0x50] sm:$0xff] }
 0x250   : > { %v3524_v59 = vmax.f32 %v3486_v4, 0.0  ;;  %v3450_v20 = vadd.f32 %v3374_v19, %v3219_v3  ;;  %v9634_v47 = vpack.i.bf16 %v3692_v16, %v3691_v21  ;;  %v9639_v7 = vpack.i.bf16 %v3694_v35, %v3693_v32  ;;  %v12496_v6 = vld [vmem:[%s10392_s30] sm:$0xff]  ;;  %v12501_v17 = vld [vmem:[%s10392_s30 + $0x8] sm:$0xff]  ;;  %v12504_v4 = vld [vmem:[%s10392_s30 + $0x10] sm:$0xff] }
 0x251   : > { %v3525_v14 = vmax.f32 %v3487_v42, 0.0  ;;  %v3581_v31 = vld [vmem:[#allocation2 + $0x100] ss:$2 sm:$0xff]  ;;  %v3600_v25 = vld [vmem:[#allocation2 + $0x101] ss:$2 sm:$0xff]  ;;  %v12512_v3 = vld [vmem:[%s10392_s30 + $0x18] sm:$0xff] }
 0x252   : > { %v3619_v53 = vmax.f32 %v3581_v31, %v3600_v25  ;;  %3562 = vst.msk [vmem:[#allocation2 + $0x118] sm:$0xff] %vm1402_vm4, %v3524_v59  ;;  %v3488_v39 = vadd.f32 %v12250_v54, %v3450_v20  ;;  %v12509_v42 = vld [vmem:[%s10392_s30 + $0x20] sm:$0xff]  ;;  %v12517_v19 = vld [vmem:[%s10392_s30 + $0x30] sm:$0xff]  ;;  %v12520_v59 = vld [vmem:[%s10392_s30 + $0x28] sm:$0xff] }
 0x253   : > { %3563 = vst.msk [vmem:[#allocation2 + $0x120] sm:$0xff] %vm1402_vm4, %v3525_v14  ;;  %v3676_v41 = vld [vmem:[#allocation3 + $0x79] sm:$0xff]  ;;  %v12525_v14 = vld [vmem:[%s10392_s30 + $0x40] sm:$0xff]  ;;  %v12528_v20 = vld [vmem:[%s10392_s30 + $0x38] sm:$0xff] }
 0x254   : > { %3638 = vst.msk [vmem:[#allocation3 + $0x83] sm:$0xff] %vm1402_vm4, %v3619_v53  ;;  %v3526_v1 = vmax.f32 %v3488_v39, 0.0  ;;  %v9594_v22 = vpack.i.bf16 %v3676_v41, %v3675_v61  ;;  %v3696_v63 = vld [vmem:[#allocation3 + $0x7a] sm:$0xff]  ;;  %v12541_v25 = vld [vmem:[%s16538_s4] ss:$0 sm:$0xff]  ;;  %v12549_v61 = vld [vmem:[%s10392_s30 + $0x58] sm:$0xff] }
 0x255   : > { %v9644_v11 = vpack.i.bf16 %v3696_v63, %v3695_v44  ;;  %v12536_v31 = vld [vmem:[%s10392_s30 + $0x48] sm:$0xff]  ;;  %v12546_v39 = vld [vmem:[%s10392_s30 + $0x60] sm:$0xff]  ;;  %v12580_v36 = vld [vmem:[%s10392_s30 + $0x90] sm:$0xff] }
 0x256   : > { %3564 = vst.msk [vmem:[#allocation2 + $0x128] sm:$0x7f] %vm1440_vm5, %v3526_v1  ;;  %9595 = vrot.lane.b32.xlu0 %v9594_v22, %s10332_s12  ;;  %v12568_v60 = vld [vmem:[%s10392_s30 + $0x80] sm:$0xff]  ;;  %v12595_v16 = vld [vmem:[%s10392_s30 + $0x98] sm:$0xff]  ;;  %v12607_v44 = vld [vmem:[%s10392_s30 + $0xa8] sm:$0xff] }
 0x259   : > { %v3582_v15 = vld [vmem:[#allocation2 + $0x110] ss:$2 sm:$0xff]  ;;  %v3601_v24 = vld [vmem:[#allocation2 + $0x111] ss:$2 sm:$0xff] }
 0x25a   : > { %v3620_v34 = vmax.f32 %v3582_v15, %v3601_v24 }
 0x25b   : > { %v3677_v54 = vld [vmem:[#allocation3 + $0x81] sm:$0xff] }
 0x25c   : > { %3639 = vst.msk [vmem:[#allocation3 + $0x8b] sm:$0xff] %vm1402_vm4, %v3620_v34  ;;  %v3697_v12 = vld [vmem:[#allocation3 + $0x82] sm:$0xff] }
 0x25d   : > { %v3583_v30 = vld [vmem:[#allocation2 + $0x120] ss:$2 sm:$0x7f]  ;;  %v3602_v26 = vld [vmem:[#allocation2 + $0x121] ss:$2 sm:$0x7f] }
 0x25e   : > { %v3621_v55 = vmax.f32 %v3583_v30, %v3602_v26  ;;  %v12556_v34 = vld [vmem:[%s10392_s30 + $0x70] sm:$0xff]  ;;  %v12559_v30 = vld [vmem:[%s10392_s30 + $0x68] sm:$0xff] }
 0x260   : > { %3640 = vst.msk [vmem:[#allocation3 + $0x93] sm:$0x7f] %vm1440_vm5, %v3621_v55 }
 0x263   : > { %v3678_v9 = vld [vmem:[#allocation3 + $0x89] sm:$0xff] }
 0x264   : > { %v9599_v0 = vpack.i.bf16 %v3678_v9, %v3677_v54  ;;  %v3698_v5 = vld [vmem:[#allocation3 + $0x8a] sm:$0xff] }
 0x265   : > { %v9649_v38 = vpack.i.bf16 %v3698_v5, %v3697_v12  ;;  %v12604_v5 = vld [vmem:[%s10392_s30 + $0xb0] sm:$0xff] }
 0x266   : > { %9600 = vrot.lane.b32.xlu1 %v9599_v0, %s10332_s12 }
 0x267   : > { %v3679_v18 = vld [vmem:[#allocation3 + $0x91] sm:$0xff]  ;;  %v3680_v10 = vld [vmem:[#allocation3 + $0x99] sm:$0x3] }
 0x268   : > { %v9604_v43 = vpack.i.bf16 %v3680_v10, %v3679_v18  ;;  %v3699_v27 = vld [vmem:[#allocation3 + $0x92] sm:$0xff]  ;;  %v12571_v18 = vld [vmem:[%s10392_s30 + $0x78] sm:$0xff] }
 0x269   : > { %v9654_v23 = vpack.i.bf16 %v3700_v8, %v3699_v27 }
 0x26a   : > { %9605 = vrot.lane.b32.xlu0 %v9604_v43, %s10332_s12  ;;  %9610 = vrot.lane.b32.xlu1 %v9609_v40, %s10333_s16 }
 0x26e   : > { %9615 = vrot.lane.b32.xlu0 %v9614_v46, %s10333_s16  ;;  %9620 = vrot.lane.b32.xlu1 %v9619_v57, %s10333_s16  ;;  %v12583_v46 = vld [vmem:[%s10392_s30 + $0x88] sm:$0xff] }
 0x272   : > { %9625 = vrot.lane.b32.xlu0 %v9624_v62, %s10333_s16  ;;  %9630 = vrot.lane.b32.xlu1 %v9629_v45, %s10333_s16  ;;  %v12592_v45 = vld [vmem:[%s10392_s30 + $0xa0] sm:$0xff] }
 0x276   : > { %9635 = vrot.lane.b32.xlu0 %v9634_v47, %s10333_s16  ;;  %9640 = vrot.lane.b32.xlu1 %v9639_v7, %s10333_s16 }
 0x27a   : > { %9645 = vrot.lane.b32.xlu0 %v9644_v11, %s10333_s16  ;;  %9650 = vrot.lane.b32.xlu1 %v9649_v38, %s10333_s16 }
 0x27e   : > { %9655 = vrot.lane.b32.xlu0 %v9654_v23, %s10333_s16  ;;  %4583 = vperm.xlu1 %9659, %v12496_v6  }
 0x282   : > { %4588 = vperm.xlu0 %9660, %v12501_v17   ;;  %4593 = vperm.xlu1 %9659, %v12504_v4  }
 0x286   : > { %4603 = vperm.xlu0 %9660, %v12509_v42   ;;  %4598 = vperm.xlu1 %9659, %v12512_v3  }
 0x28a   : > { %4613 = vperm.xlu0 %9660, %v12517_v19   ;;  %4608 = vperm.xlu1 %9659, %v12520_v59  }
 0x28e   : > { %4623 = vperm.xlu0 %9660, %v12525_v14   ;;  %4618 = vperm.xlu1 %9659, %v12528_v20  }
 0x291   : > { %v9173_v53 = vpop.f32.mrf.mxu0 }
 0x292   : > { %4633 = vperm.xlu0 %9660, %v12533_v29   ;;  %4628 = vperm.xlu1 %9659, %v12536_v31   ;;  %v2015_v41 = vadd.f32 %v9173_v53, %v12541_v25 }
 0x293   : > { %v2009_v1 = vpop.f32.mrf.mxu0 }
 0x294   : > { %v2109_v22 = vmax.f32 %v2015_v41, 0.0  ;;  %v2010_v15 = vadd.f32 %v12541_v25, %v2009_v1 }
 0x296   : > { %4643 = vperm.xlu0 %9660, %v12546_v39   ;;  %4638 = vperm.xlu1 %9659, %v12549_v61   ;;  %2129 = vst.msk [vmem:[#allocation4 + $0x8] sm:$0xff] %vm1895_vm6, %v2109_v22  ;;  %v2108_v26 = vmax.f32 %v2010_v15, 0.0  ;;  %v12616_v22 = vld [vmem:[%s10392_s30 + $0xc0] sm:$0xff]  ;;  %v12619_v15 = vld [vmem:[%s10392_s30 + $0xb8] sm:$0xff] }
 0x297   : > { %v9176_v24 = vpop.f32.mrf.mxu0 }
 0x298   : > { %v2025_v55 = vadd.f32 %v9176_v24, %v12541_v25  ;;  %2128 = vst.msk [vmem:[#allocation4] sm:$0xff] %vm1895_vm6, %v2108_v26 }
 0x299   : > { %v2019_v54 = vpop.f32.mrf.mxu0 }
 0x29a   : > { %v2111_v9 = vmax.f32 %v2025_v55, 0.0  ;;  %v2020_v0 = vadd.f32 %v12541_v25, %v2019_v54  ;;  %4653 = vperm.xlu0 %9660, %v12556_v34   ;;  %4648 = vperm.xlu1 %9659, %v12559_v30  }
 0x29b   : > { %v9179_v58 = vpop.f32.mrf.mxu0 }
 0x29c   : > { %2131 = vst.msk [vmem:[#allocation4 + $0x18] sm:$0xff] %vm1895_vm6, %v2111_v9  ;;  %v2110_v10 = vmax.f32 %v2020_v0, 0.0  ;;  %v2035_v43 = vadd.f32 %v9179_v58, %v12541_v25 }
 0x29d   : > { %v2029_v40 = vpop.f32.mrf.mxu0 }
 0x29e   : > { %2130 = vst.msk [vmem:[#allocation4 + $0x10] sm:$0xff] %vm1895_vm6, %v2110_v10  ;;  %v2113_v56 = vmax.f32 %v2035_v43, 0.0  ;;  %v2030_v37 = vadd.f32 %v12541_v25, %v2029_v40  ;;  %4663 = vperm.xlu0 %9660, %v12568_v60   ;;  %4658 = vperm.xlu1 %9659, %v12571_v18   ;;  %v12629_v40 = vld [vmem:[%s10392_s30 + $0xd0] sm:$0xff] }
 0x29f   : > { %v9182_v2 = vpop.f32.mrf.mxu0 }
 0x2a0   : > { %2133 = vst.msk [vmem:[#allocation4 + $0x28] sm:$0xff] %vm1895_vm6, %v2113_v56  ;;  %v2112_v57 = vmax.f32 %v2030_v37, 0.0  ;;  %v2045_v33 = vadd.f32 %v9182_v2, %v12541_v25  ;;  %v12632_v56 = vld [vmem:[%s10392_s30 + $0xc8] sm:$0xff] }
 0x2a1   : > { %v2039_v28 = vpop.f32.mrf.mxu0 }
 0x2a2   : > { %2132 = vst.msk [vmem:[#allocation4 + $0x20] sm:$0xff] %vm1895_vm6, %v2112_v57  ;;  %v2115_v13 = vmax.f32 %v2045_v33, 0.0  ;;  %v2040_v48 = vadd.f32 %v12541_v25, %v2039_v28  ;;  %4673 = vperm.xlu0 %9660, %v12580_v36   ;;  %4668 = vperm.xlu1 %9659, %v12583_v46  }
 0x2a3   : > { %v9185_v62 = vpop.f32.mrf.mxu0 }
 0x2a4   : > { %2135 = vst.msk [vmem:[#allocation4 + $0x38] sm:$0xff] %vm1895_vm6, %v2115_v13  ;;  %v2114_v35 = vmax.f32 %v2040_v48, 0.0  ;;  %v2055_v21 = vadd.f32 %v9185_v62, %v12541_v25  ;;  %v12642_v48 = vld [vmem:[%s10392_s30 + $0xe0] sm:$0xff]  ;;  %v12645_v62 = vld [vmem:[%s10392_s30 + $0xd8] sm:$0xff] }
 0x2a5   : > { %v2049_v32 = vpop.f32.mrf.mxu0 }
 0x2a6   : > { %2134 = vst.msk [vmem:[#allocation4 + $0x30] sm:$0xff] %vm1895_vm6, %v2114_v35  ;;  %v2117_v47 = vmax.f32 %v2055_v21, 0.0  ;;  %v2050_v7 = vadd.f32 %v12541_v25, %v2049_v32  ;;  %4683 = vperm.xlu0 %9660, %v12592_v45   ;;  %4678 = vperm.xlu1 %9659, %v12595_v16  }
 0x2a7   : > { %v9188_v63 = vpop.f32.mrf.mxu0 }
 0x2a8   : > { %2137 = vst.msk [vmem:[#allocation4 + $0x48] sm:$0xff] %vm1895_vm6, %v2117_v47  ;;  %v2116_v12 = vmax.f32 %v2050_v7, 0.0  ;;  %v2065_v11 = vadd.f32 %v9188_v63, %v12541_v25 }
 0x2a9   : > { %v2153_v38 = vld [vmem:[#allocation4 + $0x20] ss:$2 sm:$0xff]  ;;  %v2173_v27 = vld [vmem:[#allocation4 + $0x21] ss:$2 sm:$0xff]  ;;  %v2059_v8 = vpop.f32.mrf.mxu0 }
 0x2aa   : > { %v2190_v23 = vmax.f32 %v2153_v38, %v2173_v27  ;;  %2136 = vst.msk [vmem:[#allocation4 + $0x40] sm:$0xff] %vm1895_vm6, %v2116_v12  ;;  %v2119_v53 = vmax.f32 %v2065_v11, 0.0  ;;  %v2060_v41 = vadd.f32 %v12541_v25, %v2059_v8  ;;  %4693 = vperm.xlu0 %9660, %v12604_v5   ;;  %4688 = vperm.xlu1 %9659, %v12607_v44   ;;  %v12654_v12 = vld [vmem:[%s10392_s30 + $0xf0] sm:$0xff]  ;;  %v12657_v11 = vld [vmem:[%s10392_s30 + $0xe8] sm:$0xff] }
 0x2ab   : > { %v9191_v1 = vpop.f32.mrf.mxu0 }
 0x2ac   : > { %2200 = vst.msk [vmem:[#allocation5 + $0x13] sm:$0xff] %vm1895_vm6, %v2190_v23  ;;  %2139 = vst.msk [vmem:[#allocation4 + $0x58] sm:$0xff] %vm1895_vm6, %v2119_v53  ;;  %v2118_v24 = vmax.f32 %v2060_v41, 0.0  ;;  %v2075_v26 = vadd.f32 %v9191_v1, %v12541_v25 }
 0x2ad   : > { %v2155_v55 = vld [vmem:[#allocation4 + $0x30] ss:$2 sm:$0xff]  ;;  %v2175_v54 = vld [vmem:[#allocation4 + $0x31] ss:$2 sm:$0xff]  ;;  %v2069_v9 = vpop.f32.mrf.mxu0 }
 0x2ae   : > { %v2191_v0 = vmax.f32 %v2155_v55, %v2175_v54  ;;  %2138 = vst.msk [vmem:[#allocation4 + $0x50] sm:$0xff] %vm1895_vm6, %v2118_v24  ;;  %v2121_v58 = vmax.f32 %v2075_v26, 0.0  ;;  %v2070_v10 = vadd.f32 %v12541_v25, %v2069_v9  ;;  %4703 = vperm.xlu0 %9660, %v12616_v22   ;;  %4698 = vperm.xlu1 %9659, %v12619_v15   ;;  %v4574_v26 = vld [vmem:[%s10392_s30 + $0x100] sm:$0xff]  ;;  %v12667_v55 = vld [vmem:[%s10392_s30 + $0xf8] sm:$0xff] }
 0x2af   : > { %v9194_v43 = vpop.f32.mrf.mxu0 }
 0x2b0   : > { %2201 = vst.msk [vmem:[#allocation5 + $0x1b] sm:$0xff] %vm1895_vm6, %v2191_v0  ;;  %2141 = vst.msk [vmem:[#allocation4 + $0x68] sm:$0xff] %vm1895_vm6, %v2121_v58  ;;  %v2120_v37 = vmax.f32 %v2070_v10, 0.0  ;;  %v2085_v2 = vadd.f32 %v9194_v43, %v12541_v25  ;;  %v4575_v10 = vld [vmem:[%s10392_s30 + $0x108] sm:$0xff]  ;;  %v2149_v43 = vld [vmem:[#allocation4] ss:$2 sm:$0xff] }
 0x2b1   : > { %v2079_v57 = vpop.f32.mrf.mxu0 }
 0x2b2   : > { %2140 = vst.msk [vmem:[#allocation4 + $0x60] sm:$0xff] %vm1895_vm6, %v2120_v37  ;;  %v2123_v33 = vmax.f32 %v2085_v2, 0.0  ;;  %v2080_v28 = vadd.f32 %v12541_v25, %v2079_v57  ;;  %4713 = vperm.xlu0 %9660, %v12629_v40   ;;  %4708 = vperm.xlu1 %9659, %v12632_v56   ;;  %v2169_v37 = vld [vmem:[#allocation4 + $0x1] ss:$2 sm:$0xff]  ;;  %v4578_v2 = vld [vmem:[%s10392_s30 + $0x120] sm:$0xff] }
 0x2b3   : > { %v9197_v13 = vpop.f32.mrf.mxu0  ;;  %v4577_v57 = vld [vmem:[%s10392_s30 + $0x118] sm:$0xff] }
 0x2b4   : > { %2143 = vst.msk [vmem:[#allocation4 + $0x78] sm:$0xff] %vm1895_vm6, %v2123_v33  ;;  %v2122_v35 = vmax.f32 %v2080_v28, 0.0  ;;  %v2095_v21 = vadd.f32 %v9197_v13, %v12541_v25  ;;  %v2188_v33 = vmax.f32 %v2149_v43, %v2169_v37  ;;  %v12678_v28 = vpop.permute.xlu1 %9560  ;;  %v2151_v13 = vld [vmem:[#allocation4 + $0x10] ss:$2 sm:$0xff] }
 0x2b5   : > { %v2089_v32 = vpop.f32.mrf.mxu0  ;;  %v12752_v43 = vld [vmem:[#allocation3 + $0x33] sm:$0xff]  ;;  %v12754_v37 = vld [vmem:[#allocation3 + $0x3b] sm:$0xff] }
 0x2b6   : > { %2142 = vst.msk [vmem:[#allocation4 + $0x70] sm:$0xff] %vm1895_vm6, %v2122_v35  ;;  %v2125_v47 = vmax.f32 %v2095_v21, 0.0  ;;  %v2090_v7 = vadd.f32 %v12541_v25, %v2089_v32  ;;  %4723 = vperm.xlu0 %9660, %v12642_v48   ;;  %4718 = vperm.xlu1 %9659, %v12645_v62   ;;  %v2171_v35 = vld [vmem:[#allocation4 + $0x11] ss:$2 sm:$0xff]  ;;  %v4580_v21 = vld [vmem:[%s10392_s30 + $0x130] sm:$0x3] }
 0x2b7   : > { %v9200_v63 = vpop.f32.mrf.mxu0  ;;  %v4579_v32 = vld [vmem:[%s10392_s30 + $0x128] sm:$0xff]  ;;  %2198 = vst.msk [vmem:[#allocation5 + $0x3] sm:$0xff] %vm1895_vm6, %v2188_v33 }
 0x2b8   : > { %2145 = vst.msk [vmem:[#allocation4 + $0x88] sm:$0xff] %vm1895_vm6, %v2125_v47  ;;  %v2124_v38 = vmax.f32 %v2090_v7, 0.0  ;;  %v2105_v27 = vadd.f32 %v9200_v63, %v12541_v25  ;;  %v16704_v47 = vmov 0.0   ;;  %v2189_v7 = vmax.f32 %v2151_v13, %v2171_v35  ;;  %v12686_v63 = vpop.permute.xlu1 %9570  ;;  %v12760_v35 = vld [vmem:[#allocation3 + $0x5b] sm:$0xff] }
 0x2b9   : > { %v2161_v8 = vld [vmem:[#allocation4 + $0x60] ss:$2 sm:$0xff]  ;;  %v2181_v23 = vld [vmem:[#allocation4 + $0x61] ss:$2 sm:$0xff]  ;;  %v2099_v53 = vpop.f32.mrf.mxu0  ;;  %286 = vst.msk [vmem:[#allocation5] sm:$0x7] %vm285_vm9, %v16704_v47 }
 0x2ba   : > { %v2194_v41 = vmax.f32 %v2161_v8, %v2181_v23  ;;  %2144 = vst.msk [vmem:[#allocation4 + $0x80] sm:$0xff] %vm1895_vm6, %v2124_v38  ;;  %v2127_v1 = vmax.f32 %v2105_v27, 0.0  ;;  %v2100_v24 = vadd.f32 %v12541_v25, %v2099_v53  ;;  %4733 = vperm.xlu0 %9660, %v12654_v12   ;;  %4728 = vperm.xlu1 %9659, %v12657_v11   ;;  %v4576_v25 = vld [vmem:[%s10392_s30 + $0x110] sm:$0xff]  ;;  %2199 = vst.msk [vmem:[#allocation5 + $0xb] sm:$0xff] %vm1895_vm6, %v2189_v7  ;;  %v12688_v38 = vpop.permute.xlu0 %9565  ;;  %v10336_v27 = vmov 3  }
 0x2bb   : > { %287 = vst.msk [vmem:[#allocation5 + $0x50] sm:$0x7] %vm285_vm9, %v16704_v47  ;;  %v9568_v33 = vunpack.i.h.bf16 %v12688_v38  ;;  %v9567_v13 = vunpack.i.l.bf16 %v12688_v38  ;;  %v12772_v7 = vld [vmem:[#allocation3 + $0x43] sm:$0xff]  ;;  %v12776_v38 = vld [vmem:[#allocation3 + $0x53] sm:$0xff] }
 0x2bc   : > { %2204 = vst.msk [vmem:[#allocation5 + $0x33] sm:$0xff] %vm1895_vm6, %v2194_v41  ;;  %v2126_v54 = vmax.f32 %v2100_v24, 0.0  ;;  %v12694_v23 = vpop.permute.xlu1 %9580  ;;  %v3643_v47 = vld [vmem:[#allocation3 + $0x10] sm:$0xff] }
 0x2bd   : > { %2148 = vst.msk [vmem:[#allocation4 + $0x98] sm:$0x3] %vm2147_vm8, %v2127_v1  ;;  %v2163_v9 = vld [vmem:[#allocation4 + $0x70] ss:$2 sm:$0xff]  ;;  %v2183_v0 = vld [vmem:[#allocation4 + $0x71] ss:$2 sm:$0xff] }
 0x2be   : > { %v2195_v58 = vmax.f32 %v2163_v9, %v2183_v0  ;;  %2146 = vst.msk [vmem:[#allocation4 + $0x90] sm:$0xff] %vm1895_vm6, %v2126_v54  ;;  %4743 = vperm.xlu0 %9660, %v4574_v26   ;;  %4738 = vperm.xlu1 %9659, %v12667_v55   ;;  %v12692_v8 = vpop.permute.xlu0 %9575  ;;  %16705 = vst [vmem:[#allocation9_spill] sm:$0xff] %v12694_v23  ;;  %v2179_v26 = vld [vmem:[#allocation4 + $0x51] ss:$2 sm:$0xff] }
 0x2bf   : > { %v12736_v9 = vld [vmem:[#allocation3 + $0xb] sm:$0xff]  ;;  %v12741_v0 = vld [vmem:[#allocation3 + $0x1b] sm:$0xff] }
 0x2c0   : > { %2205 = vst.msk [vmem:[#allocation5 + $0x3b] sm:$0xff] %vm1895_vm6, %v2195_v58  ;;  %v12743_v58 = vld [vmem:[#allocation3 + $0x23] sm:$0xff] }
 0x2c1   : > { %v12700_v41 = vpop.permute.xlu1 %9590  ;;  %v12839_v23 = vld [vmem:[#allocation5 + $0x1] sm:$0xff] }
 0x2c2   : > { %4753 = vperm.xlu0 %9660, %v4576_v25   ;;  %4748 = vperm.xlu1 %9659, %v4575_v10   ;;  %v12698_v53 = vpop.permute.xlu0 %9585  ;;  %16707 = vst [vmem:[#allocation10_spill] sm:$0xff] %v12700_v41  ;;  %v12745_v25 = vld [vmem:[#allocation3 + $0x2b] sm:$0xff]  ;;  %v12837_v41 = vld [vmem:[#allocation5 + $0x3] sm:$0xff] }
 0x2c3   : > { %16706 = vst [vmem:[#allocation6_spill] sm:$0xff] %v12698_v53 }
 0x2c6   : > { %4763 = vperm.xlu0 %9660, %v4578_v2   ;;  %4758 = vperm.xlu1 %9659, %v4577_v57   ;;  %v12756_v2 = vld [vmem:[#allocation3 + $0x4b] sm:$0xff]  ;;  %v3641_v57 = vld [vmem:[#allocation3] sm:$0xff] }
 0x2c8   : > { %v12704_v1 = vpop.permute.xlu0 %9595 }
 0x2c9   : > { %16708 = vst [vmem:[#allocation7_spill] sm:$0xff] %v12704_v1  ;;  %v9578_v1 = vunpack.i.h.bf16 %v12692_v8 }
 0x2ca   : > { %5038 = vperm.xlu0 %9660, %v4580_v21   ;;  %4768 = vperm.xlu1 %9659, %v4579_v32   ;;  %v12764_v21 = vld [vmem:[#allocation3 + $0x6b] sm:$0xff]  ;;  %v3644_v32 = vld [vmem:[#allocation3 + $0x18] sm:$0xff] }
 0x2ce   : > { %9662 = vset.pattern.permute.xlu0 %v10336_v27  ;;  %9661 = vset.pattern.permute.xlu1 %v10336_v27  ;;  %v12774_v27 = vld [vmem:[#allocation3 + $0x7b] sm:$0xff] }
 0x2cf   : > { %6640 = vperm.xlu0 %9662, %v12501_v17   ;;  %6635 = vperm.xlu1 %9661, %v12496_v6  }
 0x2d3   : > { %6655 = vperm.xlu0 %9662, %v12509_v42   ;;  %6645 = vperm.xlu1 %9661, %v12504_v4  }
 0x2d7   : > { %6665 = vperm.xlu0 %9662, %v12517_v19   ;;  %6650 = vperm.xlu1 %9661, %v12512_v3   ;;  %v2157_v19 = vld [vmem:[#allocation4 + $0x40] ss:$2 sm:$0xff]  ;;  %v2177_v3 = vld [vmem:[#allocation4 + $0x41] ss:$2 sm:$0xff] }
 0x2d8   : > { %v12706_v17 = vpop.permute.xlu1 %9600 }
 0x2d9   : > { %16709 = vst [vmem:[#allocation11_spill] sm:$0xff] %v12706_v17  ;;  %v3645_v17 = vld [vmem:[#allocation3 + $0x20] sm:$0xff] }
 0x2db   : > { %6675 = vperm.xlu0 %9662, %v12525_v14   ;;  %6660 = vperm.xlu1 %9661, %v12520_v59   ;;  %v2192_v14 = vmax.f32 %v2157_v19, %v2177_v3  ;;  %v2159_v59 = vld [vmem:[#allocation4 + $0x50] ss:$2 sm:$0xff] }
 0x2dc   : > { %v12710_v6 = vpop.permute.xlu0 %9605  ;;  %v12712_v42 = vpop.permute.xlu1 %9610 }
 0x2dd   : > { %16710 = vst [vmem:[#allocation12_spill] sm:$0xff] %v12710_v6  ;;  %2202 = vst.msk [vmem:[#allocation5 + $0x23] sm:$0xff] %vm1895_vm6, %v2192_v14  ;;  %v9577_v6 = vunpack.i.l.bf16 %v12692_v8 }
 0x2df   : > { %6685 = vperm.xlu0 %9662, %v12533_v29   ;;  %6670 = vperm.xlu1 %9661, %v12528_v20   ;;  %v2193_v29 = vmax.f32 %v2159_v59, %v2179_v26  ;;  %v12785_v59 = vld [vmem:[#allocation3 + $0x93] sm:$0xff]  ;;  %v12787_v26 = vld [vmem:[#allocation3 + $0x63] sm:$0xff] }
 0x2e0   : > { %v12716_v4 = vpop.permute.xlu0 %9615  ;;  %v12718_v24 = vpop.permute.xlu1 %9620  ;;  %16714 = vst [vmem:[#allocation8_spill] sm:$0xff] %v12787_v26 }
 0x2e1   : > { %2203 = vst.msk [vmem:[#allocation5 + $0x2b] sm:$0xff] %vm1895_vm6, %v2193_v29  ;;  %v12789_v29 = vld [vmem:[#allocation3 + $0x8b] sm:$0xff] }
 0x2e2   : > { %16715 = vst [vmem:[#allocation13_spill] sm:$0xff] %v12789_v29  ;;  %v12853_v29 = vld [vmem:[#allocation5 + $0x1b] sm:$0xff] }
 0x2e3   : > { %6695 = vperm.xlu0 %9662, %v12546_v39   ;;  %6680 = vperm.xlu1 %9661, %v12536_v31   ;;  %v12734_v39 = vld [vmem:[#allocation3 + $0x3] sm:$0xff]  ;;  %16722 = vst [vmem:[#allocation23_spill] sm:$0xff] %v12853_v29 }
 0x2e4   : > { %v12722_v54 = vpop.permute.xlu0 %9625  ;;  %v12727_v20 = vpop.permute.xlu1 %9630  ;;  %v12889_v53 = vld [vmem:[#allocation5 + $0x21] sm:$0xff] }
 0x2e5   : > { %16711 = vst [vmem:[#allocation15_spill] sm:$0xff] %v12727_v20  ;;  %v3647_v20 = vld [vmem:[#allocation3 + $0x30] sm:$0xff]  ;;  %16729 = vst [vmem:[#allocation29_spill] sm:$0xff] %v12889_v53 }
 0x2e7   : > { %6705 = vperm.xlu0 %9662, %v12556_v34   ;;  %6690 = vperm.xlu1 %9661, %v12549_v61   ;;  %v12738_v34 = vld [vmem:[#allocation3 + $0x13] sm:$0xff]  ;;  %v9563_v61 = vunpack.i.h.bf16 %v12678_v28 }
 0x2e8   : > { %v12732_v31 = vpop.permute.xlu0 %9635  ;;  %v12748_v10 = vpop.permute.xlu1 %9640 }
 0x2e9   : > { %16712 = vst [vmem:[#allocation16_spill] sm:$0xff] %v12732_v31  ;;  %16713 = vst [vmem:[#allocation17_spill] sm:$0xff] %v12748_v10  ;;  %v3646_v10 = vld [vmem:[#allocation3 + $0x28] sm:$0xff]  ;;  %v3964_v31 = vsel %vm1402_vm4, %v3644_v32, %v9568_v33  ;;  %v9612_v33 = vunpack.i.l.bf16 %v12712_v42 }
 0x2ea   : > { %v12822_v32 = vld [vmem:[#allocation5 + $0xb] sm:$0xff] }
 0x2eb   : > { %6715 = vperm.xlu0 %9662, %v12568_v60   ;;  %6700 = vperm.xlu1 %9661, %v12559_v30   ;;  %v9562_v30 = vunpack.i.l.bf16 %v12678_v28  ;;  %v3642_v60 = vld [vmem:[#allocation3 + $0x8] sm:$0xff]  ;;  %v12762_v28 = vld [vmem:[#allocation3 + $0x9b] sm:$0x3] }
 0x2ec   : > { %v3962_v19 = vsel %vm1402_vm4, %v3642_v60, %v9563_v61  ;;  %v12792_v61 = vpop.permute.xlu0 %9645  ;;  %v12796_v60 = vld [vmem:[#allocation3 + $0x73] sm:$0xff]  ;;  %v12810_v14 = vpop.permute.xlu1 %9650 }
 0x2ed   : > { %16716 = vst [vmem:[#allocation14_spill] sm:$0xff] %v12792_v61  ;;  %v3961_v3 = vsel %vm1402_vm4, %v3641_v57, %v9562_v30  ;;  %16718 = vst [vmem:[#allocation19_spill] sm:$0xff] %v12810_v14  ;;  %v3648_v14 = vld [vmem:[#allocation3 + $0x38] sm:$0xff]  ;;  %v9627_v61 = vunpack.i.l.bf16 %v12722_v54 }
 0x2ee   : > { %v12841_v30 = vld [vmem:[#allocation5 + $0x11] sm:$0xff] }
 0x2ef   : > { %6725 = vperm.xlu0 %9662, %v12580_v36   ;;  %6710 = vperm.xlu1 %9661, %v12571_v18   ;;  %v9573_v36 = vunpack.i.h.bf16 %v12686_v63  ;;  %v9572_v18 = vunpack.i.l.bf16 %v12686_v63  ;;  %v12826_v63 = vld [vmem:[#allocation5 + $0x19] sm:$0xff]  ;;  %16720 = vst [vmem:[#allocation21_spill] sm:$0xff] %v12841_v30  ;;  %v16725_v30 = vpack.i.bf16 %v12736_v9, %v12734_v39 }
 0x2f0   : > { %16719 = vst [vmem:[#allocation20_spill] sm:$0xff] %v12826_v63 }
 0x2f1   : > { %v3965_v8 = vsel %vm1402_vm4, %v3645_v17, %v9572_v18  ;;  %v3966_v57 = vsel %vm1402_vm4, %v3646_v10, %v9573_v36  ;;  %v9618_v17 = vunpack.i.h.bf16 %v12716_v4  ;;  %v9617_v10 = vunpack.i.l.bf16 %v12716_v4 }
 0x2f2   : > { %v3967_v36 = vsel %vm1402_vm4, %v3647_v20, %v9577_v6  ;;  %v9622_v18 = vunpack.i.l.bf16 %v12718_v24  ;;  %v3968_v4 = vsel %vm1402_vm4, %v3648_v14, %v9578_v1  ;;  %v12865_v6 = vld [vmem:[#allocation5 + $0x29] sm:$0xff] }
 0x2f3   : > { %6735 = vperm.xlu0 %9662, %v12592_v45   ;;  %6720 = vperm.xlu1 %9661, %v12583_v46   ;;  %v12806_v45 = vld [vmem:[#allocation3 + $0x83] sm:$0xff]  ;;  %v3963_v46 = vsel %vm1402_vm4, %v3643_v47, %v9567_v13  ;;  %v9613_v13 = vunpack.i.h.bf16 %v12712_v42  ;;  %v9623_v42 = vunpack.i.h.bf16 %v12718_v24  ;;  %16724 = vst [vmem:[#allocation25_spill] sm:$0xff] %v12865_v6  ;;  %v12895_v9 = vsel %vm1895_vm6, %v3967_v36, %v9627_v61 }
 0x2f4   : > { %16717 = vst [vmem:[#allocation18_spill] sm:$0xff] %v12806_v45  ;;  %v12824_v47 = vld [vmem:[#allocation5 + $0x9] sm:$0xff]  ;;  %v12845_v45 = vpop.permute.xlu0 %9655  ;;  %16731 = vst [vmem:[#allocation31_spill] sm:$0xff] %v12895_v9 }
 0x2f5   : > { %16721 = vst [vmem:[#allocation22_spill] sm:$0xff] %v12845_v45  ;;  %v12861_v14 = vsel %vm1895_vm6, %v3962_v19, %v9613_v13  ;;  %v12863_v45 = vld [vmem:[#allocation5 + $0x2b] sm:$0xff]  ;;  %v12878_v19 = vsel %vm1895_vm6, %v3964_v31, %v9618_v17  ;;  %v12880_v13 = vld [vmem:[#allocation5 + $0x13] sm:$0xff]  ;;  %v12884_v24 = vld [vmem:[#allocation5 + $0x23] sm:$0xff]  ;;  %v12892_v39 = vsel %vm1895_vm6, %v3966_v57, %v9623_v42 }
 0x2f6   : > { %16723 = vst [vmem:[#allocation24_spill] sm:$0xff] %v12863_v45  ;;  %16726 = vst [vmem:[#allocation26_spill] sm:$0xff] %v12880_v13 }
 0x2f7   : > { %6740 = vperm.xlu0 %9662, %v12607_v44   ;;  %6730 = vperm.xlu1 %9661, %v12595_v16   ;;  %v9628_v44 = vunpack.i.h.bf16 %v12722_v54  ;;  %v12858_v54 = vsel %vm1895_vm6, %v3961_v3, %v9612_v33  ;;  %v12875_v3 = vsel %vm1895_vm6, %v3963_v46, %v9617_v10  ;;  %16727 = vst [vmem:[#allocation27_spill] sm:$0xff] %v12884_v24  ;;  %16730 = vst [vmem:[#allocation30_spill] sm:$0xff] %v12892_v39 }
 0x2f9   : > { %v4584_v16 = vpop.permute.xlu1 %4583 }
 0x2fa   : > { %v4809_v26 = vmul.f32 %v4584_v16, %v10494_v49  ;;  %v5041_v1 = vmul.f32 %v4584_v16, %v10496_v50  ;;  %v5272_v20 = vmul.f32 %v4584_v16, %v10498_v51 }
 0x2fb   : > { %6750 = vperm.xlu0 %9662, %v12619_v15   ;;  %9664 = vrot.lane.b32.xlu1 %v16725_v30, %s10334_s9  ;;  %v12887_v15 = vsel %vm1895_vm6, %v3965_v8, %v9622_v18  ;;  %v12902_v8 = vsel %vm1895_vm6, %v3968_v4, %v9628_v44  ;;  %v16733_v4 = vpack.i.bf16 %v12741_v0, %v12738_v34 }
 0x2fc   : > { %16728 = vst [vmem:[#allocation28_spill] sm:$0xff] %v12887_v15  ;;  %v4885_v31 = vrot.slane %v4809_v26, 1  ;;  %16732 = vst [vmem:[#allocation32_spill] sm:$0xff] %v12902_v8  ;;  %v5119_v18 = vrot.slane %v5041_v1, 2  ;;  %v5350_v36 = vrot.slane %v5272_v20, 3  ;;  %v4771_v20 = vmul.f32 %v4584_v16, %v10500_v52 }
 0x2fd   : > { %v4589_v46 = vpop.permute.xlu0 %4588  ;;  %v4594_v30 = vpop.permute.xlu1 %4593 }
 0x2fe   : > { %v4810_v33 = vmul.f32 %v4589_v46, %v10494_v49  ;;  %v5042_v57 = vmul.f32 %v4589_v46, %v10496_v50  ;;  %v5273_v61 = vmul.f32 %v4589_v46, %v10498_v51  ;;  %v4811_v26 = vmul.f32 %v4594_v30, %v10494_v49 }
 0x2ff   : > { %v5043_v42 = vmul.f32 %v4594_v30, %v10496_v50  ;;  %v12910_v17 = vmul.f32 %v4594_v30, %v10498_v51  ;;  %9669 = vrot.lane.b32.xlu0 %v16733_v4, %s10334_s9  ;;  %v4772_v44 = vmul.f32 %v4589_v46, %v10500_v52  ;;  %6745 = vperm.xlu1 %9661, %v12604_v5  }
 0x300   : > { %v4886_v1 = vrot.slane %v4810_v33, 1  ;;  %v5120_v10 = vrot.slane %v5042_v57, 2  ;;  %v5351_v8 = vrot.slane %v5273_v61, 3  ;;  %v4888_v9 = vrot.slane %v4811_v26, 1 }
 0x301   : > { %v5122_v53 = vrot.slane %v5043_v42, 2  ;;  %v5353_v6 = vrot.slane %v12910_v17, 3  ;;  %v4604_v39 = vpop.permute.xlu0 %4603  ;;  %v4773_v0 = vmul.f32 %v4594_v30, %v10500_v52  ;;  %v4599_v33 = vpop.permute.xlu1 %4598 }
 0x302   : > { %v4887_v15 = vsel %vm691_vm1, %v4885_v31, %v4886_v1  ;;  %v5121_v24 = vsel %vm930_vm2, %v5119_v18, %v5120_v10  ;;  %v5352_v34 = vsel %vm1166_vm3, %v5350_v36, %v5351_v8  ;;  %v4889_v57 = vsel %vm691_vm1, %v4886_v1, %v4888_v9 }
 0x303   : > { %v4998_v46 = vadd.f32 %v4887_v15, %v4771_v20  ;;  %v5123_v5 = vsel %vm930_vm2, %v5120_v10, %v5122_v53  ;;  %v12927_v16 = vmul.f32 %v4604_v39, %v10500_v52  ;;  %6765 = vperm.xlu0 %9662, %v12629_v40   ;;  %v4999_v17 = vadd.f32 %v4889_v57, %v4772_v44 }
 0x304   : > { %v12931_v31 = vmul.f32 %v4604_v39, %v10494_v49  ;;  %v12934_v18 = vmul.f32 %v4604_v39, %v10496_v50  ;;  %v12937_v30 = vmul.f32 %v4604_v39, %v10498_v51  ;;  %6755 = vperm.xlu1 %9661, %v12616_v22   ;;  %v5354_v10 = vsel %vm1166_vm3, %v5351_v8, %v5353_v6 }
 0x305   : > { %v5234_v15 = vadd.f32 %v5121_v24, %v4998_v46  ;;  %v4812_v61 = vmul.f32 %v4599_v33, %v10494_v49  ;;  %v5044_v36 = vmul.f32 %v4599_v33, %v10496_v50  ;;  %v4614_v40 = vpop.permute.xlu0 %4613  ;;  %v5235_v26 = vadd.f32 %v5123_v5, %v4999_v17 }
 0x306   : > { %v4892_v42 = vrot.slane %v12931_v31, 1  ;;  %v5126_v4 = vrot.slane %v12934_v18, 2  ;;  %v4774_v44 = vmul.f32 %v4599_v33, %v10500_v52  ;;  %v5275_v22 = vmul.f32 %v4599_v33, %v10498_v51  ;;  %v4609_v31 = vpop.permute.xlu1 %4608 }
 0x307   : > { %v5465_v1 = vadd.f32 %v5352_v34, %v5234_v15  ;;  %v4890_v39 = vrot.slane %v4812_v61, 1  ;;  %v5124_v20 = vrot.slane %v5044_v36, 2  ;;  %6775 = vperm.xlu0 %9662, %v12642_v48   ;;  %v5466_v24 = vadd.f32 %v5354_v10, %v5235_v26  ;;  %v12959_v34 = vld [vmem:[%s16536_s2] ss:$0 sm:$0xff] }
 0x308   : > { %v5357_v8 = vrot.slane %v12937_v30, 3  ;;  %v12950_v46 = vmul.f32 %v4614_v40, %v10500_v52  ;;  %v12953_v57 = vmul.f32 %v4614_v40, %v10494_v49  ;;  %6760 = vperm.xlu1 %9661, %v12632_v56   ;;  %v12965_v17 = vmul.f32 %v4614_v40, %v10496_v50 }
 0x309   : > { %v5503_v33 = vadd.f32 %v12959_v34, %v5465_v1  ;;  %v4891_v48 = vsel %vm691_vm1, %v4888_v9, %v4890_v39  ;;  %v4893_v5 = vsel %vm691_vm1, %v4890_v39, %v4892_v42  ;;  %v5504_v30 = vadd.f32 %v12959_v34, %v5466_v24 }
 0x30a   : > { %v5000_v15 = vadd.f32 %v4891_v48, %v4773_v0  ;;  %v5001_v10 = vadd.f32 %v4893_v5, %v4774_v44  ;;  %v5125_v56 = vsel %vm930_vm2, %v5122_v53, %v5124_v20  ;;  %v5127_v36 = vsel %vm930_vm2, %v5124_v20, %v5126_v4  ;;  %v4624_v0 = vpop.permute.xlu0 %4623 }
 0x30b   : > { %v5541_v61 = vmax.f32 %v5503_v33, 0.0  ;;  %v5355_v26 = vrot.slane %v5275_v22, 3  ;;  %v4896_v9 = vrot.slane %v12953_v57, 1  ;;  %6780 = vperm.xlu0 %9662, %v12657_v11   ;;  %v5542_v1 = vmax.f32 %v5504_v30, 0.0  ;;  %v4619_v30 = vpop.permute.xlu1 %4618 }
 0x30c   : > { %v5236_v39 = vadd.f32 %v5125_v56, %v5000_v15  ;;  %v5237_v45 = vadd.f32 %v5127_v36, %v5001_v10  ;;  %v12975_v13 = vmul.f32 %v4614_v40, %v10498_v51  ;;  %6770 = vperm.xlu1 %9661, %v12645_v62   ;;  %v5130_v20 = vrot.slane %v12965_v17, 2 }
 0x30d   : > { %5579 = vst.msk [vmem:[#allocation2] sm:$0xff] %vm1402_vm4, %v5541_v61  ;;  %v5356_v53 = vsel %vm1166_vm3, %v5353_v6, %v5355_v26  ;;  %v5358_v44 = vsel %vm1166_vm3, %v5355_v26, %v5357_v8  ;;  %v4814_v22 = vmul.f32 %v4609_v31, %v10494_v49  ;;  %5580 = vst.msk [vmem:[#allocation2 + $0x8] sm:$0xff] %vm1402_vm4, %v5542_v1 }
 0x30e   : > { %v5467_v11 = vadd.f32 %v5356_v53, %v5236_v39  ;;  %v5468_v24 = vadd.f32 %v5358_v44, %v5237_v45  ;;  %v4776_v40 = vmul.f32 %v4609_v31, %v10500_v52  ;;  %v5046_v33 = vmul.f32 %v4609_v31, %v10496_v50 }
 0x30f   : > { %v5361_v62 = vrot.slane %v12975_v13, 3  ;;  %v4894_v48 = vrot.slane %v4814_v22, 1  ;;  %v5277_v5 = vmul.f32 %v4609_v31, %v10498_v51  ;;  %v12989_v6 = vmul.f32 %v4624_v0, %v10494_v49  ;;  %6790 = vperm.xlu0 %9662, %v12667_v55  }
 0x310   : > { %v5505_v15 = vadd.f32 %v12959_v34, %v5467_v11  ;;  %v5506_v10 = vadd.f32 %v12959_v34, %v5468_v24  ;;  %v5128_v45 = vrot.slane %v5046_v33, 2  ;;  %v12995_v56 = vmul.f32 %v4624_v0, %v10500_v52  ;;  %v6628_v24 = vld [vmem:[%s10392_s30 + $0x110] sm:$0xff] }
 0x311   : > { %v16734_v61 = vpack.i.bf16 %v12745_v25, %v12743_v58  ;;  %v4895_v31 = vsel %vm691_vm1, %v4892_v42, %v4894_v48  ;;  %v4897_v36 = vsel %vm691_vm1, %v4894_v48, %v4896_v9  ;;  %v5359_v55 = vrot.slane %v5277_v5, 3 }
 0x312   : > { %v13006_v26 = vmul.f32 %v4624_v0, %v10496_v50  ;;  %v5543_v1 = vmax.f32 %v5505_v15, 0.0  ;;  %v5544_v39 = vmax.f32 %v5506_v10, 0.0  ;;  %v5002_v53 = vadd.f32 %v4895_v31, %v12927_v16  ;;  %v4634_v15 = vpop.permute.xlu0 %4633  ;;  %v4629_v10 = vpop.permute.xlu1 %4628 }
 0x313   : > { %9674 = vrot.lane.b32.xlu1 %v16734_v61, %s10334_s9  ;;  %v5003_v44 = vadd.f32 %v4897_v36, %v4776_v40  ;;  %v5129_v58 = vsel %vm930_vm2, %v5126_v4, %v5128_v45  ;;  %v5131_v25 = vsel %vm930_vm2, %v5128_v45, %v5130_v20  ;;  %v5360_v42 = vsel %vm1166_vm3, %v5357_v8, %v5359_v55  ;;  %v6626_v45 = vld [vmem:[%s10392_s30 + $0x100] sm:$0xff] }
 0x314   : > { %v4900_v22 = vrot.slane %v12989_v6, 1  ;;  %v16735_v11 = vpack.i.bf16 %v12754_v37, %v12752_v43  ;;  %5581 = vst.msk [vmem:[#allocation2 + $0x10] sm:$0xff] %vm1402_vm4, %v5543_v1  ;;  %5582 = vst.msk [vmem:[#allocation2 + $0x18] sm:$0xff] %vm1402_vm4, %v5544_v39  ;;  %v5238_v16 = vadd.f32 %v5129_v58, %v5002_v53  ;;  %v5362_v4 = vsel %vm1166_vm3, %v5359_v55, %v5361_v62  ;;  %v5617_v40 = vld [vmem:[#allocation2] ss:$2 sm:$0xff] }
 0x315   : > { %v5239_v18 = vadd.f32 %v5131_v25, %v5003_v44  ;;  %v13027_v8 = vmul.f32 %v4624_v0, %v10498_v51  ;;  %v5636_v43 = vld [vmem:[#allocation2 + $0x1] ss:$2 sm:$0xff]  ;;  %v5134_v37 = vrot.slane %v13006_v26, 2  ;;  %v4816_v33 = vmul.f32 %v4619_v30, %v10494_v49 }
 0x316   : > { %9679 = vrot.lane.b32.xlu0 %v16735_v11, %s10334_s9  ;;  %v5048_v48 = vmul.f32 %v4619_v30, %v10496_v50  ;;  %v5279_v5 = vmul.f32 %v4619_v30, %v10498_v51  ;;  %v5655_v61 = vmax.f32 %v5617_v40, %v5636_v43  ;;  %v5469_v0 = vadd.f32 %v5360_v42, %v5238_v16 }
 0x317   : > { %6785 = vperm.xlu1 %9661, %v12654_v12   ;;  %v5470_v31 = vadd.f32 %v5362_v4, %v5239_v18  ;;  %v4778_v12 = vmul.f32 %v4619_v30, %v10500_v52  ;;  %v5365_v36 = vrot.slane %v13027_v8, 3  ;;  %v4898_v55 = vrot.slane %v4816_v33, 1  ;;  %v6630_v30 = vld [vmem:[%s10392_s30 + $0x120] sm:$0xff]  ;;  %v6627_v4 = vld [vmem:[%s10392_s30 + $0x108] sm:$0xff] }
 0x318   : > { %v5132_v1 = vrot.slane %v5048_v48, 2  ;;  %v5363_v39 = vrot.slane %v5279_v5, 3  ;;  %5674 = vst.msk [vmem:[#allocation3 + $0x3] sm:$0xff] %vm1402_vm4, %v5655_v61  ;;  %v5507_v53 = vadd.f32 %v12959_v34, %v5469_v0  ;;  %v13042_v58 = vmul.f32 %v4634_v15, %v10500_v52 }
 0x319   : > { %v5508_v44 = vadd.f32 %v12959_v34, %v5470_v31  ;;  %v13045_v25 = vmul.f32 %v4634_v15, %v10494_v49  ;;  %v4899_v42 = vsel %vm691_vm1, %v4896_v9, %v4898_v55  ;;  %v4901_v11 = vsel %vm691_vm1, %v4898_v55, %v4900_v22  ;;  %v6631_v31 = vld [vmem:[%s10392_s30 + $0x128] sm:$0xff] }
 0x31a   : > { %6805 = vperm.xlu0 %9662, %v6628_v24   ;;  %v5133_v16 = vsel %vm930_vm2, %v5130_v20, %v5132_v1  ;;  %v13058_v18 = vmul.f32 %v4634_v15, %v10496_v50  ;;  %v5545_v24 = vmax.f32 %v5507_v53, 0.0  ;;  %v5004_v43 = vadd.f32 %v4899_v42, %v12950_v46  ;;  %v13072_v46 = vpop.permute.xlu1 %4638  ;;  %v6629_v53 = vld [vmem:[%s10392_s30 + $0x118] sm:$0xff] }
 0x31b   : > { %6795 = vperm.xlu1 %9661, %v6626_v45   ;;  %v5546_v40 = vmax.f32 %v5508_v44, 0.0  ;;  %v5005_v33 = vadd.f32 %v4901_v11, %v4778_v12  ;;  %v5618_v57 = vld [vmem:[#allocation2 + $0x10] ss:$2 sm:$0xff]  ;;  %v5637_v9 = vld [vmem:[#allocation2 + $0x11] ss:$2 sm:$0xff]  ;;  %v5135_v48 = vsel %vm930_vm2, %v5132_v1, %v5134_v37  ;;  %v5364_v17 = vsel %vm1166_vm3, %v5361_v62, %v5363_v39  ;;  %v4644_v62 = vpop.permute.xlu0 %4643 }
 0x31c   : > { %v5366_v20 = vsel %vm1166_vm3, %v5363_v39, %v5365_v36  ;;  %v4904_v5 = vrot.slane %v13045_v25, 1  ;;  %v5656_v45 = vmax.f32 %v5618_v57, %v5637_v9  ;;  %5583 = vst.msk [vmem:[#allocation2 + $0x20] sm:$0xff] %vm1402_vm4, %v5545_v24  ;;  %v5240_v61 = vadd.f32 %v5133_v16, %v5004_v43  ;;  %v6632_v9 = vld [vmem:[%s10392_s30 + $0x130] sm:$0x3] }
 0x31d   : > { %5584 = vst.msk [vmem:[#allocation2 + $0x28] sm:$0xff] %vm1402_vm4, %v5546_v40  ;;  %v5241_v0 = vadd.f32 %v5135_v48, %v5005_v33  ;;  %v13077_v13 = vmul.f32 %v4634_v15, %v10498_v51  ;;  %v5138_v12 = vrot.slane %v13058_v18, 2  ;;  %v4818_v55 = vmul.f32 %v4629_v10, %v10494_v49 }
 0x31e   : > { %6815 = vperm.xlu0 %9662, %v6630_v30   ;;  %v5050_v1 = vmul.f32 %v4629_v10, %v10496_v50  ;;  %v5281_v39 = vmul.f32 %v4629_v10, %v10498_v51  ;;  %5675 = vst.msk [vmem:[#allocation3 + $0xb] sm:$0xff] %vm1402_vm4, %v5656_v45  ;;  %v5471_v44 = vadd.f32 %v5364_v17, %v5240_v61  ;;  %v13112_v45 = vpop.permute.xlu1 %4648 }
 0x31f   : > { %6800 = vperm.xlu1 %9661, %v6627_v4   ;;  %v5472_v30 = vadd.f32 %v5366_v20, %v5241_v0  ;;  %v5369_v15 = vrot.slane %v13077_v13, 3  ;;  %v4780_v42 = vmul.f32 %v4629_v10, %v10500_v52  ;;  %v4902_v11 = vrot.slane %v4818_v55, 1 }
 0x320   : > { %v5136_v16 = vrot.slane %v5050_v1, 2  ;;  %v5367_v4 = vrot.slane %v5281_v39, 3  ;;  %v13089_v24 = vmul.f32 %v4644_v62, %v10494_v49  ;;  %v5509_v40 = vadd.f32 %v12959_v34, %v5471_v44  ;;  %v4654_v39 = vpop.permute.xlu0 %4653 }
 0x321   : > { %v5510_v43 = vadd.f32 %v12959_v34, %v5472_v30  ;;  %v13094_v33 = vmul.f32 %v4644_v62, %v10500_v52  ;;  %v13097_v57 = vmul.f32 %v4644_v62, %v10496_v50  ;;  %v4903_v10 = vsel %vm691_vm1, %v4900_v22, %v4902_v11 }
 0x322   : > { %6820 = vperm.xlu0 %9662, %v6631_v31   ;;  %v4905_v48 = vsel %vm691_vm1, %v4902_v11, %v4904_v5  ;;  %v5137_v17 = vsel %vm930_vm2, %v5134_v37, %v5136_v16  ;;  %v13110_v20 = vmul.f32 %v4644_v62, %v10498_v51  ;;  %v5547_v61 = vmax.f32 %v5509_v40, 0.0 }
 0x323   : > { %6810 = vperm.xlu1 %9661, %v6629_v53   ;;  %v5548_v0 = vmax.f32 %v5510_v43, 0.0  ;;  %v5006_v31 = vadd.f32 %v4903_v10, %v12995_v56  ;;  %v5007_v6 = vadd.f32 %v4905_v48, %v4780_v42  ;;  %v5139_v1 = vsel %vm930_vm2, %v5136_v16, %v5138_v12 }
 0x324   : > { %v5619_v55 = vld [vmem:[#allocation2 + $0x20] ss:$2 sm:$0xff]  ;;  %v5638_v22 = vld [vmem:[#allocation2 + $0x21] ss:$2 sm:$0xff]  ;;  %v5368_v26 = vsel %vm1166_vm3, %v5365_v36, %v5367_v4  ;;  %v5370_v37 = vsel %vm1166_vm3, %v5367_v4, %v5369_v15  ;;  %v4908_v62 = vrot.slane %v13089_v24, 1  ;;  %5585 = vst.msk [vmem:[#allocation2 + $0x30] sm:$0xff] %vm1402_vm4, %v5547_v61  ;;  %v16736_v8 = vpack.i.bf16 %v12756_v2, %v12772_v7 }
 0x325   : > { %v5657_v56 = vmax.f32 %v5619_v55, %v5638_v22  ;;  %5586 = vst.msk [vmem:[#allocation2 + $0x38] sm:$0xff] %vm1402_vm4, %v5548_v0  ;;  %v5242_v53 = vadd.f32 %v5137_v17, %v5006_v31  ;;  %v5243_v44 = vadd.f32 %v5139_v1, %v5007_v6  ;;  %v5142_v30 = vrot.slane %v13097_v57, 2  ;;  %v13148_v17 = vpop.permute.xlu1 %4658 }
 0x326   : > { %7090 = vperm.xlu0 %9662, %v6632_v9   ;;  %v5373_v36 = vrot.slane %v13110_v20, 3  ;;  %v4820_v42 = vmul.f32 %v13072_v46, %v10494_v49  ;;  %v5052_v11 = vmul.f32 %v13072_v46, %v10496_v50  ;;  %v5283_v16 = vmul.f32 %v13072_v46, %v10498_v51 }
 0x327   : > { %9684 = vrot.lane.b32.xlu1 %v16736_v8, %s10334_s9  ;;  %5676 = vst.msk [vmem:[#allocation3 + $0x13] sm:$0xff] %vm1402_vm4, %v5657_v56  ;;  %v5473_v4 = vadd.f32 %v5368_v26, %v5242_v53  ;;  %v5474_v40 = vadd.f32 %v5370_v37, %v5243_v44  ;;  %v4782_v43 = vmul.f32 %v13072_v46, %v10500_v52  ;;  %v4664_v53 = vpop.permute.xlu0 %4663 }
 0x328   : > { %v13143_v2 = vmul.f32 %v4654_v39, %v10494_v49  ;;  %v4906_v7 = vrot.slane %v4820_v42, 1  ;;  %v5140_v9 = vrot.slane %v5052_v11, 2  ;;  %v5371_v10 = vrot.slane %v5283_v16, 3  ;;  %v16740_v42 = vld [vmem:[#allocation8_spill] sm:$0xff] }
 0x329   : > { %v13146_v48 = vmul.f32 %v4654_v39, %v10496_v50  ;;  %v16737_v61 = vpack.i.bf16 %v12774_v27, %v12796_v60  ;;  %v5511_v0 = vadd.f32 %v12959_v34, %v5473_v4  ;;  %v5512_v46 = vadd.f32 %v12959_v34, %v5474_v40  ;;  %v13206_v40 = vpop.permute.xlu1 %4668 }
 0x32a   : > { %v13157_v31 = vmul.f32 %v4654_v39, %v10500_v52  ;;  %v13160_v6 = vmul.f32 %v4654_v39, %v10498_v51  ;;  %v16738_v55 = vpack.i.bf16 %v12760_v35, %v12776_v38  ;;  %v4907_v27 = vsel %vm691_vm1, %v4904_v5, %v4906_v7 }
 0x32b   : > { %9699 = vrot.lane.b32.xlu0 %v16737_v61, %s10334_s9  ;;  %v4909_v60 = vsel %vm691_vm1, %v4906_v7, %v4908_v62  ;;  %v5141_v22 = vsel %vm930_vm2, %v5138_v12, %v5140_v9  ;;  %v4912_v1 = vrot.slane %v13143_v2, 1  ;;  %v5549_v26 = vmax.f32 %v5511_v0, 0.0 }
 0x32c   : > { %9689 = vrot.lane.b32.xlu1 %v16738_v55, %s10334_s9  ;;  %v5550_v37 = vmax.f32 %v5512_v46, 0.0  ;;  %v5008_v39 = vadd.f32 %v4907_v27, %v13042_v58  ;;  %v5009_v35 = vadd.f32 %v4909_v60, %v4782_v43  ;;  %v5620_v38 = vld [vmem:[#allocation2 + $0x30] ss:$2 sm:$0xff]  ;;  %v5639_v56 = vld [vmem:[#allocation2 + $0x31] ss:$2 sm:$0xff]  ;;  %v5143_v25 = vsel %vm930_vm2, %v5140_v9, %v5142_v30 }
 0x32d   : > { %v5372_v5 = vsel %vm1166_vm3, %v5369_v15, %v5371_v10  ;;  %v5374_v18 = vsel %vm1166_vm3, %v5371_v10, %v5373_v36  ;;  %v5146_v12 = vrot.slane %v13146_v48, 2  ;;  %v16739_v58 = vpack.i.bf16 %v12762_v28, %v12785_v59  ;;  %5587 = vst.msk [vmem:[#allocation2 + $0x40] sm:$0xff] %vm1402_vm4, %v5549_v26  ;;  %v16743_v26 = vld [vmem:[#allocation18_spill] sm:$0xff] }
 0x32e   : > { %v5658_v44 = vmax.f32 %v5620_v38, %v5639_v56  ;;  %5588 = vst.msk [vmem:[#allocation2 + $0x48] sm:$0xff] %vm1402_vm4, %v5550_v37  ;;  %v5244_v13 = vadd.f32 %v5141_v22, %v5008_v39  ;;  %v5245_v8 = vadd.f32 %v5143_v25, %v5009_v35  ;;  %v5377_v15 = vrot.slane %v13160_v6, 3  ;;  %v16742_v22 = vld [vmem:[#allocation13_spill] sm:$0xff] }
 0x32f   : > { %9709 = vrot.lane.b32.xlu0 %v16739_v58, %s10334_s9  ;;  %v16741_v11 = vpack.i.bf16 %v12764_v21, %v16740_v42  ;;  %v4784_v16 = vmul.f32 %v13112_v45, %v10500_v52  ;;  %v4822_v28 = vmul.f32 %v13112_v45, %v10494_v49  ;;  %v5054_v59 = vmul.f32 %v13112_v45, %v10496_v50  ;;  %v4674_v58 = vpop.permute.xlu0 %4673 }
 0x330   : > { %v5285_v4 = vmul.f32 %v13112_v45, %v10498_v51  ;;  %5677 = vst.msk [vmem:[#allocation3 + $0x1b] sm:$0xff] %vm1402_vm4, %v5658_v44  ;;  %v5475_v43 = vadd.f32 %v5372_v5, %v5244_v13  ;;  %v5476_v7 = vadd.f32 %v5374_v18, %v5245_v8  ;;  %v13210_v21 = vmul.f32 %v4664_v53, %v10494_v49  ;;  %v13249_v8 = vpop.permute.xlu1 %4678 }
 0x331   : > { %9694 = vrot.lane.b32.xlu1 %v16741_v11, %s10334_s9  ;;  %v13213_v9 = vmul.f32 %v4664_v53, %v10496_v50  ;;  %v4910_v10 = vrot.slane %v4822_v28, 1  ;;  %v5144_v61 = vrot.slane %v5054_v59, 2  ;;  %v13216_v46 = vmul.f32 %v4664_v53, %v10498_v51 }
 0x332   : > { %v5375_v0 = vrot.slane %v5285_v4, 3  ;;  %v5513_v45 = vadd.f32 %v12959_v34, %v5475_v43  ;;  %v5514_v55 = vadd.f32 %v12959_v34, %v5476_v7  ;;  %v13221_v27 = vmul.f32 %v4664_v53, %v10500_v52 }
 0x333   : > { %v4916_v60 = vrot.slane %v13210_v21, 1  ;;  %v16744_v37 = vpack.i.bf16 %v16742_v22, %v16743_v26  ;;  %v4911_v39 = vsel %vm691_vm1, %v4908_v62, %v4910_v10  ;;  %v4913_v35 = vsel %vm691_vm1, %v4910_v10, %v4912_v1 }
 0x334   : > { %v5145_v38 = vsel %vm930_vm2, %v5142_v30, %v5144_v61  ;;  %v5150_v56 = vrot.slane %v13213_v9, 2  ;;  %v5551_v25 = vmax.f32 %v5513_v45, 0.0  ;;  %v5552_v5 = vmax.f32 %v5514_v55, 0.0 }
 0x335   : > { %9704 = vrot.lane.b32.xlu1 %v16744_v37, %s10334_s9  ;;  %v5010_v18 = vadd.f32 %v4911_v39, %v13094_v33  ;;  %v5011_v53 = vadd.f32 %v4913_v35, %v4784_v16  ;;  %v5621_v44 = vld [vmem:[#allocation2 + $0x40] ss:$2 sm:$0xff]  ;;  %v5640_v24 = vld [vmem:[#allocation2 + $0x41] ss:$2 sm:$0xff]  ;;  %v5147_v62 = vsel %vm930_vm2, %v5144_v61, %v5146_v12  ;;  %v5376_v57 = vsel %vm1166_vm3, %v5373_v36, %v5375_v0 }
 0x336   : > { %v5378_v30 = vsel %vm1166_vm3, %v5375_v0, %v5377_v15  ;;  %v5381_v13 = vrot.slane %v13216_v46, 3  ;;  %v5659_v33 = vmax.f32 %v5621_v44, %v5640_v24  ;;  %5589 = vst.msk [vmem:[#allocation2 + $0x50] sm:$0xff] %vm1402_vm4, %v5551_v25  ;;  %5590 = vst.msk [vmem:[#allocation2 + $0x58] sm:$0xff] %vm1402_vm4, %v5552_v5  ;;  %v4824_v20 = vmul.f32 %v13148_v17, %v10494_v49  ;;  %v13287_v5 = vpop.permute.xlu1 %4688 }
 0x337   : > { %v5246_v42 = vadd.f32 %v5145_v38, %v5010_v18  ;;  %v5247_v11 = vadd.f32 %v5147_v62, %v5011_v53  ;;  %v4786_v36 = vmul.f32 %v13148_v17, %v10500_v52  ;;  %v5056_v16 = vmul.f32 %v13148_v17, %v10496_v50  ;;  %v4684_v62 = vpop.permute.xlu0 %4683 }
 0x338   : > { %v5287_v28 = vmul.f32 %v13148_v17, %v10498_v51  ;;  %v13262_v59 = vmul.f32 %v4674_v58, %v10494_v49  ;;  %5678 = vst.msk [vmem:[#allocation3 + $0x23] sm:$0xff] %vm1402_vm4, %v5659_v33  ;;  %v4914_v7 = vrot.slane %v4824_v20, 1  ;;  %v13266_v10 = vmul.f32 %v4674_v58, %v10500_v52 }
 0x339   : > { %v5477_v4 = vadd.f32 %v5376_v57, %v5246_v42  ;;  %v5478_v43 = vadd.f32 %v5378_v30, %v5247_v11  ;;  %v5148_v61 = vrot.slane %v5056_v16, 2  ;;  %v13269_v45 = vmul.f32 %v4674_v58, %v10496_v50 }
 0x33a   : > { %v5379_v0 = vrot.slane %v5287_v28, 3  ;;  %v13272_v55 = vmul.f32 %v4674_v58, %v10498_v51  ;;  %v4915_v26 = vsel %vm691_vm1, %v4912_v1, %v4914_v7  ;;  %v4917_v37 = vsel %vm691_vm1, %v4914_v7, %v4916_v60 }
 0x33b   : > { %v5515_v17 = vadd.f32 %v12959_v34, %v5477_v4  ;;  %v5516_v22 = vadd.f32 %v12959_v34, %v5478_v43  ;;  %v5012_v39 = vadd.f32 %v4915_v26, %v13157_v31  ;;  %v5013_v35 = vadd.f32 %v4917_v37, %v4786_v36 }
 0x33c   : > { %v5149_v38 = vsel %vm930_vm2, %v5146_v12, %v5148_v61  ;;  %v4920_v25 = vrot.slane %v13262_v59, 1  ;;  %v5151_v2 = vsel %vm930_vm2, %v5148_v61, %v5150_v56  ;;  %v5380_v1 = vsel %vm1166_vm3, %v5377_v15, %v5379_v0 }
 0x33d   : > { %v5553_v18 = vmax.f32 %v5515_v17, 0.0  ;;  %v5554_v53 = vmax.f32 %v5516_v22, 0.0  ;;  %v5622_v31 = vld [vmem:[#allocation2 + $0x50] ss:$2 sm:$0xff]  ;;  %v5641_v58 = vld [vmem:[#allocation2 + $0x51] ss:$2 sm:$0xff]  ;;  %v5248_v44 = vadd.f32 %v5149_v38, %v5012_v39  ;;  %v5249_v48 = vadd.f32 %v5151_v2, %v5013_v35  ;;  %v13322_v17 = vpop.permute.xlu1 %4698 }
 0x33e   : > { %v5382_v12 = vsel %vm1166_vm3, %v5379_v0, %v5381_v13  ;;  %v5154_v24 = vrot.slane %v13269_v45, 2  ;;  %v5660_v57 = vmax.f32 %v5622_v31, %v5641_v58  ;;  %v5385_v6 = vrot.slane %v13272_v55, 3  ;;  %v13402_v55 = vld [vmem:[#allocation3 + $0x40] sm:$0xff] }
 0x33f   : > { %5591 = vst.msk [vmem:[#allocation2 + $0x60] sm:$0xff] %vm1402_vm4, %v5553_v18  ;;  %5592 = vst.msk [vmem:[#allocation2 + $0x68] sm:$0xff] %vm1402_vm4, %v5554_v53  ;;  %v4826_v15 = vmul.f32 %v13206_v40, %v10494_v49  ;;  %v5058_v30 = vmul.f32 %v13206_v40, %v10496_v50  ;;  %v5479_v33 = vadd.f32 %v5380_v1, %v5248_v44  ;;  %v4694_v53 = vpop.permute.xlu0 %4693 }
 0x340   : > { %v5480_v42 = vadd.f32 %v5382_v12, %v5249_v48  ;;  %v4788_v11 = vmul.f32 %v13206_v40, %v10500_v52  ;;  %v5289_v20 = vmul.f32 %v13206_v40, %v10498_v51  ;;  %5679 = vst.msk [vmem:[#allocation3 + $0x2b] sm:$0xff] %vm1402_vm4, %v5660_v57  ;;  %v13312_v28 = vmul.f32 %v4684_v62, %v10494_v49 }
 0x341   : > { %v4918_v36 = vrot.slane %v4826_v15, 1  ;;  %v5152_v16 = vrot.slane %v5058_v30, 2  ;;  %v13315_v4 = vmul.f32 %v4684_v62, %v10496_v50  ;;  %v5517_v43 = vadd.f32 %v12959_v34, %v5479_v33  ;;  %v13362_v33 = vpop.permute.xlu1 %4708  ;;  %16745 = vst [vmem:[#allocation8_spill] sm:$0xff] %v13402_v55  ;;  %v14126_v55 = vld [vmem:[#allocation3 + $0x8] sm:$0xff] }
 0x342   : > { %v5518_v7 = vadd.f32 %v12959_v34, %v5480_v42  ;;  %v5383_v61 = vrot.slane %v5289_v20, 3  ;;  %v13320_v0 = vmul.f32 %v4684_v62, %v10498_v51  ;;  %v13334_v37 = vmul.f32 %v4684_v62, %v10500_v52  ;;  %16772 = vst [vmem:[#allocation45_spill] sm:$0xff] %v14126_v55 }
 0x343   : > { %v4919_v40 = vsel %vm691_vm1, %v4916_v60, %v4918_v36  ;;  %v4921_v22 = vsel %vm691_vm1, %v4918_v36, %v4920_v25  ;;  %v5153_v26 = vsel %vm930_vm2, %v5150_v56, %v5152_v16  ;;  %v5555_v39 = vmax.f32 %v5517_v43, 0.0 }
 0x344   : > { %v5556_v35 = vmax.f32 %v5518_v7, 0.0  ;;  %v5014_v38 = vadd.f32 %v4919_v40, %v13221_v27  ;;  %v5015_v18 = vadd.f32 %v4921_v22, %v4788_v11  ;;  %v5155_v21 = vsel %vm930_vm2, %v5152_v16, %v5154_v24 }
 0x345   : > { %v5384_v60 = vsel %vm1166_vm3, %v5381_v13, %v5383_v61  ;;  %v5386_v9 = vsel %vm1166_vm3, %v5383_v61, %v5385_v6  ;;  %v4924_v56 = vrot.slane %v13312_v28, 1  ;;  %5593 = vst.msk [vmem:[#allocation2 + $0x70] sm:$0xff] %vm1402_vm4, %v5555_v39  ;;  %v5158_v58 = vrot.slane %v13315_v4, 2  ;;  %v4704_v61 = vpop.permute.xlu0 %4703 }
 0x346   : > { %v5623_v2 = vld [vmem:[#allocation2 + $0x60] ss:$2 sm:$0xff]  ;;  %v5642_v1 = vld [vmem:[#allocation2 + $0x61] ss:$2 sm:$0xff]  ;;  %5594 = vst.msk [vmem:[#allocation2 + $0x78] sm:$0xff] %vm1402_vm4, %v5556_v35  ;;  %v5250_v27 = vadd.f32 %v5153_v26, %v5014_v38  ;;  %v5251_v31 = vadd.f32 %v5155_v21, %v5015_v18  ;;  %v5389_v46 = vrot.slane %v13320_v0, 3  ;;  %v4828_v13 = vmul.f32 %v13249_v8, %v10494_v49 }
 0x347   : > { %v5661_v44 = vmax.f32 %v5623_v2, %v5642_v1  ;;  %v5060_v48 = vmul.f32 %v13249_v8, %v10496_v50  ;;  %v5291_v12 = vmul.f32 %v13249_v8, %v10498_v51  ;;  %v4790_v15 = vmul.f32 %v13249_v8, %v10500_v52  ;;  %v13457_v0 = vld [vmem:[#allocation3 + $0x48] sm:$0xff] }
 0x348   : > { %v5481_v62 = vadd.f32 %v5384_v60, %v5250_v27  ;;  %v5482_v57 = vadd.f32 %v5386_v9, %v5251_v31  ;;  %v13360_v30 = vmul.f32 %v4694_v53, %v10494_v49  ;;  %v4922_v42 = vrot.slane %v4828_v13, 1  ;;  %v13400_v27 = vpop.permute.xlu1 %4718  ;;  %16746 = vst [vmem:[#allocation13_spill] sm:$0xff] %v13457_v0  ;;  %v14124_v0 = vld [vmem:[#allocation3] sm:$0xff] }
 0x349   : > { %5680 = vst.msk [vmem:[#allocation3 + $0x33] sm:$0xff] %vm1402_vm4, %v5661_v44  ;;  %v5156_v11 = vrot.slane %v5060_v48, 2  ;;  %v5387_v20 = vrot.slane %v5291_v12, 3  ;;  %v13366_v36 = vmul.f32 %v4694_v53, %v10496_v50  ;;  %v13371_v7 = vmul.f32 %v4694_v53, %v10500_v52  ;;  %16771 = vst [vmem:[#allocation44_spill] sm:$0xff] %v14124_v0 }
 0x34a   : > { %v5519_v16 = vadd.f32 %v12959_v34, %v5481_v62  ;;  %v5520_v43 = vadd.f32 %v12959_v34, %v5482_v57  ;;  %v13374_v8 = vmul.f32 %v4694_v53, %v10498_v51  ;;  %v4923_v40 = vsel %vm691_vm1, %v4920_v25, %v4922_v42 }
 0x34b   : > { %v4925_v22 = vsel %vm691_vm1, %v4922_v42, %v4924_v56  ;;  %v5157_v26 = vsel %vm930_vm2, %v5154_v24, %v5156_v11  ;;  %v4928_v39 = vrot.slane %v13360_v30, 1  ;;  %v5016_v18 = vadd.f32 %v4923_v40, %v13266_v10 }
 0x34c   : > { %v5557_v35 = vmax.f32 %v5519_v16, 0.0  ;;  %v5558_v38 = vmax.f32 %v5520_v43, 0.0  ;;  %v5017_v53 = vadd.f32 %v4925_v22, %v4790_v15  ;;  %v5159_v59 = vsel %vm930_vm2, %v5156_v11, %v5158_v58  ;;  %v4714_v15 = vpop.permute.xlu0 %4713 }
 0x34d   : > { %v5624_v21 = vld [vmem:[#allocation2 + $0x70] ss:$2 sm:$0xff]  ;;  %v5643_v60 = vld [vmem:[#allocation2 + $0x71] ss:$2 sm:$0xff]  ;;  %v5388_v25 = vsel %vm1166_vm3, %v5385_v6, %v5387_v20  ;;  %v5390_v45 = vsel %vm1166_vm3, %v5387_v20, %v5389_v46  ;;  %v5162_v24 = vrot.slane %v13366_v36, 2  ;;  %v5252_v10 = vadd.f32 %v5157_v26, %v5016_v18 }
 0x34e   : > { %v5662_v9 = vmax.f32 %v5624_v21, %v5643_v60  ;;  %5595 = vst.msk [vmem:[#allocation2 + $0x80] sm:$0xff] %vm1402_vm4, %v5557_v35  ;;  %5596 = vst.msk [vmem:[#allocation2 + $0x88] sm:$0xff] %vm1402_vm4, %v5558_v38  ;;  %v5253_v2 = vadd.f32 %v5159_v59, %v5017_v53  ;;  %v5393_v1 = vrot.slane %v13374_v8, 3  ;;  %v4792_v6 = vmul.f32 %v13287_v5, %v10500_v52  ;;  %v13439_v59 = vpop.permute.xlu1 %4728 }
 0x34f   : > { %v4830_v31 = vmul.f32 %v13287_v5, %v10494_v49  ;;  %v5062_v44 = vmul.f32 %v13287_v5, %v10496_v50  ;;  %v5293_v13 = vmul.f32 %v13287_v5, %v10498_v51  ;;  %v5483_v48 = vadd.f32 %v5388_v25, %v5252_v10 }
 0x350   : > { %5681 = vst.msk [vmem:[#allocation3 + $0x3b] sm:$0xff] %vm1402_vm4, %v5662_v9  ;;  %v5484_v12 = vadd.f32 %v5390_v45, %v5253_v2  ;;  %v13414_v62 = vmul.f32 %v4704_v61, %v10494_v49  ;;  %v13417_v57 = vmul.f32 %v4704_v61, %v10496_v50  ;;  %v13420_v16 = vmul.f32 %v4704_v61, %v10498_v51 }
 0x351   : > { %v4926_v42 = vrot.slane %v4830_v31, 1  ;;  %v5160_v11 = vrot.slane %v5062_v44, 2  ;;  %v5391_v20 = vrot.slane %v5293_v13, 3  ;;  %v5521_v43 = vadd.f32 %v12959_v34, %v5483_v48 }
 0x352   : > { %v5522_v5 = vadd.f32 %v12959_v34, %v5484_v12  ;;  %v13425_v40 = vmul.f32 %v4704_v61, %v10500_v52  ;;  %v4932_v22 = vrot.slane %v13414_v62, 1  ;;  %v5166_v18 = vrot.slane %v13417_v57, 2 }
 0x353   : > { %v4927_v26 = vsel %vm691_vm1, %v4924_v56, %v4926_v42  ;;  %v4929_v35 = vsel %vm691_vm1, %v4926_v42, %v4928_v39  ;;  %v5161_v38 = vsel %vm930_vm2, %v5158_v58, %v5160_v11  ;;  %v5559_v53 = vmax.f32 %v5521_v43, 0.0 }
 0x354   : > { %v5560_v21 = vmax.f32 %v5522_v5, 0.0  ;;  %v5018_v61 = vadd.f32 %v4927_v26, %v13334_v37  ;;  %v5019_v60 = vadd.f32 %v4929_v35, %v4792_v6  ;;  %v5163_v56 = vsel %vm930_vm2, %v5160_v11, %v5162_v24  ;;  %v13455_v6 = vpop.permute.xlu0 %4723 }
 0x355   : > { %v5625_v28 = vld [vmem:[#allocation2 + $0x80] ss:$2 sm:$0xff]  ;;  %v5644_v25 = vld [vmem:[#allocation2 + $0x81] ss:$2 sm:$0xff]  ;;  %v5392_v4 = vsel %vm1166_vm3, %v5389_v46, %v5391_v20  ;;  %v5394_v58 = vsel %vm1166_vm3, %v5391_v20, %v5393_v1  ;;  %v5397_v45 = vrot.slane %v13420_v16, 3  ;;  %5597 = vst.msk [vmem:[#allocation2 + $0x90] sm:$0xff] %vm1402_vm4, %v5559_v53  ;;  %v4832_v2 = vmul.f32 %v13322_v17, %v10494_v49 }
 0x356   : > { %v5663_v37 = vmax.f32 %v5625_v28, %v5644_v25  ;;  %5598 = vst.msk [vmem:[#allocation2 + $0x98] sm:$0xff] %vm1402_vm4, %v5560_v21  ;;  %v5254_v9 = vadd.f32 %v5161_v38, %v5018_v61  ;;  %v5255_v10 = vadd.f32 %v5163_v56, %v5019_v60  ;;  %v4794_v46 = vmul.f32 %v13322_v17, %v10500_v52  ;;  %v13486_v21 = vpop.permute.xlu1 %4738 }
 0x357   : > { %v5064_v31 = vmul.f32 %v13322_v17, %v10496_v50  ;;  %v5295_v44 = vmul.f32 %v13322_v17, %v10498_v51  ;;  %v13466_v13 = vmul.f32 %v4714_v15, %v10494_v49  ;;  %v4930_v42 = vrot.slane %v4832_v2, 1 }
 0x358   : > { %5682 = vst.msk [vmem:[#allocation3 + $0x43] sm:$0xff] %vm1402_vm4, %v5663_v37  ;;  %v5485_v48 = vadd.f32 %v5392_v4, %v5254_v9  ;;  %v5486_v12 = vadd.f32 %v5394_v58, %v5255_v10  ;;  %v13470_v11 = vmul.f32 %v4714_v15, %v10500_v52  ;;  %v13473_v5 = vmul.f32 %v4714_v15, %v10496_v50  ;;  %v5734_v4 = vld [vmem:[#allocation3 + $0xa] sm:$0xff]  ;;  %v13499_v58 = vpop.permute.xlu0 %4733 }
 0x359   : > { %v5164_v20 = vrot.slane %v5064_v31, 2  ;;  %v5395_v43 = vrot.slane %v5295_v44, 3  ;;  %v13476_v26 = vmul.f32 %v4714_v15, %v10498_v51  ;;  %v4931_v38 = vsel %vm691_vm1, %v4928_v39, %v4930_v42  ;;  %v5733_v31 = vld [vmem:[#allocation3 + $0x2] sm:$0xff]  ;;  %v13512_v44 = vld [vmem:[#allocation3 + $0x50] sm:$0xff] }
 0x35a   : > { %v5523_v17 = vadd.f32 %v12959_v34, %v5485_v48  ;;  %v5524_v35 = vadd.f32 %v12959_v34, %v5486_v12  ;;  %v4933_v53 = vsel %vm691_vm1, %v4930_v42, %v4932_v22  ;;  %v5020_v61 = vadd.f32 %v4931_v38, %v13371_v7  ;;  %16747 = vst [vmem:[#allocation18_spill] sm:$0xff] %v13512_v44 }
 0x35b   : > { %v5021_v60 = vadd.f32 %v4933_v53, %v4794_v46  ;;  %v5165_v15 = vsel %vm930_vm2, %v5162_v24, %v5164_v20  ;;  %v4936_v28 = vrot.slane %v13466_v13, 1  ;;  %v5167_v30 = vsel %vm930_vm2, %v5164_v20, %v5166_v18  ;;  %v13523_v53 = vpop.permute.xlu1 %4748 }
 0x35c   : > { %v5561_v25 = vmax.f32 %v5523_v17, 0.0  ;;  %v5562_v56 = vmax.f32 %v5524_v35, 0.0  ;;  %v5396_v39 = vsel %vm1166_vm3, %v5393_v1, %v5395_v43  ;;  %v5256_v36 = vadd.f32 %v5165_v15, %v5020_v61 }
 0x35d   : > { %v5626_v7 = vld [vmem:[#allocation2 + $0x90] ss:$2 sm:$0xff]  ;;  %v5645_v37 = vld [vmem:[#allocation2 + $0x91] ss:$2 sm:$0xff]  ;;  %v5257_v9 = vadd.f32 %v5167_v30, %v5021_v60  ;;  %v5398_v24 = vsel %vm1166_vm3, %v5395_v43, %v5397_v45  ;;  %v5170_v10 = vrot.slane %v13473_v5, 2  ;;  %v5401_v8 = vrot.slane %v13476_v26, 3 }
 0x35e   : > { %v5664_v2 = vmax.f32 %v5626_v7, %v5645_v37  ;;  %5599 = vst.msk [vmem:[#allocation2 + $0xa0] sm:$0xff] %vm1402_vm4, %v5561_v25  ;;  %5600 = vst.msk [vmem:[#allocation2 + $0xa8] sm:$0xff] %vm1402_vm4, %v5562_v56  ;;  %v4834_v1 = vmul.f32 %v13362_v33, %v10494_v49  ;;  %v5066_v46 = vmul.f32 %v13362_v33, %v10496_v50 }
 0x35f   : > { %v5487_v48 = vadd.f32 %v5396_v39, %v5256_v36  ;;  %v5488_v12 = vadd.f32 %v5398_v24, %v5257_v9  ;;  %v5297_v42 = vmul.f32 %v13362_v33, %v10498_v51  ;;  %v9718_v20 = vpack.i.bf16 %v5734_v4, %v5733_v31  ;;  %v13545_v4 = vpop.permute.xlu0 %4743  ;;  %v5716_v24 = vld [vmem:[#allocation3 + $0x19] sm:$0xff] }
 0x360   : > { %5683 = vst.msk [vmem:[#allocation3 + $0x4b] sm:$0xff] %vm1402_vm4, %v5664_v2  ;;  %v4796_v43 = vmul.f32 %v13362_v33, %v10500_v52  ;;  %v4934_v17 = vrot.slane %v4834_v1, 1  ;;  %v5168_v35 = vrot.slane %v5066_v46, 2  ;;  %v13521_v38 = vmul.f32 %v13455_v6, %v10494_v49 }
 0x361   : > { %v5525_v61 = vadd.f32 %v12959_v34, %v5487_v48  ;;  %v5526_v60 = vadd.f32 %v12959_v34, %v5488_v12  ;;  %v5399_v15 = vrot.slane %v5297_v42, 3  ;;  %9719 = vrot.lane.b32.xlu0 %v9718_v20, %s10333_s16  ;;  %v13530_v25 = vmul.f32 %v13455_v6, %v10496_v50 }
 0x362   : > { %v4935_v33 = vsel %vm691_vm1, %v4932_v22, %v4934_v17  ;;  %v4937_v56 = vsel %vm691_vm1, %v4934_v17, %v4936_v28  ;;  %v5169_v30 = vsel %vm930_vm2, %v5166_v18, %v5168_v35  ;;  %v13543_v39 = vmul.f32 %v13455_v6, %v10500_v52  ;;  %v13571_v17 = vpop.permute.xlu1 %4758 }
 0x363   : > { %v5563_v7 = vmax.f32 %v5525_v61, 0.0  ;;  %v5564_v37 = vmax.f32 %v5526_v60, 0.0  ;;  %v5022_v62 = vadd.f32 %v4935_v33, %v13425_v40  ;;  %v5023_v36 = vadd.f32 %v4937_v56, %v4796_v43  ;;  %v5715_v43 = vld [vmem:[#allocation3 + $0x11] sm:$0xff]  ;;  %v5713_v33 = vld [vmem:[#allocation3 + $0x1] sm:$0xff] }
 0x364   : > { %v5171_v22 = vsel %vm930_vm2, %v5168_v35, %v5170_v10  ;;  %v5400_v57 = vsel %vm1166_vm3, %v5397_v45, %v5399_v15  ;;  %v5402_v18 = vsel %vm1166_vm3, %v5399_v15, %v5401_v8  ;;  %v4940_v9 = vrot.slane %v13521_v38, 1  ;;  %v5714_v45 = vld [vmem:[#allocation3 + $0x9] sm:$0xff]  ;;  %v13573_v35 = vld [vmem:[#allocation3 + $0x58] sm:$0xff] }
 0x365   : > { %v5627_v2 = vld [vmem:[#allocation2 + $0xa0] ss:$2 sm:$0xff]  ;;  %v5646_v1 = vld [vmem:[#allocation2 + $0xa1] ss:$2 sm:$0xff]  ;;  %5601 = vst.msk [vmem:[#allocation2 + $0xb0] sm:$0xff] %vm1402_vm4, %v5563_v7  ;;  %5602 = vst.msk [vmem:[#allocation2 + $0xb8] sm:$0xff] %vm1402_vm4, %v5564_v37  ;;  %v5258_v40 = vadd.f32 %v5169_v30, %v5022_v62  ;;  %v5259_v46 = vadd.f32 %v5171_v22, %v5023_v36  ;;  %v13563_v16 = vmul.f32 %v13455_v6, %v10498_v51  ;;  %v13578_v62 = vpop.permute.xlu0 %4753 }
 0x366   : > { %v5174_v31 = vrot.slane %v13530_v25, 2  ;;  %v5665_v48 = vmax.f32 %v5627_v2, %v5646_v1  ;;  %v4836_v12 = vmul.f32 %v13400_v27, %v10494_v49  ;;  %v5068_v42 = vmul.f32 %v13400_v27, %v10496_v50  ;;  %16748 = vst [vmem:[#allocation33_spill] sm:$0xff] %v13573_v35 }
 0x367   : > { %v5299_v20 = vmul.f32 %v13400_v27, %v10498_v51  ;;  %v5489_v61 = vadd.f32 %v5400_v57, %v5258_v40  ;;  %v5490_v60 = vadd.f32 %v5402_v18, %v5259_v46  ;;  %v4798_v6 = vmul.f32 %v13400_v27, %v10500_v52 }
 0x368   : > { %v9728_v15 = vpack.i.bf16 %v5716_v24, %v5715_v43  ;;  %5684 = vst.msk [vmem:[#allocation3 + $0x53] sm:$0xff] %vm1402_vm4, %v5665_v48  ;;  %v4938_v56 = vrot.slane %v4836_v12, 1  ;;  %v5172_v30 = vrot.slane %v5068_v42, 2  ;;  %v9713_v37 = vpack.i.bf16 %v5714_v45, %v5713_v33 }
 0x369   : > { %v5403_v7 = vrot.slane %v5299_v20, 3  ;;  %v5527_v36 = vadd.f32 %v12959_v34, %v5489_v61  ;;  %v5528_v22 = vadd.f32 %v12959_v34, %v5490_v60  ;;  %v5405_v57 = vrot.slane %v13563_v16, 3  ;;  %v13624_v61 = vld [vmem:[#allocation3 + $0x60] sm:$0xff] }
 0x36a   : > { %9729 = vrot.lane.b32.xlu0 %v9728_v15, %s10332_s12  ;;  %v13586_v27 = vmul.f32 %v13499_v58, %v10500_v52  ;;  %v4939_v18 = vsel %vm691_vm1, %v4936_v28, %v4938_v56  ;;  %v4941_v24 = vsel %vm691_vm1, %v4938_v56, %v4940_v9  ;;  %v5173_v34 = vsel %vm930_vm2, %v5170_v10, %v5172_v30  ;;  %v5754_v56 = vld [vmem:[#allocation3 + $0xb] sm:$0xff] }
 0x36b   : > { %9714 = vrot.lane.b32.xlu1 %v9713_v37, %s10332_s12  ;;  %v13600_v2 = vmul.f32 %v13499_v58, %v10494_v49  ;;  %v5565_v1 = vmax.f32 %v5527_v36, 0.0  ;;  %v5566_v40 = vmax.f32 %v5528_v22, 0.0  ;;  %v5024_v13 = vadd.f32 %v4939_v18, %v13470_v11  ;;  %v13616_v11 = vpop.permute.xlu1 %4768  ;;  %16749 = vst [vmem:[#allocation34_spill] sm:$0xff] %v13624_v61  ;;  %v5755_v22 = vld [vmem:[#allocation3 + $0x13] sm:$0xff] }
 0x36c   : > { %v5025_v46 = vadd.f32 %v4941_v24, %v4798_v6  ;;  %v5628_v28 = vld [vmem:[#allocation2 + $0xb0] ss:$2 sm:$0xff]  ;;  %v5647_v45 = vld [vmem:[#allocation2 + $0xb1] ss:$2 sm:$0xff]  ;;  %v5175_v48 = vsel %vm930_vm2, %v5172_v30, %v5174_v31  ;;  %v5404_v5 = vsel %vm1166_vm3, %v5401_v8, %v5403_v7  ;;  %v5406_v10 = vsel %vm1166_vm3, %v5403_v7, %v5405_v57  ;;  %v13632_v30 = vpop.permute.xlu0 %4763 }
 0x36d   : > { %v13614_v12 = vmul.f32 %v13499_v58, %v10496_v50  ;;  %v5666_v42 = vmax.f32 %v5628_v28, %v5647_v45  ;;  %5603 = vst.msk [vmem:[#allocation2 + $0xc0] sm:$0xff] %vm1402_vm4, %v5565_v1  ;;  %5604 = vst.msk [vmem:[#allocation2 + $0xc8] sm:$0xff] %vm1402_vm4, %v5566_v40  ;;  %v5260_v20 = vadd.f32 %v5173_v34, %v5024_v13  ;;  %v5756_v8 = vld [vmem:[#allocation3 + $0x1b] sm:$0xff]  ;;  %v4944_v60 = vrot.slane %v13600_v2, 1  ;;  %v5753_v40 = vld [vmem:[#allocation3 + $0x3] sm:$0xff] }
 0x36e   : > { %v5261_v43 = vadd.f32 %v5175_v48, %v5025_v46  ;;  %v13622_v26 = vmul.f32 %v13499_v58, %v10498_v51  ;;  %v4838_v15 = vmul.f32 %v13439_v59, %v10494_v49  ;;  %v5070_v33 = vmul.f32 %v13439_v59, %v10496_v50  ;;  %v13643_v13 = vld [vmem:[%s16536_s2] ss:$0 sm:$0xff] }
 0x36f   : > { %v5178_v6 = vrot.slane %v13614_v12, 2  ;;  %5685 = vst.msk [vmem:[#allocation3 + $0x5b] sm:$0xff] %vm1402_vm4, %v5666_v42  ;;  %v5491_v58 = vadd.f32 %v5404_v5, %v5260_v20  ;;  %v4800_v37 = vmul.f32 %v13439_v59, %v10500_v52  ;;  %v5301_v36 = vmul.f32 %v13439_v59, %v10498_v51  ;;  %v13661_v20 = vpop.permute.xlu1 %6635 }
 0x370   : > { %v5492_v7 = vadd.f32 %v5406_v10, %v5261_v43  ;;  %v5409_v18 = vrot.slane %v13622_v26, 3  ;;  %v4942_v24 = vrot.slane %v4838_v15, 1  ;;  %v5176_v34 = vrot.slane %v5070_v33, 2 }
 0x371   : > { %v9738_v1 = vpack.i.bf16 %v5756_v8, %v5755_v22  ;;  %v5529_v46 = vadd.f32 %v13643_v13, %v5491_v58  ;;  %v5407_v45 = vrot.slane %v5301_v36, 3  ;;  %v9723_v48 = vpack.i.bf16 %v5754_v56, %v5753_v40  ;;  %v13679_v58 = vpop.permute.xlu0 %5038  ;;  %v5736_v22 = vld [vmem:[#allocation3 + $0x1a] sm:$0xff] }
 0x372   : > { %v5530_v28 = vadd.f32 %v13643_v13, %v5492_v7  ;;  %v4943_v59 = vsel %vm691_vm1, %v4940_v9, %v4942_v24  ;;  %v4945_v5 = vsel %vm691_vm1, %v4942_v24, %v4944_v60  ;;  %v5177_v10 = vsel %vm930_vm2, %v5174_v31, %v5176_v34  ;;  %v13687_v24 = vld [vmem:[#allocation3 + $0x68] sm:$0xff] }
 0x373   : > { %9739 = vrot.lane.b32.xlu0 %v9738_v1, %s10334_s9  ;;  %v13659_v42 = vmul.f32 %v13545_v4, %v10500_v52  ;;  %v5567_v43 = vmax.f32 %v5529_v46, 0.0  ;;  %v5026_v9 = vadd.f32 %v4943_v59, %v13543_v39  ;;  %v5027_v8 = vadd.f32 %v4945_v5, %v4800_v37  ;;  %9724 = vrot.lane.b32.xlu1 %v9723_v48, %s10334_s9  ;;  %v5737_v5 = vld [vmem:[#allocation3 + $0x22] sm:$0xff] }
 0x374   : > { %v5568_v38 = vmax.f32 %v5530_v28, 0.0  ;;  %v5629_v15 = vld [vmem:[#allocation2 + $0xc0] ss:$2 sm:$0xff]  ;;  %v5648_v33 = vld [vmem:[#allocation2 + $0xc1] ss:$2 sm:$0xff]  ;;  %v5179_v25 = vsel %vm930_vm2, %v5176_v34, %v5178_v6  ;;  %v5408_v31 = vsel %vm1166_vm3, %v5405_v57, %v5407_v45  ;;  %v13673_v56 = vmul.f32 %v13545_v4, %v10494_v49  ;;  %16750 = vst [vmem:[#allocation35_spill] sm:$0xff] %v13687_v24 }
 0x375   : > { %v13677_v39 = vmul.f32 %v13545_v4, %v10496_v50  ;;  %v5667_v7 = vmax.f32 %v5629_v15, %v5648_v33  ;;  %5605 = vst.msk [vmem:[#allocation2 + $0xd0] sm:$0xff] %vm1402_vm4, %v5567_v43  ;;  %v5262_v37 = vadd.f32 %v5177_v10, %v5026_v9  ;;  %v5263_v36 = vadd.f32 %v5179_v25, %v5027_v8  ;;  %v5738_v57 = vld [vmem:[#allocation3 + $0x2a] sm:$0xff]  ;;  %v5735_v10 = vld [vmem:[#allocation3 + $0x12] sm:$0xff]  ;;  %v13703_v8 = vpop.permute.xlu1 %6645 }
 0x376   : > { %5606 = vst.msk [vmem:[#allocation2 + $0xd8] sm:$0xff] %vm1402_vm4, %v5568_v38  ;;  %v13685_v16 = vmul.f32 %v13545_v4, %v10498_v51  ;;  %v5410_v34 = vsel %vm1166_vm3, %v5407_v45, %v5409_v18  ;;  %v4948_v1 = vrot.slane %v13673_v56, 1  ;;  %v4840_v46 = vmul.f32 %v13486_v21, %v10494_v49 }
 0x377   : > { %v5182_v40 = vrot.slane %v13677_v39, 2  ;;  %5686 = vst.msk [vmem:[#allocation3 + $0x63] sm:$0xff] %vm1402_vm4, %v5667_v7  ;;  %v5493_v28 = vadd.f32 %v5408_v31, %v5262_v37  ;;  %v5494_v4 = vadd.f32 %v5410_v34, %v5263_v36  ;;  %v4802_v48 = vmul.f32 %v13486_v21, %v10500_v52 }
 0x378   : > { %v5072_v59 = vmul.f32 %v13486_v21, %v10496_v50  ;;  %v4946_v45 = vrot.slane %v4840_v46, 1  ;;  %v5303_v43 = vmul.f32 %v13486_v21, %v10498_v51  ;;  %v9748_v38 = vpack.i.bf16 %v5738_v57, %v5737_v5  ;;  %v13720_v57 = vpop.permute.xlu0 %6640 }
 0x379   : > { %v9733_v9 = vpack.i.bf16 %v5736_v22, %v5735_v10  ;;  %v5531_v15 = vadd.f32 %v13643_v13, %v5493_v28  ;;  %v5532_v33 = vadd.f32 %v13643_v13, %v5494_v4  ;;  %v5413_v25 = vrot.slane %v13685_v16, 3 }
 0x37a   : > { %v5180_v31 = vrot.slane %v5072_v59, 2  ;;  %v4947_v7 = vsel %vm691_vm1, %v4944_v60, %v4946_v45  ;;  %v4949_v37 = vsel %vm691_vm1, %v4946_v45, %v4948_v1  ;;  %v5411_v21 = vrot.slane %v5303_v43, 3  ;;  %9749 = vrot.lane.b32.xlu0 %v9748_v38, %s10333_s16  ;;  %v5720_v45 = vld [vmem:[#allocation3 + $0x39] sm:$0xff]  ;;  %v13741_v43 = vld [vmem:[#allocation3 + $0x70] sm:$0xff] }
 0x37b   : > { %9734 = vrot.lane.b32.xlu1 %v9733_v9, %s10333_s16  ;;  %v13718_v36 = vmul.f32 %v13578_v62, %v10494_v49  ;;  %v5569_v22 = vmax.f32 %v5531_v15, 0.0  ;;  %v5570_v34 = vmax.f32 %v5532_v33, 0.0  ;;  %v5028_v2 = vadd.f32 %v4947_v7, %v13586_v27  ;;  %16751 = vst [vmem:[#allocation36_spill] sm:$0xff] %v13741_v43  ;;  %v13754_v15 = vpop.permute.xlu1 %6650 }
 0x37c   : > { %v5029_v60 = vadd.f32 %v4949_v37, %v4802_v48  ;;  %v5181_v4 = vsel %vm930_vm2, %v5178_v6, %v5180_v31  ;;  %v5183_v59 = vsel %vm930_vm2, %v5180_v31, %v5182_v40  ;;  %v5412_v5 = vsel %vm1166_vm3, %v5409_v18, %v5411_v21 }
 0x37d   : > { %v5630_v46 = vld [vmem:[#allocation2 + $0xd0] ss:$2 sm:$0xff]  ;;  %v5649_v28 = vld [vmem:[#allocation2 + $0xd1] ss:$2 sm:$0xff]  ;;  %v13734_v10 = vmul.f32 %v13578_v62, %v10500_v52  ;;  %5607 = vst.msk [vmem:[#allocation2 + $0xe0] sm:$0xff] %vm1402_vm4, %v5569_v22  ;;  %5608 = vst.msk [vmem:[#allocation2 + $0xe8] sm:$0xff] %vm1402_vm4, %v5570_v34  ;;  %v5264_v12 = vadd.f32 %v5181_v4, %v5028_v2  ;;  %v5414_v6 = vsel %vm1166_vm3, %v5411_v21, %v5413_v25 }
 0x37e   : > { %v5668_v27 = vmax.f32 %v5630_v46, %v5649_v28  ;;  %v5265_v48 = vadd.f32 %v5183_v59, %v5029_v60  ;;  %v4952_v26 = vrot.slane %v13718_v36, 1  ;;  %v13746_v18 = vmul.f32 %v13578_v62, %v10496_v50  ;;  %v5719_v21 = vld [vmem:[#allocation3 + $0x31] sm:$0xff]  ;;  %v5718_v22 = vld [vmem:[#allocation3 + $0x29] sm:$0xff]  ;;  %v13764_v46 = vpop.permute.xlu0 %6655 }
 0x37f   : > { %v13750_v38 = vmul.f32 %v13578_v62, %v10498_v51  ;;  %v4842_v9 = vmul.f32 %v13523_v53, %v10494_v49  ;;  %v5495_v33 = vadd.f32 %v5412_v5, %v5264_v12  ;;  %v5074_v7 = vmul.f32 %v13523_v53, %v10496_v50 }
 0x380   : > { %5687 = vst.msk [vmem:[#allocation3 + $0x6b] sm:$0xff] %vm1402_vm4, %v5668_v27  ;;  %v5496_v31 = vadd.f32 %v5414_v6, %v5265_v48  ;;  %v5305_v37 = vmul.f32 %v13523_v53, %v10498_v51  ;;  %v5186_v62 = vrot.slane %v13746_v18, 2  ;;  %v4804_v34 = vmul.f32 %v13523_v53, %v10500_v52  ;;  %v5717_v27 = vld [vmem:[#allocation3 + $0x21] sm:$0xff] }
 0x381   : > { %v4950_v2 = vrot.slane %v4842_v9, 1  ;;  %v9758_v60 = vpack.i.bf16 %v5720_v45, %v5719_v21  ;;  %v5533_v28 = vadd.f32 %v13643_v13, %v5495_v33  ;;  %v5184_v59 = vrot.slane %v5074_v7, 2  ;;  %v13791_v21 = vpop.permute.xlu1 %6660 }
 0x382   : > { %v5534_v4 = vadd.f32 %v13643_v13, %v5496_v31  ;;  %v5415_v5 = vrot.slane %v5305_v37, 3  ;;  %v5417_v12 = vrot.slane %v13750_v38, 3  ;;  %v9743_v6 = vpack.i.bf16 %v5718_v22, %v5717_v27 }
 0x383   : > { %v4951_v48 = vsel %vm691_vm1, %v4948_v1, %v4950_v2  ;;  %v4953_v53 = vsel %vm691_vm1, %v4950_v2, %v4952_v26  ;;  %9759 = vrot.lane.b32.xlu0 %v9758_v60, %s10332_s12  ;;  %v5571_v45 = vmax.f32 %v5533_v28, 0.0  ;;  %v5185_v56 = vsel %vm930_vm2, %v5182_v40, %v5184_v59 }
 0x384   : > { %v5572_v9 = vmax.f32 %v5534_v4, 0.0  ;;  %v5030_v33 = vadd.f32 %v4951_v48, %v13659_v42  ;;  %v5031_v31 = vadd.f32 %v4953_v53, %v4804_v34  ;;  %v5631_v7 = vld [vmem:[#allocation2 + $0xe0] ss:$2 sm:$0xff]  ;;  %v5650_v37 = vld [vmem:[#allocation2 + $0xe1] ss:$2 sm:$0xff]  ;;  %v5187_v1 = vsel %vm930_vm2, %v5184_v59, %v5186_v62  ;;  %9744 = vrot.lane.b32.xlu1 %v9743_v6, %s10332_s12  ;;  %v13812_v59 = vpop.permute.xlu0 %6665 }
 0x385   : > { %v5416_v38 = vsel %vm1166_vm3, %v5413_v25, %v5415_v5  ;;  %v13789_v42 = vmul.f32 %v13632_v30, %v10500_v52  ;;  %v5669_v22 = vmax.f32 %v5631_v7, %v5650_v37  ;;  %5609 = vst.msk [vmem:[#allocation2 + $0xf0] sm:$0xff] %vm1402_vm4, %v5571_v45  ;;  %v13797_v16 = vmul.f32 %v13632_v30, %v10494_v49  ;;  %v13799_v25 = vld [vmem:[#allocation3 + $0x78] sm:$0xff]  ;;  %v5758_v6 = vld [vmem:[#allocation3 + $0x2b] sm:$0xff] }
 0x386   : > { %5610 = vst.msk [vmem:[#allocation2 + $0xf8] sm:$0xff] %vm1402_vm4, %v5572_v9  ;;  %v5266_v39 = vadd.f32 %v5185_v56, %v5030_v33  ;;  %v5267_v40 = vadd.f32 %v5187_v1, %v5031_v31  ;;  %16752 = vst [vmem:[#allocation37_spill] sm:$0xff] %v13799_v25  ;;  %v5418_v34 = vsel %vm1166_vm3, %v5415_v5, %v5417_v12  ;;  %v5760_v4 = vld [vmem:[#allocation3 + $0x3b] sm:$0xff]  ;;  %v5759_v31 = vld [vmem:[#allocation3 + $0x33] sm:$0xff] }
 0x387   : > { %v13804_v2 = vmul.f32 %v13632_v30, %v10496_v50  ;;  %v13808_v60 = vmul.f32 %v13632_v30, %v10498_v51  ;;  %v4844_v28 = vmul.f32 %v13571_v17, %v10494_v49  ;;  %5688 = vst.msk [vmem:[#allocation3 + $0x73] sm:$0xff] %vm1402_vm4, %v5669_v22  ;;  %v4806_v5 = vmul.f32 %v13571_v17, %v10500_v52 }
 0x388   : > { %v5497_v27 = vadd.f32 %v5416_v38, %v5266_v39  ;;  %v5498_v48 = vadd.f32 %v5418_v34, %v5267_v40  ;;  %v5076_v53 = vmul.f32 %v13571_v17, %v10496_v50  ;;  %v4956_v30 = vrot.slane %v13797_v16, 1  ;;  %v5757_v38 = vld [vmem:[#allocation3 + $0x23] sm:$0xff]  ;;  %v13829_v34 = vpop.permute.xlu1 %6670 }
 0x389   : > { %v4954_v9 = vrot.slane %v4844_v28, 1  ;;  %v5307_v33 = vmul.f32 %v13571_v17, %v10498_v51  ;;  %v9768_v1 = vpack.i.bf16 %v5760_v4, %v5759_v31  ;;  %v9753_v16 = vpack.i.bf16 %v5758_v6, %v5757_v38 }
 0x38a   : > { %v5535_v7 = vadd.f32 %v13643_v13, %v5497_v27  ;;  %v5536_v37 = vadd.f32 %v13643_v13, %v5498_v48  ;;  %v5188_v56 = vrot.slane %v5076_v53, 2  ;;  %v5421_v53 = vrot.slane %v13808_v60, 3 }
 0x38b   : > { %v4955_v22 = vsel %vm691_vm1, %v4952_v26, %v4954_v9  ;;  %v4957_v39 = vsel %vm691_vm1, %v4954_v9, %v4956_v30  ;;  %v5419_v40 = vrot.slane %v5307_v33, 3  ;;  %9769 = vrot.lane.b32.xlu0 %v9768_v1, %s10334_s9  ;;  %v16753_v26 = vrot.slane %v13804_v2, 2  ;;  %9754 = vrot.lane.b32.xlu1 %v9753_v16, %s10334_s9  ;;  %v5740_v1 = vld [vmem:[#allocation3 + $0x3a] sm:$0xff]  ;;  %v5741_v16 = vld [vmem:[#allocation3 + $0x42] sm:$0xff] }
 0x38c   : > { %v5573_v28 = vmax.f32 %v5535_v7, 0.0  ;;  %v5574_v17 = vmax.f32 %v5536_v37, 0.0  ;;  %v5032_v45 = vadd.f32 %v4955_v22, %v13734_v10  ;;  %v5033_v27 = vadd.f32 %v4957_v39, %v4806_v5  ;;  %v13842_v10 = vpop.permute.xlu0 %6675  ;;  %v13848_v7 = vld [vmem:[#allocation3 + $0x80] sm:$0xff] }
 0x38d   : > { %v5632_v48 = vld [vmem:[#allocation2 + $0xf0] ss:$2 sm:$0xff]  ;;  %v5651_v4 = vld [vmem:[#allocation2 + $0xf1] ss:$2 sm:$0xff]  ;;  %v5189_v36 = vsel %vm930_vm2, %v5186_v62, %v5188_v56  ;;  %v5191_v6 = vsel %vm930_vm2, %v5188_v56, %v16753_v26  ;;  %v5420_v9 = vsel %vm1166_vm3, %v5417_v12, %v5419_v40  ;;  %v5079_v18 = vmul.f32 %v13679_v58, %v10496_v50  ;;  %16754 = vst [vmem:[#allocation38_spill] sm:$0xff] %v13848_v7 }
 0x38e   : > { %v5670_v5 = vmax.f32 %v5632_v48, %v5651_v4  ;;  %5611 = vst.msk [vmem:[#allocation2 + $0x100] sm:$0xff] %vm1402_vm4, %v5573_v28  ;;  %5612 = vst.msk [vmem:[#allocation2 + $0x108] sm:$0xff] %vm1402_vm4, %v5574_v17  ;;  %v5268_v33 = vadd.f32 %v5189_v36, %v5032_v45  ;;  %v5269_v31 = vadd.f32 %v5191_v6, %v5033_v27  ;;  %v5742_v62 = vld [vmem:[#allocation3 + $0x4a] sm:$0xff]  ;;  %v5739_v48 = vld [vmem:[#allocation3 + $0x32] sm:$0xff]  ;;  %v13864_v4 = vpop.permute.xlu1 %6680 }
 0x38f   : > { %v5422_v12 = vsel %vm1166_vm3, %v5419_v40, %v5421_v53  ;;  %v5310_v37 = vmul.f32 %v13679_v58, %v10498_v51  ;;  %v4846_v56 = vmul.f32 %v13616_v11, %v10494_v49  ;;  %v5078_v45 = vmul.f32 %v13616_v11, %v10496_v50  ;;  %v13866_v36 = vld [vmem:[#allocation5 + $0x39] sm:$0xff] }
 0x390   : > { %5689 = vst.msk [vmem:[#allocation3 + $0x7b] sm:$0xff] %vm1402_vm4, %v5670_v5  ;;  %v5499_v38 = vadd.f32 %v5420_v9, %v5268_v33  ;;  %v5500_v22 = vadd.f32 %v5422_v12, %v5269_v31  ;;  %v4808_v39 = vmul.f32 %v13616_v11, %v10500_v52  ;;  %v5309_v40 = vmul.f32 %v13616_v11, %v10498_v51  ;;  %v13875_v12 = vld [vmem:[#allocation5 + $0x31] sm:$0xff] }
 0x391   : > { %v5194_v28 = vrot.slane %v5079_v18, 2  ;;  %v4958_v58 = vrot.slane %v4846_v56, 1  ;;  %v5192_v17 = vrot.slane %v5078_v45, 2  ;;  %v9778_v27 = vpack.i.bf16 %v5742_v62, %v5741_v16  ;;  %16755 = vst [vmem:[#allocation39_spill] sm:$0xff] %v13866_v36  ;;  %v13873_v62 = vpop.permute.xlu0 %6685  ;;  %16756 = vst [vmem:[#allocation40_spill] sm:$0xff] %v13875_v12  ;;  %v14359_v36 = vld [vmem:[#allocation3 + $0x28] sm:$0xff] }
 0x392   : > { %v5537_v26 = vadd.f32 %v13643_v13, %v5499_v38  ;;  %v5538_v6 = vadd.f32 %v13643_v13, %v5500_v22  ;;  %v5423_v9 = vrot.slane %v5309_v40, 3  ;;  %v9763_v5 = vpack.i.bf16 %v5740_v1, %v5739_v48  ;;  %v13899_v48 = vld [vmem:[#allocation3 + $0x88] sm:$0xff]  ;;  %16802 = vst [vmem:[#allocation51_spill] sm:$0xff] %v14359_v36 }
 0x393   : > { %v5425_v33 = vrot.slane %v5310_v37, 3  ;;  %v4959_v31 = vsel %vm691_vm1, %v4956_v30, %v4958_v58  ;;  %v5035_v11 = vadd.f32 %v4958_v58, %v4808_v39  ;;  %v5195_v18 = vsel %vm930_vm2, %v5192_v17, %v5194_v28  ;;  %9779 = vrot.lane.b32.xlu0 %v9778_v27, %s10333_s16  ;;  %16758 = vst [vmem:[#allocation41_spill] sm:$0xff] %v13899_v48  ;;  %v5761_v48 = vld [vmem:[#allocation3 + $0x43] sm:$0xff] }
 0x394   : > { %v5575_v56 = vmax.f32 %v5537_v26, 0.0  ;;  %v5576_v45 = vmax.f32 %v5538_v6, 0.0  ;;  %v5034_v38 = vadd.f32 %v4959_v31, %v13789_v42  ;;  %9764 = vrot.lane.b32.xlu1 %v9763_v5, %s10333_s16  ;;  %v16757_v22 = vrot.slane %v13804_v2, 2  ;;  %v13907_v31 = vpop.permute.xlu1 %6690 }
 0x395   : > { %v5633_v1 = vld [vmem:[#allocation2 + $0x100] ss:$2 sm:$0xff]  ;;  %v5652_v30 = vld [vmem:[#allocation2 + $0x101] ss:$2 sm:$0xff]  ;;  %v5271_v40 = vadd.f32 %v5195_v18, %v5035_v11  ;;  %v5426_v16 = vsel %vm1166_vm3, %v5423_v9, %v5425_v33  ;;  %v13887_v28 = vmul.f32 %v13720_v57, %v10494_v49  ;;  %v13893_v27 = vmul.f32 %v13720_v57, %v10496_v50 }
 0x396   : > { %v5193_v39 = vsel %vm930_vm2, %v16757_v22, %v5192_v17  ;;  %v5671_v58 = vmax.f32 %v5633_v1, %v5652_v30  ;;  %5613 = vst.msk [vmem:[#allocation2 + $0x110] sm:$0xff] %vm1402_vm4, %v5575_v56  ;;  %5614 = vst.msk [vmem:[#allocation2 + $0x118] sm:$0xff] %vm1402_vm4, %v5576_v45  ;;  %v13897_v2 = vmul.f32 %v13720_v57, %v10498_v51  ;;  %v5722_v17 = vld [vmem:[#allocation3 + $0x49] sm:$0xff]  ;;  %v13918_v30 = vpop.permute.xlu0 %6695 }
 0x397   : > { %v5270_v42 = vadd.f32 %v5193_v39, %v5034_v38  ;;  %v5424_v26 = vsel %vm1166_vm3, %v5421_v53, %v5423_v9  ;;  %v5502_v6 = vadd.f32 %v5426_v16, %v5271_v40  ;;  %v16592_v5 = vrot.slane %v13887_v28, 1  ;;  %v5721_v53 = vld [vmem:[#allocation3 + $0x41] sm:$0xff] }
 0x398   : > { %v6861_v33 = vmul.f32 %v13661_v20, %v10494_v49  ;;  %5690 = vst.msk [vmem:[#allocation3 + $0x83] sm:$0xff] %vm1402_vm4, %v5671_v58  ;;  %v7172_v18 = vrot.slane %v13893_v27, 2  ;;  %v6823_v56 = vmul.f32 %v13661_v20, %v10500_v52  ;;  %v7093_v60 = vmul.f32 %v13661_v20, %v10496_v50  ;;  %v5724_v58 = vld [vmem:[#allocation3 + $0x59] sm:$0xff] }
 0x399   : > { %v5501_v11 = vadd.f32 %v5424_v26, %v5270_v42  ;;  %v5540_v9 = vadd.f32 %v13643_v13, %v5502_v6  ;;  %v7324_v38 = vmul.f32 %v13661_v20, %v10498_v51  ;;  %v9773_v1 = vpack.i.bf16 %v5722_v17, %v5721_v53  ;;  %v5762_v53 = vld [vmem:[#allocation3 + $0x4b] sm:$0xff] }
 0x39a   : > { %v6937_v45 = vrot.slane %v6861_v33, 1  ;;  %v7403_v39 = vrot.slane %v13897_v2, 3  ;;  %v7171_v40 = vrot.slane %v7093_v60, 2  ;;  %v13924_v16 = vmul.f32 %v13764_v46, %v10494_v49  ;;  %v5723_v60 = vld [vmem:[#allocation3 + $0x51] sm:$0xff] }
 0x39b   : > { %v5539_v22 = vadd.f32 %v13643_v13, %v5501_v11  ;;  %v5578_v42 = vmax.f32 %v5540_v9, 0.0  ;;  %v7402_v6 = vrot.slane %v7324_v38, 3  ;;  %9774 = vrot.lane.b32.xlu1 %v9773_v1, %s10332_s12  ;;  %v13932_v20 = vmul.f32 %v13764_v46, %v10496_v50 }
 0x39c   : > { %v6939_v26 = vsel %vm691_vm1, %v6937_v45, %v16592_v5  ;;  %v6824_v2 = vmul.f32 %v13720_v57, %v10500_v52  ;;  %v13938_v11 = vmul.f32 %v13764_v46, %v10500_v52  ;;  %v7173_v38 = vsel %vm930_vm2, %v7171_v40, %v7172_v18  ;;  %v13955_v40 = vld [vmem:[#allocation3 + $0x90] sm:$0xff] }
 0x39d   : > { %v5577_v17 = vmax.f32 %v5539_v22, 0.0  ;;  %v7050_v33 = vadd.f32 %v6939_v26, %v6823_v56  ;;  %v5634_v9 = vld [vmem:[#allocation2 + $0x110] ss:$2 sm:$0xff]  ;;  %v5653_v45 = vld [vmem:[#allocation2 + $0x111] ss:$2 sm:$0xff]  ;;  %v13947_v57 = vmul.f32 %v13764_v46, %v10498_v51  ;;  %v9788_v56 = vpack.i.bf16 %v5724_v58, %v5723_v60  ;;  %v13949_v22 = vpop.permute.xlu1 %6700  ;;  %16759 = vst [vmem:[#allocation42_spill] sm:$0xff] %v13955_v40 }
 0x39e   : > { %5616 = vst.msk [vmem:[#allocation2 + $0x128] sm:$0x7f] %vm1440_vm5, %v5578_v42  ;;  %v5672_v26 = vmax.f32 %v5634_v9, %v5653_v45  ;;  %v7404_v5 = vsel %vm1166_vm3, %v7402_v6, %v7403_v39  ;;  %v6863_v42 = vmul.f32 %v13703_v8, %v10494_v49  ;;  %v13961_v46 = vmul.f32 %v13703_v8, %v10496_v50  ;;  %v5764_v6 = vld [vmem:[#allocation3 + $0x5b] sm:$0xff] }
 0x39f   : > { %5615 = vst.msk [vmem:[#allocation2 + $0x120] sm:$0xff] %vm1402_vm4, %v5577_v17  ;;  %v7286_v37 = vadd.f32 %v7173_v38, %v7050_v33  ;;  %9789 = vrot.lane.b32.xlu0 %v9788_v56, %s10332_s12  ;;  %v13965_v58 = vmul.f32 %v13703_v8, %v10498_v51  ;;  %v9783_v17 = vpack.i.bf16 %v5762_v53, %v5761_v48  ;;  %v13967_v33 = vpop.permute.xlu0 %6705  ;;  %v5744_v56 = vld [vmem:[#allocation3 + $0x5a] sm:$0xff] }
 0x3a0   : > { %5691 = vst.msk [vmem:[#allocation3 + $0x8b] sm:$0xff] %vm1402_vm4, %v5672_v26  ;;  %v6825_v9 = vmul.f32 %v13703_v8, %v10500_v52  ;;  %v6940_v45 = vrot.slane %v6863_v42, 1  ;;  %v13974_v38 = vmul.f32 %v13812_v59, %v10494_v49  ;;  %v7174_v1 = vrot.slane %v13961_v46, 2 }
 0x3a1   : > { %v7517_v60 = vadd.f32 %v7404_v5, %v7286_v37  ;;  %v7405_v48 = vrot.slane %v13965_v58, 3  ;;  %9784 = vrot.lane.b32.xlu1 %v9783_v17, %s10334_s9  ;;  %v13982_v53 = vmul.f32 %v13812_v59, %v10496_v50  ;;  %v5763_v37 = vld [vmem:[#allocation3 + $0x53] sm:$0xff]  ;;  %v16760_v5 = vrot.slane %v13887_v28, 1  ;;  %v14000_v28 = vpop.permute.xlu1 %6710 }
 0x3a2   : > { %v13990_v42 = vmul.f32 %v13812_v59, %v10498_v51  ;;  %v9798_v46 = vpack.i.bf16 %v5764_v6, %v5763_v37  ;;  %v7175_v17 = vsel %vm930_vm2, %v7172_v18, %v7174_v1  ;;  %v13997_v40 = vmul.f32 %v13812_v59, %v10500_v52 }
 0x3a3   : > { %v7555_v8 = vadd.f32 %v13643_v13, %v7517_v60  ;;  %v6941_v26 = vsel %vm691_vm1, %v16760_v5, %v6940_v45  ;;  %v7406_v7 = vsel %vm1166_vm3, %v7403_v39, %v7405_v48  ;;  %v6864_v27 = vmul.f32 %v13754_v15, %v10494_v49  ;;  %v14011_v60 = vpop.permute.xlu0 %6715 }
 0x3a4   : > { %v7051_v58 = vadd.f32 %v6941_v26, %v6824_v2  ;;  %9799 = vrot.lane.b32.xlu0 %v9798_v46, %s10334_s9  ;;  %v5743_v2 = vld [vmem:[#allocation3 + $0x52] sm:$0xff]  ;;  %v7096_v59 = vmul.f32 %v13754_v15, %v10496_v50  ;;  %v7327_v26 = vmul.f32 %v13754_v15, %v10498_v51  ;;  %v14017_v43 = vmul.f32 %v13842_v10, %v10494_v49 }
 0x3a5   : > { %v7593_v5 = vmax.f32 %v7555_v8, 0.0  ;;  %v9793_v8 = vpack.i.bf16 %v5744_v56, %v5743_v2  ;;  %v6942_v25 = vrot.slane %v6864_v27, 1  ;;  %v6826_v24 = vmul.f32 %v13754_v15, %v10500_v52 }
 0x3a6   : > { %v5635_v18 = vld [vmem:[#allocation2 + $0x120] ss:$2 sm:$0x7f]  ;;  %v5654_v6 = vld [vmem:[#allocation2 + $0x121] ss:$2 sm:$0x7f]  ;;  %v7287_v37 = vadd.f32 %v7175_v17, %v7051_v58  ;;  %v14048_v46 = vmul.f32 %v13842_v10, %v10498_v51 }
 0x3a7   : > { %v5673_v39 = vmax.f32 %v5635_v18, %v5654_v6  ;;  %7631 = vst.msk [vmem:[#allocation2] sm:$0xff] %vm1402_vm4, %v7593_v5  ;;  %v14019_v58 = vld [vmem:[#allocation3 + $0x98] sm:$0x3]  ;;  %v7176_v61 = vrot.slane %v7096_v59, 2  ;;  %v7407_v56 = vrot.slane %v7327_v26, 3  ;;  %9794 = vrot.lane.b32.xlu1 %v9793_v8, %s10333_s16  ;;  %v6943_v5 = vsel %vm691_vm1, %v6940_v45, %v6942_v25  ;;  %v5746_v26 = vld [vmem:[#allocation3 + $0x6a] sm:$0xff]  ;;  %v14039_v45 = vpop.permute.xlu1 %6720 }
 0x3a8   : > { %16761 = vst [vmem:[#allocation43_spill] sm:$0xff] %v14019_v58  ;;  %v7518_v17 = vadd.f32 %v7406_v7, %v7287_v37  ;;  %v16762_v27 = vrot.slane %v13924_v16, 1  ;;  %v14031_v18 = vmul.f32 %v13842_v10, %v10500_v52  ;;  %v14035_v7 = vmul.f32 %v13842_v10, %v10496_v50  ;;  %v5745_v58 = vld [vmem:[#allocation3 + $0x62] sm:$0xff] }
 0x3a9   : > { %5692 = vst.msk [vmem:[#allocation3 + $0x93] sm:$0x7f] %vm1440_vm5, %v5673_v39  ;;  %v7052_v6 = vadd.f32 %v6943_v5, %v6825_v9  ;;  %v7177_v8 = vsel %vm930_vm2, %v7174_v1, %v7176_v61  ;;  %v14053_v1 = vpop.permute.xlu0 %6725  ;;  %v7098_v10 = vmul.f32 %v13791_v21, %v10496_v50  ;;  %v16777_v55 = vrot.slane %v13990_v42, 3 }
 0x3aa   : > { %v6945_v2 = vsel %vm691_vm1, %v6942_v25, %v16762_v27  ;;  %v7556_v15 = vadd.f32 %v13643_v13, %v7518_v17  ;;  %v16763_v25 = vrot.slane %v13932_v20, 2  ;;  %v7408_v27 = vsel %vm1166_vm3, %v7405_v48, %v7407_v56  ;;  %v5726_v17 = vld [vmem:[#allocation3 + $0x69] sm:$0xff] }
 0x3ab   : > { %v7053_v37 = vadd.f32 %v6945_v2, %v6826_v24  ;;  %v7288_v24 = vadd.f32 %v7177_v8, %v7052_v6  ;;  %v16764_v2 = vrot.slane %v13947_v57, 3  ;;  %v6866_v48 = vmul.f32 %v13791_v21, %v10494_v49 }
 0x3ac   : > { %v7179_v39 = vsel %vm930_vm2, %v7176_v61, %v16763_v25  ;;  %v7594_v9 = vmax.f32 %v7556_v15, 0.0  ;;  %v9808_v61 = vpack.i.bf16 %v5746_v26, %v5745_v58  ;;  %v5725_v25 = vld [vmem:[#allocation3 + $0x61] sm:$0xff]  ;;  %v6828_v58 = vmul.f32 %v13791_v21, %v10500_v52 }
 0x3ad   : > { %v7289_v5 = vadd.f32 %v7179_v39, %v7053_v37  ;;  %v7410_v59 = vsel %vm1166_vm3, %v7407_v56, %v16764_v2  ;;  %v7519_v15 = vadd.f32 %v7408_v27, %v7288_v24  ;;  %v7329_v56 = vmul.f32 %v13791_v21, %v10498_v51  ;;  %v14074_v27 = vpop.permute.xlu1 %6730 }
 0x3ae   : > { %7632 = vst.msk [vmem:[#allocation2 + $0x8] sm:$0xff] %vm1402_vm4, %v7594_v9  ;;  %v9803_v37 = vpack.i.bf16 %v5726_v17, %v5725_v25  ;;  %9809 = vrot.lane.b32.xlu0 %v9808_v61, %s10333_s16  ;;  %v6946_v26 = vrot.slane %v6866_v48, 1  ;;  %v7180_v39 = vrot.slane %v7098_v10, 2  ;;  %v16765_v17 = vrot.slane %v13924_v16, 1  ;;  %v5766_v16 = vld [vmem:[#allocation3 + $0x6b] sm:$0xff] }
 0x3af   : > { %v7520_v6 = vadd.f32 %v7410_v59, %v7289_v5  ;;  %v7557_v2 = vadd.f32 %v13643_v13, %v7519_v15  ;;  %v7411_v9 = vrot.slane %v7329_v56, 3  ;;  %v14072_v59 = vmul.f32 %v13873_v62, %v10494_v49  ;;  %v14091_v56 = vpop.permute.xlu0 %6735 }
 0x3b0   : > { %9804 = vrot.lane.b32.xlu1 %v9803_v37, %s10332_s12  ;;  %v6947_v24 = vsel %vm691_vm1, %v16765_v17, %v6946_v26  ;;  %v16766_v21 = vrot.slane %v13974_v38, 1  ;;  %v14084_v61 = vmul.f32 %v13873_v62, %v10500_v52  ;;  %v14088_v48 = vmul.f32 %v13873_v62, %v10496_v50 }
 0x3b1   : > { %v7558_v35 = vadd.f32 %v13643_v13, %v7520_v6  ;;  %v7595_v10 = vmax.f32 %v7557_v2, 0.0  ;;  %v7054_v15 = vadd.f32 %v6947_v24, %v13938_v11  ;;  %v16767_v37 = vrot.slane %v13932_v20, 2 }
 0x3b2   : > { %v6949_v5 = vsel %vm691_vm1, %v6946_v26, %v16766_v21  ;;  %v16768_v17 = vrot.slane %v13982_v53, 2  ;;  %v16769_v8 = vrot.slane %v13947_v57, 3  ;;  %v14110_v24 = vmul.f32 %v13873_v62, %v10498_v51  ;;  %v14119_v62 = vpop.permute.xlu1 %9664 }
 0x3b3   : > { %v7596_v25 = vmax.f32 %v7558_v35, 0.0  ;;  %v7055_v6 = vadd.f32 %v6949_v5, %v6828_v58  ;;  %v7181_v26 = vsel %vm930_vm2, %v16767_v37, %v7180_v39  ;;  %v16770_v35 = vrot.slane %v13990_v42, 3  ;;  %7633 = vst.msk [vmem:[#allocation2 + $0x10] sm:$0xff] %vm1402_vm4, %v7595_v10 }
 0x3b4   : > { %v7183_v21 = vsel %vm930_vm2, %v7180_v39, %v16768_v17  ;;  %v7412_v44 = vsel %vm1166_vm3, %v16769_v8, %v7411_v9  ;;  %v7290_v58 = vadd.f32 %v7181_v26, %v7054_v15  ;;  %v5765_v39 = vld [vmem:[#allocation3 + $0x63] sm:$0xff]  ;;  %v6868_v8 = vmul.f32 %v13829_v34, %v10494_v49 }
 0x3b5   : > { %v7414_v11 = vsel %vm1166_vm3, %v7411_v9, %v16770_v35  ;;  %7634 = vst.msk [vmem:[#allocation2 + $0x18] sm:$0xff] %vm1402_vm4, %v7596_v25  ;;  %v7291_v20 = vadd.f32 %v7183_v21, %v7055_v6  ;;  %v7669_v57 = vld [vmem:[#allocation2] ss:$2 sm:$0xff]  ;;  %v7688_v5 = vld [vmem:[#allocation2 + $0x1] ss:$2 sm:$0xff]  ;;  %v7100_v9 = vmul.f32 %v13829_v34, %v10496_v50  ;;  %v7331_v10 = vmul.f32 %v13829_v34, %v10498_v51 }
 0x3b6   : > { %v9813_v25 = vpack.i.bf16 %v5766_v16, %v5765_v39  ;;  %v7707_v15 = vmax.f32 %v7669_v57, %v7688_v5  ;;  %v7521_v6 = vadd.f32 %v7412_v44, %v7290_v58  ;;  %v6830_v17 = vmul.f32 %v13829_v34, %v10500_v52  ;;  %v14135_v34 = vpop.permute.xlu0 %6740  ;;  %v14171_v42 = vpop.permute.xlu1 %6745 }
 0x3b7   : > { %v7522_v37 = vadd.f32 %v7414_v11, %v7291_v20  ;;  %v6950_v21 = vrot.slane %v6868_v8, 1  ;;  %v7184_v35 = vrot.slane %v7100_v9, 2  ;;  %v7415_v2 = vrot.slane %v7331_v10, 3 }
 0x3b8   : > { %9814 = vrot.lane.b32.xlu1 %v9813_v25, %s10334_s9  ;;  %v7559_v16 = vadd.f32 %v13643_v13, %v7521_v6  ;;  %v14133_v58 = vmul.f32 %v13918_v30, %v10500_v52  ;;  %7726 = vst.msk [vmem:[#allocation3 + $0x3] sm:$0xff] %vm1402_vm4, %v7707_v15  ;;  %v16773_v20 = vrot.slane %v13974_v38, 1  ;;  %v16774_v57 = vrot.slane %v14017_v43, 1  ;;  %v5728_v38 = vld [vmem:[#allocation3 + $0x79] sm:$0xff] }
 0x3b9   : > { %v7560_v44 = vadd.f32 %v13643_v13, %v7522_v37  ;;  %v14146_v8 = vmul.f32 %v13918_v30, %v10494_v49  ;;  %v14150_v9 = vmul.f32 %v13918_v30, %v10496_v50  ;;  %v16775_v11 = vrot.slane %v13982_v53, 2 }
 0x3ba   : > { %v6951_v39 = vsel %vm691_vm1, %v16773_v20, %v6950_v21  ;;  %v6953_v5 = vsel %vm691_vm1, %v6950_v21, %v16774_v57  ;;  %v7597_v10 = vmax.f32 %v7559_v16, 0.0  ;;  %v16776_v57 = vrot.slane %v14035_v7, 2 }
 0x3bb   : > { %v7598_v25 = vmax.f32 %v7560_v44, 0.0  ;;  %v7056_v15 = vadd.f32 %v6951_v39, %v13997_v40  ;;  %v7057_v6 = vadd.f32 %v6953_v5, %v6830_v17  ;;  %v7185_v21 = vsel %vm930_vm2, %v16775_v11, %v7184_v35  ;;  %v5748_v39 = vld [vmem:[#allocation3 + $0x7a] sm:$0xff] }
 0x3bc   : > { %v7670_v37 = vld [vmem:[#allocation2 + $0x10] ss:$2 sm:$0xff]  ;;  %v7689_v20 = vld [vmem:[#allocation2 + $0x11] ss:$2 sm:$0xff]  ;;  %v7187_v26 = vsel %vm930_vm2, %v7184_v35, %v16776_v57  ;;  %v7416_v0 = vsel %vm1166_vm3, %v16777_v55, %v7415_v2  ;;  %v16778_v16 = vrot.slane %v14048_v46, 3  ;;  %7635 = vst.msk [vmem:[#allocation2 + $0x20] sm:$0xff] %vm1402_vm4, %v7597_v10  ;;  %v14169_v11 = vmul.f32 %v13918_v30, %v10498_v51 }
 0x3bd   : > { %v7708_v17 = vmax.f32 %v7670_v37, %v7689_v20  ;;  %7636 = vst.msk [vmem:[#allocation2 + $0x28] sm:$0xff] %vm1402_vm4, %v7598_v25  ;;  %v7292_v53 = vadd.f32 %v7185_v21, %v7056_v15  ;;  %v7293_v44 = vadd.f32 %v7187_v26, %v7057_v6  ;;  %v5727_v35 = vld [vmem:[#allocation3 + $0x71] sm:$0xff]  ;;  %v7102_v10 = vmul.f32 %v13864_v4, %v10496_v50  ;;  %v14183_v20 = vpop.permute.xlu0 %6750 }
 0x3be   : > { %v7418_v40 = vsel %vm1166_vm3, %v7415_v2, %v16778_v16  ;;  %v9818_v5 = vpack.i.bf16 %v5728_v38, %v5727_v35  ;;  %v6870_v2 = vmul.f32 %v13864_v4, %v10494_v49  ;;  %v14178_v25 = vld [vmem:[#allocation3 + $0x10] sm:$0xff]  ;;  %v7333_v6 = vmul.f32 %v13864_v4, %v10498_v51 }
 0x3bf   : > { %16779 = vst [vmem:[#allocation46_spill] sm:$0xff] %v14178_v25  ;;  %v7523_v26 = vadd.f32 %v7416_v0, %v7292_v53  ;;  %v7524_v15 = vadd.f32 %v7418_v40, %v7293_v44  ;;  %v5747_v37 = vld [vmem:[#allocation3 + $0x72] sm:$0xff]  ;;  %7727 = vst.msk [vmem:[#allocation3 + $0xb] sm:$0xff] %vm1402_vm4, %v7708_v17  ;;  %v6832_v38 = vmul.f32 %v13864_v4, %v10500_v52  ;;  %v7188_v57 = vrot.slane %v7102_v10, 2  ;;  %v5729_v25 = vld [vmem:[#allocation3 + $0x81] sm:$0xff] }
 0x3c0   : > { %9819 = vrot.lane.b32.xlu0 %v9818_v5, %s10332_s12  ;;  %v6954_v21 = vrot.slane %v6870_v2, 1  ;;  %v9823_v16 = vpack.i.bf16 %v5748_v39, %v5747_v37  ;;  %v7419_v44 = vrot.slane %v7333_v6, 3  ;;  %v16780_v35 = vrot.slane %v14017_v43, 1  ;;  %v14208_v6 = vpop.permute.xlu1 %6755 }
 0x3c1   : > { %v7561_v0 = vadd.f32 %v13643_v13, %v7523_v26  ;;  %v7562_v40 = vadd.f32 %v13643_v13, %v7524_v15  ;;  %v16781_v17 = vrot.slane %v14072_v59, 1  ;;  %v14201_v4 = vmul.f32 %v13967_v33, %v10500_v52  ;;  %v5768_v15 = vld [vmem:[#allocation3 + $0x7b] sm:$0xff] }
 0x3c2   : > { %v6955_v30 = vsel %vm691_vm1, %v16780_v35, %v6954_v21  ;;  %9824 = vrot.lane.b32.xlu1 %v9823_v16, %s10333_s16  ;;  %v14205_v39 = vmul.f32 %v13967_v33, %v10494_v49  ;;  %v16782_v16 = vrot.slane %v14035_v7, 2  ;;  %v16784_v55 = vrot.slane %v14048_v46, 3 }
 0x3c3   : > { %v6957_v5 = vsel %vm691_vm1, %v6954_v21, %v16781_v17  ;;  %v7599_v2 = vmax.f32 %v7561_v0, 0.0  ;;  %v7600_v10 = vmax.f32 %v7562_v40, 0.0  ;;  %v7058_v43 = vadd.f32 %v6955_v30, %v14031_v18 }
 0x3c4   : > { %v7059_v26 = vadd.f32 %v6957_v5, %v6832_v38  ;;  %v7671_v37 = vld [vmem:[#allocation2 + $0x20] ss:$2 sm:$0xff]  ;;  %v7690_v21 = vld [vmem:[#allocation2 + $0x21] ss:$2 sm:$0xff]  ;;  %v7189_v35 = vsel %vm930_vm2, %v16782_v16, %v7188_v57  ;;  %v16783_v17 = vrot.slane %v14088_v48, 2  ;;  %v7420_v0 = vsel %vm1166_vm3, %v16784_v55, %v7419_v44  ;;  %v14229_v5 = vpop.permute.xlu0 %9669 }
 0x3c5   : > { %v14221_v18 = vmul.f32 %v13967_v33, %v10496_v50  ;;  %v7709_v30 = vmax.f32 %v7671_v37, %v7690_v21  ;;  %7637 = vst.msk [vmem:[#allocation2 + $0x30] sm:$0xff] %vm1402_vm4, %v7599_v2  ;;  %7638 = vst.msk [vmem:[#allocation2 + $0x38] sm:$0xff] %vm1402_vm4, %v7600_v10  ;;  %v7294_v7 = vadd.f32 %v7189_v35, %v7058_v43  ;;  %v16785_v46 = vrot.slane %v14110_v24, 3  ;;  %v14237_v10 = vld [vmem:[#allocation3 + $0x18] sm:$0xff] }
 0x3c6   : > { %v7191_v53 = vsel %vm930_vm2, %v7188_v57, %v16783_v17  ;;  %v14227_v40 = vmul.f32 %v13967_v33, %v10498_v51  ;;  %v5767_v57 = vld [vmem:[#allocation3 + $0x73] sm:$0xff]  ;;  %v6872_v2 = vmul.f32 %v13907_v31, %v10494_v49  ;;  %16786 = vst [vmem:[#allocation47_spill] sm:$0xff] %v14237_v10  ;;  %v7335_v21 = vmul.f32 %v13907_v31, %v10498_v51  ;;  %v5730_v33 = vld [vmem:[#allocation3 + $0x89] sm:$0xff] }
 0x3c7   : > { %v7295_v38 = vadd.f32 %v7191_v53, %v7059_v26  ;;  %v7422_v55 = vsel %vm1166_vm3, %v7419_v44, %v16785_v46  ;;  %v9828_v37 = vpack.i.bf16 %v5768_v15, %v5767_v57  ;;  %v7525_v53 = vadd.f32 %v7420_v0, %v7294_v7  ;;  %7728 = vst.msk [vmem:[#allocation3 + $0x13] sm:$0xff] %vm1402_vm4, %v7709_v30  ;;  %v5750_v7 = vld [vmem:[#allocation3 + $0x8a] sm:$0xff] }
 0x3c8   : > { %v7104_v26 = vmul.f32 %v13907_v31, %v10496_v50  ;;  %v6834_v44 = vmul.f32 %v13907_v31, %v10500_v52  ;;  %v6958_v15 = vrot.slane %v6872_v2, 1  ;;  %v14250_v35 = vmul.f32 %v14011_v60, %v10494_v49  ;;  %v14268_v16 = vpop.permute.xlu0 %6765 }
 0x3c9   : > { %v7526_v43 = vadd.f32 %v7422_v55, %v7295_v38  ;;  %9829 = vrot.lane.b32.xlu0 %v9828_v37, %s10334_s9  ;;  %v7563_v17 = vadd.f32 %v13643_v13, %v7525_v53  ;;  %v14255_v38 = vpop.permute.xlu1 %6760  ;;  %v16788_v57 = vrot.slane %v14072_v59, 1  ;;  %v16789_v55 = vrot.slane %v14146_v8, 1 }
 0x3ca   : > { %v7192_v30 = vrot.slane %v7104_v26, 2  ;;  %16787 = vst [vmem:[#allocation48_spill] sm:$0xff] %v14255_v38  ;;  %v7423_v37 = vrot.slane %v7335_v21, 3  ;;  %v14265_v2 = vmul.f32 %v14011_v60, %v10500_v52  ;;  %v16790_v10 = vrot.slane %v14088_v48, 2 }
 0x3cb   : > { %v7564_v0 = vadd.f32 %v13643_v13, %v7526_v43  ;;  %v6959_v46 = vsel %vm691_vm1, %v16788_v57, %v6958_v15  ;;  %v6961_v31 = vsel %vm691_vm1, %v6958_v15, %v16789_v55  ;;  %v7601_v53 = vmax.f32 %v7563_v17, 0.0 }
 0x3cc   : > { %v7060_v43 = vadd.f32 %v6959_v46, %v14084_v61  ;;  %v7061_v26 = vadd.f32 %v6961_v31, %v6834_v44  ;;  %v7672_v59 = vld [vmem:[#allocation2 + $0x30] ss:$2 sm:$0xff]  ;;  %v7691_v57 = vld [vmem:[#allocation2 + $0x31] ss:$2 sm:$0xff]  ;;  %v7193_v15 = vsel %vm930_vm2, %v16790_v10, %v7192_v30  ;;  %v16791_v21 = vrot.slane %v14150_v9, 2 }
 0x3cd   : > { %v7602_v13 = vmax.f32 %v7564_v0, 0.0  ;;  %v14279_v61 = vmul.f32 %v14011_v60, %v10496_v50  ;;  %v7710_v44 = vmax.f32 %v7672_v59, %v7691_v57  ;;  %7639 = vst.msk [vmem:[#allocation2 + $0x40] sm:$0xff] %vm1402_vm4, %v7601_v53  ;;  %v16792_v48 = vrot.slane %v14110_v24, 3  ;;  %v5749_v31 = vld [vmem:[#allocation3 + $0x82] sm:$0xff] }
 0x3ce   : > { %v7195_v55 = vsel %vm930_vm2, %v7192_v30, %v16791_v21  ;;  %v7296_v0 = vadd.f32 %v7193_v15, %v7060_v43  ;;  %v14286_v30 = vld [vmem:[#allocation3 + $0x20] sm:$0xff]  ;;  %v16794_v21 = vrot.slane %v14169_v11, 3  ;;  %v14293_v59 = vmul.f32 %v14011_v60, %v10498_v51  ;;  %v14300_v15 = vpop.permute.xlu1 %6770 }
 0x3cf   : > { %7640 = vst.msk [vmem:[#allocation2 + $0x48] sm:$0xff] %vm1402_vm4, %v7602_v13  ;;  %v7297_v46 = vadd.f32 %v7195_v55, %v7061_v26  ;;  %v7424_v10 = vsel %vm1166_vm3, %v16792_v48, %v7423_v37  ;;  %16793 = vst [vmem:[#allocation49_spill] sm:$0xff] %v14286_v30  ;;  %v9838_v53 = vpack.i.bf16 %v5750_v7, %v5749_v31  ;;  %v14316_v7 = vld [vmem:[%s16536_s2] ss:$0 sm:$0xff]  ;;  %v16807_v36 = vrot.slane %v14221_v18, 2 }
 0x3d0   : > { %v7426_v17 = vsel %vm1166_vm3, %v7423_v37, %v16794_v21  ;;  %v9833_v13 = vpack.i.bf16 %v5730_v33, %v5729_v25  ;;  %v7527_v43 = vadd.f32 %v7424_v10, %v7296_v0  ;;  %v6874_v24 = vmul.f32 %v13949_v22, %v10494_v49  ;;  %7729 = vst.msk [vmem:[#allocation3 + $0x1b] sm:$0xff] %vm1402_vm4, %v7710_v44 }
 0x3d1   : > { %v7528_v26 = vadd.f32 %v7426_v17, %v7297_v46  ;;  %v7106_v57 = vmul.f32 %v13949_v22, %v10496_v50  ;;  %16795 = vst [vmem:[#allocation50_spill] sm:$0xff] %v14300_v15  ;;  %9839 = vrot.lane.b32.xlu0 %v9838_v53, %s10333_s16  ;;  %v6836_v60 = vmul.f32 %v13949_v22, %v10500_v52  ;;  %v14320_v46 = vpop.permute.xlu0 %6775  ;;  %v16809_v63 = vrot.slane %v14227_v40, 3 }
 0x3d2   : > { %9834 = vrot.lane.b32.xlu1 %v9833_v13, %s10332_s12  ;;  %v7337_v25 = vmul.f32 %v13949_v22, %v10498_v51  ;;  %v14311_v33 = vmul.f32 %v14053_v1, %v10494_v49  ;;  %v7565_v55 = vadd.f32 %v14316_v7, %v7527_v43  ;;  %v6962_v44 = vrot.slane %v6874_v24, 1 }
 0x3d3   : > { %v7566_v17 = vadd.f32 %v14316_v7, %v7528_v26  ;;  %v7196_v0 = vrot.slane %v7106_v57, 2  ;;  %v14325_v10 = vmul.f32 %v14053_v1, %v10500_v52  ;;  %v14329_v31 = vmul.f32 %v14053_v1, %v10496_v50  ;;  %v5770_v57 = vld [vmem:[#allocation3 + $0x8b] sm:$0xff] }
 0x3d4   : > { %v7427_v22 = vrot.slane %v7337_v25, 3  ;;  %v7603_v21 = vmax.f32 %v7565_v55, 0.0  ;;  %v16796_v13 = vrot.slane %v14146_v8, 1  ;;  %v16797_v26 = vrot.slane %v14205_v39, 1  ;;  %v5732_v25 = vld [vmem:[#allocation3 + $0x99] sm:$0x3] }
 0x3d5   : > { %v7604_v53 = vmax.f32 %v7566_v17, 0.0  ;;  %v14341_v55 = vmul.f32 %v14053_v1, %v10498_v51  ;;  %v5731_v8 = vld [vmem:[#allocation3 + $0x91] sm:$0xff]  ;;  %v5769_v1 = vld [vmem:[#allocation3 + $0x83] sm:$0xff] }
 0x3d6   : > { %v6963_v43 = vsel %vm691_vm1, %v16796_v13, %v6962_v44  ;;  %v6965_v24 = vsel %vm691_vm1, %v6962_v44, %v16797_v26  ;;  %v7673_v48 = vld [vmem:[#allocation2 + $0x40] ss:$2 sm:$0xff]  ;;  %v7692_v37 = vld [vmem:[#allocation2 + $0x41] ss:$2 sm:$0xff]  ;;  %7641 = vst.msk [vmem:[#allocation2 + $0x50] sm:$0xff] %vm1402_vm4, %v7603_v21  ;;  %v16798_v44 = vrot.slane %v14150_v9, 2  ;;  %v9843_v9 = vpack.i.bf16 %v5770_v57, %v5769_v1 }
 0x3d7   : > { %v7062_v30 = vadd.f32 %v6963_v43, %v14133_v58  ;;  %v7063_v12 = vadd.f32 %v6965_v24, %v6836_v60  ;;  %v7711_v17 = vmax.f32 %v7673_v48, %v7692_v37  ;;  %7642 = vst.msk [vmem:[#allocation2 + $0x58] sm:$0xff] %vm1402_vm4, %v7604_v53  ;;  %v16799_v26 = vrot.slane %v14221_v18, 2  ;;  %v14354_v24 = vpop.permute.xlu1 %9674 }
 0x3d8   : > { %v7197_v13 = vsel %vm930_vm2, %v16798_v44, %v7196_v0  ;;  %v16800_v60 = vrot.slane %v14169_v11, 3  ;;  %v16801_v21 = vrot.slane %v14227_v40, 3  ;;  %v9848_v15 = vpack.i.bf16 %v5732_v25, %v5731_v8  ;;  %9844 = vrot.lane.b32.xlu1 %v9843_v9, %s10334_s9 }
 0x3d9   : > { %v7199_v58 = vsel %vm930_vm2, %v7196_v0, %v16799_v26  ;;  %v7298_v37 = vadd.f32 %v7197_v13, %v7062_v30  ;;  %v6876_v11 = vmul.f32 %v14000_v28, %v10494_v49  ;;  %v7108_v0 = vmul.f32 %v14000_v28, %v10496_v50  ;;  %v14366_v26 = vpop.permute.xlu0 %6780  ;;  %7730 = vst.msk [vmem:[#allocation3 + $0x23] sm:$0xff] %vm1402_vm4, %v7711_v17 }
 0x3da   : > { %v7428_v43 = vsel %vm1166_vm3, %v16800_v60, %v7427_v22  ;;  %v7299_v48 = vadd.f32 %v7199_v58, %v7063_v12  ;;  %v7430_v53 = vsel %vm1166_vm3, %v7427_v22, %v16801_v21  ;;  %16803 = vst [vmem:[#allocation52_spill] sm:$0xff] %v14366_v26  ;;  %v7339_v57 = vmul.f32 %v14000_v28, %v10498_v51 }
 0x3db   : > { %v7529_v12 = vadd.f32 %v7428_v43, %v7298_v37  ;;  %9849 = vrot.lane.b32.xlu0 %v9848_v15, %s10332_s12  ;;  %v6838_v25 = vmul.f32 %v14000_v28, %v10500_v52  ;;  %v6966_v8 = vrot.slane %v6876_v11, 1  ;;  %v7200_v13 = vrot.slane %v7108_v0, 2  ;;  %v5752_v37 = vld [vmem:[#allocation3 + $0x9a] sm:$0x3]  ;;  %v5751_v11 = vld [vmem:[#allocation3 + $0x92] sm:$0xff] }
 0x3dc   : > { %v7530_v30 = vadd.f32 %v7430_v53, %v7299_v48  ;;  %v14378_v58 = vmul.f32 %v14091_v56, %v10500_v52  ;;  %v7431_v43 = vrot.slane %v7339_v57, 3  ;;  %v14384_v1 = vmul.f32 %v14091_v56, %v10494_v49  ;;  %v5771_v0 = vld [vmem:[#allocation3 + $0x93] sm:$0xff] }
 0x3dd   : > { %v7567_v17 = vadd.f32 %v14316_v7, %v7529_v12  ;;  %v16804_v15 = vrot.slane %v14205_v39, 1  ;;  %v16805_v48 = vrot.slane %v14250_v35, 1  ;;  %v14394_v53 = vmul.f32 %v14091_v56, %v10496_v50  ;;  %v5772_v12 = vld [vmem:[#allocation3 + $0x9b] sm:$0x3]  ;;  %v14412_v38 = vpop.permute.xlu0 %6790 }
 0x3de   : > { %v7568_v60 = vadd.f32 %v14316_v7, %v7530_v30  ;;  %v14398_v9 = vmul.f32 %v14091_v56, %v10498_v51  ;;  %v14400_v30 = vpop.permute.xlu1 %6785  ;;  %v7674_v39 = vld [vmem:[#allocation2 + $0x50] ss:$2 sm:$0xff]  ;;  %v7693_v57 = vld [vmem:[#allocation2 + $0x51] ss:$2 sm:$0xff]  ;;  %v7201_v29 = vsel %vm930_vm2, %v16807_v36, %v7200_v13  ;;  %v16808_v56 = vrot.slane %v14279_v61, 2 }
 0x3df   : > { %v6967_v28 = vsel %vm691_vm1, %v16804_v15, %v6966_v8  ;;  %v6969_v21 = vsel %vm691_vm1, %v6966_v8, %v16805_v48  ;;  %16806 = vst [vmem:[#allocation53_spill] sm:$0xff] %v14400_v30  ;;  %v7605_v15 = vmax.f32 %v7567_v17, 0.0  ;;  %v7712_v48 = vmax.f32 %v7674_v39, %v7693_v57 }
 0x3e0   : > { %v7606_v22 = vmax.f32 %v7568_v60, 0.0  ;;  %v7064_v44 = vadd.f32 %v6967_v28, %v14201_v4  ;;  %v7065_v8 = vadd.f32 %v6969_v21, %v6838_v25  ;;  %v7203_v26 = vsel %vm930_vm2, %v7200_v13, %v16808_v56  ;;  %v14420_v60 = vld [vmem:[#allocation3 + $0x30] sm:$0xff] }
 0x3e1   : > { %v7432_v30 = vsel %vm1166_vm3, %v16809_v63, %v7431_v43  ;;  %7643 = vst.msk [vmem:[#allocation2 + $0x60] sm:$0xff] %vm1402_vm4, %v7605_v15  ;;  %v16810_v18 = vrot.slane %v14293_v59, 3  ;;  %v6976_v17 = vrot.slane %v14384_v1, 1  ;;  %v7210_v40 = vrot.slane %v14394_v53, 2  ;;  %7731 = vst.msk [vmem:[#allocation3 + $0x2b] sm:$0xff] %vm1402_vm4, %v7712_v48 }
 0x3e2   : > { %7644 = vst.msk [vmem:[#allocation2 + $0x68] sm:$0xff] %vm1402_vm4, %v7606_v22  ;;  %v7300_v4 = vadd.f32 %v7201_v29, %v7064_v44  ;;  %v7301_v25 = vadd.f32 %v7203_v26, %v7065_v8  ;;  %v9853_v13 = vpack.i.bf16 %v5752_v37, %v5751_v11  ;;  %v9858_v63 = vpack.i.bf16 %v5772_v12, %v5771_v0  ;;  %v14442_v0 = vpop.permute.xlu1 %6795 }
 0x3e3   : > { %v7434_v36 = vsel %vm1166_vm3, %v7431_v43, %v16810_v18  ;;  %v6878_v28 = vmul.f32 %v14039_v45, %v10494_v49  ;;  %v7110_v44 = vmul.f32 %v14039_v45, %v10496_v50  ;;  %v7341_v26 = vmul.f32 %v14039_v45, %v10498_v51 }
 0x3e4   : > { %v7531_v22 = vadd.f32 %v7432_v30, %v7300_v4  ;;  %v7532_v29 = vadd.f32 %v7434_v36, %v7301_v25  ;;  %9854 = vrot.lane.b32.xlu1 %v9853_v13, %s10333_s16  ;;  %9859 = vrot.lane.b32.xlu0 %v9858_v63, %s10334_s9  ;;  %v6840_v43 = vmul.f32 %v14039_v45, %v10500_v52  ;;  %v16811_v15 = vrot.slane %v14250_v35, 1  ;;  %v14454_v25 = vpop.permute.xlu0 %9679 }
 0x3e5   : > { %v6970_v37 = vrot.slane %v6878_v28, 1  ;;  %v14436_v21 = vmul.f32 %v14135_v34, %v10494_v49  ;;  %v14440_v11 = vmul.f32 %v14135_v34, %v10496_v50  ;;  %v7204_v39 = vrot.slane %v7110_v44, 2 }
 0x3e6   : > { %v7569_v12 = vadd.f32 %v14316_v7, %v7531_v22  ;;  %v7570_v30 = vadd.f32 %v14316_v7, %v7532_v29  ;;  %v7435_v57 = vrot.slane %v7341_v26, 3  ;;  %v16812_v8 = vrot.slane %v14311_v33, 1 }
 0x3e7   : > { %v6971_v45 = vsel %vm691_vm1, %v16811_v15, %v6970_v37  ;;  %v16603_v56 = vrot.slane %v14436_v21, 1  ;;  %v16602_v4 = vrot.slane %v14440_v11, 2  ;;  %v16604_v35 = vrot.slane %v14398_v9, 3 }
 0x3e8   : > { %v6973_v48 = vsel %vm691_vm1, %v6970_v37, %v16812_v8  ;;  %v7607_v18 = vmax.f32 %v7569_v12, 0.0  ;;  %v7608_v36 = vmax.f32 %v7570_v30, 0.0  ;;  %v7066_v13 = vadd.f32 %v6971_v45, %v14265_v2 }
 0x3e9   : > { %v7067_v63 = vadd.f32 %v6973_v48, %v6840_v43  ;;  %v7675_v28 = vld [vmem:[#allocation2 + $0x60] ss:$2 sm:$0xff]  ;;  %v7694_v22 = vld [vmem:[#allocation2 + $0x61] ss:$2 sm:$0xff]  ;;  %v16813_v29 = vrot.slane %v14279_v61, 2  ;;  %v16814_v26 = vrot.slane %v14329_v31, 2  ;;  %v6979_v61 = vsel %vm691_vm1, %v6976_v17, %v16603_v56 }
 0x3ea   : > { %v16815_v15 = vrot.slane %v14293_v59, 3  ;;  %v7713_v30 = vmax.f32 %v7675_v28, %v7694_v22  ;;  %7645 = vst.msk [vmem:[#allocation2 + $0x70] sm:$0xff] %vm1402_vm4, %v7607_v18  ;;  %7646 = vst.msk [vmem:[#allocation2 + $0x78] sm:$0xff] %vm1402_vm4, %v7608_v36  ;;  %v16816_v45 = vrot.slane %v14341_v55, 3  ;;  %v7070_v59 = vadd.f32 %v6979_v61, %v14378_v58  ;;  %v14487_v18 = vpop.permute.xlu1 %6800  ;;  %v14489_v36 = vld [vmem:[#allocation3 + $0x38] sm:$0xff] }
 0x3eb   : > { %v7205_v44 = vsel %vm930_vm2, %v16813_v29, %v7204_v39  ;;  %v7207_v37 = vsel %vm930_vm2, %v7204_v39, %v16814_v26  ;;  %v7213_v8 = vsel %vm930_vm2, %v7210_v40, %v16602_v4  ;;  %v14485_v48 = vmul.f32 %v14135_v34, %v10498_v51  ;;  %v14503_v26 = vpop.permute.xlu0 %6805 }
 0x3ec   : > { %v7436_v12 = vsel %vm1166_vm3, %v16815_v15, %v7435_v57  ;;  %v7302_v2 = vadd.f32 %v7205_v44, %v7066_v13  ;;  %v7303_v43 = vadd.f32 %v7207_v37, %v7067_v63  ;;  %v7438_v39 = vsel %vm1166_vm3, %v7435_v57, %v16816_v45  ;;  %7732 = vst.msk [vmem:[#allocation3 + $0x33] sm:$0xff] %vm1402_vm4, %v7713_v30  ;;  %v14510_v30 = vld [vmem:[%s16539_s5 + $0xf8] sm:$0xff] }
 0x3ed   : > { %v6880_v57 = vmul.f32 %v14074_v27, %v10494_v49  ;;  %v7112_v58 = vmul.f32 %v14074_v27, %v10496_v50  ;;  %v14498_v28 = vmul.f32 %v14135_v34, %v10500_v52  ;;  %v7306_v22 = vadd.f32 %v7213_v8, %v7070_v59  ;;  %v322_v34 = vld [vmem:[%s16539_s5 + $0x78] sm:$0xff]  ;;  %8783 = vmatprep.subr.mxu1 %v14510_v30  ;;  %v321_v8 = vld [vmem:[%s16539_s5 + $0x70] sm:$0xff] }
 0x3ee   : > { %v7533_v13 = vadd.f32 %v7436_v12, %v7302_v2  ;;  %v7534_v63 = vadd.f32 %v7438_v39, %v7303_v43  ;;  %v16601_v29 = vrot.slane %v14485_v48, 3  ;;  %v7343_v44 = vmul.f32 %v14074_v27, %v10498_v51  ;;  %v337_v43 = vld [vmem:[%s16539_s5 + $0xf0] sm:$0xff]  ;;  %8784 = vmatpush3.msra.mxu1 %v322_v34  ;;  %v7786_v34 = vld [vmem:[#allocation3 + $0xa] sm:$0xff] }
 0x3ef   : > { %v6974_v12 = vrot.slane %v6880_v57, 1  ;;  %v7208_v2 = vrot.slane %v7112_v58, 2  ;;  %v6842_v45 = vmul.f32 %v14074_v27, %v10500_v52  ;;  %v14527_v59 = vmul.f32 %v14183_v20, %v10500_v52  ;;  %v336_v27 = vld [vmem:[%s16539_s5 + $0xe8] sm:$0xff]  ;;  %8785 = vmatprep.subr.mxu1 %v337_v43  ;;  %v335_v43 = vld [vmem:[%s16539_s5 + $0xe0] sm:$0xff] }
 0x3f0   : > { %v7571_v37 = vadd.f32 %v14316_v7, %v7533_v13  ;;  %v7572_v15 = vadd.f32 %v14316_v7, %v7534_v63  ;;  %v7444_v61 = vsel %vm1166_vm3, %v16604_v35, %v16601_v29  ;;  %v7439_v39 = vrot.slane %v7343_v44, 3  ;;  %8786 = vmatpush3.msra.mxu1 %v321_v8  ;;  %v14576_v8 = vpop.permute.xlu0 %6815 }
 0x3f1   : > { %v7537_v57 = vadd.f32 %v7444_v61, %v7306_v22  ;;  %v16817_v58 = vrot.slane %v14311_v33, 1  ;;  %v7676_v44 = vld [vmem:[#allocation2 + $0x70] ss:$2 sm:$0xff]  ;;  %v7695_v4 = vld [vmem:[#allocation2 + $0x71] ss:$2 sm:$0xff]  ;;  %v6977_v56 = vsel %vm691_vm1, %v6974_v12, %v6976_v17  ;;  %v14545_v22 = vmul.f32 %v14183_v20, %v10494_v49  ;;  %8787 = vmatprep.subr.mxu1 %v336_v27 }
 0x3f2   : > { %v7609_v13 = vmax.f32 %v7571_v37, 0.0  ;;  %v7610_v63 = vmax.f32 %v7572_v15, 0.0  ;;  %v14549_v33 = vmul.f32 %v14183_v20, %v10496_v50  ;;  %v14551_v37 = vpop.permute.xlu1 %6810  ;;  %v320_v15 = vld [vmem:[%s16539_s5 + $0x68] sm:$0xff]  ;;  %v7714_v1 = vmax.f32 %v7676_v44, %v7695_v4  ;;  %v7766_v61 = vld [vmem:[#allocation3 + $0x9] sm:$0xff] }
 0x3f3   : > { %v6975_v29 = vsel %vm691_vm1, %v16817_v58, %v6974_v12  ;;  %v7069_v17 = vadd.f32 %v6977_v56, %v6842_v45  ;;  %v14565_v58 = vld [vmem:[#allocation3 + $0x40] sm:$0xff]  ;;  %v7211_v4 = vsel %vm930_vm2, %v7208_v2, %v7210_v40  ;;  %v16820_v56 = vrot.slane %v14341_v55, 3  ;;  %8788 = vmatpush3.msra.mxu1 %v320_v15 }
 0x3f4   : > { %v7068_v35 = vadd.f32 %v6975_v29, %v14325_v10  ;;  %7647 = vst.msk [vmem:[#allocation2 + $0x80] sm:$0xff] %vm1402_vm4, %v7609_v13  ;;  %7648 = vst.msk [vmem:[#allocation2 + $0x88] sm:$0xff] %vm1402_vm4, %v7610_v63  ;;  %v7575_v10 = vadd.f32 %v14316_v7, %v7537_v57  ;;  %v16818_v29 = vrot.slane %v14329_v31, 2  ;;  %v16821_v45 = vrot.slane %v14398_v9, 3  ;;  %v319_v57 = vld [vmem:[%s16539_s5 + $0x60] sm:$0xff]  ;;  %8789 = vmatprep.subr.mxu1 %v335_v43  ;;  %v14620_v15 = vpop.permute.xlu0 %6820 }
 0x3f5   : > { %16819 = vst [vmem:[#allocation54_spill] sm:$0xff] %v14565_v58  ;;  %v7440_v31 = vsel %vm1166_vm3, %v16820_v56, %v7439_v39  ;;  %v7305_v53 = vadd.f32 %v7211_v4, %v7069_v17  ;;  %v14583_v40 = vmul.f32 %v14183_v20, %v10498_v51  ;;  %v9667_v55 = vunpack.i.h.bf16 %v14119_v62  ;;  %7733 = vst.msk [vmem:[#allocation3 + $0x3b] sm:$0xff] %vm1402_vm4, %v7714_v1 }
 0x3f6   : > { %v7209_v12 = vsel %vm930_vm2, %v16818_v29, %v7208_v2  ;;  %v7442_v63 = vsel %vm1166_vm3, %v7439_v39, %v16821_v45  ;;  %v7613_v44 = vmax.f32 %v7575_v10, 0.0  ;;  %v7765_v2 = vld [vmem:[#allocation3 + $0x1] sm:$0xff]  ;;  %v9666_v39 = vunpack.i.l.bf16 %v14119_v62  ;;  %8790 = vmatpush3.msra.mxu1 %v319_v57  ;;  %v14606_v56 = vpop.permute.xlu1 %9684 }
 0x3f7   : > { %v7304_v13 = vadd.f32 %v7209_v12, %v7068_v35  ;;  %v7785_v35 = vld [vmem:[#allocation3 + $0x2] sm:$0xff]  ;;  %v9863_v29 = vpack.i.bf16 %v7766_v61, %v7765_v2  ;;  %v7806_v12 = vld [vmem:[#allocation3 + $0xb] sm:$0xff]  ;;  %v7536_v20 = vadd.f32 %v7442_v63, %v7305_v53  ;;  %v6845_v61 = vmul.f32 %v14171_v42, %v10500_v52 }
 0x3f8   : > { %v9868_v27 = vpack.i.bf16 %v7786_v34, %v7785_v35  ;;  %v334_v10 = vld [vmem:[%s16539_s5 + $0xd8] sm:$0xff]  ;;  %7651 = vst.msk [vmem:[#allocation2 + $0xa0] sm:$0xff] %vm1402_vm4, %v7613_v44  ;;  %v9671_v34 = vunpack.i.l.bf16 %v14229_v5  ;;  %v6883_v43 = vmul.f32 %v14171_v42, %v10494_v49  ;;  %v7115_v63 = vmul.f32 %v14171_v42, %v10496_v50 }
 0x3f9   : > { %v7535_v9 = vadd.f32 %v7440_v31, %v7304_v13  ;;  %v318_v62 = vld [vmem:[%s16539_s5 + $0x58] sm:$0xff]  ;;  %9864 = vrot.lane.b32.xlu1 %v9863_v29, %s10332_s12  ;;  %v333_v31 = vld [vmem:[%s16539_s5 + $0xd0] sm:$0xff]  ;;  %v7574_v45 = vadd.f32 %v14316_v7, %v7536_v20  ;;  %v7346_v57 = vmul.f32 %v14171_v42, %v10498_v51  ;;  %8791 = vmatprep.subr.mxu1 %v334_v10 }
 0x3fa   : > { %9869 = vrot.lane.b32.xlu0 %v9868_v27, %s10333_s16  ;;  %v7805_v13 = vld [vmem:[#allocation3 + $0x3] sm:$0xff]  ;;  %v4001_v27 = vsel %vm1916_vm7, %v12858_v54, %v9666_v39  ;;  %v4002_v29 = vsel %vm1916_vm7, %v12861_v14, %v9667_v55  ;;  %8792 = vmatpush3.msra.mxu1 %v318_v62  ;;  %v7214_v17 = vrot.slane %v7115_v63, 2  ;;  %v16822_v54 = vrot.slane %v14436_v21, 1 }
 0x3fb   : > { %v7573_v1 = vadd.f32 %v14316_v7, %v7535_v9  ;;  %v9873_v44 = vpack.i.bf16 %v7806_v12, %v7805_v13  ;;  %v7677_v53 = vld [vmem:[#allocation2 + $0x80] ss:$2 sm:$0xff]  ;;  %v7696_v35 = vld [vmem:[#allocation2 + $0x81] ss:$2 sm:$0xff]  ;;  %v6980_v9 = vrot.slane %v6883_v43, 1  ;;  %v7612_v4 = vmax.f32 %v7574_v45, 0.0  ;;  %9233 = vmatprep.mubr.f32.mxu0 %v4001_v27  ;;  %8793 = vmatprep.subr.mxu1 %v333_v31 }
 0x3fc   : > { %v7715_v20 = vmax.f32 %v7677_v53, %v7696_v35  ;;  %v7445_v58 = vrot.slane %v7346_v57, 3  ;;  %v14622_v42 = vld [vmem:[#allocation3 + $0x48] sm:$0xff]  ;;  %v9672_v12 = vunpack.i.h.bf16 %v14229_v5  ;;  %v16823_v14 = vrot.slane %v14545_v22, 1  ;;  %9234 = vmatmul.mubr.f32.vlgmr.msra.gmra.mxu0 %v4002_v29  ;;  %v7768_v53 = vld [vmem:[#allocation3 + $0x19] sm:$0xff] }
 0x3fd   : > { %v7611_v2 = vmax.f32 %v7573_v1, 0.0  ;;  %v6981_v39 = vsel %vm691_vm1, %v16822_v54, %v6980_v9  ;;  %9874 = vrot.lane.b32.xlu1 %v9873_v44, %s10334_s9  ;;  %v16824_v10 = vpack.i.bf16 %v12822_v32, %v12837_v41  ;;  %7650 = vst.msk [vmem:[#allocation2 + $0x98] sm:$0xff] %vm1402_vm4, %v7612_v4  ;;  %v16825_v1 = vrot.slane %v14440_v11, 2  ;;  %v10222_v35 = vld [vmem:[%s16537_s3 + $0x70] sm:$0xff] }
 0x3fe   : > { %v6983_v55 = vsel %vm691_vm1, %v6980_v9, %v16823_v14  ;;  %7734 = vst.msk [vmem:[#allocation3 + $0x43] sm:$0xff] %vm1402_vm4, %v7715_v20  ;;  %v7071_v5 = vadd.f32 %v6981_v39, %v14498_v28  ;;  %v14646_v13 = vmul.f32 %v14268_v16, %v10500_v52  ;;  %v16826_v41 = vrot.slane %v14549_v33, 2  ;;  %v14701_v20 = vpop.permute.xlu0 %7090 }
 0x3ff   : > { %7649 = vst.msk [vmem:[#allocation2 + $0x90] sm:$0xff] %vm1402_vm4, %v7611_v2  ;;  %9884 = vrot.lane.b32.xlu0 %v16824_v10, %s10333_s16  ;;  %v7072_v21 = vadd.f32 %v6983_v55, %v6845_v61  ;;  %v7215_v43 = vsel %vm930_vm2, %v16825_v1, %v7214_v17  ;;  %v16827_v31 = vrot.slane %v14485_v48, 3  ;;  %v14656_v28 = vmul.f32 %v14268_v16, %v10494_v49  ;;  %v14665_v61 = vld [vmem:[%s16537_s3 + $0x78] sm:$0xff]  ;;  %v317_v48 = vld [vmem:[%s16539_s5 + $0x50] sm:$0xff]  ;;  %v332_v2 = vld [vmem:[%s16539_s5 + $0xc8] sm:$0xff] }
 0x400   : > { %v7217_v32 = vsel %vm930_vm2, %v7214_v17, %v16826_v41  ;;  %v14660_v11 = vmul.f32 %v14268_v16, %v10496_v50  ;;  %9264 = vmatpush3.msra.mxu0 %v14665_v61  ;;  %v14668_v17 = vpop.permute.xlu1 %9689  ;;  %v7307_v45 = vadd.f32 %v7215_v43, %v7071_v5  ;;  %v14675_v57 = vmul.f32 %v14268_v16, %v10498_v51  ;;  %v7767_v10 = vld [vmem:[#allocation3 + $0x11] sm:$0xff] }
 0x401   : > { %v7446_v4 = vsel %vm1166_vm3, %v16827_v31, %v7445_v58  ;;  %v7308_v63 = vadd.f32 %v7217_v32, %v7072_v21  ;;  %v4003_v44 = vsel %vm1916_vm7, %v12875_v3, %v9671_v34  ;;  %9265 = vmatprep.subr.mxu0 %v10222_v35  ;;  %v16828_v9 = vrot.slane %v14583_v40, 3  ;;  %8794 = vmatpush3.msra.mxu1 %v317_v48  ;;  %v10223_v1 = vld [vmem:[%s16537_s3 + $0x68] sm:$0xff]  ;;  %v331_v43 = vld [vmem:[%s16539_s5 + $0xc0] sm:$0xff] }
 0x402   : > { %v16606_v16 = vrot.slane %v14656_v28, 1  ;;  %9236 = vmatprep.mubr.f32.mxu0 %v4003_v44  ;;  %v14691_v3 = vmul.f32 %v14208_v6, %v10500_v52  ;;  %v14695_v34 = vmul.f32 %v14208_v6, %v10494_v49  ;;  %v16829_v29 = vpack.i.bf16 %v12824_v47, %v12839_v23  ;;  %9266 = vmatpush3.msra.mxu0 %v10222_v35 }
 0x403   : > { %v7448_v27 = vsel %vm1166_vm3, %v7445_v58, %v16828_v9  ;;  %v316_v58 = vld [vmem:[%s16539_s5 + $0x48] sm:$0xff]  ;;  %v7538_v54 = vadd.f32 %v7446_v4, %v7307_v45  ;;  %v16605_v14 = vrot.slane %v14660_v11, 2  ;;  %v14709_v55 = vmul.f32 %v14208_v6, %v10496_v50  ;;  %9267 = vmatprep.subr.mxu0 %v10223_v1  ;;  %8795 = vmatprep.subr.mxu1 %v332_v2 }
 0x404   : > { %9879 = vrot.lane.b32.xlu1 %v16829_v29, %s10333_s16  ;;  %v7539_v39 = vadd.f32 %v7448_v27, %v7308_v63  ;;  %v6984_v23 = vrot.slane %v14695_v34, 1  ;;  %v14714_v47 = vmul.f32 %v14208_v6, %v10498_v51  ;;  %v9888_v5 = vpack.i.bf16 %v7768_v53, %v7767_v10  ;;  %8796 = vmatpush3.msra.mxu1 %v316_v58  ;;  %v14746_v35 = vpop.permute.xlu1 %9694  ;;  %v7788_v29 = vld [vmem:[#allocation3 + $0x1a] sm:$0xff]  ;;  %v10224_v58 = vld [vmem:[%s16537_s3 + $0x60] sm:$0xff] }
 0x405   : > { %v4004_v21 = vsel %vm1916_vm7, %v12878_v19, %v9672_v12  ;;  %v7576_v41 = vadd.f32 %v14316_v7, %v7538_v54  ;;  %v7218_v31 = vrot.slane %v14709_v55, 2  ;;  %v315_v19 = vld [vmem:[%s16539_s5 + $0x40] sm:$0xff]  ;;  %v16830_v48 = vrot.slane %v14545_v22, 1  ;;  %9268 = vmatpush3.msra.mxu0 %v10223_v1  ;;  %8797 = vmatprep.subr.mxu1 %v331_v43  ;;  %v14767_v43 = vpop.permute.xlu0 %9699 }
 0x406   : > { %v7577_v32 = vadd.f32 %v14316_v7, %v7539_v39  ;;  %9237 = vmatmul.mubr.f32.gmra.mxu0 %v4004_v21  ;;  %v7678_v12 = vld [vmem:[#allocation2 + $0x90] ss:$2 sm:$0xff]  ;;  %v7697_v4 = vld [vmem:[#allocation2 + $0x91] ss:$2 sm:$0xff]  ;;  %v7449_v63 = vrot.slane %v14714_v47, 3  ;;  %9889 = vrot.lane.b32.xlu0 %v9888_v5, %s10332_s12  ;;  %v14740_v44 = vmul.f32 %v14320_v46, %v10494_v49  ;;  %v14744_v53 = vmul.f32 %v14320_v46, %v10496_v50  ;;  %v14752_v54 = vld [vmem:[#allocation3 + $0x50] sm:$0xff] }
 0x407   : > { %v6985_v45 = vsel %vm691_vm1, %v16830_v48, %v6984_v23  ;;  %v7716_v2 = vmax.f32 %v7678_v12, %v7697_v4  ;;  %v7614_v9 = vmax.f32 %v7576_v41, 0.0  ;;  %9269 = vmatprep.subr.mxu0 %v10224_v58  ;;  %v16831_v39 = vrot.slane %v14549_v33, 2  ;;  %8798 = vmatpush3.msra.mxu1 %v315_v19  ;;  %v330_v33 = vld [vmem:[%s16539_s5 + $0xb8] sm:$0xff]  ;;  %v7787_v4 = vld [vmem:[#allocation3 + $0x12] sm:$0xff] }
 0x408   : > { %v7615_v22 = vmax.f32 %v7577_v32, 0.0  ;;  %v7073_v27 = vadd.f32 %v6985_v45, %v14527_v59  ;;  %v16832_v5 = vrot.slane %v14583_v40, 3  ;;  %v6851_v21 = vmul.f32 %v14320_v46, %v10500_v52  ;;  %9270 = vmatpush3.msra.mxu0 %v10224_v58  ;;  %v16833_v12 = vld [vmem:[#allocation48_spill] sm:$0xff]  ;;  %8799 = vmatprep.subr.mxu1 %v330_v33  ;;  %v329_v33 = vld [vmem:[%s16539_s5 + $0xb0] sm:$0xff] }
 0x409   : > { %v7219_v10 = vsel %vm930_vm2, %v16831_v39, %v7218_v31  ;;  %7735 = vst.msk [vmem:[#allocation3 + $0x4b] sm:$0xff] %vm1402_vm4, %v7716_v2  ;;  %7652 = vst.msk [vmem:[#allocation2 + $0xa8] sm:$0xff] %vm1402_vm4, %v7614_v9  ;;  %v14778_v32 = vmul.f32 %v14320_v46, %v10498_v51  ;;  %v6886_v19 = vmul.f32 %v16833_v12, %v10494_v49  ;;  %v10225_v48 = vld [vmem:[%s16537_s3 + $0x58] sm:$0xff] }
 0x40a   : > { %v7450_v59 = vsel %vm1166_vm3, %v16832_v5, %v7449_v63  ;;  %7653 = vst.msk [vmem:[#allocation2 + $0xb0] sm:$0xff] %vm1402_vm4, %v7615_v22  ;;  %v7309_v40 = vadd.f32 %v7219_v10, %v7073_v27  ;;  %9271 = vmatprep.subr.mxu0 %v10225_v48  ;;  %v6848_v45 = vmul.f32 %v16833_v12, %v10500_v52  ;;  %v16834_v46 = vld [vmem:[#allocation20_spill] sm:$0xff]  ;;  %v16835_v22 = vld [vmem:[#allocation21_spill] sm:$0xff] }
 0x40b   : > { %v7118_v2 = vmul.f32 %v16833_v12, %v10496_v50  ;;  %v7349_v9 = vmul.f32 %v16833_v12, %v10498_v51  ;;  %v16836_v27 = vpack.i.bf16 %v16834_v46, %v16835_v22  ;;  %v9893_v58 = vpack.i.bf16 %v7788_v29, %v7787_v4  ;;  %v314_v39 = vld [vmem:[%s16539_s5 + $0x38] sm:$0xff]  ;;  %9272 = vmatpush3.msra.mxu0 %v10225_v48 }
 0x40c   : > { %v7540_v10 = vadd.f32 %v7450_v59, %v7309_v40  ;;  %v7457_v5 = vrot.slane %v14778_v32, 3  ;;  %v6986_v62 = vrot.slane %v6886_v19, 1  ;;  %v16837_v41 = vld [vmem:[#allocation52_spill] sm:$0xff]  ;;  %v10226_v40 = vld [vmem:[%s16537_s3 + $0x50] sm:$0xff]  ;;  %v14815_v19 = vpop.permute.xlu1 %9704  ;;  %8800 = vmatpush3.msra.mxu1 %v314_v39  ;;  %v16839_v39 = vrot.slane %v14740_v44, 1 }
 0x40d   : > { %9899 = vrot.lane.b32.xlu0 %v16836_v27, %s10333_s16  ;;  %v14801_v1 = vmul.f32 %v16837_v41, %v10494_v49  ;;  %v7220_v12 = vrot.slane %v7118_v2, 2  ;;  %v7451_v6 = vrot.slane %v7349_v9, 3  ;;  %9894 = vrot.lane.b32.xlu1 %v9893_v58, %s10333_s16  ;;  %v14806_v29 = vmul.f32 %v16837_v41, %v10496_v50 }
 0x40e   : > { %v14810_v59 = vmul.f32 %v16837_v41, %v10498_v51  ;;  %9273 = vmatprep.subr.mxu0 %v10226_v40  ;;  %v7578_v4 = vadd.f32 %v14316_v7, %v7540_v10  ;;  %v6987_v48 = vsel %vm691_vm1, %v6984_v23, %v6986_v62  ;;  %v6989_v2 = vsel %vm691_vm1, %v6986_v62, %v16606_v16  ;;  %v14835_v23 = vpop.permute.xlu0 %9709  ;;  %v10227_v62 = vld [vmem:[%s16537_s3 + $0x48] sm:$0xff] }
 0x40f   : > { %v16608_v9 = vrot.slane %v14801_v1, 1  ;;  %9274 = vmatpush3.msra.mxu0 %v10226_v40  ;;  %v7074_v46 = vadd.f32 %v6987_v48, %v14691_v3  ;;  %v7075_v22 = vadd.f32 %v6989_v2, %v6848_v45  ;;  %v7221_v27 = vsel %vm930_vm2, %v7218_v31, %v7220_v12  ;;  %v313_v3 = vld [vmem:[%s16539_s5 + $0x30] sm:$0xff]  ;;  %8801 = vmatprep.subr.mxu1 %v329_v33  ;;  %v328_v33 = vld [vmem:[%s16539_s5 + $0xa8] sm:$0xff] }
 0x410   : > { %v7223_v34 = vsel %vm930_vm2, %v7220_v12, %v16605_v14  ;;  %9275 = vmatprep.subr.mxu0 %v10227_v62  ;;  %v7616_v45 = vmax.f32 %v7578_v4, 0.0  ;;  %v7452_v55 = vsel %vm1166_vm3, %v7449_v63, %v7451_v6  ;;  %v16838_v31 = vrot.slane %v14675_v57, 3  ;;  %v7679_v12 = vld [vmem:[#allocation2 + $0xa0] ss:$2 sm:$0xff]  ;;  %v7698_v40 = vld [vmem:[#allocation2 + $0xa1] ss:$2 sm:$0xff]  ;;  %8802 = vmatpush3.msra.mxu1 %v313_v3 }
 0x411   : > { %v6995_v10 = vsel %vm691_vm1, %v16839_v39, %v16608_v9  ;;  %9276 = vmatpush3.msra.mxu0 %v10227_v62  ;;  %v7310_v48 = vadd.f32 %v7221_v27, %v7074_v46  ;;  %v7311_v4 = vadd.f32 %v7223_v34, %v7075_v22  ;;  %v16607_v47 = vrot.slane %v14806_v29, 2  ;;  %v16840_v63 = vld [vmem:[#allocation23_spill] sm:$0xff]  ;;  %v16841_v14 = vld [vmem:[#allocation26_spill] sm:$0xff]  ;;  %v10229_v3 = vld [vmem:[%s16537_s3 + $0x38] sm:$0xff]  ;;  %8803 = vmatprep.subr.mxu1 %v328_v33 }
 0x412   : > { %v7454_v58 = vsel %vm1166_vm3, %v7451_v6, %v16838_v31  ;;  %v7078_v2 = vadd.f32 %v6995_v10, %v6851_v21  ;;  %v16842_v16 = vpack.i.bf16 %v16840_v63, %v16841_v14  ;;  %v10228_v6 = vld [vmem:[%s16537_s3 + $0x40] sm:$0xff]  ;;  %v7717_v62 = vmax.f32 %v7679_v12, %v7698_v40  ;;  %7654 = vst.msk [vmem:[#allocation2 + $0xb8] sm:$0xff] %vm1402_vm4, %v7616_v45  ;;  %v16843_v46 = vld [vmem:[#allocation50_spill] sm:$0xff]  ;;  %v14886_v40 = vpop.permute.xlu1 %9714  ;;  %v14901_v9 = vpop.permute.xlu0 %9719 }
 0x413   : > { %9277 = vmatprep.subr.mxu0 %v10228_v6  ;;  %v16609_v21 = vrot.slane %v14810_v59, 3  ;;  %v6850_v22 = vmul.f32 %v16843_v46, %v10500_v52  ;;  %v7808_v14 = vld [vmem:[#allocation3 + $0x1b] sm:$0xff]  ;;  %v7541_v34 = vadd.f32 %v7452_v55, %v7310_v48  ;;  %v7542_v31 = vadd.f32 %v7454_v58, %v7311_v4  ;;  %v327_v55 = vld [vmem:[%s16539_s5 + $0xa0] sm:$0xff] }
 0x414   : > { %9909 = vrot.lane.b32.xlu1 %v16842_v16, %s10333_s16  ;;  %v6888_v16 = vmul.f32 %v16843_v46, %v10494_v49  ;;  %9278 = vmatpush3.msra.mxu0 %v10228_v6  ;;  %v312_v27 = vld [vmem:[%s16539_s5 + $0x28] sm:$0xff]  ;;  %v16844_v45 = vrot.slane %v14744_v53, 2  ;;  %v7120_v10 = vmul.f32 %v16843_v46, %v10496_v50  ;;  %v7351_v63 = vmul.f32 %v16843_v46, %v10498_v51 }
 0x415   : > { %v14881_v12 = vld [vmem:[#allocation3 + $0x58] sm:$0xff]  ;;  %9279 = vmatprep.subr.mxu0 %v10229_v3  ;;  %v7460_v48 = vsel %vm1166_vm3, %v7457_v5, %v16609_v21  ;;  %8804 = vmatpush3.msra.mxu1 %v312_v27  ;;  %v16846_v21 = vrot.slane %v14656_v28, 1  ;;  %v16847_v33 = vrot.slane %v14740_v44, 1  ;;  %v311_v44 = vld [vmem:[%s16539_s5 + $0x20] sm:$0xff]  ;;  %v16848_v27 = vrot.slane %v14660_v11, 2 }
 0x416   : > { %v7229_v39 = vsel %vm930_vm2, %v16844_v45, %v16607_v47  ;;  %16845 = vst [vmem:[#allocation48_spill] sm:$0xff] %v14881_v12  ;;  %v6990_v4 = vrot.slane %v6888_v16, 1  ;;  %v7807_v6 = vld [vmem:[#allocation3 + $0x13] sm:$0xff]  ;;  %7736 = vst.msk [vmem:[#allocation3 + $0x53] sm:$0xff] %vm1402_vm4, %v7717_v62  ;;  %9280 = vmatpush3.msra.mxu0 %v10229_v3  ;;  %v7579_v45 = vadd.f32 %v14316_v7, %v7541_v34  ;;  %v10230_v16 = vld [vmem:[%s16537_s3 + $0x30] sm:$0xff]  ;;  %8805 = vmatprep.subr.mxu1 %v327_v55 }
 0x417   : > { %v7314_v58 = vadd.f32 %v7229_v39, %v7078_v2  ;;  %v7580_v47 = vadd.f32 %v14316_v7, %v7542_v31  ;;  %v7224_v2 = vrot.slane %v7120_v10, 2  ;;  %v9903_v39 = vpack.i.bf16 %v7808_v14, %v7807_v6  ;;  %9281 = vmatprep.subr.mxu0 %v10230_v16  ;;  %v10231_v28 = vld [vmem:[%s16537_s3 + $0x28] sm:$0xff]  ;;  %8806 = vmatpush3.msra.mxu1 %v311_v44 }
 0x418   : > { %v6991_v62 = vsel %vm691_vm1, %v16846_v21, %v6990_v4  ;;  %v6993_v34 = vsel %vm691_vm1, %v6990_v4, %v16847_v33  ;;  %v7455_v31 = vrot.slane %v7351_v63, 3  ;;  %9282 = vmatpush3.msra.mxu0 %v10230_v16  ;;  %v7617_v14 = vmax.f32 %v7579_v45, 0.0  ;;  %v14939_v16 = vpop.permute.xlu1 %9724  ;;  %v15232_v12 = vld [vmem:[#allocation3 + $0x78] sm:$0xff] }
 0x419   : > { %v7545_v46 = vadd.f32 %v7460_v48, %v7314_v58  ;;  %v7618_v10 = vmax.f32 %v7580_v47, 0.0  ;;  %v7076_v3 = vadd.f32 %v6991_v62, %v14646_v13  ;;  %v7077_v6 = vadd.f32 %v6993_v34, %v6850_v22  ;;  %9904 = vrot.lane.b32.xlu0 %v9903_v39, %s10334_s9  ;;  %9283 = vmatprep.subr.mxu0 %v10231_v28  ;;  %v7770_v58 = vld [vmem:[#allocation3 + $0x29] sm:$0xff] }
 0x41a   : > { %v7225_v47 = vsel %vm930_vm2, %v16848_v27, %v7224_v2  ;;  %v16849_v13 = vrot.slane %v14744_v53, 2  ;;  %v9676_v55 = vunpack.i.l.bf16 %v14354_v24  ;;  %9284 = vmatpush3.msra.mxu0 %v10231_v28  ;;  %v7680_v48 = vld [vmem:[#allocation2 + $0xb0] ss:$2 sm:$0xff]  ;;  %v7699_v4 = vld [vmem:[#allocation2 + $0xb1] ss:$2 sm:$0xff]  ;;  %7655 = vst.msk [vmem:[#allocation2 + $0xc0] sm:$0xff] %vm1402_vm4, %v7617_v14  ;;  %v7458_v53 = vsel %vm1166_vm3, %v7455_v31, %v7457_v5  ;;  %v14962_v27 = vpop.permute.xlu0 %9729 }
 0x41b   : > { %v7583_v21 = vadd.f32 %v14316_v7, %v7545_v46  ;;  %7656 = vst.msk [vmem:[#allocation2 + $0xc8] sm:$0xff] %vm1402_vm4, %v7618_v10  ;;  %v7312_v63 = vadd.f32 %v7225_v47, %v7076_v3  ;;  %v16850_v11 = vrot.slane %v14675_v57, 3  ;;  %v326_v46 = vld [vmem:[%s16539_s5 + $0x98] sm:$0xff]  ;;  %v7718_v62 = vmax.f32 %v7680_v48, %v7699_v4  ;;  %v16852_v3 = vld [vmem:[#allocation27_spill] sm:$0xff]  ;;  %16885 = vst [vmem:[#allocation23_spill] sm:$0xff] %v15232_v12 }
 0x41c   : > { %v7227_v22 = vsel %vm930_vm2, %v7224_v2, %v16849_v13  ;;  %v10232_v2 = vld [vmem:[%s16537_s3 + $0x20] sm:$0xff]  ;;  %v14946_v57 = vmul.f32 %v14412_v38, %v10494_v49  ;;  %v14950_v32 = vmul.f32 %v14412_v38, %v10496_v50  ;;  %v7769_v5 = vld [vmem:[#allocation3 + $0x21] sm:$0xff]  ;;  %v14954_v14 = vmul.f32 %v14412_v38, %v10498_v51  ;;  %8807 = vmatprep.subr.mxu1 %v326_v46 }
 0x41d   : > { %v7313_v45 = vadd.f32 %v7227_v22, %v7077_v6  ;;  %v7456_v39 = vsel %vm1166_vm3, %v16850_v11, %v7455_v31  ;;  %9285 = vmatprep.subr.mxu0 %v10232_v2  ;;  %v7621_v33 = vmax.f32 %v7583_v21, 0.0  ;;  %v16851_v10 = vld [vmem:[#allocation24_spill] sm:$0xff]  ;;  %v9913_v28 = vpack.i.bf16 %v7770_v58, %v7769_v5  ;;  %v14960_v21 = vld [vmem:[#allocation3 + $0x60] sm:$0xff] }
 0x41e   : > { %9286 = vmatpush3.msra.mxu0 %v10232_v2  ;;  %v7543_v34 = vadd.f32 %v7456_v39, %v7312_v63  ;;  %v16853_v6 = vpack.i.bf16 %v16851_v10, %v16852_v3  ;;  %16854 = vst [vmem:[#allocation20_spill] sm:$0xff] %v14960_v21  ;;  %v6852_v47 = vmul.f32 %v16837_v41, %v10500_v52  ;;  %v16612_v13 = vrot.slane %v14946_v57, 1  ;;  %v7790_v48 = vld [vmem:[#allocation3 + $0x2a] sm:$0xff]  ;;  %v16858_v10 = vld [vmem:[#allocation30_spill] sm:$0xff] }
 0x41f   : > { %v7544_v31 = vadd.f32 %v7458_v53, %v7313_v45  ;;  %7659 = vst.msk [vmem:[#allocation2 + $0xe0] sm:$0xff] %vm1402_vm4, %v7621_v33  ;;  %v14969_v44 = vmul.f32 %v14412_v38, %v10500_v52  ;;  %v16611_v22 = vrot.slane %v14950_v32, 2  ;;  %7737 = vst.msk [vmem:[#allocation3 + $0x5b] sm:$0xff] %vm1402_vm4, %v7718_v62  ;;  %v10233_v58 = vld [vmem:[%s16537_s3 + $0x18] sm:$0xff]  ;;  %v16610_v38 = vrot.slane %v14954_v14, 3  ;;  %9914 = vrot.lane.b32.xlu1 %v9913_v28, %s10332_s12  ;;  %v16855_v45 = vld [vmem:[#allocation53_spill] sm:$0xff] }
 0x420   : > { %9924 = vrot.lane.b32.xlu0 %v16853_v6, %s10333_s16  ;;  %9287 = vmatprep.subr.mxu0 %v10233_v58  ;;  %v7581_v41 = vadd.f32 %v14316_v7, %v7543_v34  ;;  %v6891_v11 = vmul.f32 %v16855_v45, %v10494_v49  ;;  %v7123_v39 = vmul.f32 %v16855_v45, %v10496_v50  ;;  %v16856_v2 = vld [vmem:[#allocation28_spill] sm:$0xff]  ;;  %v10234_v62 = vld [vmem:[%s16537_s3 + $0x10] sm:$0xff]  ;;  %v14997_v6 = vpop.permute.xlu1 %9734 }
 0x421   : > { %v7582_v4 = vadd.f32 %v14316_v7, %v7544_v31  ;;  %9288 = vmatpush3.msra.mxu0 %v10233_v58  ;;  %v7354_v53 = vmul.f32 %v16855_v45, %v10498_v51  ;;  %v4005_v46 = vsel %vm1916_vm7, %v16856_v2, %v9676_v55  ;;  %v7789_v7 = vld [vmem:[#allocation3 + $0x22] sm:$0xff]  ;;  %v16857_v31 = vunpack.i.h.bf16 %v14354_v24  ;;  %v10235_v24 = vld [vmem:[%s16537_s3 + $0x8] sm:$0xff] }
 0x422   : > { %9289 = vmatprep.subr.mxu0 %v10234_v62  ;;  %v7619_v33 = vmax.f32 %v7581_v41, 0.0  ;;  %9239 = vmatprep.mubr.f32.mxu0 %v4005_v46  ;;  %v9928_v34 = vpack.i.bf16 %v7790_v48, %v7789_v7  ;;  %v7681_v28 = vld [vmem:[#allocation2 + $0xc0] ss:$2 sm:$0xff]  ;;  %v7700_v55 = vld [vmem:[#allocation2 + $0xc1] ss:$2 sm:$0xff]  ;;  %v9681_v58 = vunpack.i.l.bf16 %v14454_v25  ;;  %v6996_v2 = vrot.slane %v6891_v11, 1 }
 0x423   : > { %v7620_v5 = vmax.f32 %v7582_v4, 0.0  ;;  %v4006_v3 = vsel %vm1916_vm7, %v16858_v10, %v16857_v31  ;;  %9290 = vmatpush3.msra.mxu0 %v10234_v62  ;;  %v7230_v63 = vrot.slane %v7123_v39, 2  ;;  %v15002_v41 = vmul.f32 %v14503_v26, %v10494_v49  ;;  %v16859_v39 = vld [vmem:[#allocation25_spill] sm:$0xff]  ;;  %v15020_v31 = vpop.permute.xlu0 %9739 }
 0x424   : > { %9240 = vmatmul.mubr.f32.gmra.mxu0 %v4006_v3  ;;  %9291 = vmatprep.subr.mxu0 %v10235_v24  ;;  %v7719_v48 = vmax.f32 %v7681_v28, %v7700_v55  ;;  %7657 = vst.msk [vmem:[#allocation2 + $0xd0] sm:$0xff] %vm1402_vm4, %v7619_v33  ;;  %v6853_v4 = vmul.f32 %v16855_v45, %v10500_v52  ;;  %v7461_v11 = vrot.slane %v7354_v53, 3  ;;  %v16860_v46 = vld [vmem:[#allocation29_spill] sm:$0xff]  ;;  %v310_v33 = vld [vmem:[%s16539_s5 + $0x18] sm:$0xff]  ;;  %v16862_v45 = vrot.slane %v14801_v1, 1 }
 0x425   : > { %7658 = vst.msk [vmem:[#allocation2 + $0xd8] sm:$0xff] %vm1402_vm4, %v7620_v5  ;;  %9929 = vrot.lane.b32.xlu0 %v9928_v34, %s10333_s16  ;;  %v16861_v7 = vpack.i.bf16 %v16859_v39, %v16860_v46  ;;  %v15018_v62 = vmul.f32 %v14503_v26, %v10496_v50  ;;  %v6999_v5 = vsel %vm691_vm1, %v6996_v2, %v16612_v13  ;;  %v15039_v3 = vld [vmem:[#allocation3 + $0x68] sm:$0xff]  ;;  %v16864_v1 = vrot.slane %v14806_v29, 2 }
 0x426   : > { %v6997_v53 = vsel %vm691_vm1, %v16862_v45, %v6996_v2  ;;  %v15033_v34 = vmul.f32 %v14503_v26, %v10500_v52  ;;  %v15037_v10 = vmul.f32 %v14503_v26, %v10498_v51  ;;  %16863 = vst [vmem:[#allocation21_spill] sm:$0xff] %v15039_v3  ;;  %9292 = vmatpush3.msra.mxu0 %v10235_v24  ;;  %v7810_v46 = vld [vmem:[#allocation3 + $0x2b] sm:$0xff]  ;;  %7738 = vst.msk [vmem:[#allocation3 + $0x63] sm:$0xff] %vm1402_vm4, %v7719_v48 }
 0x427   : > { %9919 = vrot.lane.b32.xlu1 %v16861_v7, %s10333_s16  ;;  %v7079_v28 = vadd.f32 %v6997_v53, %v6852_v47  ;;  %v7080_v55 = vadd.f32 %v6999_v5, %v6853_v4  ;;  %v7231_v39 = vsel %vm930_vm2, %v16864_v1, %v7230_v63  ;;  %v7233_v2 = vsel %vm930_vm2, %v7230_v63, %v16611_v22  ;;  %v10236_v26 = vld [vmem:[%s16537_s3] sm:$0xff]  ;;  %v16866_v7 = vld [vmem:[#allocation31_spill] sm:$0xff]  ;;  %v15065_v1 = vpop.permute.xlu1 %9744  ;;  %v15091_v13 = vpop.permute.xlu0 %9749 }
 0x428   : > { %9293 = vmatprep.subr.mxu0 %v10236_v26  ;;  %v16865_v24 = vrot.slane %v14810_v59, 3  ;;  %v7464_v29 = vsel %vm1166_vm3, %v7461_v11, %v16610_v38  ;;  %v4007_v63 = vsel %vm1916_vm7, %v16866_v7, %v9681_v58  ;;  %8808 = vmatpush3.msra.mxu1 %v310_v33  ;;  %v15063_v59 = vmul.f32 %v14442_v0, %v10494_v49  ;;  %v7809_v5 = vld [vmem:[#allocation3 + $0x23] sm:$0xff] }
 0x429   : > { %9294 = vmatpush3.msra.mxu0 %v10236_v26  ;;  %v7315_v48 = vadd.f32 %v7231_v39, %v7079_v28  ;;  %v7316_v45 = vadd.f32 %v7233_v2, %v7080_v55  ;;  %9242 = vmatprep.mubr.f32.mxu0 %v4007_v63  ;;  %v15072_v58 = vmul.f32 %v14442_v0, %v10496_v50  ;;  %v16867_v28 = vld [vmem:[#allocation39_spill] sm:$0xff]  ;;  %v16868_v55 = vld [vmem:[#allocation40_spill] sm:$0xff]  ;;  %v16870_v26 = vunpack.i.h.bf16 %v14454_v25  ;;  %v324_v25 = vld [vmem:[%s16539_s5 + $0x88] sm:$0xff] }
 0x42a   : > { %v7462_v47 = vsel %vm1166_vm3, %v16865_v24, %v7461_v11  ;;  %v325_v11 = vld [vmem:[%s16539_s5 + $0x90] sm:$0xff]  ;;  %v15076_v33 = vmul.f32 %v14442_v0, %v10498_v51  ;;  %v16869_v39 = vpack.i.bf16 %v16867_v28, %v16868_v55  ;;  %v9933_v2 = vpack.i.bf16 %v7810_v46, %v7809_v5  ;;  %v16871_v24 = vld [vmem:[#allocation32_spill] sm:$0xff]  ;;  %9325 = vmatprep.subr.mxu0 %v14665_v61  ;;  %v308_v46 = vld [vmem:[%s16539_s5 + $0x8] sm:$0xff] }
 0x42b   : > { %v4008_v7 = vsel %vm1916_vm7, %v16871_v24, %v16870_v26  ;;  %v309_v63 = vld [vmem:[%s16539_s5 + $0x10] sm:$0xff]  ;;  %v7546_v53 = vadd.f32 %v7462_v47, %v7315_v48  ;;  %v7547_v4 = vadd.f32 %v7464_v29, %v7316_v45  ;;  %v16613_v22 = vrot.slane %v15063_v59, 1  ;;  %8809 = vmatprep.subr.mxu1 %v325_v11  ;;  %v15114_v55 = vld [vmem:[%s16536_s2] ss:$0 sm:$0xff] }
 0x42c   : > { %9939 = vrot.lane.b32.xlu0 %v16869_v39, %s10333_s16  ;;  %9243 = vmatmul.mubr.f32.gmra.mxu0 %v4008_v7  ;;  %v7682_v5 = vld [vmem:[#allocation2 + $0xd0] ss:$2 sm:$0xff]  ;;  %v7701_v47 = vld [vmem:[#allocation2 + $0xd1] ss:$2 sm:$0xff]  ;;  %v7234_v29 = vrot.slane %v15072_v58, 2  ;;  %v16614_v48 = vrot.slane %v15076_v33, 3  ;;  %v15105_v45 = vmul.f32 %v14576_v8, %v10494_v49  ;;  %v15109_v61 = vmul.f32 %v14576_v8, %v10496_v50 }
 0x42d   : > { %9934 = vrot.lane.b32.xlu1 %v9933_v2, %s10334_s9  ;;  %v7720_v28 = vmax.f32 %v7682_v5, %v7701_v47  ;;  %v7584_v58 = vadd.f32 %v15114_v55, %v7546_v53  ;;  %v7585_v39 = vadd.f32 %v15114_v55, %v7547_v4  ;;  %v16872_v2 = vrot.slane %v14946_v57, 1  ;;  %v2246_v24 = vld [vmem:[#allocation5 + $0x3b] sm:$0xff]  ;;  %8810 = vmatpush3.msra.mxu1 %v309_v63  ;;  %v323_v11 = vld [vmem:[%s16539_s5 + $0x80] sm:$0xff] }
 0x42e   : > { %v6855_v7 = vmul.f32 %v14442_v0, %v10500_v52  ;;  %v16873_v53 = vrot.slane %v14950_v32, 2  ;;  %v15134_v57 = vmul.f32 %v14576_v8, %v10500_v52  ;;  %v7772_v47 = vld [vmem:[#allocation3 + $0x39] sm:$0xff]  ;;  %8811 = vmatprep.subr.mxu1 %v324_v25  ;;  %v307_v63 = vld [vmem:[%s16539_s5] sm:$0xff]  ;;  %v16875_v32 = vrot.slane %v14954_v14, 3 }
 0x42f   : > { %v7001_v26 = vsel %vm691_vm1, %v16872_v2, %v16613_v22  ;;  %v15136_v2 = vld [vmem:[#allocation3 + $0x70] sm:$0xff]  ;;  %v7622_v38 = vmax.f32 %v7584_v58, 0.0  ;;  %v7623_v0 = vmax.f32 %v7585_v39, 0.0  ;;  %8812 = vmatpush3.msra.mxu1 %v308_v46  ;;  %v15152_v22 = vmul.f32 %v14576_v8, %v10498_v51 }
 0x430   : > { %v7081_v5 = vadd.f32 %v7001_v26, %v14969_v44  ;;  %v7235_v4 = vsel %vm930_vm2, %v16873_v53, %v7234_v29  ;;  %16874 = vst [vmem:[#allocation52_spill] sm:$0xff] %v15136_v2  ;;  %v7466_v44 = vsel %vm1166_vm3, %v16875_v32, %v16614_v48  ;;  %7739 = vst.msk [vmem:[#allocation3 + $0x6b] sm:$0xff] %vm1402_vm4, %v7720_v28  ;;  %v15148_v53 = vpop.permute.xlu1 %9754  ;;  %v7771_v39 = vld [vmem:[#allocation3 + $0x31] sm:$0xff]  ;;  %8813 = vmatprep.subr.mxu1 %v323_v11 }
 0x431   : > { %v6894_v58 = vmul.f32 %v14487_v18, %v10494_v49  ;;  %v7126_v14 = vmul.f32 %v14487_v18, %v10496_v50  ;;  %v2245_v32 = vld [vmem:[#allocation5 + $0x33] sm:$0xff]  ;;  %7660 = vst.msk [vmem:[#allocation2 + $0xe8] sm:$0xff] %vm1402_vm4, %v7622_v38  ;;  %7661 = vst.msk [vmem:[#allocation2 + $0xf0] sm:$0xff] %vm1402_vm4, %v7623_v0  ;;  %v7357_v28 = vmul.f32 %v14487_v18, %v10498_v51  ;;  %8814 = vmatpush3.msra.mxu1 %v307_v63 }
 0x432   : > { %v7317_v25 = vadd.f32 %v7235_v4, %v7081_v5  ;;  %v9943_v8 = vpack.i.bf16 %v7772_v47, %v7771_v39  ;;  %v9948_v5 = vpack.i.bf16 %v2246_v24, %v2245_v32  ;;  %v15163_v4 = vpop.permute.xlu0 %9759  ;;  %v6856_v48 = vmul.f32 %v14487_v18, %v10500_v52  ;;  %8881 = vmatprep.subr.mxu1 %v14510_v30 }
 0x433   : > { %v7002_v2 = vrot.slane %v6894_v58, 1  ;;  %v7236_v11 = vrot.slane %v7126_v14, 2  ;;  %v7467_v38 = vrot.slane %v7357_v28, 3  ;;  %v15172_v47 = vmul.f32 %v14620_v15, %v10494_v49 }
 0x434   : > { %v7548_v26 = vadd.f32 %v7466_v44, %v7317_v25  ;;  %9944 = vrot.lane.b32.xlu0 %v9943_v8, %s10332_s12  ;;  %9949 = vrot.lane.b32.xlu1 %v9948_v5, %s10333_s16  ;;  %v15176_v24 = vmul.f32 %v14620_v15, %v10496_v50  ;;  %v15180_v18 = vmul.f32 %v14620_v15, %v10498_v51  ;;  %v16876_v0 = vrot.slane %v15063_v59, 1  ;;  %v15194_v5 = vpop.permute.xlu1 %9764 }
 0x435   : > { %v16877_v25 = vrot.slane %v15002_v41, 1  ;;  %v7237_v32 = vsel %vm930_vm2, %v7234_v29, %v7236_v11  ;;  %v16878_v28 = vrot.slane %v15018_v62, 2  ;;  %v16879_v30 = vrot.slane %v15076_v33, 3 }
 0x436   : > { %v7586_v63 = vadd.f32 %v15114_v55, %v7548_v26  ;;  %v7003_v44 = vsel %vm691_vm1, %v16876_v0, %v7002_v2  ;;  %v16615_v0 = vrot.slane %v15172_v47, 1  ;;  %v16616_v46 = vrot.slane %v15176_v24, 2 }
 0x437   : > { %v7005_v58 = vsel %vm691_vm1, %v7002_v2, %v16877_v25  ;;  %v7082_v14 = vadd.f32 %v7003_v44, %v6855_v7  ;;  %v7239_v8 = vsel %vm930_vm2, %v7236_v11, %v16878_v28  ;;  %v7468_v59 = vsel %vm1166_vm3, %v16879_v30, %v7467_v38  ;;  %v2165_v2 = vld [vmem:[#allocation4 + $0x80] ss:$2 sm:$0xff]  ;;  %v15205_v25 = vpop.permute.xlu0 %9769 }
 0x438   : > { %v7083_v39 = vadd.f32 %v7005_v58, %v6856_v48  ;;  %v7624_v26 = vmax.f32 %v7586_v63, 0.0  ;;  %v16880_v29 = vrot.slane %v15037_v10, 3  ;;  %v2185_v63 = vld [vmem:[#allocation4 + $0x81] ss:$2 sm:$0xff]  ;;  %v7683_v58 = vld [vmem:[#allocation2 + $0xe0] ss:$2 sm:$0xff]  ;;  %v6896_v28 = vmul.f32 %v14551_v37, %v10494_v49 }
 0x439   : > { %v7318_v7 = vadd.f32 %v7237_v32, %v7082_v14  ;;  %v7702_v33 = vld [vmem:[#allocation2 + $0xe1] ss:$2 sm:$0xff]  ;;  %v16881_v30 = vrot.slane %v15105_v45, 1  ;;  %v6858_v32 = vmul.f32 %v14551_v37, %v10500_v52  ;;  %v16883_v3 = vrot.slane %v15180_v18, 3 }
 0x43a   : > { %v7319_v48 = vadd.f32 %v7239_v8, %v7083_v39  ;;  %v7470_v44 = vsel %vm1166_vm3, %v7467_v38, %v16880_v29  ;;  %7662 = vst.msk [vmem:[#allocation2 + $0xf8] sm:$0xff] %vm1402_vm4, %v7624_v26  ;;  %v16882_v39 = vrot.slane %v15109_v61, 2  ;;  %v7721_v8 = vmax.f32 %v7683_v58, %v7702_v33  ;;  %v2167_v49 = vld [vmem:[#allocation4 + $0x90] ss:$2 sm:$0x1f] }
 0x43b   : > { %v7011_v14 = vsel %vm691_vm1, %v16881_v30, %v16615_v0  ;;  %v7549_v26 = vadd.f32 %v7468_v59, %v7318_v7  ;;  %v16884_v30 = vrot.slane %v15152_v22, 3  ;;  %v7006_v21 = vrot.slane %v6896_v28, 1 }
 0x43c   : > { %v7245_v38 = vsel %vm930_vm2, %v16882_v39, %v16616_v46  ;;  %v7550_v29 = vadd.f32 %v7470_v44, %v7319_v48  ;;  %v7086_v11 = vadd.f32 %v7011_v14, %v15134_v57  ;;  %v7128_v39 = vmul.f32 %v14551_v37, %v10496_v50  ;;  %7740 = vst.msk [vmem:[#allocation3 + $0x73] sm:$0xff] %vm1402_vm4, %v7721_v8  ;;  %v15237_v44 = vpop.permute.xlu1 %9774 }
 0x43d   : > { %v7476_v0 = vsel %vm1166_vm3, %v16884_v30, %v16883_v3  ;;  %v7359_v46 = vmul.f32 %v14551_v37, %v10498_v51  ;;  %v7587_v59 = vadd.f32 %v15114_v55, %v7549_v26  ;;  %v2196_v48 = vmax.f32 %v2165_v2, %v2185_v63  ;;  %v2187_v3 = vld [vmem:[#allocation4 + $0x91] ss:$2 sm:$0x1f]  ;;  %v15247_v63 = vpop.permute.xlu0 %9779 }
 0x43e   : > { %v7588_v57 = vadd.f32 %v15114_v55, %v7550_v29  ;;  %v7322_v7 = vadd.f32 %v7245_v38, %v7086_v11  ;;  %v16886_v58 = vrot.slane %v15002_v41, 1  ;;  %v16887_v37 = vrot.slane %v15105_v45, 1  ;;  %v7792_v11 = vld [vmem:[#allocation3 + $0x3a] sm:$0xff] }
 0x43f   : > { %v7240_v28 = vrot.slane %v7128_v39, 2  ;;  %v7471_v30 = vrot.slane %v7359_v46, 3  ;;  %v7625_v26 = vmax.f32 %v7587_v59, 0.0  ;;  %2206 = vst.msk [vmem:[#allocation5 + $0x43] sm:$0xff] %vm1895_vm6, %v2196_v48  ;;  %v16888_v41 = vrot.slane %v15018_v62, 2 }
 0x440   : > { %v7007_v33 = vsel %vm691_vm1, %v16886_v58, %v7006_v21  ;;  %v7009_v14 = vsel %vm691_vm1, %v7006_v21, %v16887_v37  ;;  %v7626_v12 = vmax.f32 %v7588_v57, 0.0  ;;  %v7553_v29 = vadd.f32 %v7476_v0, %v7322_v7  ;;  %v7791_v7 = vld [vmem:[#allocation3 + $0x32] sm:$0xff] }
 0x441   : > { %v7084_v2 = vadd.f32 %v7007_v33, %v15033_v34  ;;  %v7085_v38 = vadd.f32 %v7009_v14, %v6858_v32  ;;  %v7241_v8 = vsel %vm930_vm2, %v16888_v41, %v7240_v28  ;;  %v16889_v45 = vrot.slane %v15109_v61, 2  ;;  %v7684_v39 = vld [vmem:[#allocation2 + $0xf0] ss:$2 sm:$0xff]  ;;  %v7703_v34 = vld [vmem:[#allocation2 + $0xf1] ss:$2 sm:$0xff]  ;;  %7663 = vst.msk [vmem:[#allocation2 + $0x100] sm:$0xff] %vm1402_vm4, %v7625_v26 }
 0x442   : > { %v16890_v46 = vrot.slane %v15037_v10, 3  ;;  %7664 = vst.msk [vmem:[#allocation2 + $0x108] sm:$0xff] %vm1402_vm4, %v7626_v12  ;;  %v7591_v32 = vadd.f32 %v15114_v55, %v7553_v29  ;;  %v16891_v62 = vrot.slane %v15152_v22, 3  ;;  %v2197_v61 = vmax.f32 %v2167_v49, %v2187_v3  ;;  %v15271_v22 = vpop.permute.xlu1 %9784  ;;  %v16892_v49 = vld [vmem:[#allocation10_spill] sm:$0xff] }
 0x443   : > { %v7243_v21 = vsel %vm930_vm2, %v7240_v28, %v16889_v45  ;;  %v7320_v59 = vadd.f32 %v7241_v8, %v7084_v2  ;;  %v7722_v48 = vmax.f32 %v7684_v39, %v7703_v34  ;;  %v9953_v10 = vpack.i.bf16 %v7792_v11, %v7791_v7  ;;  %v15269_v28 = vld [vmem:[#allocation3 + $0x80] sm:$0xff]  ;;  %v16896_v34 = vld [vmem:[#allocation9_spill] sm:$0xff] }
 0x444   : > { %v7472_v0 = vsel %vm1166_vm3, %v16890_v46, %v7471_v30  ;;  %v7474_v57 = vsel %vm1166_vm3, %v7471_v30, %v16891_v62  ;;  %v7321_v58 = vadd.f32 %v7243_v21, %v7085_v38  ;;  %v7629_v33 = vmax.f32 %v7591_v32, 0.0  ;;  %2208 = vst.msk [vmem:[#allocation5 + $0x4b] sm:$0x1f] %vm2207_vm10, %v2197_v61  ;;  %v16893_v30 = vld [vmem:[#allocation15_spill] sm:$0xff]  ;;  %v15282_v38 = vpop.permute.xlu0 %9789 }
 0x445   : > { %v7551_v37 = vadd.f32 %v7472_v0, %v7320_v59  ;;  %v7131_v12 = vmul.f32 %v14701_v20, %v10496_v50  ;;  %v7362_v14 = vmul.f32 %v14701_v20, %v10498_v51  ;;  %v9593_v3 = vunpack.i.h.bf16 %v16892_v49  ;;  %9954 = vrot.lane.b32.xlu1 %v9953_v10, %s10333_s16  ;;  %7741 = vst.msk [vmem:[#allocation3 + $0x7b] sm:$0xff] %vm1402_vm4, %v7722_v48  ;;  %v16898_v59 = vld [vmem:[#allocation8_spill] sm:$0xff] }
 0x446   : > { %v9632_v26 = vunpack.i.l.bf16 %v16893_v30  ;;  %v6860_v29 = vmul.f32 %v14620_v15, %v10500_v52  ;;  %v7552_v2 = vadd.f32 %v7474_v57, %v7321_v58  ;;  %7667 = vst.msk [vmem:[#allocation2 + $0x120] sm:$0xff] %vm1402_vm4, %v7629_v33  ;;  %v9686_v11 = vunpack.i.l.bf16 %v14606_v56  ;;  %v16899_v57 = vld [vmem:[#allocation16_spill] sm:$0xff] }
 0x447   : > { %v7589_v50 = vadd.f32 %v15114_v55, %v7551_v37  ;;  %v7246_v51 = vrot.slane %v7131_v12, 2  ;;  %v7477_v20 = vrot.slane %v7362_v14, 3  ;;  %v9592_v41 = vunpack.i.l.bf16 %v16892_v49 }
 0x448   : > { %v9633_v8 = vunpack.i.h.bf16 %v16893_v30  ;;  %v16894_v52 = vrot.slane %v15172_v47, 1  ;;  %v7590_v45 = vadd.f32 %v15114_v55, %v7552_v2  ;;  %v16895_v46 = vrot.slane %v15176_v24, 2  ;;  %v2247_v24 = vld [vmem:[#allocation5 + $0x43] sm:$0xff]  ;;  %v16902_v30 = vld [vmem:[#allocation13_spill] sm:$0xff] }
 0x449   : > { %v7627_v21 = vmax.f32 %v7589_v50, 0.0  ;;  %v9687_v39 = vunpack.i.h.bf16 %v14606_v56  ;;  %v16897_v32 = vunpack.i.l.bf16 %v16896_v34  ;;  %v9637_v61 = vunpack.i.l.bf16 %v16899_v57  ;;  %v7685_v7 = vld [vmem:[#allocation2 + $0x100] ss:$2 sm:$0xff]  ;;  %v7704_v48 = vld [vmem:[#allocation2 + $0x101] ss:$2 sm:$0xff]  ;;  %v15308_v2 = vld [vmem:[#allocation3 + $0x88] sm:$0xff]  ;;  %v15310_v50 = vpop.permute.xlu1 %9794 }
 0x44a   : > { %v7087_v15 = vadd.f32 %v16894_v52, %v6860_v29  ;;  %v7247_v0 = vsel %vm930_vm2, %v16895_v46, %v7246_v51  ;;  %v7628_v47 = vmax.f32 %v7590_v45, 0.0  ;;  %v7723_v33 = vmax.f32 %v7685_v7, %v7704_v48  ;;  %v7812_v48 = vld [vmem:[#allocation3 + $0x3b] sm:$0xff] }
 0x44b   : > { %v3969_v62 = vsel %vm1402_vm4, %v16898_v59, %v16897_v32  ;;  %7665 = vst.msk [vmem:[#allocation2 + $0x110] sm:$0xff] %vm1402_vm4, %v7627_v21  ;;  %v16900_v37 = vrot.slane %v15180_v18, 3  ;;  %v16901_v14 = vunpack.i.h.bf16 %v16896_v34  ;;  %v2248_v51 = vld [vmem:[#allocation5 + $0x4b] sm:$0xff]  ;;  %v2227_v18 = vld [vmem:[#allocation5 + $0x41] sm:$0xff]  ;;  %v9692_v46 = vunpack.i.h.bf16 %v14668_v17  ;;  %v15319_v34 = vpop.permute.xlu0 %9799 }
 0x44c   : > { %v7323_v58 = vadd.f32 %v7247_v0, %v7087_v15  ;;  %v3989_v10 = vsel %vm1895_vm6, %v3969_v62, %v9632_v26  ;;  %v9638_v26 = vunpack.i.h.bf16 %v16899_v57  ;;  %7666 = vst.msk [vmem:[#allocation2 + $0x118] sm:$0xff] %vm1402_vm4, %v7628_v47  ;;  %v2228_v15 = vld [vmem:[#allocation5 + $0x49] sm:$0xff]  ;;  %v9963_v45 = vpack.i.bf16 %v2248_v51, %v2247_v24  ;;  %7742 = vst.msk [vmem:[#allocation3 + $0x83] sm:$0xff] %vm1402_vm4, %v7723_v33  ;;  %v16903_v32 = vld [vmem:[#allocation7_spill] sm:$0xff] }
 0x44d   : > { %v7478_v56 = vsel %vm1166_vm3, %v16900_v37, %v7477_v20  ;;  %v4009_v12 = vsel %vm1916_vm7, %v3989_v10, %v9686_v11  ;;  %v3970_v29 = vsel %vm1402_vm4, %v16902_v30, %v16901_v14  ;;  %v9691_v20 = vunpack.i.l.bf16 %v14668_v17  ;;  %v16904_v62 = vld [vmem:[#allocation17_spill] sm:$0xff]  ;;  %v16907_v10 = vld [vmem:[#allocation18_spill] sm:$0xff]  ;;  %v7773_v30 = vld [vmem:[#allocation3 + $0x41] sm:$0xff] }
 0x44e   : > { %v7554_v52 = vadd.f32 %v7478_v56, %v7323_v58  ;;  %9245 = vmatprep.mubr.f32.mxu0 %v4009_v12  ;;  %v3990_v11 = vsel %vm1895_vm6, %v3970_v29, %v9633_v8  ;;  %v9958_v21 = vpack.i.bf16 %v2228_v15, %v2227_v18  ;;  %v9597_v59 = vunpack.i.l.bf16 %v16903_v32  ;;  %v7774_v47 = vld [vmem:[#allocation3 + $0x49] sm:$0xff]  ;;  %v16905_v8 = vld [vmem:[#allocation6_spill] sm:$0xff]  ;;  %9964 = vrot.lane.b32.xlu0 %v9963_v45, %s10333_s16 }
 0x44f   : > { %v4010_v0 = vsel %vm1916_vm7, %v3990_v11, %v9687_v39  ;;  %v9642_v57 = vunpack.i.l.bf16 %v16904_v62  ;;  %v16906_v58 = vunpack.i.l.bf16 %v16905_v8  ;;  %v9643_v39 = vunpack.i.h.bf16 %v16904_v62  ;;  %v16909_v37 = vld [vmem:[#allocation33_spill] sm:$0xff]  ;;  %v16911_v62 = vld [vmem:[#allocation14_spill] sm:$0xff] }
 0x450   : > { %v7592_v7 = vadd.f32 %v15114_v55, %v7554_v52  ;;  %9246 = vmatmul.mubr.f32.gmra.mxu0 %v4010_v0  ;;  %9959 = vrot.lane.b32.xlu1 %v9958_v21, %s10333_s16  ;;  %v9696_v33 = vunpack.i.l.bf16 %v14746_v35  ;;  %v16908_v55 = vunpack.i.h.bf16 %v16905_v8  ;;  %v7811_v14 = vld [vmem:[#allocation3 + $0x33] sm:$0xff]  ;;  %v9697_v29 = vunpack.i.h.bf16 %v14746_v35  ;;  %v15343_v21 = vpop.permute.xlu1 %9804  ;;  %v7794_v35 = vld [vmem:[#allocation3 + $0x4a] sm:$0xff] }
 0x451   : > { %v3971_v17 = vsel %vm1402_vm4, %v16907_v10, %v16906_v58  ;;  %v9968_v18 = vpack.i.bf16 %v7812_v48, %v7811_v14  ;;  %v9973_v15 = vpack.i.bf16 %v7774_v47, %v7773_v30  ;;  %v9598_v0 = vunpack.i.h.bf16 %v16903_v32  ;;  %v16912_v48 = vld [vmem:[#allocation35_spill] sm:$0xff] }
 0x452   : > { %v3991_v24 = vsel %vm1895_vm6, %v3971_v17, %v9637_v61  ;;  %v3972_v56 = vsel %vm1402_vm4, %v16909_v37, %v16908_v55  ;;  %v7630_v12 = vmax.f32 %v7592_v7, 0.0  ;;  %v16910_v61 = vld [vmem:[#allocation34_spill] sm:$0xff]  ;;  %v9647_v7 = vunpack.i.l.bf16 %v16911_v62  ;;  %v16913_v47 = vld [vmem:[#allocation11_spill] sm:$0xff] }
 0x453   : > { %v4011_v51 = vsel %vm1916_vm7, %v3991_v24, %v9691_v20  ;;  %v3992_v52 = vsel %vm1895_vm6, %v3972_v56, %v9638_v26  ;;  %v3973_v45 = vsel %vm1402_vm4, %v16910_v61, %v9592_v41  ;;  %v7814_v20 = vld [vmem:[#allocation3 + $0x4b] sm:$0xff]  ;;  %v9603_v41 = vunpack.i.h.bf16 %v16913_v47  ;;  %9969 = vrot.lane.b32.xlu0 %v9968_v18, %s10334_s9  ;;  %v7793_v55 = vld [vmem:[#allocation3 + $0x42] sm:$0xff]  ;;  %v7776_v30 = vld [vmem:[#allocation3 + $0x59] sm:$0xff] }
 0x454   : > { %9248 = vmatprep.mubr.f32.mxu0 %v4011_v51  ;;  %v4012_v11 = vsel %vm1916_vm7, %v3992_v52, %v9692_v46  ;;  %7668 = vst.msk [vmem:[#allocation2 + $0x128] sm:$0x7f] %vm1440_vm5, %v7630_v12  ;;  %v3993_v26 = vsel %vm1895_vm6, %v3973_v45, %v9642_v57  ;;  %v3974_v46 = vsel %vm1402_vm4, %v16912_v48, %v9593_v3  ;;  %v7686_v8 = vld [vmem:[#allocation2 + $0x110] ss:$2 sm:$0xff]  ;;  %v7705_v58 = vld [vmem:[#allocation2 + $0x111] ss:$2 sm:$0xff]  ;;  %v9701_v32 = vunpack.i.l.bf16 %v14767_v43  ;;  %v15359_v57 = vpop.permute.xlu0 %9809 }
 0x455   : > { %9249 = vmatmul.mubr.f32.gmra.mxu0 %v4012_v11  ;;  %9974 = vrot.lane.b32.xlu1 %v9973_v15, %s10332_s12  ;;  %v4013_v10 = vsel %vm1916_vm7, %v3993_v26, %v9696_v33  ;;  %v3994_v17 = vsel %vm1895_vm6, %v3974_v46, %v9643_v39  ;;  %v9602_v49 = vunpack.i.l.bf16 %v16913_v47  ;;  %v9648_v3 = vunpack.i.h.bf16 %v16911_v62  ;;  %v7813_v37 = vld [vmem:[#allocation3 + $0x43] sm:$0xff]  ;;  %v15367_v52 = vld [vmem:[#allocation3 + $0x90] sm:$0xff]  ;;  %v7796_v62 = vld [vmem:[#allocation3 + $0x5a] sm:$0xff]  ;;  %v15381_v46 = vpop.permute.xlu1 %9814 }
 0x456   : > { %v7724_v24 = vmax.f32 %v7686_v8, %v7705_v58  ;;  %9251 = vmatprep.mubr.f32.mxu0 %v4013_v10  ;;  %v4014_v56 = vsel %vm1916_vm7, %v3994_v17, %v9697_v29  ;;  %v9702_v12 = vunpack.i.h.bf16 %v14767_v43  ;;  %v9978_v14 = vpack.i.bf16 %v7794_v35, %v7793_v55  ;;  %v16914_v33 = vld [vmem:[#allocation36_spill] sm:$0xff]  ;;  %v16916_v61 = vld [vmem:[#allocation19_spill] sm:$0xff]  ;;  %v7775_v35 = vld [vmem:[#allocation3 + $0x51] sm:$0xff] }
 0x457   : > { %v9983_v51 = vpack.i.bf16 %v7814_v20, %v7813_v37  ;;  %v3975_v39 = vsel %vm1402_vm4, %v16914_v33, %v9597_v59  ;;  %v16915_v18 = vld [vmem:[#allocation12_spill] sm:$0xff]  ;;  %v9652_v45 = vunpack.i.l.bf16 %v16916_v61  ;;  %v9653_v43 = vunpack.i.h.bf16 %v16916_v61  ;;  %v16917_v26 = vld [vmem:[#allocation37_spill] sm:$0xff]  ;;  %v16918_v8 = vld [vmem:[#allocation22_spill] sm:$0xff] }
 0x458   : > { %v9608_v15 = vunpack.i.h.bf16 %v16915_v18  ;;  %v9607_v11 = vunpack.i.l.bf16 %v16915_v18  ;;  %v3995_v29 = vsel %vm1895_vm6, %v3975_v39, %v9647_v7  ;;  %7743 = vst.msk [vmem:[#allocation3 + $0x8b] sm:$0xff] %vm1402_vm4, %v7724_v24  ;;  %9979 = vrot.lane.b32.xlu0 %v9978_v14, %s10333_s16  ;;  %v9706_v59 = vunpack.i.l.bf16 %v14815_v19  ;;  %v7816_v17 = vld [vmem:[#allocation3 + $0x5b] sm:$0xff]  ;;  %v7795_v24 = vld [vmem:[#allocation3 + $0x52] sm:$0xff]  ;;  %v15390_v39 = vpop.permute.xlu0 %9819 }
 0x459   : > { %9252 = vmatmul.mubr.f32.gmra.mxu0 %v4014_v56  ;;  %9984 = vrot.lane.b32.xlu1 %v9983_v51, %s10334_s9  ;;  %v4015_v20 = vsel %vm1916_vm7, %v3995_v29, %v9701_v32  ;;  %v3976_v48 = vsel %vm1402_vm4, %v16917_v26, %v9598_v0  ;;  %v9658_v7 = vunpack.i.h.bf16 %v16918_v8  ;;  %v9657_v58 = vunpack.i.l.bf16 %v16918_v8  ;;  %v16919_v0 = vld [vmem:[#allocation38_spill] sm:$0xff]  ;;  %v16920_v26 = vld [vmem:[#allocation41_spill] sm:$0xff] }
 0x45a   : > { %v9988_v10 = vpack.i.bf16 %v7776_v30, %v7775_v35  ;;  %9254 = vmatprep.mubr.f32.mxu0 %v4015_v20  ;;  %v3996_v55 = vsel %vm1895_vm6, %v3976_v48, %v9648_v3  ;;  %v9707_v14 = vunpack.i.h.bf16 %v14815_v19  ;;  %v9993_v32 = vpack.i.bf16 %v7796_v62, %v7795_v24  ;;  %v7778_v35 = vld [vmem:[#allocation3 + $0x69] sm:$0xff]  ;;  %v7815_v62 = vld [vmem:[#allocation3 + $0x53] sm:$0xff] }
 0x45b   : > { %v7687_v37 = vld [vmem:[#allocation2 + $0x120] ss:$2 sm:$0x7f]  ;;  %v7706_v56 = vld [vmem:[#allocation2 + $0x121] ss:$2 sm:$0x7f]  ;;  %v4016_v51 = vsel %vm1916_vm7, %v3996_v55, %v9702_v12  ;;  %v3977_v33 = vsel %vm1402_vm4, %v16919_v0, %v9602_v49  ;;  %v9712_v30 = vunpack.i.h.bf16 %v14835_v23  ;;  %v9711_v29 = vunpack.i.l.bf16 %v14835_v23  ;;  %v15414_v0 = vpop.permute.xlu1 %9824 }
 0x45c   : > { %v7725_v61 = vmax.f32 %v7687_v37, %v7706_v56  ;;  %v3997_v3 = vsel %vm1895_vm6, %v3977_v33, %v9652_v45  ;;  %9989 = vrot.lane.b32.xlu0 %v9988_v10, %s10332_s12  ;;  %v9722_v19 = vunpack.i.h.bf16 %v14901_v9  ;;  %v9716_v49 = vunpack.i.l.bf16 %v14886_v40  ;;  %v7798_v12 = vld [vmem:[#allocation3 + $0x6a] sm:$0xff]  ;;  %v15404_v48 = vld [vmem:[#allocation3 + $0x98] sm:$0x3]  ;;  %v7777_v55 = vld [vmem:[#allocation3 + $0x61] sm:$0xff] }
 0x45d   : > { %9255 = vmatmul.mubr.f32.gmra.mxu0 %v4016_v51  ;;  %9994 = vrot.lane.b32.xlu1 %v9993_v32, %s10333_s16  ;;  %v4017_v20 = vsel %vm1916_vm7, %v3997_v3, %v9706_v59  ;;  %v3978_v23 = vsel %vm1402_vm4, %v16920_v26, %v9603_v41  ;;  %v9721_v45 = vunpack.i.l.bf16 %v14901_v9  ;;  %v9998_v10 = vpack.i.bf16 %v7816_v17, %v7815_v62  ;;  %v7797_v56 = vld [vmem:[#allocation3 + $0x62] sm:$0xff]  ;;  %v16921_v41 = vld [vmem:[#allocation42_spill] sm:$0xff]  ;;  %v7818_v17 = vld [vmem:[#allocation3 + $0x6b] sm:$0xff] }
 0x45e   : > { %v9717_v24 = vunpack.i.h.bf16 %v14886_v40  ;;  %9257 = vmatprep.mubr.f32.mxu0 %v4017_v20  ;;  %v3998_v37 = vsel %vm1895_vm6, %v3978_v23, %v9653_v43  ;;  %7744 = vst.msk [vmem:[#allocation3 + $0x93] sm:$0x7f] %vm1440_vm5, %v7725_v61  ;;  %v9731_v59 = vunpack.i.l.bf16 %v14962_v27  ;;  %v10003_v47 = vpack.i.bf16 %v7778_v35, %v7777_v55  ;;  %v16922_v35 = vld [vmem:[#allocation43_spill] sm:$0xff]  ;;  %v16923_v3 = vld [vmem:[#allocation44_spill] sm:$0xff]  ;;  %v7779_v55 = vld [vmem:[#allocation3 + $0x71] sm:$0xff] }
 0x45f   : > { %v4018_v32 = vsel %vm1916_vm7, %v3998_v37, %v9707_v14  ;;  %v3979_v51 = vsel %vm1402_vm4, %v16921_v41, %v9607_v11  ;;  %v9732_v9 = vunpack.i.h.bf16 %v14962_v27  ;;  %v10008_v40 = vpack.i.bf16 %v7798_v12, %v7797_v56  ;;  %v7780_v11 = vld [vmem:[#allocation3 + $0x79] sm:$0xff]  ;;  %v16924_v12 = vld [vmem:[#allocation45_spill] sm:$0xff] }
 0x460   : > { %v3999_v43 = vsel %vm1895_vm6, %v3979_v51, %v9657_v58  ;;  %v9736_v33 = vunpack.i.l.bf16 %v14997_v6  ;;  %9999 = vrot.lane.b32.xlu0 %v9998_v10, %s10334_s9  ;;  %v9726_v14 = vunpack.i.l.bf16 %v14939_v16  ;;  %v3980_v27 = vsel %vm1402_vm4, %v16922_v35, %v9608_v15  ;;  %v15429_v58 = vpop.permute.xlu0 %9829  ;;  %v7817_v10 = vld [vmem:[#allocation3 + $0x63] sm:$0xff]  ;;  %v16925_v56 = vld [vmem:[#allocation46_spill] sm:$0xff]  ;;  %v16927_v35 = vld [vmem:[#allocation49_spill] sm:$0xff] }
 0x461   : > { %9258 = vmatmul.mubr.f32.gmra.mxu0 %v4018_v32  ;;  %10004 = vrot.lane.b32.xlu1 %v10003_v47, %s10332_s12  ;;  %v4019_v61 = vsel %vm1916_vm7, %v3999_v43, %v9711_v29  ;;  %v6013_v62 = vsel %vm1402_vm4, %v16923_v3, %v9716_v49  ;;  %v6014_v20 = vsel %vm1402_vm4, %v16924_v12, %v9717_v24  ;;  %v9741_v26 = vunpack.i.l.bf16 %v15020_v31  ;;  %v7800_v29 = vld [vmem:[#allocation3 + $0x7a] sm:$0xff]  ;;  %v7782_v43 = vld [vmem:[#allocation3 + $0x89] sm:$0xff] }
 0x462   : > { %v9727_v23 = vunpack.i.h.bf16 %v14939_v16  ;;  %9260 = vmatprep.mubr.f32.mxu0 %v4019_v61  ;;  %v4000_v18 = vsel %vm1895_vm6, %v3980_v27, %v9658_v7  ;;  %v10013_v15 = vpack.i.bf16 %v7818_v17, %v7817_v10  ;;  %v9746_v37 = vunpack.i.l.bf16 %v15065_v1  ;;  %v7799_v16 = vld [vmem:[#allocation3 + $0x72] sm:$0xff]  ;;  %v15450_v17 = vpop.permute.xlu1 %9834 }
 0x463   : > { %v4020_v49 = vsel %vm1916_vm7, %v4000_v18, %v9712_v30  ;;  %v6015_v24 = vsel %vm1402_vm4, %v16925_v56, %v9731_v59  ;;  %v9737_v47 = vunpack.i.h.bf16 %v14997_v6  ;;  %v10018_v32 = vpack.i.bf16 %v7780_v11, %v7779_v55  ;;  %v16926_v11 = vld [vmem:[#allocation47_spill] sm:$0xff]  ;;  %v7802_v55 = vld [vmem:[#allocation3 + $0x8a] sm:$0xff] }
 0x464   : > { %v6033_v41 = vsel %vm1895_vm6, %v6013_v62, %v9721_v45  ;;  %v6035_v8 = vsel %vm1895_vm6, %v6015_v24, %v9736_v33  ;;  %10009 = vrot.lane.b32.xlu0 %v10008_v40, %s10333_s16  ;;  %v10023_v7 = vpack.i.bf16 %v7800_v29, %v7799_v16  ;;  %v9747_v51 = vunpack.i.h.bf16 %v15065_v1  ;;  %v7820_v33 = vld [vmem:[#allocation3 + $0x7b] sm:$0xff]  ;;  %v7822_v24 = vld [vmem:[#allocation3 + $0x8b] sm:$0xff] }
 0x465   : > { %9261 = vmatmul.mubr.f32.gmra.mxu0 %v4020_v49  ;;  %10014 = vrot.lane.b32.xlu1 %v10013_v15, %s10334_s9  ;;  %v6053_v30 = vsel %vm1916_vm7, %v6033_v41, %v9726_v14  ;;  %v6034_v59 = vsel %vm1895_vm6, %v6014_v20, %v9722_v19  ;;  %v9761_v6 = vunpack.i.l.bf16 %v15163_v4  ;;  %v6055_v40 = vsel %vm1916_vm7, %v6035_v8, %v9741_v26  ;;  %v15460_v19 = vpop.permute.xlu0 %9839  ;;  %v7781_v62 = vld [vmem:[#allocation3 + $0x81] sm:$0xff]  ;;  %v7819_v26 = vld [vmem:[#allocation3 + $0x73] sm:$0xff] }
 0x466   : > { %9295 = vmatprep.mubr.f32.mxu0 %v6053_v30  ;;  %v6054_v45 = vsel %vm1916_vm7, %v6034_v59, %v9727_v23  ;;  %v9756_v61 = vunpack.i.l.bf16 %v15148_v53  ;;  %v6016_v14 = vsel %vm1402_vm4, %v16926_v11, %v9732_v9  ;;  %v6017_v1 = vsel %vm1402_vm4, %v16927_v35, %v9746_v37  ;;  %v16928_v29 = vld [vmem:[#allocation51_spill] sm:$0xff]  ;;  %v7804_v11 = vld [vmem:[#allocation3 + $0x9a] sm:$0x3] }
 0x467   : > { %v9742_v27 = vunpack.i.h.bf16 %v15020_v31  ;;  %v9751_v3 = vunpack.i.l.bf16 %v15091_v13  ;;  %v6036_v12 = vsel %vm1895_vm6, %v6016_v14, %v9737_v47  ;;  %v9766_v20 = vunpack.i.l.bf16 %v15194_v5  ;;  %v7801_v41 = vld [vmem:[#allocation3 + $0x82] sm:$0xff] }
 0x468   : > { %10019 = vrot.lane.b32.xlu0 %v10018_v32, %s10332_s12  ;;  %v9762_v9 = vunpack.i.h.bf16 %v15163_v4  ;;  %v9757_v23 = vunpack.i.h.bf16 %v15148_v53  ;;  %v10033_v10 = vpack.i.bf16 %v7782_v43, %v7781_v62  ;;  %v6018_v31 = vsel %vm1402_vm4, %v16928_v29, %v9747_v51  ;;  %v10238_v4 = vld [vmem:[%s16537_s3 + $0x78] sm:$0xff]  ;;  %v15486_v32 = vpop.permute.xlu1 %9844  ;;  %v7783_v62 = vld [vmem:[#allocation3 + $0x91] sm:$0xff] }
 0x469   : > { %9296 = vmatmul.mubr.f32.vlgmr.msra.gmra.mxu0 %v6054_v45  ;;  %10024 = vrot.lane.b32.xlu1 %v10023_v7, %s10333_s16  ;;  %v9752_v18 = vunpack.i.h.bf16 %v15091_v13  ;;  %v10028_v15 = vpack.i.bf16 %v7820_v33, %v7819_v26  ;;  %v9767_v49 = vunpack.i.h.bf16 %v15194_v5  ;;  %v6037_v37 = vsel %vm1895_vm6, %v6017_v1, %v9751_v3  ;;  %v10239_v5 = vld [vmem:[%s16537_s3 + $0x70] sm:$0xff]  ;;  %v15497_v45 = vpop.permute.xlu0 %9849  ;;  %v16929_v1 = vld [vmem:[#allocation54_spill] sm:$0xff] }
 0x46a   : > { %9298 = vmatprep.mubr.f32.mxu0 %v6055_v40  ;;  %9326 = vmatpush3.msra.mxu0 %v10238_v4  ;;  %v6056_v53 = vsel %vm1916_vm7, %v6036_v12, %v9742_v27  ;;  %v6057_v56 = vsel %vm1916_vm7, %v6037_v37, %v9756_v61  ;;  %v9776_v47 = vunpack.i.l.bf16 %v15237_v44  ;;  %v6019_v13 = vsel %vm1402_vm4, %v14420_v60, %v9761_v6  ;;  %v7821_v60 = vld [vmem:[#allocation3 + $0x83] sm:$0xff]  ;;  %v7784_v12 = vld [vmem:[#allocation3 + $0x99] sm:$0x3]  ;;  %v7824_v4 = vld [vmem:[#allocation3 + $0x9b] sm:$0x3] }
 0x46b   : > { %9327 = vmatprep.subr.mxu0 %v10239_v5  ;;  %v9771_v16 = vunpack.i.l.bf16 %v15205_v25  ;;  %v6038_v8 = vsel %vm1895_vm6, %v6018_v31, %v9752_v18  ;;  %v6039_v7 = vsel %vm1895_vm6, %v6019_v13, %v9766_v20  ;;  %v10038_v30 = vpack.i.bf16 %v7802_v55, %v7801_v41  ;;  %v7803_v20 = vld [vmem:[#allocation3 + $0x92] sm:$0xff]  ;;  %v16930_v13 = vld [vmem:[#allocation48_spill] sm:$0xff] }
 0x46c   : > { %10029 = vrot.lane.b32.xlu0 %v10028_v15, %s10334_s9  ;;  %v6058_v51 = vsel %vm1916_vm7, %v6038_v8, %v9757_v23  ;;  %v9777_v59 = vunpack.i.h.bf16 %v15237_v44  ;;  %v6020_v6 = vsel %vm1402_vm4, %v14489_v36, %v9762_v9  ;;  %v9772_v43 = vunpack.i.h.bf16 %v15205_v25  ;;  %9328 = vmatpush3.msra.mxu0 %v10239_v5  ;;  %v10240_v25 = vld [vmem:[%s16537_s3 + $0x68] sm:$0xff]  ;;  %v15519_v29 = vpop.permute.xlu1 %9854 }
 0x46d   : > { %9299 = vmatmul.mubr.f32.gmra.mxu0 %v6056_v53  ;;  %10034 = vrot.lane.b32.xlu1 %v10033_v10, %s10332_s12  ;;  %v10043_v33 = vpack.i.bf16 %v7822_v24, %v7821_v60  ;;  %v9791_v40 = vunpack.i.l.bf16 %v15282_v38  ;;  %v6040_v61 = vsel %vm1895_vm6, %v6020_v6, %v9767_v49  ;;  %v6059_v14 = vsel %vm1916_vm7, %v6039_v7, %v9771_v16  ;;  %v7823_v37 = vld [vmem:[#allocation3 + $0x93] sm:$0xff]  ;;  %v16931_v7 = vld [vmem:[#allocation20_spill] sm:$0xff] }
 0x46e   : > { %9301 = vmatprep.mubr.f32.mxu0 %v6057_v56  ;;  %v9786_v35 = vunpack.i.l.bf16 %v15271_v22  ;;  %v9796_v44 = vunpack.i.l.bf16 %v15310_v50  ;;  %v6021_v36 = vsel %vm1402_vm4, %v16929_v1, %v9776_v47  ;;  %9329 = vmatprep.subr.mxu0 %v10240_v25  ;;  %v9782_v27 = vunpack.i.h.bf16 %v15247_v63  ;;  %v10242_v6 = vld [vmem:[%s16537_s3 + $0x58] sm:$0xff] }
 0x46f   : > { %v9781_v3 = vunpack.i.l.bf16 %v15247_v63  ;;  %v9792_v9 = vunpack.i.h.bf16 %v15282_v38  ;;  %v6060_v26 = vsel %vm1916_vm7, %v6040_v61, %v9772_v43  ;;  %v9787_v23 = vunpack.i.h.bf16 %v15271_v22  ;;  %9330 = vmatpush3.msra.mxu0 %v10240_v25 }
 0x470   : > { %10039 = vrot.lane.b32.xlu0 %v10038_v30, %s10333_s16  ;;  %v6022_v10 = vsel %vm1402_vm4, %v14622_v42, %v9777_v59  ;;  %v9797_v63 = vunpack.i.h.bf16 %v15310_v50  ;;  %v9806_v18 = vunpack.i.l.bf16 %v15343_v21  ;;  %v6023_v15 = vsel %vm1402_vm4, %v14752_v54, %v9791_v40  ;;  %v10241_v42 = vld [vmem:[%s16537_s3 + $0x60] sm:$0xff]  ;;  %v15531_v50 = vpop.permute.xlu0 %9859 }
 0x471   : > { %9302 = vmatmul.mubr.f32.gmra.mxu0 %v6058_v51  ;;  %10044 = vrot.lane.b32.xlu1 %v10043_v33, %s10334_s9  ;;  %v6041_v31 = vsel %vm1895_vm6, %v6021_v36, %v9781_v3  ;;  %v10048_v38 = vpack.i.bf16 %v7784_v12, %v7783_v62  ;;  %v10053_v55 = vpack.i.bf16 %v7804_v11, %v7803_v20  ;;  %v9801_v53 = vunpack.i.l.bf16 %v15319_v34  ;;  %v15555_v33 = vpop.permute.xlu1 %9864  ;;  %v10243_v62 = vld [vmem:[%s16537_s3 + $0x50] sm:$0xff] }
 0x472   : > { %9304 = vmatprep.mubr.f32.mxu0 %v6059_v14  ;;  %v6061_v22 = vsel %vm1916_vm7, %v6041_v31, %v9786_v35  ;;  %v6043_v49 = vsel %vm1895_vm6, %v6023_v15, %v9796_v44  ;;  %9331 = vmatprep.subr.mxu0 %v10241_v42  ;;  %v6042_v54 = vsel %vm1895_vm6, %v6022_v10, %v9782_v27  ;;  %v9821_v24 = vunpack.i.l.bf16 %v15390_v39  ;;  %v16932_v14 = vld [vmem:[#allocation21_spill] sm:$0xff] }
 0x473   : > { %v6062_v56 = vsel %vm1916_vm7, %v6042_v54, %v9787_v23  ;;  %v9807_v47 = vunpack.i.h.bf16 %v15343_v21  ;;  %v6024_v5 = vsel %vm1402_vm4, %v16930_v13, %v9792_v9  ;;  %v6063_v16 = vsel %vm1916_vm7, %v6043_v49, %v9801_v53  ;;  %9332 = vmatpush3.msra.mxu0 %v10241_v42 }
 0x474   : > { %10049 = vrot.lane.b32.xlu0 %v10048_v38, %s10332_s12  ;;  %v6044_v41 = vsel %vm1895_vm6, %v6024_v5, %v9797_v63  ;;  %v9816_v8 = vunpack.i.l.bf16 %v15381_v46  ;;  %v6025_v30 = vsel %vm1402_vm4, %v16931_v7, %v9806_v18  ;;  %v10058_v60 = vpack.i.bf16 %v7824_v4, %v7823_v37  ;;  %9333 = vmatprep.subr.mxu0 %v10242_v6  ;;  %v15553_v43 = vpop.permute.xlu0 %9869  ;;  %v16934_v63 = vld [vmem:[#allocation23_spill] sm:$0xff] }
 0x475   : > { %9305 = vmatmul.mubr.f32.gmra.mxu0 %v6060_v26  ;;  %10054 = vrot.lane.b32.xlu1 %v10053_v55, %s10333_s16  ;;  %v9802_v51 = vunpack.i.h.bf16 %v15319_v34  ;;  %v9811_v59 = vunpack.i.l.bf16 %v15359_v57  ;;  %v9826_v21 = vunpack.i.l.bf16 %v15414_v0  ;;  %v9822_v40 = vunpack.i.h.bf16 %v15390_v39  ;;  %v2229_v38 = vld [vmem:[#allocation5 + $0x2] sm:$0xff] }
 0x476   : > { %9307 = vmatprep.mubr.f32.mxu0 %v6061_v22  ;;  %v9817_v61 = vunpack.i.h.bf16 %v15381_v46  ;;  %v6026_v35 = vsel %vm1402_vm4, %v16932_v14, %v9807_v47  ;;  %v9836_v44 = vunpack.i.l.bf16 %v15450_v17  ;;  %v9812_v1 = vunpack.i.h.bf16 %v15359_v57  ;;  %9334 = vmatpush3.msra.mxu0 %v10242_v6  ;;  %v16933_v46 = vld [vmem:[#allocation52_spill] sm:$0xff] }
 0x477   : > { %v6064_v34 = vsel %vm1916_vm7, %v6044_v41, %v9802_v51  ;;  %v6045_v11 = vsel %vm1895_vm6, %v6025_v30, %v9811_v59  ;;  %v9827_v36 = vunpack.i.h.bf16 %v15414_v0  ;;  %v6027_v25 = vsel %vm1402_vm4, %v16933_v46, %v9821_v24  ;;  %9335 = vmatprep.subr.mxu0 %v10243_v62  ;;  %v15578_v0 = vpop.permute.xlu1 %9874  ;;  %v2210_v14 = vld [vmem:[#allocation5 + $0x8] sm:$0xff]  ;;  %v10249_v46 = vld [vmem:[%s16537_s3 + $0x20] sm:$0xff] }
 0x478   : > { %10059 = vrot.lane.b32.xlu0 %v10058_v60, %s10334_s9  ;;  %v6065_v39 = vsel %vm1916_vm7, %v6045_v11, %v9816_v8  ;;  %v9831_v27 = vunpack.i.l.bf16 %v15429_v58  ;;  %v9841_v3 = vunpack.i.l.bf16 %v15460_v19  ;;  %v6047_v12 = vsel %vm1895_vm6, %v6027_v25, %v9826_v21  ;;  %v15576_v57 = vpop.permute.xlu0 %9884  ;;  %9336 = vmatpush3.msra.mxu0 %v10243_v62  ;;  %v10247_v60 = vld [vmem:[%s16537_s3 + $0x30] sm:$0xff]  ;;  %v2230_v21 = vld [vmem:[#allocation5 + $0xa] sm:$0xff] }
 0x479   : > { %9308 = vmatmul.mubr.f32.gmra.mxu0 %v6062_v56  ;;  %v6046_v20 = vsel %vm1895_vm6, %v6026_v35, %v9812_v1  ;;  %v9851_v9 = vunpack.i.l.bf16 %v15497_v45  ;;  %v9837_v26 = vunpack.i.h.bf16 %v15450_v17  ;;  %v9886_v23 = vunpack.i.l.bf16 %v15576_v57  ;;  %v10244_v17 = vld [vmem:[%s16537_s3 + $0x48] sm:$0xff]  ;;  %v10245_v56 = vld [vmem:[%s16537_s3 + $0x40] sm:$0xff]  ;;  %v7746_v25 = vld [vmem:[#allocation3 + $0x8] sm:$0xff] }
 0x47a   : > { %9310 = vmatprep.mubr.f32.mxu0 %v6063_v16  ;;  %v6066_v10 = vsel %vm1916_vm7, %v6046_v20, %v9817_v61  ;;  %v6028_v31 = vsel %vm1402_vm4, %v16934_v63, %v9822_v40  ;;  %v9846_v18 = vunpack.i.l.bf16 %v15486_v32  ;;  %v6029_v15 = vsel %vm1402_vm4, %v15269_v28, %v9836_v44  ;;  %9337 = vmatprep.subr.mxu0 %v10244_v17  ;;  %v2209_v16 = vld [vmem:[#allocation5] sm:$0xff]  ;;  %v10248_v35 = vld [vmem:[%s16537_s3 + $0x28] sm:$0xff] }
 0x47b   : > { %v6067_v55 = vsel %vm1916_vm7, %v6047_v12, %v9831_v27  ;;  %v6048_v22 = vsel %vm1895_vm6, %v6028_v31, %v9827_v36  ;;  %v9856_v49 = vunpack.i.l.bf16 %v15519_v29  ;;  %v2339_v42 = vsel %vm1895_vm6, %v2229_v38, %v9886_v23  ;;  %9338 = vmatpush3.msra.mxu0 %v10244_v17  ;;  %v9880_v54 = vpop.permute.xlu1 %9879  ;;  %v10250_v12 = vld [vmem:[%s16537_s3 + $0x18] sm:$0xff]  ;;  %v10253_v63 = vld [vmem:[%s16537_s3 + $0x10] sm:$0xff] }
 0x47c   : > { %v9832_v37 = vunpack.i.h.bf16 %v15429_v58  ;;  %v9842_v4 = vunpack.i.h.bf16 %v15460_v19  ;;  %v9852_v28 = vunpack.i.h.bf16 %v15497_v45  ;;  %v9847_v53 = vunpack.i.h.bf16 %v15486_v32  ;;  %2419 = vmatprep.mubr.f32.mxu1 %v2339_v42  ;;  %9339 = vmatprep.subr.mxu0 %v10245_v56  ;;  %v15625_v59 = vpop.permute.xlu0 %9889 }
 0x47d   : > { %9311 = vmatmul.mubr.f32.gmra.mxu0 %v6064_v34  ;;  %v9857_v24 = vunpack.i.h.bf16 %v15519_v29  ;;  %v6049_v47 = vsel %vm1895_vm6, %v6029_v15, %v9841_v3  ;;  %v6030_v58 = vsel %vm1402_vm4, %v15308_v2, %v9837_v26  ;;  %v9881_v19 = vunpack.i.l.bf16 %v9880_v54  ;;  %v10246_v29 = vld [vmem:[%s16537_s3 + $0x38] sm:$0xff]  ;;  %v7745_v34 = vld [vmem:[#allocation3] sm:$0xff] }
 0x47e   : > { %9313 = vmatprep.mubr.f32.mxu0 %v6065_v39  ;;  %v6068_v45 = vsel %vm1916_vm7, %v6048_v22, %v9832_v37  ;;  %9340 = vmatpush3.msra.mxu0 %v10245_v56  ;;  %v6069_v32 = vsel %vm1916_vm7, %v6049_v47, %v9846_v18  ;;  %v6031_v13 = vsel %vm1402_vm4, %v15367_v52, %v9851_v9  ;;  %v9887_v5 = vunpack.i.h.bf16 %v15576_v57  ;;  %v10251_v9 = vld [vmem:[%s16539_s5 + $0x78] sm:$0xff]  ;;  %v10255_v22 = vld [vmem:[%s16539_s5 + $0x70] sm:$0xff]  ;;  %v2211_v56 = vld [vmem:[#allocation5 + $0x10] sm:$0xff] }
 0x47f   : > { %9341 = vmatprep.subr.mxu0 %v10246_v29  ;;  %v9866_v2 = vunpack.i.l.bf16 %v15555_v33  ;;  %v6051_v41 = vsel %vm1895_vm6, %v6031_v13, %v9856_v49  ;;  %v9882_v8 = vunpack.i.h.bf16 %v9880_v54  ;;  %v2329_v7 = vsel %vm1895_vm6, %v2209_v16, %v9881_v19  ;;  %v9895_v62 = vpop.permute.xlu1 %9894  ;;  %v7748_v19 = vld [vmem:[#allocation3 + $0x18] sm:$0xff] }
 0x480   : > { %v9861_v30 = vunpack.i.l.bf16 %v15531_v50  ;;  %9342 = vmatpush3.msra.mxu0 %v10246_v29  ;;  %v6050_v52 = vsel %vm1895_vm6, %v6030_v58, %v9842_v4  ;;  %2420 = vmatmul.mubr.f32.vlgmr.msra.gmra.mxu1 %v2329_v7  ;;  %v9867_v6 = vunpack.i.h.bf16 %v15555_v33  ;;  %v6032_v61 = vsel %vm1402_vm4, %v15404_v48, %v9852_v28  ;;  %v9900_v20 = vpop.permute.xlu0 %9899  ;;  %v2231_v4 = vld [vmem:[#allocation5 + $0x12] sm:$0xff] }
 0x481   : > { %9314 = vmatmul.mubr.f32.gmra.mxu0 %v6066_v10  ;;  %9343 = vmatprep.subr.mxu0 %v10247_v60  ;;  %v6070_v51 = vsel %vm1916_vm7, %v6050_v52, %v9847_v53  ;;  %v2340_v11 = vsel %vm1895_vm6, %v2230_v21, %v9887_v5  ;;  %v6052_v44 = vsel %vm1895_vm6, %v6032_v61, %v9857_v24  ;;  %v9876_v1 = vunpack.i.l.bf16 %v15578_v0  ;;  %v10252_v10 = vld [vmem:[%s16539_s5 + $0xf0] sm:$0xff]  ;;  %v10256_v28 = vld [vmem:[%s16539_s5 + $0xe8] sm:$0xff]  ;;  %v10257_v53 = vld [vmem:[%s16537_s3] sm:$0xff] }
 0x482   : > { %9316 = vmatprep.mubr.f32.mxu0 %v6067_v55  ;;  %9344 = vmatpush3.msra.mxu0 %v10247_v60  ;;  %v6071_v40 = vsel %vm1916_vm7, %v6051_v41, %v9861_v30  ;;  %v8065_v33 = vsel %vm1402_vm4, %v7745_v34, %v9866_v2  ;;  %v2330_v36 = vsel %vm1895_vm6, %v2210_v14, %v9882_v8  ;;  %v9862_v48 = vunpack.i.h.bf16 %v15531_v50  ;;  %v10258_v24 = vld [vmem:[%s16539_s5 + $0x68] sm:$0xff]  ;;  %v7747_v58 = vld [vmem:[#allocation3 + $0x10] sm:$0xff]  ;;  %v10262_v61 = vld [vmem:[%s16539_s5 + $0x58] sm:$0xff] }
 0x483   : > { %9345 = vmatprep.subr.mxu0 %v10248_v35  ;;  %2424 = vmatprep.mubr.f32.mxu1 %v2340_v11  ;;  %v9871_v39 = vunpack.i.l.bf16 %v15553_v43  ;;  %v8066_v50 = vsel %vm1402_vm4, %v7746_v25, %v9867_v6  ;;  %v9872_v26 = vunpack.i.h.bf16 %v15553_v43  ;;  %v9877_v23 = vunpack.i.h.bf16 %v15578_v0  ;;  %v10254_v0 = vld [vmem:[%s16537_s3 + $0x8] sm:$0xff]  ;;  %v10259_v8 = vld [vmem:[%s16539_s5 + $0xe0] sm:$0xff]  ;;  %v10263_v11 = vld [vmem:[%s16539_s5 + $0xd0] sm:$0xff] }
 0x484   : > { %9346 = vmatpush3.msra.mxu0 %v10248_v35  ;;  %2425 = vmatmul.mubr.f32.gmra.mxu1 %v2330_v36  ;;  %v6072_v27 = vsel %vm1916_vm7, %v6052_v44, %v9862_v48  ;;  %v9901_v18 = vunpack.i.l.bf16 %v9900_v20  ;;  %v9892_v15 = vunpack.i.h.bf16 %v15625_v59  ;;  %v9891_v38 = vunpack.i.l.bf16 %v15625_v59  ;;  %v2212_v52 = vld [vmem:[#allocation5 + $0x18] sm:$0xff]  ;;  %v10260_v60 = vld [vmem:[%s16539_s5 + $0x60] sm:$0xff]  ;;  %v10261_v59 = vld [vmem:[%s16539_s5 + $0xd8] sm:$0xff] }
 0x485   : > { %9317 = vmatmul.mubr.f32.gmra.mxu0 %v6068_v45  ;;  %9347 = vmatprep.subr.mxu0 %v10249_v46  ;;  %v8085_v3 = vsel %vm1895_vm6, %v8065_v33, %v9871_v39  ;;  %v8086_v31 = vsel %vm1895_vm6, %v8066_v50, %v9872_v26  ;;  %v9897_v42 = vunpack.i.h.bf16 %v9895_v62  ;;  %v9896_v37 = vunpack.i.l.bf16 %v9895_v62  ;;  %v2233_v35 = vld [vmem:[#allocation5 + $0x22] sm:$0xff]  ;;  %v10265_v33 = vld [vmem:[%s16539_s5 + $0xc8] sm:$0xff]  ;;  %v10267_v48 = vld [vmem:[%s16539_s5 + $0xc0] sm:$0xff] }
 0x486   : > { %9319 = vmatprep.mubr.f32.mxu0 %v6069_v32  ;;  %9348 = vmatpush3.msra.mxu0 %v10249_v46  ;;  %v8105_v57 = vsel %vm1916_vm7, %v8085_v3, %v9876_v1  ;;  %v9910_v43 = vpop.permute.xlu1 %9909  ;;  %v8106_v49 = vsel %vm1916_vm7, %v8086_v31, %v9877_v23  ;;  %v9902_v47 = vunpack.i.h.bf16 %v9900_v20  ;;  %v2331_v45 = vsel %vm1895_vm6, %v2211_v56, %v9901_v18  ;;  %v2232_v32 = vld [vmem:[#allocation5 + $0x1a] sm:$0xff]  ;;  %v10268_v25 = vld [vmem:[%s16539_s5 + $0x40] sm:$0xff]  ;;  %v10269_v3 = vld [vmem:[%s16539_s5 + $0xb8] sm:$0xff] }
 0x487   : > { %9349 = vmatprep.subr.mxu0 %v10250_v12  ;;  %8882 = vmatpush3.msra.mxu1 %v10251_v9  ;;  %v9912_v55 = vunpack.i.h.bf16 %v9910_v43  ;;  %v9911_v17 = vunpack.i.l.bf16 %v9910_v43  ;;  %v8067_v13 = vsel %vm1402_vm4, %v7747_v58, %v9891_v38  ;;  %v8068_v5 = vsel %vm1402_vm4, %v7748_v19, %v9892_v15  ;;  %v10264_v44 = vld [vmem:[%s16539_s5 + $0x50] sm:$0xff]  ;;  %v10266_v36 = vld [vmem:[%s16539_s5 + $0x48] sm:$0xff]  ;;  %v10270_v20 = vld [vmem:[%s16539_s5 + $0x38] sm:$0xff] }
 0x488   : > { %9350 = vmatpush3.msra.mxu0 %v10250_v12  ;;  %8883 = vmatprep.subr.mxu1 %v10252_v10  ;;  %v8087_v2 = vsel %vm1895_vm6, %v8067_v13, %v9896_v37  ;;  %v8088_v41 = vsel %vm1895_vm6, %v8068_v5, %v9897_v42  ;;  %v2234_v23 = vld [vmem:[#allocation5 + $0x2a] sm:$0xff]  ;;  %v10271_v10 = vld [vmem:[%s16539_s5 + $0xb0] sm:$0xff]  ;;  %v10274_v37 = vld [vmem:[%s16539_s5 + $0x28] sm:$0xff] }
 0x489   : > { %9320 = vmatmul.mubr.f32.gmra.mxu0 %v6070_v51  ;;  %9351 = vmatprep.subr.mxu0 %v10253_v63  ;;  %v2341_v54 = vsel %vm1895_vm6, %v2231_v4, %v9911_v17  ;;  %v2342_v16 = vsel %vm1895_vm6, %v2232_v32, %v9912_v55  ;;  %v2332_v51 = vsel %vm1895_vm6, %v2212_v52, %v9902_v47  ;;  %v7749_v43 = vld [vmem:[#allocation3 + $0x20] sm:$0xff]  ;;  %v2214_v55 = vld [vmem:[#allocation5 + $0x28] sm:$0xff]  ;;  %v10283_v52 = vld [vmem:[%s16539_s5 + $0x80] sm:$0xff] }
 0x48a   : > { %9322 = vmatprep.mubr.f32.mxu0 %v6071_v40  ;;  %9352 = vmatpush3.msra.mxu0 %v10253_v63  ;;  %v10272_v15 = vld [vmem:[%s16539_s5 + $0x30] sm:$0xff]  ;;  %v10277_v19 = vld [vmem:[%s16539_s5 + $0x98] sm:$0xff] }
 0x48b   : > { %9353 = vmatprep.subr.mxu0 %v10254_v0  ;;  %8884 = vmatpush3.msra.mxu1 %v10255_v22  ;;  %v9905_v29 = vpop.permute.xlu0 %9904  ;;  %v10273_v22 = vld [vmem:[%s16539_s5 + $0xa8] sm:$0xff]  ;;  %v10278_v32 = vld [vmem:[%s16539_s5 + $0x18] sm:$0xff]  ;;  %v10279_v13 = vld [vmem:[%s16539_s5 + $0x90] sm:$0xff] }
 0x48c   : > { %9354 = vmatpush3.msra.mxu0 %v10254_v0  ;;  %8885 = vmatprep.subr.mxu1 %v10256_v28  ;;  %v9907_v7 = vunpack.i.h.bf16 %v9905_v29  ;;  %v9906_v30 = vunpack.i.l.bf16 %v9905_v29  ;;  %v7750_v0 = vld [vmem:[#allocation3 + $0x28] sm:$0xff]  ;;  %v10280_v5 = vld [vmem:[%s16539_s5 + $0x10] sm:$0xff] }
 0x48d   : > { %9323 = vmatmul.mubr.f32.gmra.mxu0 %v6072_v27  ;;  %9355 = vmatprep.subr.mxu0 %v10257_v53 }
 0x48e   : > { %9357 = vmatprep.mubr.f32.mxu0 %v8105_v57  ;;  %8886 = vmatpush3.msra.mxu1 %v10258_v24  ;;  %v8107_v21 = vsel %vm1916_vm7, %v8087_v2, %v9906_v30  ;;  %v8108_v6 = vsel %vm1916_vm7, %v8088_v41, %v9907_v7  ;;  %v2213_v57 = vld [vmem:[#allocation5 + $0x20] sm:$0xff]  ;;  %v10276_v24 = vld [vmem:[%s16539_s5 + $0x20] sm:$0xff]  ;;  %v10281_v2 = vld [vmem:[%s16539_s5 + $0x88] sm:$0xff] }
 0x48f   : > { %9356 = vmatpush3.msra.mxu0 %v10257_v53  ;;  %2429 = vmatprep.mubr.f32.mxu1 %v2341_v54  ;;  %v10275_v53 = vld [vmem:[%s16539_s5 + $0xa0] sm:$0xff]  ;;  %v10282_v7 = vld [vmem:[%s16539_s5 + $0x8] sm:$0xff] }
 0x490   : > { %2430 = vmatmul.mubr.f32.gmra.mxu1 %v2331_v45  ;;  %8887 = vmatprep.subr.mxu1 %v10259_v8  ;;  %v2235_v30 = vld [vmem:[#allocation5 + $0x32] sm:$0xff] }
 0x491   : > { %9358 = vmatmul.mubr.f32.vlgmr.msra.gmra.mxu0 %v8106_v49  ;;  %2434 = vmatprep.mubr.f32.mxu1 %v2342_v16  ;;  %v9915_v14 = vpop.permute.xlu1 %9914 }
 0x492   : > { %8888 = vmatpush3.msra.mxu1 %v10260_v60  ;;  %v9925_v40 = vpop.permute.xlu0 %9924  ;;  %9360 = vmatprep.mubr.f32.mxu0 %v8107_v21  ;;  %v9917_v62 = vunpack.i.h.bf16 %v9915_v14  ;;  %v9916_v50 = vunpack.i.l.bf16 %v9915_v14 }
 0x493   : > { %8889 = vmatprep.subr.mxu1 %v10261_v59  ;;  %v9926_v34 = vunpack.i.l.bf16 %v9925_v40  ;;  %v9927_v39 = vunpack.i.h.bf16 %v9925_v40  ;;  %v10284_v59 = vld [vmem:[%s16539_s5] sm:$0xff]  ;;  %v2236_v40 = vld [vmem:[#allocation5 + $0x3a] sm:$0xff] }
 0x494   : > { %2435 = vmatmul.mubr.f32.gmra.mxu1 %v2332_v51  ;;  %v8069_v38 = vsel %vm1402_vm4, %v7749_v43, %v9916_v50  ;;  %v8070_v17 = vsel %vm1402_vm4, %v7750_v0, %v9917_v62  ;;  %v2215_v51 = vld [vmem:[#allocation5 + $0x30] sm:$0xff]  ;;  %v2237_v62 = vld [vmem:[#allocation5 + $0x42] sm:$0xff] }
 0x495   : > { %8890 = vmatpush3.msra.mxu1 %v10262_v61  ;;  %9361 = vmatmul.mubr.f32.gmra.mxu0 %v8108_v6  ;;  %v2343_v1 = vsel %vm1895_vm6, %v2233_v35, %v9926_v34  ;;  %v2344_v63 = vsel %vm1895_vm6, %v2234_v23, %v9927_v39  ;;  %v10285_v61 = vld [vmem:[%s16539_s5 + $0xf8] sm:$0xff]  ;;  %v7751_v50 = vld [vmem:[#allocation3 + $0x30] sm:$0xff] }
 0x496   : > { %8891 = vmatprep.subr.mxu1 %v10263_v11  ;;  %2439 = vmatprep.mubr.f32.mxu1 %v2343_v1  ;;  %v2216_v11 = vld [vmem:[#allocation5 + $0x38] sm:$0xff] }
 0x497   : > { %8892 = vmatpush3.msra.mxu1 %v10264_v44  ;;  %v9930_v12 = vpop.permute.xlu0 %9929 }
 0x498   : > { %8893 = vmatprep.subr.mxu1 %v10265_v33  ;;  %v9932_v31 = vunpack.i.h.bf16 %v9930_v12  ;;  %v9931_v18 = vunpack.i.l.bf16 %v9930_v12  ;;  %v7752_v12 = vld [vmem:[#allocation3 + $0x38] sm:$0xff] }
 0x499   : > { %8894 = vmatpush3.msra.mxu1 %v10266_v36  ;;  %v9920_v46 = vpop.permute.xlu1 %9919 }
 0x49a   : > { %8895 = vmatprep.subr.mxu1 %v10267_v48  ;;  %v9921_v27 = vunpack.i.l.bf16 %v9920_v46  ;;  %v9922_v9 = vunpack.i.h.bf16 %v9920_v46  ;;  %v8089_v54 = vsel %vm1895_vm6, %v8069_v38, %v9931_v18  ;;  %v8090_v56 = vsel %vm1895_vm6, %v8070_v17, %v9932_v31 }
 0x49b   : > { %8896 = vmatpush3.msra.mxu1 %v10268_v25 }
 0x49c   : > { %8897 = vmatprep.subr.mxu1 %v10269_v3  ;;  %v2333_v26 = vsel %vm1895_vm6, %v2213_v57, %v9921_v27  ;;  %v2334_v42 = vsel %vm1895_vm6, %v2214_v55, %v9922_v9  ;;  %v2217_v57 = vld [vmem:[#allocation5 + $0x40] sm:$0xff] }
 0x49d   : > { %8898 = vmatpush3.msra.mxu1 %v10270_v20 }
 0x49e   : > { %8899 = vmatprep.subr.mxu1 %v10271_v10  ;;  %2440 = vmatmul.mubr.f32.gmra.mxu1 %v2333_v26  ;;  %v9940_v45 = vpop.permute.xlu0 %9939  ;;  %v2238_v10 = vld [vmem:[#allocation5 + $0x4a] sm:$0xff] }
 0x49f   : > { %2444 = vmatprep.mubr.f32.mxu1 %v2344_v63  ;;  %8900 = vmatpush3.msra.mxu1 %v10272_v15  ;;  %v9935_v49 = vpop.permute.xlu1 %9934  ;;  %v9941_v16 = vunpack.i.l.bf16 %v9940_v45  ;;  %v9942_v21 = vunpack.i.h.bf16 %v9940_v45 }
 0x4a0   : > { %8901 = vmatprep.subr.mxu1 %v10273_v22  ;;  %v9937_v4 = vunpack.i.h.bf16 %v9935_v49  ;;  %v9936_v28 = vunpack.i.l.bf16 %v9935_v49 }
 0x4a1   : > { %8902 = vmatpush3.msra.mxu1 %v10274_v37  ;;  %v2335_v6 = vsel %vm1895_vm6, %v2215_v51, %v9941_v16  ;;  %v2336_v14 = vsel %vm1895_vm6, %v2216_v11, %v9942_v21  ;;  %v2218_v37 = vld [vmem:[#allocation5 + $0x48] sm:$0xff]  ;;  %v7755_v11 = vld [vmem:[#allocation3 + $0x50] sm:$0xff] }
 0x4a2   : > { %2445 = vmatmul.mubr.f32.gmra.mxu1 %v2334_v42  ;;  %8903 = vmatprep.subr.mxu1 %v10275_v53  ;;  %v8109_v47 = vsel %vm1916_vm7, %v8089_v54, %v9936_v28  ;;  %v8110_v58 = vsel %vm1916_vm7, %v8090_v56, %v9937_v4  ;;  %v7753_v4 = vld [vmem:[#allocation3 + $0x40] sm:$0xff]  ;;  %v7754_v28 = vld [vmem:[#allocation3 + $0x48] sm:$0xff] }
 0x4a3   : > { %8904 = vmatpush3.msra.mxu1 %v10276_v24  ;;  %9363 = vmatprep.mubr.f32.mxu0 %v8109_v47 }
 0x4a4   : > { %8905 = vmatprep.subr.mxu1 %v10277_v19  ;;  %9364 = vmatmul.mubr.f32.gmra.mxu0 %v8110_v58  ;;  %v15801_v19 = vld [vmem:[%s16538_s4] ss:$0 sm:$0xff] }
 0x4a5   : > { %8906 = vmatpush3.msra.mxu1 %v10278_v32 }
 0x4a6   : > { %8907 = vmatprep.subr.mxu1 %v10279_v13  ;;  %v9950_v29 = vpop.permute.xlu1 %9949  ;;  %v9945_v35 = vpop.permute.xlu0 %9944 }
 0x4a7   : > { %8908 = vmatpush3.msra.mxu1 %v10280_v5  ;;  %v9952_v41 = vunpack.i.h.bf16 %v9950_v29  ;;  %v9951_v8 = vunpack.i.l.bf16 %v9950_v29  ;;  %v9947_v1 = vunpack.i.h.bf16 %v9945_v35  ;;  %v9946_v33 = vunpack.i.l.bf16 %v9945_v35 }
 0x4a8   : > { %8909 = vmatprep.subr.mxu1 %v10281_v2 }
 0x4a9   : > { %8910 = vmatpush3.msra.mxu1 %v10282_v7  ;;  %v2345_v60 = vsel %vm1895_vm6, %v2235_v30, %v9951_v8  ;;  %v2346_v34 = vsel %vm1895_vm6, %v2236_v40, %v9952_v41  ;;  %v8071_v9 = vsel %vm1402_vm4, %v7751_v50, %v9946_v33  ;;  %v8072_v26 = vsel %vm1402_vm4, %v7752_v12, %v9947_v1 }
 0x4aa   : > { %8911 = vmatprep.subr.mxu1 %v10283_v52  ;;  %2449 = vmatprep.mubr.f32.mxu1 %v2345_v60 }
 0x4ab   : > { %8912 = vmatpush3.msra.mxu1 %v10284_v59 }
 0x4ac   : > { %8979 = vmatprep.subr.mxu1 %v10285_v61  ;;  %2450 = vmatmul.mubr.f32.gmra.mxu1 %v2335_v6 }
 0x4ad   : > { %2454 = vmatprep.mubr.f32.mxu1 %v2346_v34 }
 0x4b0   : > { %2455 = vmatmul.mubr.f32.gmra.mxu1 %v2336_v14  ;;  %v7756_v14 = vld [vmem:[#allocation3 + $0x58] sm:$0xff] }
 0x4b7   : > { %v9955_v44 = vpop.permute.xlu1 %9954 }
 0x4b8   : > { %v9957_v48 = vunpack.i.h.bf16 %v9955_v44  ;;  %v9956_v39 = vunpack.i.l.bf16 %v9955_v44 }
 0x4ba   : > { %v8091_v18 = vsel %vm1895_vm6, %v8071_v9, %v9956_v39  ;;  %v8092_v43 = vsel %vm1895_vm6, %v8072_v26, %v9957_v48  ;;  %v7757_v26 = vld [vmem:[#allocation3 + $0x60] sm:$0xff] }
 0x4bc   : > { %v9235_v53 = vpop.f32.mrf.mxu0 }
 0x4bd   : > { %v4093_v45 = vadd.f32 %v15801_v19, %v9235_v53 }
 0x4be   : > { %v4087_v29 = vpop.f32.mrf.mxu0 }
 0x4bf   : > { %v4187_v2 = vmax.f32 %v4093_v45, 0.0  ;;  %v4088_v41 = vadd.f32 %v15801_v19, %v4087_v29  ;;  %v7760_v45 = vld [vmem:[#allocation3 + $0x78] sm:$0xff] }
 0x4c0   : > { %v9965_v36 = vpop.permute.xlu0 %9964 }
 0x4c1   : > { %v9967_v25 = vunpack.i.h.bf16 %v9965_v36  ;;  %v9966_v27 = vunpack.i.l.bf16 %v9965_v36  ;;  %4207 = vst.msk [vmem:[#allocation4 + $0x8] sm:$0xff] %vm1895_vm6, %v4187_v2  ;;  %v4186_v59 = vmax.f32 %v4088_v41, 0.0 }
 0x4c2   : > { %v9960_v46 = vpop.permute.xlu1 %9959 }
 0x4c3   : > { %v9961_v3 = vunpack.i.l.bf16 %v9960_v46  ;;  %v2347_v20 = vsel %vm1895_vm6, %v2237_v62, %v9966_v27  ;;  %v9962_v31 = vunpack.i.h.bf16 %v9960_v46  ;;  %v2348_v15 = vsel %vm1895_vm6, %v2238_v10, %v9967_v25  ;;  %4206 = vst.msk [vmem:[#allocation4] sm:$0xff] %vm1895_vm6, %v4186_v59  ;;  %v7761_v59 = vld [vmem:[#allocation3 + $0x80] sm:$0xff] }
 0x4c4   : > { %2459 = vmatprep.mubr.f32.mxu1 %v2347_v20 }
 0x4c5   : > { %v2337_v23 = vsel %vm1895_vm6, %v2217_v57, %v9961_v3  ;;  %v9970_v63 = vpop.permute.xlu0 %9969  ;;  %v2338_v24 = vsel %vm1895_vm6, %v2218_v37, %v9962_v31 }
 0x4c6   : > { %v9972_v38 = vunpack.i.h.bf16 %v9970_v63  ;;  %v9971_v55 = vunpack.i.l.bf16 %v9970_v63  ;;  %2460 = vmatmul.mubr.f32.gmra.mxu1 %v2337_v23  ;;  %v9238_v34 = vpop.f32.mrf.mxu0  ;;  %v7758_v23 = vld [vmem:[#allocation3 + $0x68] sm:$0xff] }
 0x4c7   : > { %v9975_v0 = vpop.permute.xlu1 %9974  ;;  %2464 = vmatprep.mubr.f32.mxu1 %v2348_v15  ;;  %v4103_v35 = vadd.f32 %v15801_v19, %v9238_v34 }
 0x4c8   : > { %v9977_v17 = vunpack.i.h.bf16 %v9975_v0  ;;  %v9976_v22 = vunpack.i.l.bf16 %v9975_v0  ;;  %v8111_v49 = vsel %vm1916_vm7, %v8091_v18, %v9971_v55  ;;  %v8112_v42 = vsel %vm1916_vm7, %v8092_v43, %v9972_v38  ;;  %v4097_v33 = vpop.f32.mrf.mxu0 }
 0x4c9   : > { %9366 = vmatprep.mubr.f32.mxu0 %v8111_v49  ;;  %v4189_v25 = vmax.f32 %v4103_v35, 0.0  ;;  %v4098_v27 = vadd.f32 %v15801_v19, %v4097_v33 }
 0x4ca   : > { %v9980_v54 = vpop.permute.xlu0 %9979  ;;  %v8073_v47 = vsel %vm1402_vm4, %v7753_v4, %v9976_v22  ;;  %v8074_v58 = vsel %vm1402_vm4, %v7754_v28, %v9977_v17  ;;  %9367 = vmatmul.mubr.f32.gmra.mxu0 %v8112_v42  ;;  %2465 = vmatmul.mubr.f32.gmra.mxu1 %v2338_v24  ;;  %v4226_v55 = vld [vmem:[#allocation4] ss:$2 sm:$0xff]  ;;  %v4236_v17 = vld [vmem:[#allocation4 + $0x1] ss:$2 sm:$0xff] }
 0x4cb   : > { %v9985_v56 = vpop.permute.xlu1 %9984  ;;  %v9982_v32 = vunpack.i.h.bf16 %v9980_v54  ;;  %v9981_v13 = vunpack.i.l.bf16 %v9980_v54  ;;  %4209 = vst.msk [vmem:[#allocation4 + $0x18] sm:$0xff] %vm1895_vm6, %v4189_v25  ;;  %v4188_v57 = vmax.f32 %v4098_v27, 0.0  ;;  %v4246_v22 = vmax.f32 %v4226_v55, %v4236_v17 }
 0x4cc   : > { %v9987_v5 = vunpack.i.h.bf16 %v9985_v56  ;;  %v9986_v16 = vunpack.i.l.bf16 %v9985_v56 }
 0x4cd   : > { %v8093_v8 = vsel %vm1895_vm6, %v8073_v47, %v9981_v13  ;;  %v8094_v7 = vsel %vm1895_vm6, %v8074_v58, %v9982_v32  ;;  %4208 = vst.msk [vmem:[#allocation4 + $0x10] sm:$0xff] %vm1895_vm6, %v4188_v57  ;;  %4256 = vst.msk [vmem:[#allocation5 + $0x3] sm:$0xff] %vm1895_vm6, %v4246_v22  ;;  %v7759_v58 = vld [vmem:[#allocation3 + $0x70] sm:$0xff] }
 0x4ce   : > { %v9990_v30 = vpop.permute.xlu0 %9989  ;;  %v8113_v60 = vsel %vm1916_vm7, %v8093_v8, %v9986_v16  ;;  %v8114_v51 = vsel %vm1916_vm7, %v8094_v7, %v9987_v5 }
 0x4cf   : > { %v9995_v52 = vpop.permute.xlu1 %9994  ;;  %v9992_v21 = vunpack.i.h.bf16 %v9990_v30  ;;  %v9991_v6 = vunpack.i.l.bf16 %v9990_v30  ;;  %9369 = vmatprep.mubr.f32.mxu0 %v8113_v60 }
 0x4d0   : > { %v9997_v40 = vunpack.i.h.bf16 %v9995_v52  ;;  %v9996_v61 = vunpack.i.l.bf16 %v9995_v52  ;;  %9370 = vmatmul.mubr.f32.gmra.mxu0 %v8114_v51 }
 0x4d1   : > { %v8075_v44 = vsel %vm1402_vm4, %v7755_v11, %v9991_v6  ;;  %v8076_v1 = vsel %vm1402_vm4, %v7756_v14, %v9992_v21 }
 0x4d2   : > { %v10000_v36 = vpop.permute.xlu0 %9999  ;;  %v8095_v39 = vsel %vm1895_vm6, %v8075_v44, %v9996_v61  ;;  %v8096_v46 = vsel %vm1895_vm6, %v8076_v1, %v9997_v40  ;;  %v7762_v40 = vld [vmem:[#allocation3 + $0x88] sm:$0xff] }
 0x4d3   : > { %v10005_v48 = vpop.permute.xlu1 %10004  ;;  %v10002_v3 = vunpack.i.h.bf16 %v10000_v36  ;;  %v10001_v62 = vunpack.i.l.bf16 %v10000_v36 }
 0x4d4   : > { %v10007_v50 = vunpack.i.h.bf16 %v10005_v48  ;;  %v10006_v12 = vunpack.i.l.bf16 %v10005_v48  ;;  %v4227_v5 = vld [vmem:[#allocation4 + $0x10] ss:$2 sm:$0xff]  ;;  %v4237_v16 = vld [vmem:[#allocation4 + $0x11] ss:$2 sm:$0xff]  ;;  %v4276_v61 = vld [vmem:[#allocation5 + $0x1] sm:$0xff] }
 0x4d5   : > { %v8115_v20 = vsel %vm1916_vm7, %v8095_v39, %v10001_v62  ;;  %v8116_v9 = vsel %vm1916_vm7, %v8096_v46, %v10002_v3  ;;  %v4247_v7 = vmax.f32 %v4227_v5, %v4237_v16  ;;  %v4296_v34 = vld [vmem:[#allocation5 + $0x3] sm:$0xff] }
 0x4d6   : > { %v10010_v10 = vpop.permute.xlu0 %10009  ;;  %9372 = vmatprep.mubr.f32.mxu0 %v8115_v20  ;;  %v8077_v31 = vsel %vm1402_vm4, %v7757_v26, %v10006_v12  ;;  %v8078_v18 = vsel %vm1402_vm4, %v7758_v23, %v10007_v50  ;;  %v10063_v1 = vpack.i.bf16 %v4276_v61, %v4296_v34 }
 0x4d7   : > { %v10015_v63 = vpop.permute.xlu1 %10014  ;;  %v10012_v43 = vunpack.i.h.bf16 %v10010_v10  ;;  %v10011_v0 = vunpack.i.l.bf16 %v10010_v10  ;;  %9373 = vmatmul.mubr.f32.gmra.mxu0 %v8116_v9  ;;  %4257 = vst.msk [vmem:[#allocation5 + $0xb] sm:$0xff] %vm1895_vm6, %v4247_v7  ;;  %v7763_v10 = vld [vmem:[#allocation3 + $0x90] sm:$0xff] }
 0x4d8   : > { %v10017_v15 = vunpack.i.h.bf16 %v10015_v63  ;;  %v10016_v38 = vunpack.i.l.bf16 %v10015_v63  ;;  %10064 = vrot.lane.b32.xlu1 %v10063_v1, %s10333_s16  ;;  %v7764_v63 = vld [vmem:[#allocation3 + $0x98] sm:$0x3] }
 0x4d9   : > { %v8097_v49 = vsel %vm1895_vm6, %v8077_v31, %v10011_v0  ;;  %v8098_v42 = vsel %vm1895_vm6, %v8078_v18, %v10012_v43 }
 0x4da   : > { %v10020_v37 = vpop.permute.xlu0 %10019  ;;  %v8117_v28 = vsel %vm1916_vm7, %v8097_v49, %v10016_v38  ;;  %v8118_v53 = vsel %vm1916_vm7, %v8098_v42, %v10017_v15 }
 0x4db   : > { %v10025_v4 = vpop.permute.xlu1 %10024  ;;  %v10022_v54 = vunpack.i.h.bf16 %v10020_v37  ;;  %v10021_v56 = vunpack.i.l.bf16 %v10020_v37  ;;  %9375 = vmatprep.mubr.f32.mxu0 %v8117_v28 }
 0x4dc   : > { %v10027_v24 = vunpack.i.h.bf16 %v10025_v4  ;;  %v10026_v47 = vunpack.i.l.bf16 %v10025_v4  ;;  %9376 = vmatmul.mubr.f32.gmra.mxu0 %v8118_v53 }
 0x4dd   : > { %v8079_v32 = vsel %vm1402_vm4, %v7759_v58, %v10021_v56  ;;  %v8080_v13 = vsel %vm1402_vm4, %v7760_v45, %v10022_v54 }
 0x4de   : > { %v10030_v29 = vpop.permute.xlu0 %10029  ;;  %v8099_v41 = vsel %vm1895_vm6, %v8079_v32, %v10026_v47  ;;  %v8100_v8 = vsel %vm1895_vm6, %v8080_v13, %v10027_v24  ;;  %v4277_v26 = vld [vmem:[#allocation5 + $0x9] sm:$0xff] }
 0x4df   : > { %v10035_v2 = vpop.permute.xlu1 %10034  ;;  %v10032_v30 = vunpack.i.h.bf16 %v10030_v29  ;;  %v10031_v52 = vunpack.i.l.bf16 %v10030_v29  ;;  %v4297_v23 = vld [vmem:[#allocation5 + $0xb] sm:$0xff] }
 0x4e0   : > { %v10037_v60 = vunpack.i.h.bf16 %v10035_v2  ;;  %v10036_v51 = vunpack.i.l.bf16 %v10035_v2  ;;  %v10068_v31 = vpack.i.bf16 %v4277_v26, %v4297_v23 }
 0x4e1   : > { %v8119_v21 = vsel %vm1916_vm7, %v8099_v41, %v10031_v52  ;;  %v8120_v6 = vsel %vm1916_vm7, %v8100_v8, %v10032_v30 }
 0x4e2   : > { %v10040_v11 = vpop.permute.xlu0 %10039  ;;  %9378 = vmatprep.mubr.f32.mxu0 %v8119_v21  ;;  %v8081_v35 = vsel %vm1402_vm4, %v7761_v59, %v10036_v51  ;;  %v8082_v44 = vsel %vm1402_vm4, %v7762_v40, %v10037_v60  ;;  %10069 = vrot.lane.b32.xlu0 %v10068_v31, %s10333_s16 }
 0x4e3   : > { %v10045_v14 = vpop.permute.xlu1 %10044  ;;  %v10042_v33 = vunpack.i.h.bf16 %v10040_v11  ;;  %v10041_v36 = vunpack.i.l.bf16 %v10040_v11  ;;  %9379 = vmatmul.mubr.f32.gmra.mxu0 %v8120_v6 }
 0x4e4   : > { %v10047_v48 = vunpack.i.h.bf16 %v10045_v14  ;;  %v10046_v39 = vunpack.i.l.bf16 %v10045_v14  ;;  %v9241_v0 = vpop.f32.mrf.mxu0 }
 0x4e5   : > { %v8101_v46 = vsel %vm1895_vm6, %v8081_v35, %v10041_v36  ;;  %v8102_v25 = vsel %vm1895_vm6, %v8082_v44, %v10042_v33  ;;  %v4113_v17 = vadd.f32 %v15801_v19, %v9241_v0 }
 0x4e6   : > { %v10050_v27 = vpop.permute.xlu0 %10049  ;;  %v8121_v62 = vsel %vm1916_vm7, %v8101_v46, %v10046_v39  ;;  %v8122_v50 = vsel %vm1916_vm7, %v8102_v25, %v10047_v48  ;;  %v4107_v42 = vpop.f32.mrf.mxu0 }
 0x4e7   : > { %v10055_v3 = vpop.permute.xlu1 %10054  ;;  %v10052_v12 = vunpack.i.h.bf16 %v10050_v27  ;;  %v10051_v57 = vunpack.i.l.bf16 %v10050_v27  ;;  %9381 = vmatprep.mubr.f32.mxu0 %v8121_v62  ;;  %v4191_v37 = vmax.f32 %v4113_v17, 0.0  ;;  %v4108_v4 = vadd.f32 %v15801_v19, %v4107_v42 }
 0x4e8   : > { %v10057_v20 = vunpack.i.h.bf16 %v10055_v3  ;;  %v10056_v9 = vunpack.i.l.bf16 %v10055_v3  ;;  %9382 = vmatmul.mubr.f32.gmra.mxu0 %v8122_v50 }
 0x4e9   : > { %v8083_v18 = vsel %vm1402_vm4, %v7763_v10, %v10051_v57  ;;  %v8084_v43 = vsel %vm1402_vm4, %v7764_v63, %v10052_v12  ;;  %4211 = vst.msk [vmem:[#allocation4 + $0x28] sm:$0xff] %vm1895_vm6, %v4191_v37  ;;  %v4190_v54 = vmax.f32 %v4108_v4, 0.0 }
 0x4ea   : > { %v10060_v15 = vpop.permute.xlu0 %10059  ;;  %v8103_v38 = vsel %vm1895_vm6, %v8083_v18, %v10056_v9  ;;  %v8104_v55 = vsel %vm1895_vm6, %v8084_v43, %v10057_v20 }
 0x4eb   : > { %v10062_v22 = vunpack.i.h.bf16 %v10060_v15  ;;  %v10061_v49 = vunpack.i.l.bf16 %v10060_v15  ;;  %4210 = vst.msk [vmem:[#allocation4 + $0x20] sm:$0xff] %vm1895_vm6, %v4190_v54 }
 0x4ec   : > { %v9244_v56 = vpop.f32.mrf.mxu0 }
 0x4ed   : > { %v8123_v28 = vsel %vm1916_vm7, %v8103_v38, %v10061_v49  ;;  %v8124_v53 = vsel %vm1916_vm7, %v8104_v55, %v10062_v22  ;;  %v4123_v24 = vadd.f32 %v15801_v19, %v9244_v56 }
 0x4ee   : > { %9384 = vmatprep.mubr.f32.mxu0 %v8123_v28  ;;  %v4117_v47 = vpop.f32.mrf.mxu0 }
 0x4ef   : > { %9385 = vmatmul.mubr.f32.gmra.mxu0 %v8124_v53  ;;  %v4193_v58 = vmax.f32 %v4123_v24, 0.0  ;;  %v4118_v45 = vadd.f32 %v15801_v19, %v4117_v47 }
 0x4f1   : > { %4213 = vst.msk [vmem:[#allocation4 + $0x38] sm:$0xff] %vm1895_vm6, %v4193_v58  ;;  %v4192_v32 = vmax.f32 %v4118_v45, 0.0 }
 0x4f2   : > { %v4228_v13 = vld [vmem:[#allocation4 + $0x20] ss:$2 sm:$0xff]  ;;  %v4238_v5 = vld [vmem:[#allocation4 + $0x21] ss:$2 sm:$0xff] }
 0x4f3   : > { %4212 = vst.msk [vmem:[#allocation4 + $0x30] sm:$0xff] %vm1895_vm6, %v4192_v32  ;;  %v4248_v16 = vmax.f32 %v4228_v13, %v4238_v5 }
 0x4f5   : > { %4258 = vst.msk [vmem:[#allocation5 + $0x13] sm:$0xff] %vm1895_vm6, %v4248_v16 }
 0x4fa   : > { %v4229_v29 = vld [vmem:[#allocation4 + $0x30] ss:$2 sm:$0xff]  ;;  %v4239_v2 = vld [vmem:[#allocation4 + $0x31] ss:$2 sm:$0xff] }
 0x4fb   : > { %v4249_v41 = vmax.f32 %v4229_v29, %v4239_v2 }
 0x4fc   : > { %v4278_v8 = vld [vmem:[#allocation5 + $0x11] sm:$0xff] }
 0x4fd   : > { %4259 = vst.msk [vmem:[#allocation5 + $0x1b] sm:$0xff] %vm1895_vm6, %v4249_v41  ;;  %v4298_v7 = vld [vmem:[#allocation5 + $0x13] sm:$0xff] }
 0x4fe   : > { %v10073_v30 = vpack.i.bf16 %v4278_v8, %v4298_v7 }
 0x500   : > { %10074 = vrot.lane.b32.xlu1 %v10073_v30, %s10333_s16 }
 0x504   : > { %v4279_v52 = vld [vmem:[#allocation5 + $0x19] sm:$0xff] }
 0x505   : > { %v4299_v60 = vld [vmem:[#allocation5 + $0x1b] sm:$0xff] }
 0x506   : > { %v10078_v51 = vpack.i.bf16 %v4279_v52, %v4299_v60 }
 0x508   : > { %10079 = vrot.lane.b32.xlu0 %v10078_v51, %s10333_s16 }
 0x510   : > { %v9247_v59 = vpop.f32.mrf.mxu0 }
 0x511   : > { %v4133_v21 = vadd.f32 %v15801_v19, %v9247_v59 }
 0x512   : > { %v4127_v6 = vpop.f32.mrf.mxu0 }
 0x513   : > { %v4195_v40 = vmax.f32 %v4133_v21, 0.0  ;;  %v4128_v61 = vadd.f32 %v15801_v19, %v4127_v6 }
 0x515   : > { %v9250_v34 = vpop.f32.mrf.mxu0  ;;  %4215 = vst.msk [vmem:[#allocation4 + $0x48] sm:$0xff] %vm1895_vm6, %v4195_v40  ;;  %v4194_v11 = vmax.f32 %v4128_v61, 0.0 }
 0x516   : > { %v4143_v14 = vadd.f32 %v15801_v19, %v9250_v34 }
 0x517   : > { %v4137_v35 = vpop.f32.mrf.mxu0  ;;  %4214 = vst.msk [vmem:[#allocation4 + $0x40] sm:$0xff] %vm1895_vm6, %v4194_v11 }
 0x518   : > { %v4197_v44 = vmax.f32 %v4143_v14, 0.0  ;;  %v4138_v1 = vadd.f32 %v15801_v19, %v4137_v35 }
 0x519   : > { %v9253_v33 = vpop.f32.mrf.mxu0 }
 0x51a   : > { %4217 = vst.msk [vmem:[#allocation4 + $0x58] sm:$0xff] %vm1895_vm6, %v4197_v44  ;;  %v4196_v36 = vmax.f32 %v4138_v1, 0.0  ;;  %v4153_v48 = vadd.f32 %v15801_v19, %v9253_v33 }
 0x51b   : > { %v4147_v39 = vpop.f32.mrf.mxu0 }
 0x51c   : > { %4216 = vst.msk [vmem:[#allocation4 + $0x50] sm:$0xff] %vm1895_vm6, %v4196_v36  ;;  %v4199_v46 = vmax.f32 %v4153_v48, 0.0  ;;  %v4148_v25 = vadd.f32 %v15801_v19, %v4147_v39 }
 0x51d   : > { %v9256_v27 = vpop.f32.mrf.mxu0 }
 0x51e   : > { %4219 = vst.msk [vmem:[#allocation4 + $0x68] sm:$0xff] %vm1895_vm6, %v4199_v46  ;;  %v4198_v3 = vmax.f32 %v4148_v25, 0.0  ;;  %v4163_v62 = vadd.f32 %v15801_v19, %v9256_v27  ;;  %v4230_v50 = vld [vmem:[#allocation4 + $0x40] ss:$2 sm:$0xff]  ;;  %v4240_v12 = vld [vmem:[#allocation4 + $0x41] ss:$2 sm:$0xff] }
 0x51f   : > { %v4157_v57 = vpop.f32.mrf.mxu0  ;;  %v4250_v20 = vmax.f32 %v4230_v50, %v4240_v12 }
 0x520   : > { %4218 = vst.msk [vmem:[#allocation4 + $0x60] sm:$0xff] %vm1895_vm6, %v4198_v3  ;;  %v4201_v9 = vmax.f32 %v4163_v62, 0.0  ;;  %v4158_v26 = vadd.f32 %v15801_v19, %v4157_v57 }
 0x521   : > { %v9259_v23 = vpop.f32.mrf.mxu0  ;;  %4260 = vst.msk [vmem:[#allocation5 + $0x23] sm:$0xff] %vm1895_vm6, %v4250_v20 }
 0x522   : > { %4221 = vst.msk [vmem:[#allocation4 + $0x78] sm:$0xff] %vm1895_vm6, %v4201_v9  ;;  %v4200_v10 = vmax.f32 %v4158_v26, 0.0  ;;  %v4173_v63 = vadd.f32 %v15801_v19, %v9259_v23  ;;  %v15906_v23 = vld [vmem:[#allocation5 + $0x2] sm:$0xff] }
 0x523   : > { %v4231_v31 = vld [vmem:[#allocation4 + $0x50] ss:$2 sm:$0xff]  ;;  %v4241_v18 = vld [vmem:[#allocation4 + $0x51] ss:$2 sm:$0xff]  ;;  %v4167_v43 = vpop.f32.mrf.mxu0 }
 0x524   : > { %v4251_v0 = vmax.f32 %v4231_v31, %v4241_v18  ;;  %4220 = vst.msk [vmem:[#allocation4 + $0x70] sm:$0xff] %vm1895_vm6, %v4200_v10  ;;  %v4203_v15 = vmax.f32 %v4173_v63, 0.0  ;;  %v4168_v38 = vadd.f32 %v15801_v19, %v4167_v43  ;;  %v15908_v10 = vld [vmem:[#allocation5] sm:$0xff]  ;;  %v15910_v63 = vld [vmem:[#allocation5 + $0xa] sm:$0xff] }
 0x525   : > { %v9262_v55 = vpop.f32.mrf.mxu0 }
 0x526   : > { %4261 = vst.msk [vmem:[#allocation5 + $0x2b] sm:$0xff] %vm1895_vm6, %v4251_v0  ;;  %4223 = vst.msk [vmem:[#allocation4 + $0x88] sm:$0xff] %vm1895_vm6, %v4203_v15  ;;  %v4202_v17 = vmax.f32 %v4168_v38, 0.0  ;;  %v4183_v22 = vadd.f32 %v15801_v19, %v9262_v55  ;;  %v15915_v0 = vld [vmem:[#allocation5 + $0x8] sm:$0xff] }
 0x527   : > { %v4232_v49 = vld [vmem:[#allocation4 + $0x60] ss:$2 sm:$0xff]  ;;  %v4242_v42 = vld [vmem:[#allocation4 + $0x61] ss:$2 sm:$0xff]  ;;  %v4177_v37 = vpop.f32.mrf.mxu0 }
 0x528   : > { %v4252_v4 = vmax.f32 %v4232_v49, %v4242_v42  ;;  %4222 = vst.msk [vmem:[#allocation4 + $0x80] sm:$0xff] %vm1895_vm6, %v4202_v17  ;;  %v4205_v28 = vmax.f32 %v4183_v22, 0.0  ;;  %v4178_v53 = vadd.f32 %v15801_v19, %v4177_v37  ;;  %v4280_v56 = vld [vmem:[#allocation5 + $0x21] sm:$0xff] }
 0x529   : > { %v9297_v54 = vpop.f32.mrf.mxu0  ;;  %v4300_v24 = vld [vmem:[#allocation5 + $0x23] sm:$0xff] }
 0x52a   : > { %4262 = vst.msk [vmem:[#allocation5 + $0x33] sm:$0xff] %vm1895_vm6, %v4252_v4  ;;  %v4204_v47 = vmax.f32 %v4178_v53, 0.0  ;;  %v6145_v58 = vadd.f32 %v15801_v19, %v9297_v54  ;;  %v10083_v45 = vpack.i.bf16 %v4280_v56, %v4300_v24  ;;  %v15926_v24 = vld [vmem:[#allocation5 + $0x10] sm:$0xff] }
 0x52b   : > { %4225 = vst.msk [vmem:[#allocation4 + $0x98] sm:$0x3] %vm2147_vm8, %v4205_v28  ;;  %v4233_v32 = vld [vmem:[#allocation4 + $0x70] ss:$2 sm:$0xff]  ;;  %v4243_v13 = vld [vmem:[#allocation4 + $0x71] ss:$2 sm:$0xff]  ;;  %v6139_v5 = vpop.f32.mrf.mxu0 }
 0x52c   : > { %v4253_v16 = vmax.f32 %v4233_v32, %v4243_v13  ;;  %4224 = vst.msk [vmem:[#allocation4 + $0x90] sm:$0xff] %vm1895_vm6, %v4204_v47  ;;  %v6239_v29 = vmax.f32 %v6145_v58, 0.0  ;;  %v6140_v2 = vadd.f32 %v15801_v19, %v6139_v5  ;;  %10084 = vrot.lane.b32.xlu1 %v10083_v45, %s10333_s16  ;;  %v15921_v28 = vld [vmem:[#allocation5 + $0x12] sm:$0xff] }
 0x52d   : > { %v9300_v41 = vpop.f32.mrf.mxu0  ;;  %v4281_v8 = vld [vmem:[#allocation5 + $0x29] sm:$0xff] }
 0x52e   : > { %v4301_v7 = vld [vmem:[#allocation5 + $0x2b] sm:$0xff]  ;;  %4263 = vst.msk [vmem:[#allocation5 + $0x3b] sm:$0xff] %vm1895_vm6, %v4253_v16  ;;  %6259 = vst.msk [vmem:[#allocation4 + $0x8] sm:$0xff] %vm1895_vm6, %v6239_v29  ;;  %v6238_v30 = vmax.f32 %v6140_v2, 0.0  ;;  %v6155_v52 = vadd.f32 %v15801_v19, %v9300_v41  ;;  %v15937_v41 = vld [vmem:[#allocation5 + $0x1a] sm:$0xff] }
 0x52f   : > { %v10088_v60 = vpack.i.bf16 %v4281_v8, %v4301_v7  ;;  %v4234_v51 = vld [vmem:[#allocation4 + $0x80] ss:$2 sm:$0xff]  ;;  %v4244_v59 = vld [vmem:[#allocation4 + $0x81] ss:$2 sm:$0xff]  ;;  %v6149_v21 = vpop.f32.mrf.mxu0 }
 0x530   : > { %v4254_v6 = vmax.f32 %v4234_v51, %v4244_v59  ;;  %6258 = vst.msk [vmem:[#allocation4] sm:$0xff] %vm1895_vm6, %v6238_v30  ;;  %v6241_v40 = vmax.f32 %v6155_v52, 0.0  ;;  %v6150_v61 = vadd.f32 %v15801_v19, %v6149_v21  ;;  %v15942_v52 = vld [vmem:[#allocation5 + $0x18] sm:$0xff] }
 0x531   : > { %10089 = vrot.lane.b32.xlu0 %v10088_v60, %s10333_s16  ;;  %v9303_v34 = vpop.f32.mrf.mxu0  ;;  %v4282_v11 = vld [vmem:[#allocation5 + $0x31] sm:$0xff] }
 0x532   : > { %v4302_v14 = vld [vmem:[#allocation5 + $0x33] sm:$0xff]  ;;  %4264 = vst.msk [vmem:[#allocation5 + $0x43] sm:$0xff] %vm1895_vm6, %v4254_v6  ;;  %6261 = vst.msk [vmem:[#allocation4 + $0x18] sm:$0xff] %vm1895_vm6, %v6241_v40  ;;  %v6240_v35 = vmax.f32 %v6150_v61, 0.0  ;;  %v6165_v44 = vadd.f32 %v15801_v19, %v9303_v34 }
 0x533   : > { %v10093_v1 = vpack.i.bf16 %v4282_v11, %v4302_v14  ;;  %v4235_v33 = vld [vmem:[#allocation4 + $0x90] ss:$2 sm:$0x1f]  ;;  %v4245_v36 = vld [vmem:[#allocation4 + $0x91] ss:$2 sm:$0x1f]  ;;  %v6159_v48 = vpop.f32.mrf.mxu0 }
 0x534   : > { %v4255_v39 = vmax.f32 %v4235_v33, %v4245_v36  ;;  %6260 = vst.msk [vmem:[#allocation4 + $0x10] sm:$0xff] %vm1895_vm6, %v6240_v35  ;;  %v6243_v46 = vmax.f32 %v6165_v44, 0.0  ;;  %v6160_v25 = vadd.f32 %v15801_v19, %v6159_v48  ;;  %v15953_v14 = vld [vmem:[#allocation5 + $0x22] sm:$0xff] }
 0x535   : > { %10094 = vrot.lane.b32.xlu1 %v10093_v1, %s10333_s16  ;;  %v9306_v27 = vpop.f32.mrf.mxu0  ;;  %v4283_v3 = vld [vmem:[#allocation5 + $0x39] sm:$0xff] }
 0x536   : > { %v4303_v62 = vld [vmem:[#allocation5 + $0x3b] sm:$0xff]  ;;  %4265 = vst.msk [vmem:[#allocation5 + $0x4b] sm:$0x1f] %vm2207_vm10, %v4255_v39  ;;  %v6242_v50 = vmax.f32 %v6160_v25, 0.0  ;;  %v6175_v12 = vadd.f32 %v15801_v19, %v9306_v27 }
 0x537   : > { %6263 = vst.msk [vmem:[#allocation4 + $0x28] sm:$0xff] %vm1895_vm6, %v6243_v46  ;;  %v10098_v57 = vpack.i.bf16 %v4283_v3, %v4303_v62  ;;  %v6278_v20 = vld [vmem:[#allocation4] ss:$2 sm:$0xff]  ;;  %v6288_v9 = vld [vmem:[#allocation4 + $0x1] ss:$2 sm:$0xff]  ;;  %v6169_v26 = vpop.f32.mrf.mxu0 }
 0x538   : > { %v6298_v31 = vmax.f32 %v6278_v20, %v6288_v9  ;;  %6262 = vst.msk [vmem:[#allocation4 + $0x20] sm:$0xff] %vm1895_vm6, %v6242_v50  ;;  %v6245_v18 = vmax.f32 %v6175_v12, 0.0  ;;  %v6170_v43 = vadd.f32 %v15801_v19, %v6169_v26  ;;  %v15958_v36 = vld [vmem:[#allocation5 + $0x20] sm:$0xff]  ;;  %v15967_v62 = vld [vmem:[%s16540_s6] ss:$0 sm:$0xff] }
 0x539   : > { %10099 = vrot.lane.b32.xlu0 %v10098_v57, %s10333_s16  ;;  %v4284_v15 = vld [vmem:[#allocation5 + $0x41] sm:$0xff]  ;;  %v9309_v55 = vpop.f32.mrf.mxu0  ;;  %v15969_v26 = vld [vmem:[#allocation5 + $0x2a] sm:$0xff] }
 0x53a   : > { %v4304_v38 = vld [vmem:[#allocation5 + $0x43] sm:$0xff]  ;;  %6308 = vst.msk [vmem:[#allocation5 + $0x3] sm:$0xff] %vm1895_vm6, %v6298_v31  ;;  %6265 = vst.msk [vmem:[#allocation4 + $0x38] sm:$0xff] %vm1895_vm6, %v6245_v18  ;;  %v6244_v17 = vmax.f32 %v6170_v43, 0.0  ;;  %v6185_v49 = vadd.f32 %v15801_v19, %v9309_v55 }
 0x53b   : > { %v10103_v22 = vpack.i.bf16 %v4284_v15, %v4304_v38  ;;  %v6279_v42 = vld [vmem:[#allocation4 + $0x10] ss:$2 sm:$0xff]  ;;  %v6289_v37 = vld [vmem:[#allocation4 + $0x11] ss:$2 sm:$0xff]  ;;  %v6179_v4 = vpop.f32.mrf.mxu0  ;;  %v15974_v38 = vld [vmem:[#allocation5 + $0x28] sm:$0xff] }
 0x53c   : > { %v6299_v53 = vmax.f32 %v6279_v42, %v6289_v37  ;;  %6264 = vst.msk [vmem:[#allocation4 + $0x30] sm:$0xff] %vm1895_vm6, %v6244_v17  ;;  %v6247_v54 = vmax.f32 %v6185_v49, 0.0  ;;  %v6180_v56 = vadd.f32 %v15801_v19, %v6179_v4 }
 0x53d   : > { %10104 = vrot.lane.b32.xlu1 %v10103_v22, %s10333_s16  ;;  %v4285_v47 = vld [vmem:[#allocation5 + $0x49] sm:$0xff]  ;;  %v9312_v45 = vpop.f32.mrf.mxu0 }
 0x53e   : > { %v4305_v58 = vld [vmem:[#allocation5 + $0x4b] sm:$0xff]  ;;  %6309 = vst.msk [vmem:[#allocation5 + $0xb] sm:$0xff] %vm1895_vm6, %v6299_v53  ;;  %6267 = vst.msk [vmem:[#allocation4 + $0x48] sm:$0xff] %vm1895_vm6, %v6247_v54  ;;  %v6246_v32 = vmax.f32 %v6180_v56, 0.0  ;;  %v6195_v5 = vadd.f32 %v15801_v19, %v9312_v45 }
 0x53f   : > { %v10108_v13 = vpack.i.bf16 %v4285_v47, %v4305_v58  ;;  %v6280_v16 = vld [vmem:[#allocation4 + $0x20] ss:$2 sm:$0xff]  ;;  %v6290_v29 = vld [vmem:[#allocation4 + $0x21] ss:$2 sm:$0xff]  ;;  %v6189_v2 = vpop.f32.mrf.mxu0 }
 0x540   : > { %v6300_v8 = vmax.f32 %v6280_v16, %v6290_v29  ;;  %6266 = vst.msk [vmem:[#allocation4 + $0x40] sm:$0xff] %vm1895_vm6, %v6246_v32  ;;  %v6249_v7 = vmax.f32 %v6195_v5, 0.0  ;;  %v6190_v30 = vadd.f32 %v15801_v19, %v6189_v2  ;;  %v8815_v33 = vpop.f32.mrf.mxu1  ;;  %v15985_v32 = vld [vmem:[#allocation5 + $0x32] sm:$0xff] }
 0x541   : > { %10109 = vrot.lane.b32.xlu0 %v10108_v13, %s10333_s16  ;;  %v6328_v60 = vld [vmem:[#allocation5 + $0x1] sm:$0xff]  ;;  %v9315_v59 = vpop.f32.mrf.mxu0  ;;  %v15990_v29 = vld [vmem:[#allocation5 + $0x30] sm:$0xff] }
 0x542   : > { %v6348_v51 = vld [vmem:[#allocation5 + $0x3] sm:$0xff]  ;;  %6310 = vst.msk [vmem:[#allocation5 + $0x13] sm:$0xff] %vm1895_vm6, %v6300_v8  ;;  %6269 = vst.msk [vmem:[#allocation4 + $0x58] sm:$0xff] %vm1895_vm6, %v6249_v7  ;;  %v6248_v21 = vmax.f32 %v6190_v30, 0.0  ;;  %v6205_v40 = vadd.f32 %v15801_v19, %v9315_v59  ;;  %v8816_v50 = vpop.f32.mrf.mxu1 }
 0x543   : > { %v10113_v6 = vpack.i.bf16 %v6328_v60, %v6348_v51  ;;  %v6281_v61 = vld [vmem:[#allocation4 + $0x30] ss:$2 sm:$0xff]  ;;  %v6291_v34 = vld [vmem:[#allocation4 + $0x31] ss:$2 sm:$0xff]  ;;  %v6199_v11 = vpop.f32.mrf.mxu0  ;;  %v8817_v9 = vadd.f32 %v8816_v50, %v8815_v33 }
 0x544   : > { %v6301_v35 = vmax.f32 %v6281_v61, %v6291_v34  ;;  %6268 = vst.msk [vmem:[#allocation4 + $0x50] sm:$0xff] %vm1895_vm6, %v6248_v21  ;;  %v6251_v44 = vmax.f32 %v6205_v40, 0.0  ;;  %v6200_v1 = vadd.f32 %v15801_v19, %v6199_v11  ;;  %v8818_v15 = vpop.f32.mrf.mxu1  ;;  %v15997_v34 = vld [vmem:[#allocation5 + $0x3a] sm:$0xff] }
 0x545   : > { %10114 = vrot.lane.b32.xlu1 %v10113_v6, %s10333_s16  ;;  %v6329_v48 = vld [vmem:[#allocation5 + $0x9] sm:$0xff]  ;;  %v9318_v46 = vpop.f32.mrf.mxu0  ;;  %v2422_v49 = vadd.f32 %v8817_v9, %v15967_v62  ;;  %v16012_v9 = vld [vmem:[#allocation5 + $0x40] sm:$0xff] }
 0x546   : > { %v6349_v39 = vld [vmem:[#allocation5 + $0xb] sm:$0xff]  ;;  %6311 = vst.msk [vmem:[#allocation5 + $0x1b] sm:$0xff] %vm1895_vm6, %v6301_v35  ;;  %6271 = vst.msk [vmem:[#allocation4 + $0x68] sm:$0xff] %vm1895_vm6, %v6251_v44  ;;  %v6250_v27 = vmax.f32 %v6200_v1, 0.0  ;;  %v6215_v3 = vadd.f32 %v15801_v19, %v9318_v46  ;;  %v8819_v53 = vpop.f32.mrf.mxu1  ;;  %v16002_v1 = vld [vmem:[#allocation5 + $0x38] sm:$0xff] }
 0x547   : > { %v10118_v25 = vpack.i.bf16 %v6329_v48, %v6349_v39  ;;  %v6282_v12 = vld [vmem:[#allocation4 + $0x40] ss:$2 sm:$0xff]  ;;  %v6292_v57 = vld [vmem:[#allocation4 + $0x41] ss:$2 sm:$0xff]  ;;  %v6209_v20 = vpop.f32.mrf.mxu0  ;;  %v2470_v58 = vmax.f32 %v2422_v49, 0.0  ;;  %v8820_v45 = vadd.f32 %v8819_v53, %v8818_v15 }
 0x548   : > { %v6302_v31 = vmax.f32 %v6282_v12, %v6292_v57  ;;  %6270 = vst.msk [vmem:[#allocation4 + $0x60] sm:$0xff] %vm1895_vm6, %v6250_v27  ;;  %v6253_v18 = vmax.f32 %v6215_v3, 0.0  ;;  %v6210_v43 = vadd.f32 %v15801_v19, %v6209_v20  ;;  %v16007_v12 = vld [vmem:[#allocation5 + $0x42] sm:$0xff]  ;;  %v16016_v53 = vld [vmem:[#allocation5 + $0x4a] sm:$0xff] }
 0x549   : > { %10119 = vrot.lane.b32.xlu0 %v10118_v25, %s10333_s16  ;;  %v6330_v55 = vld [vmem:[#allocation5 + $0x11] sm:$0xff]  ;;  %v9321_v22 = vpop.f32.mrf.mxu0  ;;  %2480 = vst [vmem:[%s15983_s22] sm:$0xff] %v2470_v58  ;;  %v2427_v30 = vadd.f32 %v8820_v45, %v15967_v62  ;;  %v16021_v45 = vld [vmem:[#allocation5 + $0x48] sm:$0xff] }
 0x54a   : > { %v6350_v17 = vld [vmem:[#allocation5 + $0x13] sm:$0xff]  ;;  %6312 = vst.msk [vmem:[#allocation5 + $0x23] sm:$0xff] %vm1895_vm6, %v6302_v31  ;;  %6273 = vst.msk [vmem:[#allocation4 + $0x78] sm:$0xff] %vm1895_vm6, %v6253_v18  ;;  %v6252_v37 = vmax.f32 %v6210_v43, 0.0  ;;  %v6225_v4 = vadd.f32 %v15801_v19, %v9321_v22  ;;  %v10065_v58 = vpop.permute.xlu1 %10064 }
 0x54b   : > { %v10123_v42 = vpack.i.bf16 %v6330_v55, %v6350_v17  ;;  %v6283_v54 = vld [vmem:[#allocation4 + $0x50] ss:$2 sm:$0xff]  ;;  %v6293_v56 = vld [vmem:[#allocation4 + $0x51] ss:$2 sm:$0xff]  ;;  %v6219_v47 = vpop.f32.mrf.mxu0  ;;  %v2471_v61 = vmax.f32 %v2427_v30, 0.0 }
 0x54c   : > { %v6303_v13 = vmax.f32 %v6283_v54, %v6293_v56  ;;  %6272 = vst.msk [vmem:[#allocation4 + $0x70] sm:$0xff] %vm1895_vm6, %v6252_v37  ;;  %v6255_v5 = vmax.f32 %v6225_v4, 0.0  ;;  %v6220_v16 = vadd.f32 %v15801_v19, %v6219_v47 }
 0x54d   : > { %10124 = vrot.lane.b32.xlu1 %v10123_v42, %s10333_s16  ;;  %v6331_v2 = vld [vmem:[#allocation5 + $0x19] sm:$0xff]  ;;  %v9324_v7 = vpop.f32.mrf.mxu0  ;;  %2481 = vst [vmem:[%s15983_s22 + $0x8] sm:$0xff] %v2471_v61 }
 0x54e   : > { %v6351_v8 = vld [vmem:[#allocation5 + $0x1b] sm:$0xff]  ;;  %6313 = vst.msk [vmem:[#allocation5 + $0x2b] sm:$0xff] %vm1895_vm6, %v6303_v13  ;;  %6275 = vst.msk [vmem:[#allocation4 + $0x88] sm:$0xff] %vm1895_vm6, %v6255_v5  ;;  %v6254_v51 = vmax.f32 %v6220_v16, 0.0  ;;  %v6235_v59 = vadd.f32 %v15801_v19, %v9324_v7  ;;  %v10066_v7 = vunpack.i.l.bf16 %v10065_v58 }
 0x54f   : > { %v10128_v60 = vpack.i.bf16 %v6331_v2, %v6351_v8  ;;  %v6284_v21 = vld [vmem:[#allocation4 + $0x60] ss:$2 sm:$0xff]  ;;  %v6294_v6 = vld [vmem:[#allocation4 + $0x61] ss:$2 sm:$0xff]  ;;  %v6229_v40 = vpop.f32.mrf.mxu0  ;;  %v10067_v8 = vunpack.i.h.bf16 %v10065_v58 }
 0x550   : > { %v6304_v11 = vmax.f32 %v6284_v21, %v6294_v6  ;;  %6274 = vst.msk [vmem:[#allocation4 + $0x80] sm:$0xff] %vm1895_vm6, %v6254_v51  ;;  %v6257_v35 = vmax.f32 %v6235_v59, 0.0  ;;  %v6230_v44 = vadd.f32 %v15801_v19, %v6229_v40  ;;  %v8821_v50 = vpop.f32.mrf.mxu1  ;;  %v4396_v61 = vsel %vm1895_vm6, %v15906_v23, %v10066_v7 }
 0x551   : > { %10129 = vrot.lane.b32.xlu0 %v10128_v60, %s10333_s16  ;;  %v6332_v33 = vld [vmem:[#allocation5 + $0x21] sm:$0xff]  ;;  %v9359_v3 = vpop.f32.mrf.mxu0  ;;  %4470 = vmatprep.mubr.f32.mxu1 %v4396_v61 }
 0x552   : > { %v6352_v48 = vld [vmem:[#allocation5 + $0x23] sm:$0xff]  ;;  %6314 = vst.msk [vmem:[#allocation5 + $0x33] sm:$0xff] %vm1895_vm6, %v6304_v11  ;;  %v6256_v46 = vmax.f32 %v6230_v44, 0.0  ;;  %v8197_v20 = vadd.f32 %v15801_v19, %v9359_v3  ;;  %v8822_v15 = vpop.f32.mrf.mxu1  ;;  %v4386_v11 = vsel %vm1895_vm6, %v15908_v10, %v10067_v8 }
 0x553   : > { %v10133_v39 = vpack.i.bf16 %v6332_v33, %v6352_v48  ;;  %6277 = vst.msk [vmem:[#allocation4 + $0x98] sm:$0x3] %vm2147_vm8, %v6257_v35  ;;  %v6285_v25 = vld [vmem:[#allocation4 + $0x70] ss:$2 sm:$0xff]  ;;  %v6295_v27 = vld [vmem:[#allocation4 + $0x71] ss:$2 sm:$0xff]  ;;  %v8191_v43 = vpop.f32.mrf.mxu0  ;;  %v8823_v49 = vadd.f32 %v8822_v15, %v8821_v50  ;;  %4471 = vmatmul.mubr.f32.vlgmr.msra.gmra.mxu1 %v4386_v11 }
 0x554   : > { %v6305_v57 = vmax.f32 %v6285_v25, %v6295_v27  ;;  %6276 = vst.msk [vmem:[#allocation4 + $0x90] sm:$0xff] %vm1895_vm6, %v6256_v46  ;;  %v8291_v17 = vmax.f32 %v8197_v20, 0.0  ;;  %v8192_v22 = vadd.f32 %v15801_v19, %v8191_v43  ;;  %v8824_v4 = vpop.f32.mrf.mxu1  ;;  %v10070_v27 = vpop.permute.xlu0 %10069  ;;  %v16054_v20 = vld [vmem:[%s16539_s5 + $0x70] sm:$0xff]  ;;  %v16098_v8 = vld [vmem:[%s16539_s5 + $0xd8] sm:$0xff] }
 0x555   : > { %10134 = vrot.lane.b32.xlu1 %v10133_v39, %s10333_s16  ;;  %v6333_v31 = vld [vmem:[#allocation5 + $0x29] sm:$0xff]  ;;  %v2432_v47 = vadd.f32 %v8823_v49, %v15967_v62  ;;  %v9362_v16 = vpop.f32.mrf.mxu0  ;;  %v10072_v3 = vunpack.i.h.bf16 %v10070_v27  ;;  %v10071_v50 = vunpack.i.l.bf16 %v10070_v27  ;;  %v16118_v11 = vld [vmem:[%s16539_s5 + $0x50] sm:$0xff] }
 0x556   : > { %v6353_v18 = vld [vmem:[#allocation5 + $0x2b] sm:$0xff]  ;;  %6315 = vst.msk [vmem:[#allocation5 + $0x3b] sm:$0xff] %vm1895_vm6, %v6305_v57  ;;  %8311 = vst.msk [vmem:[#allocation4 + $0x8] sm:$0xff] %vm1895_vm6, %v8291_v17  ;;  %v8290_v56 = vmax.f32 %v8192_v22, 0.0  ;;  %v8825_v2 = vpop.f32.mrf.mxu1  ;;  %v8207_v60 = vadd.f32 %v15801_v19, %v9362_v16  ;;  %v16045_v57 = vld [vmem:[%s16539_s5 + $0xf0] sm:$0xff] }
 0x557   : > { %v10138_v55 = vpack.i.bf16 %v6333_v31, %v6353_v18  ;;  %v6286_v42 = vld [vmem:[#allocation4 + $0x80] ss:$2 sm:$0xff]  ;;  %v6296_v37 = vld [vmem:[#allocation4 + $0x81] ss:$2 sm:$0xff]  ;;  %v2472_v51 = vmax.f32 %v2432_v47, 0.0  ;;  %v8826_v59 = vadd.f32 %v8825_v2, %v8824_v4  ;;  %v8201_v40 = vpop.f32.mrf.mxu0  ;;  %v4397_v15 = vsel %vm1895_vm6, %v15910_v63, %v10071_v50  ;;  %v16064_v17 = vld [vmem:[%s16539_s5 + $0xe8] sm:$0xff] }
 0x558   : > { %v6306_v54 = vmax.f32 %v6286_v42, %v6296_v37  ;;  %8310 = vst.msk [vmem:[#allocation4] sm:$0xff] %vm1895_vm6, %v8290_v56  ;;  %v8293_v44 = vmax.f32 %v8207_v60, 0.0  ;;  %v8202_v33 = vadd.f32 %v15801_v19, %v8201_v40  ;;  %v16039_v19 = vld [vmem:[%s16539_s5 + $0x78] sm:$0xff]  ;;  %v16067_v37 = vld [vmem:[#allocation5] sm:$0xff]  ;;  %4475 = vmatprep.mubr.f32.mxu1 %v4397_v15  ;;  %v16072_v63 = vld [vmem:[%s16539_s5 + $0x68] sm:$0xff] }
 0x559   : > { %10139 = vrot.lane.b32.xlu0 %v10138_v55, %s10333_s16  ;;  %v6334_v13 = vld [vmem:[#allocation5 + $0x31] sm:$0xff]  ;;  %2482 = vst [vmem:[%s15983_s22 + $0x10] sm:$0xff] %v2472_v51  ;;  %v2437_v48 = vadd.f32 %v8826_v59, %v15967_v62  ;;  %8980 = vmatpush3.msra.mxu1 %v16039_v19  ;;  %v4387_v55 = vsel %vm1895_vm6, %v15915_v0, %v10072_v3  ;;  %v16075_v4 = vld [vmem:[#allocation5 + $0x8] sm:$0xff] }
 0x55a   : > { %v6354_v5 = vld [vmem:[#allocation5 + $0x33] sm:$0xff]  ;;  %6316 = vst.msk [vmem:[#allocation5 + $0x43] sm:$0xff] %vm1895_vm6, %v6306_v54  ;;  %8313 = vst.msk [vmem:[#allocation4 + $0x18] sm:$0xff] %vm1895_vm6, %v8293_v44  ;;  %v8292_v10 = vmax.f32 %v8202_v33, 0.0  ;;  %8981 = vmatprep.subr.mxu1 %v16045_v57  ;;  %v16077_v54 = vld [vmem:[#allocation5 + $0x2] sm:$0xff]  ;;  %4476 = vmatmul.mubr.f32.gmra.mxu1 %v4387_v55 }
 0x55b   : > { %v10143_v30 = vpack.i.bf16 %v6334_v13, %v6354_v5  ;;  %v6287_v21 = vld [vmem:[#allocation4 + $0x90] ss:$2 sm:$0x1f]  ;;  %v6297_v6 = vld [vmem:[#allocation4 + $0x91] ss:$2 sm:$0x1f]  ;;  %8982 = vmatpush3.msra.mxu1 %v16054_v20 }
 0x55c   : > { %v6307_v35 = vmax.f32 %v6287_v21, %v6297_v6  ;;  %v2473_v25 = vmax.f32 %v2437_v48, 0.0  ;;  %8312 = vst.msk [vmem:[#allocation4 + $0x10] sm:$0xff] %vm1895_vm6, %v8292_v10  ;;  %8983 = vmatprep.subr.mxu1 %v16064_v17  ;;  %v16079_v56 = vld [vmem:[#allocation5 + $0xa] sm:$0xff]  ;;  %v16111_v6 = vld [vmem:[%s16539_s5 + $0xd0] sm:$0xff]  ;;  %v16123_v48 = vld [vmem:[#allocation5 + $0x12] sm:$0xff] }
 0x55d   : > { %10144 = vrot.lane.b32.xlu1 %v10143_v30, %s10333_s16  ;;  %v6335_v39 = vld [vmem:[#allocation5 + $0x39] sm:$0xff]  ;;  %8984 = vmatpush3.msra.mxu1 %v16072_v63  ;;  %v16084_v47 = vld [vmem:[%s16539_s5 + $0xe0] sm:$0xff]  ;;  %v16104_v60 = vld [vmem:[%s16539_s5 + $0x58] sm:$0xff] }
 0x55e   : > { %v6355_v46 = vld [vmem:[#allocation5 + $0x3b] sm:$0xff]  ;;  %6317 = vst.msk [vmem:[#allocation5 + $0x4b] sm:$0x1f] %vm2207_vm10, %v6307_v35  ;;  %2483 = vst [vmem:[%s15983_s22 + $0x18] sm:$0xff] %v2473_v25  ;;  %v8827_v42 = vpop.f32.mrf.mxu1  ;;  %8985 = vmatprep.subr.mxu1 %v16084_v47  ;;  %v16091_v13 = vld [vmem:[%s16539_s5 + $0x60] sm:$0xff] }
 0x55f   : > { %v10148_v23 = vpack.i.bf16 %v6335_v39, %v6355_v46  ;;  %v8330_v31 = vld [vmem:[#allocation4] ss:$2 sm:$0xff]  ;;  %v8340_v18 = vld [vmem:[#allocation4 + $0x1] ss:$2 sm:$0xff]  ;;  %8986 = vmatpush3.msra.mxu1 %v16091_v13  ;;  %v16121_v33 = vld [vmem:[#allocation5 + $0x10] sm:$0xff] }
 0x560   : > { %v8350_v22 = vmax.f32 %v8330_v31, %v8340_v18  ;;  %v8828_v58 = vpop.f32.mrf.mxu1  ;;  %8987 = vmatprep.subr.mxu1 %v16098_v8  ;;  %v16128_v39 = vld [vmem:[%s16539_s5 + $0xc8] sm:$0xff]  ;;  %v16142_v10 = vld [vmem:[%s16538_s4] ss:$0 sm:$0xff] }
 0x561   : > { %10149 = vrot.lane.b32.xlu0 %v10148_v23, %s10333_s16  ;;  %v6336_v43 = vld [vmem:[#allocation5 + $0x41] sm:$0xff]  ;;  %v8829_v2 = vadd.f32 %v8828_v58, %v8827_v42  ;;  %8988 = vmatpush3.msra.mxu1 %v16104_v60  ;;  %v16135_v23 = vld [vmem:[%s16539_s5 + $0x48] sm:$0xff]  ;;  %v16149_v31 = vld [vmem:[%s16539_s5 + $0xc0] sm:$0xff] }
 0x562   : > { %v6356_v49 = vld [vmem:[#allocation5 + $0x43] sm:$0xff]  ;;  %8360 = vst.msk [vmem:[#allocation5 + $0x3] sm:$0xff] %vm1895_vm6, %v8350_v22  ;;  %v8830_v30 = vpop.f32.mrf.mxu1  ;;  %8989 = vmatprep.subr.mxu1 %v16111_v6  ;;  %v16155_v15 = vld [vmem:[%s16539_s5 + $0x40] sm:$0xff] }
 0x563   : > { %v10153_v0 = vpack.i.bf16 %v6336_v43, %v6356_v49  ;;  %v8331_v51 = vld [vmem:[#allocation4 + $0x10] ss:$2 sm:$0xff]  ;;  %v8341_v59 = vld [vmem:[#allocation4 + $0x11] ss:$2 sm:$0xff]  ;;  %v2442_v21 = vadd.f32 %v8829_v2, %v15967_v62  ;;  %8990 = vmatpush3.msra.mxu1 %v16118_v11  ;;  %v16162_v42 = vld [vmem:[%s16539_s5 + $0xb8] sm:$0xff] }
 0x564   : > { %v8351_v40 = vmax.f32 %v8331_v51, %v8341_v59  ;;  %v8831_v61 = vpop.f32.mrf.mxu1  ;;  %8991 = vmatprep.subr.mxu1 %v16128_v39  ;;  %v9365_v46 = vpop.f32.mrf.mxu0  ;;  %v16190_v51 = vld [vmem:[%s16539_s5 + $0xa8] sm:$0xff] }
 0x565   : > { %10154 = vrot.lane.b32.xlu1 %v10153_v0, %s10333_s16  ;;  %v6337_v5 = vld [vmem:[#allocation5 + $0x49] sm:$0xff]  ;;  %v2474_v35 = vmax.f32 %v2442_v21, 0.0  ;;  %v8832_v44 = vadd.f32 %v8831_v61, %v8830_v30  ;;  %8992 = vmatpush3.msra.mxu1 %v16135_v23  ;;  %v8217_v25 = vadd.f32 %v16142_v10, %v9365_v46  ;;  %v16196_v21 = vld [vmem:[%s16539_s5 + $0x28] sm:$0xff] }
 0x566   : > { %v6357_v16 = vld [vmem:[#allocation5 + $0x4b] sm:$0xff]  ;;  %8361 = vst.msk [vmem:[#allocation5 + $0xb] sm:$0xff] %vm1895_vm6, %v8351_v40  ;;  %8993 = vmatprep.subr.mxu1 %v16149_v31  ;;  %v8211_v18 = vpop.f32.mrf.mxu0 }
 0x567   : > { %v10158_v7 = vpack.i.bf16 %v6337_v5, %v6357_v16  ;;  %2484 = vst [vmem:[%s15983_s22 + $0x20] sm:$0xff] %v2474_v35  ;;  %v2447_v27 = vadd.f32 %v8832_v44, %v15967_v62  ;;  %8994 = vmatpush3.msra.mxu1 %v16155_v15  ;;  %v8295_v55 = vmax.f32 %v8217_v25, 0.0  ;;  %v8212_v49 = vadd.f32 %v16142_v10, %v8211_v18  ;;  %v16169_v0 = vld [vmem:[%s16539_s5 + $0x38] sm:$0xff]  ;;  %v16177_v5 = vld [vmem:[%s16539_s5 + $0xb0] sm:$0xff]  ;;  %v16202_v61 = vld [vmem:[%s16539_s5 + $0xa0] sm:$0xff] }
 0x568   : > { %8995 = vmatprep.subr.mxu1 %v16162_v42  ;;  %v16183_v16 = vld [vmem:[%s16539_s5 + $0x30] sm:$0xff]  ;;  %v16209_v44 = vld [vmem:[%s16539_s5 + $0x20] sm:$0xff]  ;;  %v16215_v25 = vld [vmem:[%s16539_s5 + $0x98] sm:$0xff] }
 0x569   : > { %10159 = vrot.lane.b32.xlu0 %v10158_v7, %s10333_s16  ;;  %v8380_v3 = vld [vmem:[#allocation5 + $0x1] sm:$0xff]  ;;  %v2475_v22 = vmax.f32 %v2447_v27, 0.0  ;;  %8996 = vmatpush3.msra.mxu1 %v16169_v0  ;;  %8315 = vst.msk [vmem:[#allocation4 + $0x28] sm:$0xff] %vm1895_vm6, %v8295_v55  ;;  %v8294_v58 = vmax.f32 %v8212_v49, 0.0 }
 0x56a   : > { %v8400_v50 = vld [vmem:[#allocation5 + $0x3] sm:$0xff]  ;;  %8997 = vmatprep.subr.mxu1 %v16177_v5 }
 0x56b   : > { %v10163_v43 = vpack.i.bf16 %v8380_v3, %v8400_v50  ;;  %2485 = vst [vmem:[%s15983_s22 + $0x28] sm:$0xff] %v2475_v22  ;;  %8998 = vmatpush3.msra.mxu1 %v16183_v16  ;;  %8314 = vst.msk [vmem:[#allocation4 + $0x20] sm:$0xff] %vm1895_vm6, %v8294_v58  ;;  %v16222_v3 = vld [vmem:[%s16539_s5 + $0x18] sm:$0xff]  ;;  %v16228_v18 = vld [vmem:[%s16539_s5 + $0x90] sm:$0xff] }
 0x56c   : > { %v8833_v2 = vpop.f32.mrf.mxu1  ;;  %8999 = vmatprep.subr.mxu1 %v16190_v51  ;;  %16936 = vst [vmem:[#allocation26_spill] sm:$0xff] %v16222_v3  ;;  %16937 = vst [vmem:[#allocation50_spill] sm:$0xff] %v16228_v18 }
 0x56d   : > { %10164 = vrot.lane.b32.xlu1 %v10163_v43, %s10333_s16  ;;  %v8381_v7 = vld [vmem:[#allocation5 + $0x9] sm:$0xff]  ;;  %9000 = vmatpush3.msra.mxu1 %v16196_v21 }
 0x56e   : > { %v8401_v30 = vld [vmem:[#allocation5 + $0xb] sm:$0xff]  ;;  %v8834_v40 = vpop.f32.mrf.mxu1  ;;  %9001 = vmatprep.subr.mxu1 %v16202_v61 }
 0x56f   : > { %v10168_v59 = vpack.i.bf16 %v8381_v7, %v8401_v30  ;;  %v8835_v35 = vadd.f32 %v8834_v40, %v8833_v2  ;;  %9002 = vmatpush3.msra.mxu1 %v16209_v44  ;;  %v16234_v2 = vld [vmem:[%s16539_s5 + $0x10] sm:$0xff]  ;;  %v16240_v40 = vld [vmem:[%s16539_s5 + $0x88] sm:$0xff] }
 0x570   : > { %v8836_v46 = vpop.f32.mrf.mxu1  ;;  %9003 = vmatprep.subr.mxu1 %v16215_v25  ;;  %16938 = vst [vmem:[#allocation24_spill] sm:$0xff] %v16234_v2  ;;  %16939 = vst [vmem:[#allocation27_spill] sm:$0xff] %v16240_v40 }
 0x571   : > { %10169 = vrot.lane.b32.xlu0 %v10168_v59, %s10333_s16  ;;  %v2452_v27 = vadd.f32 %v8835_v35, %v15967_v62  ;;  %9004 = vmatpush3.msra.mxu1 %v16222_v3 }
 0x572   : > { %v8837_v50 = vpop.f32.mrf.mxu1  ;;  %9005 = vmatprep.subr.mxu1 %v16228_v18  ;;  %v8332_v43 = vld [vmem:[#allocation4 + $0x20] ss:$2 sm:$0xff]  ;;  %v8342_v55 = vld [vmem:[#allocation4 + $0x21] ss:$2 sm:$0xff]  ;;  %v10075_v58 = vpop.permute.xlu1 %10074 }
 0x573   : > { %v2476_v22 = vmax.f32 %v2452_v27, 0.0  ;;  %v8838_v49 = vadd.f32 %v8837_v50, %v8836_v46  ;;  %9006 = vmatpush3.msra.mxu1 %v16234_v2  ;;  %v8352_v7 = vmax.f32 %v8332_v43, %v8342_v55  ;;  %v10077_v30 = vunpack.i.h.bf16 %v10075_v58  ;;  %v16245_v46 = vld [vmem:[#allocation5 + $0x18] sm:$0xff] }
 0x574   : > { %v10076_v59 = vunpack.i.l.bf16 %v10075_v58  ;;  %9007 = vmatprep.subr.mxu1 %v16240_v40  ;;  %v16247_v27 = vld [vmem:[#allocation5 + $0x1a] sm:$0xff]  ;;  %v16269_v58 = vld [vmem:[%s16539_s5] sm:$0xff] }
 0x575   : > { %2486 = vst [vmem:[%s15983_s22 + $0x30] sm:$0xff] %v2476_v22  ;;  %v2457_v35 = vadd.f32 %v8838_v49, %v15967_v62  ;;  %v16252_v50 = vld [vmem:[%s16539_s5 + $0x8] sm:$0xff]  ;;  %v4388_v55 = vsel %vm1895_vm6, %v15926_v24, %v10077_v30  ;;  %8362 = vst.msk [vmem:[#allocation5 + $0x13] sm:$0xff] %vm1895_vm6, %v8352_v7  ;;  %v16263_v22 = vld [vmem:[%s16539_s5 + $0x80] sm:$0xff] }
 0x576   : > { %16940 = vst [vmem:[#allocation53_spill] sm:$0xff] %v16252_v50  ;;  %9008 = vmatpush3.msra.mxu1 %v16252_v50  ;;  %v4398_v43 = vsel %vm1895_vm6, %v15921_v28, %v10076_v59  ;;  %16941 = vst [vmem:[#allocation28_spill] sm:$0xff] %v16263_v22  ;;  %v10319_v28 = vld [vmem:[%s16539_s5 + $0xf8] sm:$0xff] }
 0x577   : > { %9009 = vmatprep.subr.mxu1 %v16263_v22  ;;  %v2477_v49 = vmax.f32 %v2457_v35, 0.0  ;;  %4480 = vmatprep.mubr.f32.mxu1 %v4398_v43  ;;  %16942 = vst [vmem:[#allocation30_spill] sm:$0xff] %v16269_v58 }
 0x578   : > { %9010 = vmatpush3.msra.mxu1 %v16269_v58 }
 0x579   : > { %4481 = vmatmul.mubr.f32.gmra.mxu1 %v4388_v55  ;;  %9077 = vmatprep.subr.mxu1 %v10319_v28  ;;  %2487 = vst [vmem:[%s15983_s22 + $0x38] sm:$0xff] %v2477_v49 }
 0x57a   : > { %v10080_v24 = vpop.permute.xlu0 %10079 }
 0x57b   : > { %v10082_v7 = vunpack.i.h.bf16 %v10080_v24  ;;  %v10081_v30 = vunpack.i.l.bf16 %v10080_v24 }
 0x57c   : > { %v8382_v43 = vld [vmem:[#allocation5 + $0x11] sm:$0xff] }
 0x57d   : > { %v4399_v59 = vsel %vm1895_vm6, %v15937_v41, %v10081_v30  ;;  %v4389_v35 = vsel %vm1895_vm6, %v15942_v52, %v10082_v7  ;;  %v8402_v22 = vld [vmem:[#allocation5 + $0x13] sm:$0xff] }
 0x57e   : > { %4485 = vmatprep.mubr.f32.mxu1 %v4399_v59  ;;  %v10173_v58 = vpack.i.bf16 %v8382_v43, %v8402_v22 }
 0x57f   : > { %4486 = vmatmul.mubr.f32.gmra.mxu1 %v4389_v35 }
 0x580   : > { %10174 = vrot.lane.b32.xlu1 %v10173_v58, %s10333_s16 }
 0x586   : > { %v8839_v55 = vpop.f32.mrf.mxu1 }
 0x588   : > { %v8840_v28 = vpop.f32.mrf.mxu1 }
 0x589   : > { %v8841_v49 = vadd.f32 %v8840_v28, %v8839_v55 }
 0x58a   : > { %v9368_v50 = vpop.f32.mrf.mxu0  ;;  %v8842_v40 = vpop.f32.mrf.mxu1 }
 0x58b   : > { %v8227_v24 = vadd.f32 %v16142_v10, %v9368_v50  ;;  %v2462_v41 = vadd.f32 %v8841_v49, %v15967_v62 }
 0x58c   : > { %v8221_v30 = vpop.f32.mrf.mxu0  ;;  %v8843_v2 = vpop.f32.mrf.mxu1 }
 0x58d   : > { %v8297_v52 = vmax.f32 %v8227_v24, 0.0  ;;  %v8222_v7 = vadd.f32 %v16142_v10, %v8221_v30  ;;  %v2478_v22 = vmax.f32 %v2462_v41, 0.0  ;;  %v8844_v59 = vadd.f32 %v8843_v2, %v8842_v40 }
 0x58f   : > { %8317 = vst.msk [vmem:[#allocation4 + $0x38] sm:$0xff] %vm1895_vm6, %v8297_v52  ;;  %v8296_v58 = vmax.f32 %v8222_v7, 0.0  ;;  %2488 = vst [vmem:[%s15983_s22 + $0x40] sm:$0xff] %v2478_v22  ;;  %v2467_v35 = vadd.f32 %v8844_v59, %v15967_v62 }
 0x590   : > { %v9371_v43 = vpop.f32.mrf.mxu0 }
 0x591   : > { %v8237_v55 = vadd.f32 %v16142_v10, %v9371_v43  ;;  %8316 = vst.msk [vmem:[#allocation4 + $0x30] sm:$0xff] %vm1895_vm6, %v8296_v58  ;;  %v2479_v50 = vmax.f32 %v2467_v35, 0.0  ;;  %v16295_v58 = vld [vmem:[#allocation5 + $0x20] sm:$0xff] }
 0x592   : > { %v8231_v28 = vpop.f32.mrf.mxu0  ;;  %v16297_v35 = vld [vmem:[#allocation5 + $0x22] sm:$0xff] }
 0x593   : > { %v8299_v49 = vmax.f32 %v8237_v55, 0.0  ;;  %v8232_v24 = vadd.f32 %v16142_v10, %v8231_v28  ;;  %2489 = vst [vmem:[%s15983_s22 + $0x48] sm:$0xff] %v2479_v50 }
 0x595   : > { %8319 = vst.msk [vmem:[#allocation4 + $0x48] sm:$0xff] %vm1895_vm6, %v8299_v49  ;;  %v8298_v2 = vmax.f32 %v8232_v24, 0.0 }
 0x597   : > { %8318 = vst.msk [vmem:[#allocation4 + $0x40] sm:$0xff] %vm1895_vm6, %v8298_v2  ;;  %v9374_v40 = vpop.f32.mrf.mxu0 }
 0x598   : > { %v8247_v41 = vadd.f32 %v16142_v10, %v9374_v40  ;;  %v8333_v62 = vld [vmem:[#allocation4 + $0x30] ss:$2 sm:$0xff]  ;;  %v8343_v30 = vld [vmem:[#allocation4 + $0x31] ss:$2 sm:$0xff] }
 0x599   : > { %v8241_v52 = vpop.f32.mrf.mxu0  ;;  %v8353_v7 = vmax.f32 %v8333_v62, %v8343_v30 }
 0x59a   : > { %v8301_v22 = vmax.f32 %v8247_v41, 0.0  ;;  %v8242_v59 = vadd.f32 %v16142_v10, %v8241_v52 }
 0x59b   : > { %8363 = vst.msk [vmem:[#allocation5 + $0x1b] sm:$0xff] %vm1895_vm6, %v8353_v7 }
 0x59c   : > { %8321 = vst.msk [vmem:[#allocation4 + $0x58] sm:$0xff] %vm1895_vm6, %v8301_v22  ;;  %v8300_v43 = vmax.f32 %v8242_v59, 0.0  ;;  %v9377_v55 = vpop.f32.mrf.mxu0 }
 0x59d   : > { %v8257_v28 = vadd.f32 %v16142_v10, %v9377_v55  ;;  %v16308_v55 = vld [vmem:[#allocation5 + $0x28] sm:$0xff] }
 0x59e   : > { %v10085_v50 = vpop.permute.xlu1 %10084  ;;  %v8334_v2 = vld [vmem:[#allocation4 + $0x40] ss:$2 sm:$0xff]  ;;  %v8344_v40 = vld [vmem:[#allocation4 + $0x41] ss:$2 sm:$0xff]  ;;  %8320 = vst.msk [vmem:[#allocation4 + $0x50] sm:$0xff] %vm1895_vm6, %v8300_v43  ;;  %v8251_v41 = vpop.f32.mrf.mxu0 }
 0x59f   : > { %v10087_v49 = vunpack.i.h.bf16 %v10085_v50  ;;  %v10086_v24 = vunpack.i.l.bf16 %v10085_v50  ;;  %v8354_v62 = vmax.f32 %v8334_v2, %v8344_v40  ;;  %v8303_v30 = vmax.f32 %v8257_v28, 0.0  ;;  %v16310_v50 = vld [vmem:[#allocation5 + $0x2a] sm:$0xff] }
 0x5a0   : > { %v8252_v52 = vadd.f32 %v16142_v10, %v8251_v41 }
 0x5a1   : > { %v4400_v22 = vsel %vm1895_vm6, %v15953_v14, %v10086_v24  ;;  %v4390_v7 = vsel %vm1895_vm6, %v15958_v36, %v10087_v49  ;;  %8323 = vst.msk [vmem:[#allocation4 + $0x68] sm:$0xff] %vm1895_vm6, %v8303_v30  ;;  %8364 = vst.msk [vmem:[#allocation5 + $0x23] sm:$0xff] %vm1895_vm6, %v8354_v62 }
 0x5a2   : > { %4490 = vmatprep.mubr.f32.mxu1 %v4400_v22  ;;  %v8302_v43 = vmax.f32 %v8252_v52, 0.0  ;;  %v8383_v14 = vld [vmem:[#allocation5 + $0x19] sm:$0xff] }
 0x5a3   : > { %v10090_v59 = vpop.permute.xlu0 %10089  ;;  %4491 = vmatmul.mubr.f32.gmra.mxu1 %v4390_v7  ;;  %v8403_v28 = vld [vmem:[#allocation5 + $0x1b] sm:$0xff]  ;;  %v9380_v24 = vpop.f32.mrf.mxu0 }
 0x5a4   : > { %v10092_v18 = vunpack.i.h.bf16 %v10090_v59  ;;  %v10091_v2 = vunpack.i.l.bf16 %v10090_v59  ;;  %8322 = vst.msk [vmem:[#allocation4 + $0x60] sm:$0xff] %vm1895_vm6, %v8302_v43  ;;  %v10178_v40 = vpack.i.bf16 %v8383_v14, %v8403_v28  ;;  %v8267_v41 = vadd.f32 %v16142_v10, %v9380_v24  ;;  %v16328_v14 = vld [vmem:[#allocation5 + $0x32] sm:$0xff] }
 0x5a5   : > { %v8335_v52 = vld [vmem:[#allocation4 + $0x50] ss:$2 sm:$0xff]  ;;  %v8345_v22 = vld [vmem:[#allocation4 + $0x51] ss:$2 sm:$0xff]  ;;  %v8261_v59 = vpop.f32.mrf.mxu0 }
 0x5a6   : > { %v4401_v36 = vsel %vm1895_vm6, %v15969_v26, %v10091_v2  ;;  %v4391_v49 = vsel %vm1895_vm6, %v15974_v38, %v10092_v18  ;;  %v8355_v43 = vmax.f32 %v8335_v52, %v8345_v22  ;;  %10179 = vrot.lane.b32.xlu0 %v10178_v40, %s10333_s16  ;;  %v8305_v3 = vmax.f32 %v8267_v41, 0.0  ;;  %v16326_v2 = vld [vmem:[#allocation5 + $0x30] sm:$0xff] }
 0x5a7   : > { %v10095_v30 = vpop.permute.xlu1 %10094  ;;  %4495 = vmatprep.mubr.f32.mxu1 %v4401_v36  ;;  %v8262_v26 = vadd.f32 %v16142_v10, %v8261_v59 }
 0x5a8   : > { %v10097_v62 = vunpack.i.h.bf16 %v10095_v30  ;;  %v10096_v7 = vunpack.i.l.bf16 %v10095_v30  ;;  %4496 = vmatmul.mubr.f32.gmra.mxu1 %v4391_v49  ;;  %8325 = vst.msk [vmem:[#allocation4 + $0x78] sm:$0xff] %vm1895_vm6, %v8305_v3  ;;  %v9383_v24 = vpop.f32.mrf.mxu0  ;;  %v8384_v36 = vld [vmem:[#allocation5 + $0x21] sm:$0xff]  ;;  %8365 = vst.msk [vmem:[#allocation5 + $0x2b] sm:$0xff] %vm1895_vm6, %v8355_v43 }
 0x5a9   : > { %v8304_v28 = vmax.f32 %v8262_v26, 0.0  ;;  %v8404_v49 = vld [vmem:[#allocation5 + $0x23] sm:$0xff]  ;;  %v8277_v41 = vadd.f32 %v16142_v10, %v9383_v24  ;;  %v16342_v24 = vld [vmem:[#allocation5 + $0x3a] sm:$0xff] }
 0x5aa   : > { %v4402_v38 = vsel %vm1895_vm6, %v15985_v32, %v10096_v7  ;;  %v4392_v18 = vsel %vm1895_vm6, %v15990_v29, %v10097_v62  ;;  %v10183_v32 = vpack.i.bf16 %v8384_v36, %v8404_v49  ;;  %v8271_v59 = vpop.f32.mrf.mxu0 }
 0x5ab   : > { %v10100_v40 = vpop.permute.xlu0 %10099  ;;  %4500 = vmatprep.mubr.f32.mxu1 %v4402_v38  ;;  %v8336_v29 = vld [vmem:[#allocation4 + $0x60] ss:$2 sm:$0xff]  ;;  %v8346_v22 = vld [vmem:[#allocation4 + $0x61] ss:$2 sm:$0xff]  ;;  %8324 = vst.msk [vmem:[#allocation4 + $0x70] sm:$0xff] %vm1895_vm6, %v8304_v28  ;;  %v8307_v62 = vmax.f32 %v8277_v41, 0.0  ;;  %v8272_v7 = vadd.f32 %v16142_v10, %v8271_v59 }
 0x5ac   : > { %v10102_v30 = vunpack.i.h.bf16 %v10100_v40  ;;  %v10101_v52 = vunpack.i.l.bf16 %v10100_v40  ;;  %4501 = vmatmul.mubr.f32.gmra.mxu1 %v4392_v18  ;;  %v8356_v3 = vmax.f32 %v8336_v29, %v8346_v22  ;;  %10184 = vrot.lane.b32.xlu1 %v10183_v32, %s10333_s16  ;;  %v16340_v18 = vld [vmem:[#allocation5 + $0x38] sm:$0xff] }
 0x5ad   : > { %8327 = vst.msk [vmem:[#allocation4 + $0x88] sm:$0xff] %vm1895_vm6, %v8307_v62  ;;  %v8306_v28 = vmax.f32 %v8272_v7, 0.0 }
 0x5ae   : > { %v4403_v43 = vsel %vm1895_vm6, %v15997_v34, %v10101_v52  ;;  %v4393_v38 = vsel %vm1895_vm6, %v16002_v1, %v10102_v30  ;;  %8366 = vst.msk [vmem:[#allocation5 + $0x33] sm:$0xff] %vm1895_vm6, %v8356_v3 }
 0x5af   : > { %v10105_v26 = vpop.permute.xlu1 %10104  ;;  %4505 = vmatprep.mubr.f32.mxu1 %v4403_v43  ;;  %8326 = vst.msk [vmem:[#allocation4 + $0x80] sm:$0xff] %vm1895_vm6, %v8306_v28  ;;  %v9386_v34 = vpop.f32.mrf.mxu0  ;;  %v8385_v40 = vld [vmem:[#allocation5 + $0x29] sm:$0xff]  ;;  %v16358_v28 = vld [vmem:[#allocation5 + $0x40] sm:$0xff] }
 0x5b0   : > { %v10107_v36 = vunpack.i.h.bf16 %v10105_v26  ;;  %v10106_v49 = vunpack.i.l.bf16 %v10105_v26  ;;  %4506 = vmatmul.mubr.f32.gmra.mxu1 %v4393_v38  ;;  %v8405_v41 = vld [vmem:[#allocation5 + $0x2b] sm:$0xff]  ;;  %v8287_v30 = vadd.f32 %v16142_v10, %v9386_v34 }
 0x5b1   : > { %v10188_v52 = vpack.i.bf16 %v8385_v40, %v8405_v41  ;;  %v8281_v62 = vpop.f32.mrf.mxu0 }
 0x5b2   : > { %v4404_v1 = vsel %vm1895_vm6, %v16007_v12, %v10106_v49  ;;  %v4394_v32 = vsel %vm1895_vm6, %v16012_v9, %v10107_v36  ;;  %v8337_v22 = vld [vmem:[#allocation4 + $0x70] ss:$2 sm:$0xff]  ;;  %v8347_v59 = vld [vmem:[#allocation4 + $0x71] ss:$2 sm:$0xff]  ;;  %v8309_v26 = vmax.f32 %v8287_v30, 0.0  ;;  %v8282_v12 = vadd.f32 %v16142_v10, %v8281_v62  ;;  %v16360_v36 = vld [vmem:[#allocation5 + $0x42] sm:$0xff] }
 0x5b3   : > { %v10110_v29 = vpop.permute.xlu0 %10109  ;;  %4510 = vmatprep.mubr.f32.mxu1 %v4404_v1  ;;  %v8357_v43 = vmax.f32 %v8337_v22, %v8347_v59  ;;  %10189 = vrot.lane.b32.xlu0 %v10188_v52, %s10333_s16  ;;  %v16370_v22 = vld [vmem:[#allocation5 + $0x4a] sm:$0xff] }
 0x5b4   : > { %v10112_v3 = vunpack.i.h.bf16 %v10110_v29  ;;  %v10111_v7 = vunpack.i.l.bf16 %v10110_v29  ;;  %4511 = vmatmul.mubr.f32.gmra.mxu1 %v4394_v32  ;;  %8329 = vst.msk [vmem:[#allocation4 + $0x98] sm:$0x3] %vm2147_vm8, %v8309_v26  ;;  %v8308_v49 = vmax.f32 %v8282_v12, 0.0  ;;  %v16372_v59 = vld [vmem:[#allocation5 + $0x48] sm:$0xff] }
 0x5b5   : > { %v8386_v34 = vld [vmem:[#allocation5 + $0x31] sm:$0xff]  ;;  %8367 = vst.msk [vmem:[#allocation5 + $0x3b] sm:$0xff] %vm1895_vm6, %v8357_v43 }
 0x5b6   : > { %v4405_v9 = vsel %vm1895_vm6, %v16016_v53, %v10111_v7  ;;  %v4395_v38 = vsel %vm1895_vm6, %v16021_v45, %v10112_v3  ;;  %v8406_v40 = vld [vmem:[#allocation5 + $0x33] sm:$0xff]  ;;  %v8338_v53 = vld [vmem:[#allocation4 + $0x80] ss:$2 sm:$0xff]  ;;  %v8348_v30 = vld [vmem:[#allocation4 + $0x81] ss:$2 sm:$0xff]  ;;  %8328 = vst.msk [vmem:[#allocation4 + $0x90] sm:$0xff] %vm1895_vm6, %v8308_v49 }
 0x5b7   : > { %v10115_v41 = vpop.permute.xlu1 %10114  ;;  %4515 = vmatprep.mubr.f32.mxu1 %v4405_v9  ;;  %v10193_v10 = vpack.i.bf16 %v8386_v34, %v8406_v40  ;;  %v8358_v45 = vmax.f32 %v8338_v53, %v8348_v30 }
 0x5b8   : > { %v10117_v1 = vunpack.i.h.bf16 %v10115_v41  ;;  %v10116_v32 = vunpack.i.l.bf16 %v10115_v41  ;;  %4516 = vmatmul.mubr.f32.gmra.mxu1 %v4395_v38 }
 0x5b9   : > { %10194 = vrot.lane.b32.xlu1 %v10193_v10, %s10333_s16  ;;  %8368 = vst.msk [vmem:[#allocation5 + $0x43] sm:$0xff] %vm1895_vm6, %v8358_v45  ;;  %v16948_v45 = vld [vmem:[#allocation28_spill] sm:$0xff] }
 0x5ba   : > { %v6448_v52 = vsel %vm1895_vm6, %v16077_v54, %v10116_v32  ;;  %v6438_v29 = vsel %vm1895_vm6, %v16067_v37, %v10117_v1 }
 0x5bb   : > { %v10120_v62 = vpop.permute.xlu0 %10119  ;;  %6522 = vmatprep.mubr.f32.mxu1 %v6448_v52 }
 0x5bc   : > { %v10122_v3 = vunpack.i.h.bf16 %v10120_v62  ;;  %v10121_v7 = vunpack.i.l.bf16 %v10120_v62  ;;  %6523 = vmatmul.mubr.f32.vlgmr.msra.gmra.mxu1 %v6438_v29  ;;  %v8387_v43 = vld [vmem:[#allocation5 + $0x39] sm:$0xff] }
 0x5bd   : > { %9078 = vmatpush3.msra.mxu1 %v16039_v19  ;;  %v8407_v26 = vld [vmem:[#allocation5 + $0x3b] sm:$0xff]  ;;  %v8339_v38 = vld [vmem:[#allocation4 + $0x90] ss:$2 sm:$0x1f] }
 0x5be   : > { %v6449_v54 = vsel %vm1895_vm6, %v16079_v56, %v10121_v7  ;;  %v6439_v37 = vsel %vm1895_vm6, %v16075_v4, %v10122_v3  ;;  %9079 = vmatprep.subr.mxu1 %v16045_v57  ;;  %v10198_v12 = vpack.i.bf16 %v8387_v43, %v8407_v26  ;;  %v8349_v49 = vld [vmem:[#allocation4 + $0x91] ss:$2 sm:$0x1f] }
 0x5bf   : > { %v10125_v9 = vpop.permute.xlu1 %10124  ;;  %6527 = vmatprep.mubr.f32.mxu1 %v6449_v54  ;;  %9080 = vmatpush3.msra.mxu1 %v16054_v20  ;;  %v8359_v19 = vmax.f32 %v8339_v38, %v8349_v49  ;;  %v16949_v29 = vld [vmem:[#allocation30_spill] sm:$0xff] }
 0x5c0   : > { %v10127_v34 = vunpack.i.h.bf16 %v10125_v9  ;;  %v10126_v40 = vunpack.i.l.bf16 %v10125_v9  ;;  %6528 = vmatmul.mubr.f32.gmra.mxu1 %v6439_v37  ;;  %9081 = vmatprep.subr.mxu1 %v16064_v17  ;;  %v8388_v20 = vld [vmem:[#allocation5 + $0x41] sm:$0xff] }
 0x5c1   : > { %10199 = vrot.lane.b32.xlu0 %v10198_v12, %s10333_s16  ;;  %9082 = vmatpush3.msra.mxu1 %v16072_v63  ;;  %8369 = vst.msk [vmem:[#allocation5 + $0x4b] sm:$0x1f] %vm2207_vm10, %v8359_v19  ;;  %v8408_v56 = vld [vmem:[#allocation5 + $0x43] sm:$0xff] }
 0x5c2   : > { %v6450_v57 = vsel %vm1895_vm6, %v16123_v48, %v10126_v40  ;;  %v6440_v4 = vsel %vm1895_vm6, %v16121_v33, %v10127_v34  ;;  %9083 = vmatprep.subr.mxu1 %v16084_v47  ;;  %v10203_v17 = vpack.i.bf16 %v8388_v20, %v8408_v56  ;;  %v8390_v37 = vld [vmem:[#allocation5 + $0x2] sm:$0xff]  ;;  %v8392_v56 = vld [vmem:[#allocation5 + $0x12] sm:$0xff] }
 0x5c3   : > { %6532 = vmatprep.mubr.f32.mxu1 %v6450_v57  ;;  %v10130_v41 = vpop.permute.xlu0 %10129  ;;  %9084 = vmatpush3.msra.mxu1 %v16091_v13  ;;  %v8370_v12 = vld [vmem:[#allocation5] sm:$0xff]  ;;  %v8371_v40 = vld [vmem:[#allocation5 + $0x8] sm:$0xff] }
 0x5c4   : > { %v10132_v10 = vunpack.i.h.bf16 %v10130_v41  ;;  %v10131_v1 = vunpack.i.l.bf16 %v10130_v41  ;;  %6533 = vmatmul.mubr.f32.gmra.mxu1 %v6440_v4  ;;  %9085 = vmatprep.subr.mxu1 %v16098_v8  ;;  %v8372_v41 = vld [vmem:[#allocation5 + $0x10] sm:$0xff] }
 0x5c5   : > { %9086 = vmatpush3.msra.mxu1 %v16104_v60  ;;  %10204 = vrot.lane.b32.xlu1 %v10203_v17, %s10333_s16 }
 0x5c6   : > { %v6451_v63 = vsel %vm1895_vm6, %v16247_v27, %v10131_v1  ;;  %v6441_v47 = vsel %vm1895_vm6, %v16245_v46, %v10132_v10  ;;  %9087 = vmatprep.subr.mxu1 %v16111_v6 }
 0x5c7   : > { %6537 = vmatprep.mubr.f32.mxu1 %v6451_v63  ;;  %v10135_v13 = vpop.permute.xlu1 %10134  ;;  %9088 = vmatpush3.msra.mxu1 %v16118_v11 }
 0x5c8   : > { %6538 = vmatmul.mubr.f32.gmra.mxu1 %v6441_v47  ;;  %v10137_v33 = vunpack.i.h.bf16 %v10135_v13  ;;  %v10136_v48 = vunpack.i.l.bf16 %v10135_v13  ;;  %9089 = vmatprep.subr.mxu1 %v16128_v39  ;;  %v8389_v8 = vld [vmem:[#allocation5 + $0x49] sm:$0xff]  ;;  %v8393_v13 = vld [vmem:[#allocation5 + $0x1a] sm:$0xff] }
 0x5c9   : > { %9090 = vmatpush3.msra.mxu1 %v16135_v23  ;;  %v8409_v60 = vld [vmem:[#allocation5 + $0x4b] sm:$0xff] }
 0x5ca   : > { %v6452_v27 = vsel %vm1895_vm6, %v16297_v35, %v10136_v48  ;;  %v6442_v46 = vsel %vm1895_vm6, %v16295_v58, %v10137_v33  ;;  %9091 = vmatprep.subr.mxu1 %v16149_v31  ;;  %v10208_v6 = vpack.i.bf16 %v8389_v8, %v8409_v60  ;;  %v8373_v33 = vld [vmem:[#allocation5 + $0x18] sm:$0xff] }
 0x5cb   : > { %6542 = vmatprep.mubr.f32.mxu1 %v6452_v27  ;;  %v10140_v11 = vpop.permute.xlu0 %10139  ;;  %9092 = vmatpush3.msra.mxu1 %v16155_v15 }
 0x5cc   : > { %v10142_v32 = vunpack.i.h.bf16 %v10140_v11  ;;  %v10141_v53 = vunpack.i.l.bf16 %v10140_v11  ;;  %6543 = vmatmul.mubr.f32.gmra.mxu1 %v6442_v46  ;;  %9093 = vmatprep.subr.mxu1 %v16162_v42 }
 0x5cd   : > { %10209 = vrot.lane.b32.xlu0 %v10208_v6, %s10333_s16  ;;  %9094 = vmatpush3.msra.mxu1 %v16169_v0 }
 0x5ce   : > { %v6453_v39 = vsel %vm1895_vm6, %v16310_v50, %v10141_v53  ;;  %v6443_v23 = vsel %vm1895_vm6, %v16308_v55, %v10142_v32  ;;  %9095 = vmatprep.subr.mxu1 %v16177_v5  ;;  %v16944_v50 = vld [vmem:[#allocation50_spill] sm:$0xff]  ;;  %v8394_v53 = vld [vmem:[#allocation5 + $0x22] sm:$0xff] }
 0x5cf   : > { %6547 = vmatprep.mubr.f32.mxu1 %v6453_v39  ;;  %v10145_v31 = vpop.permute.xlu1 %10144  ;;  %9096 = vmatpush3.msra.mxu1 %v16183_v16  ;;  %v8374_v39 = vld [vmem:[#allocation5 + $0x20] sm:$0xff] }
 0x5d0   : > { %6548 = vmatmul.mubr.f32.gmra.mxu1 %v6443_v23  ;;  %v10147_v15 = vunpack.i.h.bf16 %v10145_v31  ;;  %v10146_v58 = vunpack.i.l.bf16 %v10145_v31  ;;  %9097 = vmatprep.subr.mxu1 %v16190_v51  ;;  %v16943_v51 = vld [vmem:[#allocation26_spill] sm:$0xff] }
 0x5d1   : > { %9098 = vmatpush3.msra.mxu1 %v16196_v21 }
 0x5d2   : > { %v6454_v42 = vsel %vm1895_vm6, %v16328_v14, %v10146_v58  ;;  %v6444_v0 = vsel %vm1895_vm6, %v16326_v2, %v10147_v15  ;;  %9099 = vmatprep.subr.mxu1 %v16202_v61  ;;  %v16945_v61 = vld [vmem:[#allocation24_spill] sm:$0xff]  ;;  %v16946_v2 = vld [vmem:[#allocation27_spill] sm:$0xff]  ;;  %v16459_v15 = vld [vmem:[%s16540_s6] ss:$0 sm:$0xff] }
 0x5d3   : > { %6552 = vmatprep.mubr.f32.mxu1 %v6454_v42  ;;  %v10150_v5 = vpop.permute.xlu0 %10149  ;;  %9100 = vmatpush3.msra.mxu1 %v16209_v44 }
 0x5d4   : > { %v10152_v16 = vunpack.i.h.bf16 %v10150_v5  ;;  %v10151_v35 = vunpack.i.l.bf16 %v10150_v5  ;;  %6553 = vmatmul.mubr.f32.gmra.mxu1 %v6444_v0  ;;  %9101 = vmatprep.subr.mxu1 %v16215_v25  ;;  %v16947_v25 = vld [vmem:[#allocation53_spill] sm:$0xff] }
 0x5d5   : > { %9102 = vmatpush3.msra.mxu1 %v16943_v51 }
 0x5d6   : > { %v6455_v21 = vsel %vm1895_vm6, %v16342_v24, %v10151_v35  ;;  %v6445_v55 = vsel %vm1895_vm6, %v16340_v18, %v10152_v16  ;;  %9103 = vmatprep.subr.mxu1 %v16944_v50  ;;  %v8375_v50 = vld [vmem:[#allocation5 + $0x28] sm:$0xff] }
 0x5d7   : > { %6557 = vmatprep.mubr.f32.mxu1 %v6455_v21  ;;  %9104 = vmatpush3.msra.mxu1 %v16945_v61  ;;  %v10155_v44 = vpop.permute.xlu1 %10154 }
 0x5d8   : > { %6558 = vmatmul.mubr.f32.gmra.mxu1 %v6445_v55  ;;  %9105 = vmatprep.subr.mxu1 %v16946_v2  ;;  %v10157_v14 = vunpack.i.h.bf16 %v10155_v44  ;;  %v10156_v30 = vunpack.i.l.bf16 %v10155_v44  ;;  %v8395_v55 = vld [vmem:[#allocation5 + $0x2a] sm:$0xff] }
 0x5d9   : > { %9106 = vmatpush3.msra.mxu1 %v16947_v25 }
 0x5da   : > { %9107 = vmatprep.subr.mxu1 %v16948_v45  ;;  %v6456_v24 = vsel %vm1895_vm6, %v16360_v36, %v10156_v30  ;;  %v6446_v18 = vsel %vm1895_vm6, %v16358_v28, %v10157_v14 }
 0x5db   : > { %v10160_v52 = vpop.permute.xlu0 %10159  ;;  %9108 = vmatpush3.msra.mxu1 %v16949_v29  ;;  %6562 = vmatprep.mubr.f32.mxu1 %v6456_v24  ;;  %v8396_v24 = vld [vmem:[#allocation5 + $0x32] sm:$0xff] }
 0x5dc   : > { %v10162_v62 = vunpack.i.h.bf16 %v10160_v52  ;;  %v10161_v3 = vunpack.i.l.bf16 %v10160_v52  ;;  %6563 = vmatmul.mubr.f32.gmra.mxu1 %v6446_v18  ;;  %v8376_v52 = vld [vmem:[#allocation5 + $0x30] sm:$0xff] }
 0x5de   : > { %v6457_v7 = vsel %vm1895_vm6, %v16370_v22, %v10161_v3  ;;  %v6447_v43 = vsel %vm1895_vm6, %v16372_v59, %v10162_v62  ;;  %v8391_v22 = vld [vmem:[#allocation5 + $0xa] sm:$0xff] }
 0x5df   : > { %6567 = vmatprep.mubr.f32.mxu1 %v6457_v7  ;;  %v10165_v26 = vpop.permute.xlu1 %10164 }
 0x5e0   : > { %6568 = vmatmul.mubr.f32.gmra.mxu1 %v6447_v43  ;;  %v10167_v36 = vunpack.i.h.bf16 %v10165_v26  ;;  %v10166_v54 = vunpack.i.l.bf16 %v10165_v26  ;;  %v8397_v43 = vld [vmem:[#allocation5 + $0x3a] sm:$0xff] }
 0x5e1   : > { %v8377_v26 = vld [vmem:[#allocation5 + $0x38] sm:$0xff] }
 0x5e2   : > { %v8500_v28 = vsel %vm1895_vm6, %v8390_v37, %v10166_v54  ;;  %v8490_v9 = vsel %vm1895_vm6, %v8370_v12, %v10167_v36 }
 0x5e3   : > { %8574 = vmatprep.mubr.f32.mxu1 %v8500_v28  ;;  %v10170_v38 = vpop.permute.xlu0 %10169 }
 0x5e4   : > { %8575 = vmatmul.mubr.f32.vlgmr.msra.gmra.mxu1 %v8490_v9  ;;  %v10172_v49 = vunpack.i.h.bf16 %v10170_v38  ;;  %v10171_v34 = vunpack.i.l.bf16 %v10170_v38  ;;  %v8398_v9 = vld [vmem:[#allocation5 + $0x42] sm:$0xff] }
 0x5e5   : > { %v8378_v38 = vld [vmem:[#allocation5 + $0x40] sm:$0xff] }
 0x5e6   : > { %v8501_v59 = vsel %vm1895_vm6, %v8391_v22, %v10171_v34  ;;  %v8491_v19 = vsel %vm1895_vm6, %v8371_v40, %v10172_v49 }
 0x5e7   : > { %8579 = vmatprep.mubr.f32.mxu1 %v8501_v59 }
 0x5e8   : > { %8580 = vmatmul.mubr.f32.gmra.mxu1 %v8491_v19 }
 0x5f2   : > { %v10175_v57 = vpop.permute.xlu1 %10174 }
 0x5f3   : > { %v10177_v4 = vunpack.i.h.bf16 %v10175_v57  ;;  %v10176_v20 = vunpack.i.l.bf16 %v10175_v57 }
 0x5f5   : > { %v8502_v17 = vsel %vm1895_vm6, %v8392_v56, %v10176_v20  ;;  %v8492_v10 = vsel %vm1895_vm6, %v8372_v41, %v10177_v4  ;;  %v8399_v4 = vld [vmem:[#allocation5 + $0x4a] sm:$0xff] }
 0x5f6   : > { %8584 = vmatprep.mubr.f32.mxu1 %v8502_v17  ;;  %v8379_v20 = vld [vmem:[#allocation5 + $0x48] sm:$0xff] }
 0x5f7   : > { %8585 = vmatmul.mubr.f32.gmra.mxu1 %v8492_v10 }
 0x613   : > { %v8913_v60 = vpop.f32.mrf.mxu1 }
 0x615   : > { %v8914_v46 = vpop.f32.mrf.mxu1 }
 0x616   : > { %v8915_v32 = vadd.f32 %v8914_v46, %v8913_v60 }
 0x618   : > { %v10180_v1 = vpop.permute.xlu0 %10179  ;;  %v4473_v58 = vadd.f32 %v16459_v15, %v8915_v32 }
 0x619   : > { %v10182_v63 = vunpack.i.h.bf16 %v10180_v1  ;;  %v10181_v47 = vunpack.i.l.bf16 %v10180_v1 }
 0x61a   : > { %v8916_v42 = vpop.f32.mrf.mxu1  ;;  %v4521_v0 = vmax.f32 %v4473_v58, 0.0 }
 0x61b   : > { %v8503_v48 = vsel %vm1895_vm6, %v8393_v13, %v10181_v47  ;;  %v8493_v8 = vsel %vm1895_vm6, %v8373_v33, %v10182_v63 }
 0x61c   : > { %8589 = vmatprep.mubr.f32.mxu1 %v8503_v48  ;;  %v8917_v5 = vpop.f32.mrf.mxu1  ;;  %8715 = vst [vmem:[%s15983_s22 + $0x50] sm:$0xff] %v4521_v0 }
 0x61d   : > { %8590 = vmatmul.mubr.f32.gmra.mxu1 %v8493_v8  ;;  %v8918_v35 = vadd.f32 %v8917_v5, %v8916_v42 }
 0x61e   : > { %v10185_v27 = vpop.permute.xlu1 %10184 }
 0x61f   : > { %v10187_v6 = vunpack.i.h.bf16 %v10185_v27  ;;  %v10186_v11 = vunpack.i.l.bf16 %v10185_v27  ;;  %v4478_v61 = vadd.f32 %v16459_v15, %v8918_v35 }
 0x621   : > { %v8504_v23 = vsel %vm1895_vm6, %v8394_v53, %v10186_v11  ;;  %v8494_v31 = vsel %vm1895_vm6, %v8374_v39, %v10187_v6  ;;  %v4522_v14 = vmax.f32 %v4478_v61, 0.0 }
 0x622   : > { %8594 = vmatprep.mubr.f32.mxu1 %v8504_v23 }
 0x623   : > { %8595 = vmatmul.mubr.f32.gmra.mxu1 %v8494_v31  ;;  %8716 = vst [vmem:[%s15983_s22 + $0x58] sm:$0xff] %v4522_v14 }
 0x625   : > { %v10190_v16 = vpop.permute.xlu0 %10189 }
 0x626   : > { %v10192_v51 = vunpack.i.h.bf16 %v10190_v16  ;;  %v10191_v21 = vunpack.i.l.bf16 %v10190_v16 }
 0x628   : > { %v8505_v44 = vsel %vm1895_vm6, %v8395_v55, %v10191_v21  ;;  %v8495_v2 = vsel %vm1895_vm6, %v8375_v50, %v10192_v51 }
 0x629   : > { %8599 = vmatprep.mubr.f32.mxu1 %v8505_v44 }
 0x62a   : > { %8600 = vmatmul.mubr.f32.gmra.mxu1 %v8495_v2 }
 0x62b   : > { %v10195_v30 = vpop.permute.xlu1 %10194 }
 0x62c   : > { %v10197_v25 = vunpack.i.h.bf16 %v10195_v30  ;;  %v10196_v45 = vunpack.i.l.bf16 %v10195_v30 }
 0x62e   : > { %v8506_v18 = vsel %vm1895_vm6, %v8396_v24, %v10196_v45  ;;  %v8496_v29 = vsel %vm1895_vm6, %v8376_v52, %v10197_v25 }
 0x62f   : > { %8604 = vmatprep.mubr.f32.mxu1 %v8506_v18 }
 0x630   : > { %8605 = vmatmul.mubr.f32.gmra.mxu1 %v8496_v29 }
 0x633   : > { %v10200_v62 = vpop.permute.xlu0 %10199 }
 0x634   : > { %v10202_v3 = vunpack.i.h.bf16 %v10200_v62  ;;  %v10201_v7 = vunpack.i.l.bf16 %v10200_v62 }
 0x636   : > { %v8507_v36 = vsel %vm1895_vm6, %v8397_v43, %v10201_v7  ;;  %v8497_v54 = vsel %vm1895_vm6, %v8377_v26, %v10202_v3 }
 0x637   : > { %8609 = vmatprep.mubr.f32.mxu1 %v8507_v36  ;;  %v10205_v37 = vpop.permute.xlu1 %10204 }
 0x638   : > { %8610 = vmatmul.mubr.f32.gmra.mxu1 %v8497_v54  ;;  %v10207_v12 = vunpack.i.h.bf16 %v10205_v37  ;;  %v10206_v28 = vunpack.i.l.bf16 %v10205_v37 }
 0x639   : > { %v8919_v22 = vpop.f32.mrf.mxu1 }
 0x63a   : > { %v8508_v49 = vsel %vm1895_vm6, %v8398_v9, %v10206_v28  ;;  %v8498_v34 = vsel %vm1895_vm6, %v8378_v38, %v10207_v12 }
 0x63b   : > { %8614 = vmatprep.mubr.f32.mxu1 %v8508_v49  ;;  %v8920_v57 = vpop.f32.mrf.mxu1 }
 0x63c   : > { %8615 = vmatmul.mubr.f32.gmra.mxu1 %v8498_v34  ;;  %v8921_v56 = vadd.f32 %v8920_v57, %v8919_v22 }
 0x63e   : > { %v4483_v10 = vadd.f32 %v16459_v15, %v8921_v56 }
 0x63f   : > { %v10210_v40 = vpop.permute.xlu0 %10209  ;;  %v8922_v63 = vpop.f32.mrf.mxu1 }
 0x640   : > { %v10212_v59 = vunpack.i.h.bf16 %v10210_v40  ;;  %v10211_v19 = vunpack.i.l.bf16 %v10210_v40  ;;  %v4523_v1 = vmax.f32 %v4483_v10, 0.0 }
 0x641   : > { %v8923_v47 = vpop.f32.mrf.mxu1 }
 0x642   : > { %v8509_v41 = vsel %vm1895_vm6, %v8399_v4, %v10211_v19  ;;  %v8499_v17 = vsel %vm1895_vm6, %v8379_v20, %v10212_v59  ;;  %8717 = vst [vmem:[%s15983_s22 + $0x60] sm:$0xff] %v4523_v1  ;;  %v8924_v13 = vadd.f32 %v8923_v47, %v8922_v63 }
 0x643   : > { %8619 = vmatprep.mubr.f32.mxu1 %v8509_v41 }
 0x644   : > { %8620 = vmatmul.mubr.f32.gmra.mxu1 %v8499_v17  ;;  %v4488_v33 = vadd.f32 %v16459_v15, %v8924_v13 }
 0x646   : > { %v4524_v48 = vmax.f32 %v4488_v33, 0.0 }
 0x648   : > { %8718 = vst [vmem:[%s15983_s22 + $0x68] sm:$0xff] %v4524_v48 }
 0x663   : > { %v8925_v8 = vpop.f32.mrf.mxu1 }
 0x665   : > { %v8926_v60 = vpop.f32.mrf.mxu1 }
 0x666   : > { %v8927_v27 = vadd.f32 %v8926_v60, %v8925_v8 }
 0x668   : > { %v8928_v46 = vpop.f32.mrf.mxu1  ;;  %v4493_v6 = vadd.f32 %v16459_v15, %v8927_v27 }
 0x66a   : > { %v8929_v11 = vpop.f32.mrf.mxu1  ;;  %v4525_v32 = vmax.f32 %v4493_v6, 0.0 }
 0x66b   : > { %v8930_v53 = vadd.f32 %v8929_v11, %v8928_v46 }
 0x66c   : > { %v8931_v39 = vpop.f32.mrf.mxu1  ;;  %8719 = vst [vmem:[%s15983_s22 + $0x70] sm:$0xff] %v4525_v32 }
 0x66d   : > { %v4498_v23 = vadd.f32 %v16459_v15, %v8930_v53 }
 0x66e   : > { %v8932_v31 = vpop.f32.mrf.mxu1 }
 0x66f   : > { %v4526_v58 = vmax.f32 %v4498_v23, 0.0  ;;  %v8933_v42 = vadd.f32 %v8932_v31, %v8931_v39 }
 0x670   : > { %v8934_v0 = vpop.f32.mrf.mxu1 }
 0x671   : > { %8720 = vst [vmem:[%s15983_s22 + $0x78] sm:$0xff] %v4526_v58  ;;  %v4503_v5 = vadd.f32 %v16459_v15, %v8933_v42 }
 0x672   : > { %v8935_v16 = vpop.f32.mrf.mxu1 }
 0x673   : > { %v4527_v35 = vmax.f32 %v4503_v5, 0.0  ;;  %v8936_v51 = vadd.f32 %v8935_v16, %v8934_v0 }
 0x674   : > { %v8937_v21 = vpop.f32.mrf.mxu1 }
 0x675   : > { %8721 = vst [vmem:[%s15983_s22 + $0x80] sm:$0xff] %v4527_v35  ;;  %v4508_v55 = vadd.f32 %v16459_v15, %v8936_v51 }
 0x676   : > { %v8938_v50 = vpop.f32.mrf.mxu1 }
 0x677   : > { %v4528_v61 = vmax.f32 %v4508_v55, 0.0  ;;  %v8939_v44 = vadd.f32 %v8938_v50, %v8937_v21 }
 0x678   : > { %v8940_v2 = vpop.f32.mrf.mxu1 }
 0x679   : > { %8722 = vst [vmem:[%s15983_s22 + $0x88] sm:$0xff] %v4528_v61  ;;  %v4513_v14 = vadd.f32 %v16459_v15, %v8939_v44 }
 0x67a   : > { %v8941_v30 = vpop.f32.mrf.mxu1 }
 0x67b   : > { %v4529_v25 = vmax.f32 %v4513_v14, 0.0  ;;  %v8942_v45 = vadd.f32 %v8941_v30, %v8940_v2 }
 0x67c   : > { %v9011_v24 = vpop.f32.mrf.mxu1 }
 0x67d   : > { %8723 = vst [vmem:[%s15983_s22 + $0x90] sm:$0xff] %v4529_v25  ;;  %v4518_v52 = vadd.f32 %v16459_v15, %v8942_v45 }
 0x67e   : > { %v9012_v18 = vpop.f32.mrf.mxu1 }
 0x67f   : > { %v4530_v29 = vmax.f32 %v4518_v52, 0.0  ;;  %v9013_v62 = vadd.f32 %v9012_v18, %v9011_v24 }
 0x680   : > { %v9014_v3 = vpop.f32.mrf.mxu1 }
 0x681   : > { %8724 = vst [vmem:[%s15983_s22 + $0x98] sm:$0xff] %v4530_v29  ;;  %v6525_v7 = vadd.f32 %v16459_v15, %v9013_v62 }
 0x682   : > { %v9015_v43 = vpop.f32.mrf.mxu1 }
 0x683   : > { %v6573_v26 = vmax.f32 %v6525_v7, 0.0  ;;  %v9016_v36 = vadd.f32 %v9015_v43, %v9014_v3 }
 0x684   : > { %v9017_v54 = vpop.f32.mrf.mxu1 }
 0x685   : > { %8725 = vst [vmem:[%s15983_s22 + $0xa0] sm:$0xff] %v6573_v26  ;;  %v6530_v37 = vadd.f32 %v16459_v15, %v9016_v36 }
 0x686   : > { %v9018_v12 = vpop.f32.mrf.mxu1 }
 0x687   : > { %v6574_v28 = vmax.f32 %v6530_v37, 0.0  ;;  %v9019_v9 = vadd.f32 %v9018_v12, %v9017_v54 }
 0x688   : > { %v9020_v38 = vpop.f32.mrf.mxu1 }
 0x689   : > { %8726 = vst [vmem:[%s15983_s22 + $0xa8] sm:$0xff] %v6574_v28  ;;  %v6535_v49 = vadd.f32 %v16459_v15, %v9019_v9 }
 0x68a   : > { %v9021_v34 = vpop.f32.mrf.mxu1 }
 0x68b   : > { %v6575_v22 = vmax.f32 %v6535_v49, 0.0  ;;  %v9022_v40 = vadd.f32 %v9021_v34, %v9020_v38 }
 0x68c   : > { %v9023_v59 = vpop.f32.mrf.mxu1 }
 0x68d   : > { %8727 = vst [vmem:[%s15983_s22 + $0xb0] sm:$0xff] %v6575_v22  ;;  %v6540_v19 = vadd.f32 %v16459_v15, %v9022_v40 }
 0x68e   : > { %v9024_v57 = vpop.f32.mrf.mxu1 }
 0x68f   : > { %v6576_v4 = vmax.f32 %v6540_v19, 0.0  ;;  %v9025_v20 = vadd.f32 %v9024_v57, %v9023_v59 }
 0x690   : > { %v9026_v56 = vpop.f32.mrf.mxu1 }
 0x691   : > { %8728 = vst [vmem:[%s15983_s22 + $0xb8] sm:$0xff] %v6576_v4  ;;  %v6545_v41 = vadd.f32 %v16459_v15, %v9025_v20 }
 0x692   : > { %v9027_v17 = vpop.f32.mrf.mxu1 }
 0x693   : > { %v6577_v10 = vmax.f32 %v6545_v41, 0.0  ;;  %v9028_v1 = vadd.f32 %v9027_v17, %v9026_v56 }
 0x694   : > { %v9029_v63 = vpop.f32.mrf.mxu1 }
 0x695   : > { %8729 = vst [vmem:[%s15983_s22 + $0xc0] sm:$0xff] %v6577_v10  ;;  %v6550_v47 = vadd.f32 %v16459_v15, %v9028_v1 }
 0x696   : > { %v9030_v13 = vpop.f32.mrf.mxu1 }
 0x697   : > { %v6578_v33 = vmax.f32 %v6550_v47, 0.0  ;;  %v9031_v48 = vadd.f32 %v9030_v13, %v9029_v63 }
 0x698   : > { %v9032_v8 = vpop.f32.mrf.mxu1 }
 0x699   : > { %8730 = vst [vmem:[%s15983_s22 + $0xc8] sm:$0xff] %v6578_v33  ;;  %v6555_v60 = vadd.f32 %v16459_v15, %v9031_v48 }
 0x69a   : > { %v9033_v27 = vpop.f32.mrf.mxu1 }
 0x69b   : > { %v6579_v46 = vmax.f32 %v6555_v60, 0.0  ;;  %v9034_v6 = vadd.f32 %v9033_v27, %v9032_v8 }
 0x69c   : > { %v9035_v32 = vpop.f32.mrf.mxu1 }
 0x69d   : > { %8731 = vst [vmem:[%s15983_s22 + $0xd0] sm:$0xff] %v6579_v46  ;;  %v6560_v11 = vadd.f32 %v16459_v15, %v9034_v6 }
 0x69e   : > { %v9036_v39 = vpop.f32.mrf.mxu1 }
 0x69f   : > { %v6580_v53 = vmax.f32 %v6560_v11, 0.0  ;;  %v9037_v23 = vadd.f32 %v9036_v39, %v9035_v32 }
 0x6a0   : > { %v9038_v31 = vpop.f32.mrf.mxu1 }
 0x6a1   : > { %8732 = vst [vmem:[%s15983_s22 + $0xd8] sm:$0xff] %v6580_v53  ;;  %v6565_v58 = vadd.f32 %v16459_v15, %v9037_v23 }
 0x6a2   : > { %v9039_v42 = vpop.f32.mrf.mxu1 }
 0x6a3   : > { %v6581_v0 = vmax.f32 %v6565_v58, 0.0  ;;  %v9040_v5 = vadd.f32 %v9039_v42, %v9038_v31 }
 0x6a4   : > { %v9109_v35 = vpop.f32.mrf.mxu1 }
 0x6a5   : > { %8733 = vst [vmem:[%s15983_s22 + $0xe0] sm:$0xff] %v6581_v0  ;;  %v6570_v16 = vadd.f32 %v16459_v15, %v9040_v5 }
 0x6a6   : > { %v9110_v21 = vpop.f32.mrf.mxu1 }
 0x6a7   : > { %v6582_v51 = vmax.f32 %v6570_v16, 0.0  ;;  %v9111_v55 = vadd.f32 %v9110_v21, %v9109_v35 }
 0x6a8   : > { %v9112_v61 = vpop.f32.mrf.mxu1 }
 0x6a9   : > { %8734 = vst [vmem:[%s15983_s22 + $0xe8] sm:$0xff] %v6582_v51  ;;  %v8577_v50 = vadd.f32 %v16459_v15, %v9111_v55 }
 0x6aa   : > { %v9113_v2 = vpop.f32.mrf.mxu1 }
 0x6ab   : > { %v8625_v44 = vmax.f32 %v8577_v50, 0.0  ;;  %v9114_v14 = vadd.f32 %v9113_v2, %v9112_v61 }
 0x6ad   : > { %8735 = vst [vmem:[%s15983_s22 + $0xf0] sm:$0xff] %v8625_v44  ;;  %v8582_v30 = vadd.f32 %v16459_v15, %v9114_v14 }
 0x6af   : > { %v8626_v25 = vmax.f32 %v8582_v30, 0.0 }
 0x6b1   : > { %8736 = vst [vmem:[%s15983_s22 + $0xf8] sm:$0xff] %v8626_v25 }
 0x6b7   : > { %v9115_v45 = vpop.f32.mrf.mxu1 }
 0x6b9   : > { %v9116_v24 = vpop.f32.mrf.mxu1 }
 0x6ba   : > { %v9117_v52 = vadd.f32 %v9116_v24, %v9115_v45 }
 0x6bc   : > { %v8587_v18 = vadd.f32 %v16459_v15, %v9117_v52 }
 0x6be   : > { %v8627_v29 = vmax.f32 %v8587_v18, 0.0 }
 0x6c0   : > { %8737 = vst [vmem:[%s15983_s22 + $0x100] sm:$0xff] %v8627_v29 }
 0x6dd   : > { %v9118_v62 = vpop.f32.mrf.mxu1 }
 0x6df   : > { %v9119_v3 = vpop.f32.mrf.mxu1 }
 0x6e0   : > { %v9120_v7 = vadd.f32 %v9119_v3, %v9118_v62 }
 0x6e2   : > { %v8592_v43 = vadd.f32 %v16459_v15, %v9120_v7 }
 0x6e3   : > { %v9121_v26 = vpop.f32.mrf.mxu1 }
 0x6e4   : > { %v8628_v36 = vmax.f32 %v8592_v43, 0.0 }
 0x6e5   : > { %v9122_v54 = vpop.f32.mrf.mxu1 }
 0x6e6   : > { %v9123_v37 = vadd.f32 %v9122_v54, %v9121_v26  ;;  %8738 = vst [vmem:[%s15983_s22 + $0x108] sm:$0xff] %v8628_v36 }
 0x6e8   : > { %v8597_v12 = vadd.f32 %v16459_v15, %v9123_v37 }
 0x6ea   : > { %v8629_v28 = vmax.f32 %v8597_v12, 0.0  ;;  %v9124_v9 = vpop.f32.mrf.mxu1 }
 0x6ec   : > { %8739 = vst [vmem:[%s15983_s22 + $0x110] sm:$0xff] %v8629_v28  ;;  %v9125_v38 = vpop.f32.mrf.mxu1 }
 0x6ed   : > { %v9126_v49 = vadd.f32 %v9125_v38, %v9124_v9 }
 0x6ef   : > { %v8602_v34 = vadd.f32 %v16459_v15, %v9126_v49 }
 0x6f0   : > { %v9127_v22 = vpop.f32.mrf.mxu1 }
 0x6f1   : > { %v8630_v40 = vmax.f32 %v8602_v34, 0.0 }
 0x6f2   : > { %v9128_v59 = vpop.f32.mrf.mxu1 }
 0x6f3   : > { %v9129_v19 = vadd.f32 %v9128_v59, %v9127_v22  ;;  %8740 = vst [vmem:[%s15983_s22 + $0x118] sm:$0xff] %v8630_v40 }
 0x6f5   : > { %v8607_v57 = vadd.f32 %v16459_v15, %v9129_v19 }
 0x6f7   : > { %v8631_v4 = vmax.f32 %v8607_v57, 0.0 }
 0x6f8   : > { %v9130_v20 = vpop.f32.mrf.mxu1 }
 0x6f9   : > { %8741 = vst [vmem:[%s15983_s22 + $0x120] sm:$0xff] %v8631_v4 }
 0x6fa   : > { %v9131_v56 = vpop.f32.mrf.mxu1 }
 0x6fb   : > { %v9132_v41 = vadd.f32 %v9131_v56, %v9130_v20 }
 0x6fc   : > { %v9133_v10 = vpop.f32.mrf.mxu1 }
 0x6fd   : > { %v8612_v17 = vadd.f32 %v16459_v15, %v9132_v41 }
 0x6fe   : > { %v9134_v63 = vpop.f32.mrf.mxu1 }
 0x6ff   : > { %v8632_v1 = vmax.f32 %v8612_v17, 0.0  ;;  %v9135_v47 = vadd.f32 %v9134_v63, %v9133_v10 }
 0x701   : > { %8742 = vst [vmem:[%s15983_s22 + $0x128] sm:$0xff] %v8632_v1  ;;  %v8617_v13 = vadd.f32 %v16459_v15, %v9135_v47 }
 0x703   : > { %v8633_v33 = vmax.f32 %v8617_v13, 0.0 }
 0x704   : > { %v9136_v48 = vpop.f32.mrf.mxu1 }
 0x705   : > { %8743 = vst [vmem:[%s15983_s22 + $0x130] sm:$0xff] %v8633_v33 }
 0x706   : > { %v9137_v8 = vpop.f32.mrf.mxu1 }
 0x707   : > { %v9138_v60 = vadd.f32 %v9137_v8, %v9136_v48 }
 0x709   : > { %v8622_v27 = vadd.f32 %v16459_v15, %v9138_v60 }
 0x70b   : > { %v8634_v46 = vmax.f32 %v8622_v27, 0.0 }
 0x70d   : > { %8744 = vst [vmem:[%s15983_s22 + $0x138] sm:$0xff] %v8634_v46 }
 0x70e PF: > { %s17_s24 = sadd.s32 1, %s10327_s24  }
 0x70f   : > { %p14_p5 = scmp.ge.s32.totalorder %s17_s24, 4  }
 0x711   :  { %16 = sbr.rel (!%p14_p5) target bundleno = 1 (0x1), region = 137 }

</bundles_post_ra>
